<compile_context>
chip_gen: v5e
topology: v5e:2x2
jax: 0.10.0
libtpu: 0.0.40
codegen_flags: <defaults>
</compile_context>

<pallas_src>
import functools

import jax
import jax.numpy as jnp
from jax.experimental import pallas as pl
from jax.experimental.pallas import tpu as pltpu

HIDDEN = 1024  # hidden_size is hard-coded to 1024 in CodePromptClassification.__init__


def _gather_scale_kernel(pos_ref, h_hbm, w_ref, o_ref, row_buf, sems, *, rows_per_step):
    """Double-buffered manual row gather + w_prompt scale.

    pos_ref : (N_pad,) int32 SMEM  -- flat row indices into hidden states viewed as (B*S, H)
    h_hbm   : (B*S, H) HBM ref (memory_space=pl.ANY), gathered manually
    w_ref   : (1, H) VMEM          -- w_prompt (same block every step)
    o_ref   : (rows_per_step, H)   -- output tile
    row_buf : (2, rows_per_step, H) VMEM scratch (double buffer)
    sems    : (2, rows_per_step) DMA semaphores
    """
    R = rows_per_step
    i = pl.program_id(0)
    n = pl.num_programs(0)
    slot = i & 1
    next_slot = 1 - slot

    def issue(base, s):
        # Read all R SMEM position scalars first (keeps the scalar address path ahead
        # of any DMA wait), then issue the R row-gather DMAs; they overlap each other.
        srcs = [pos_ref[base + r] for r in range(R)]  # static, unrolled
        for r in range(R):
            pltpu.make_async_copy(
                h_hbm.at[pl.ds(srcs[r], 1)],
                row_buf.at[s, pl.ds(r, 1)],
                sems.at[s, r],
            ).start()

    # Prime slot 0 with this step's rows on the very first grid step.
    @pl.when(i == 0)
    def _():
        issue(0, 0)

    # Prefetch the NEXT step's R rows into the other slot before waiting on this
    # step's copies, so the next gather is in flight while this step drains.
    @pl.when(i + 1 < n)
    def _():
        issue((i + 1) * R, next_slot)

    # Wait for this step's R row copies (wait descriptor only needs matching
    # dst shape + semaphore; src index is irrelevant).
    for r in range(R):
        pltpu.make_async_copy(
            h_hbm.at[pl.ds(0, 1)],
            row_buf.at[slot, pl.ds(r, 1)],
            sems.at[slot, r],
        ).wait()

    # One full-tile (R, H) multiply + single lane-dense (unmasked) store per step;
    # the (1, H) weight broadcasts across the R rows.
    o_ref[...] = row_buf[slot] * w_ref[...]


def _mask_positions(loss_ids, num_mask, seq_len):
    """Positions of the first `num_mask` <mask> tokens per row (ascending), clamped.

    NOTE: rows with fewer than num_mask masks gather the clamped last token, and rows
    with more masks drop the extras; PyTorch's .view(B, -1, H) would instead raise on
    a ragged count.  Documented divergence, not a numeric bug.
    """
    B, S = loss_ids.shape
    idx = jnp.broadcast_to(jnp.arange(S, dtype=jnp.int32)[None, :], (B, S))
    pos = jnp.sort(jnp.where(loss_ids > 0, idx, S), axis=1)[:, :num_mask]
    return jnp.minimum(pos, seq_len - 1).astype(jnp.int32)


def code_prompt_classification_forward(hidden_states, loss_ids, w_prompt, num_mask,
                                       rows_per_step=64, min_rows_for_kernel=256,
                                       force_kernel=False):
    """hidden_states: (B, S, H) f32, loss_ids: (B, S) int32, w_prompt: (1, H) f32.

    rows_per_step must be a multiple of 8 for f32 (use a multiple of 16 for bf16).
    """
    B, S, H = hidden_states.shape
    M = num_mask
    R = rows_per_step

    pos = _mask_positions(loss_ids, M, S)  # (B, M)
    N = B * M

    # Small-problem dispatch: fixed pallas_call/grid overhead dominates for a few KB
    # of data movement; XLA's fused gather+mul is faster and simpler there.
    if N < min_rows_for_kernel and not force_kernel:
        gathered = jnp.take_along_axis(hidden_states, pos[:, :, None], axis=1)  # (B, M, H)
        out = gathered * w_prompt[None, :, :]
        return out.reshape(B, H) if M == 1 else out

    # Flat row indices into hidden_states viewed as (B*S, H); 1-D SMEM table.
    flat_pos = (jnp.arange(B, dtype=jnp.int32)[:, None] * S + pos).reshape(-1)  # (B*M,)
    n_steps = pl.cdiv(N, R)
    n_pad = n_steps * R
    # Pad with row index 0 (valid); padded output rows are discarded below.
    flat_pos = jnp.pad(flat_pos, (0, n_pad - N))

    h2d = hidden_states.reshape(B * S, H)

    kernel = functools.partial(_gather_scale_kernel, rows_per_step=R)

    out = pl.pallas_call(
        kernel,
        out_shape=jax.ShapeDtypeStruct((n_pad, H), hidden_states.dtype),
        grid_spec=pltpu.PrefetchScalarGridSpec(
            num_scalar_prefetch=1,
            grid=(n_steps,),
            in_specs=[
                # hidden states stay in HBM; gathered manually inside the kernel.
                pl.BlockSpec(memory_space=pl.ANY),
                # w_prompt: same (full) block every step -> fetched once, revisited.
                pl.BlockSpec((1, H), lambda i, pos: (0, 0)),
            ],
            out_specs=pl.BlockSpec((R, H), lambda i, pos: (i, 0)),
            scratch_shapes=[
                pltpu.VMEM((2, R, H), hidden_states.dtype),   # double-buffered gather
                pltpu.SemaphoreType.DMA((2, R)),
            ],
        ),
        # The grid axis carries a cross-step DMA dependency (slot primed at step 0),
        # so it must iterate sequentially on one core.
        compiler_params=pltpu.CompilerParams(
            dimension_semantics=("arbitrary",)),
    )(flat_pos, h2d, w_prompt)

    out = out[:N].reshape(B, M, H)
    if M == 1:
        out = out.reshape(B, H)
    return out


def _reference(hidden_states, loss_ids, w_prompt, num_mask):
    B, S, H = hidden_states.shape
    pos = _mask_positions(loss_ids, num_mask, S)
    gathered = jnp.take_along_axis(hidden_states, pos[:, :, None], axis=1)  # (B, M, H)
    out = gathered * w_prompt[None, :, :]
    if num_mask == 1:
        out = out.reshape(B, H)
    return out


if __name__ == "__main__":
    key = jax.random.PRNGKey(0)
    k_h, k_w, k_h3 = jax.random.split(key, 3)

    # Deterministic init of self.w_prompt = nn.Parameter(torch.rand(1, hidden_size)).
    w_prompt = jax.random.uniform(k_w, (1, HIDDEN), dtype=jnp.float32)

    # --- Case 1: small batch, one <mask> per example; forced through the Pallas kernel ---
    B, S = 2, 8
    hidden_states = jax.random.normal(k_h, (B, S, HIDDEN), dtype=jnp.float32)
    mask_pos = jnp.array([3, 5], dtype=jnp.int32)
    loss_ids = (jnp.arange(S, dtype=jnp.int32)[None, :] == mask_pos[:, None]).astype(jnp.int32)

    out = code_prompt_classification_forward(hidden_states, loss_ids, w_prompt, 1,
                                             force_kernel=True)
    out = jax.block_until_ready(out)
    ref = _reference(hidden_states, loss_ids, w_prompt, 1)
    assert out.shape == (B, HIDDEN), out.shape
    assert jnp.allclose(out, ref, atol=1e-6, rtol=1e-6), "mismatch vs reference (M=1, kernel)"

    # Same small case through the small-problem fallback (default dispatch).
    out_fb = code_prompt_classification_forward(hidden_states, loss_ids, w_prompt, 1)
    out_fb = jax.block_until_ready(out_fb)
    assert jnp.allclose(out_fb, ref, atol=1e-6, rtol=1e-6), "mismatch vs reference (M=1, fallback)"

    # --- Case 2: two <mask> tokens per example; forced through the Pallas kernel ---
    loss_ids2 = jnp.zeros((B, S), dtype=jnp.int32)
    loss_ids2 = loss_ids2.at[0, 1].set(1).at[0, 3].set(1).at[1, 2].set(1).at[1, 5].set(1)

    out2 = code_prompt_classification_forward(hidden_states, loss_ids2, w_prompt, 2,
                                              force_kernel=True)
    out2 = jax.block_until_ready(out2)
    ref2 = _reference(hidden_states, loss_ids2, w_prompt, 2)
    assert out2.shape == (B, 2, HIDDEN), out2.shape
    assert jnp.allclose(out2, ref2, atol=1e-6, rtol=1e-6), "mismatch vs reference (M=2, kernel)"

    # --- Case 3: larger batch (B*M = 256 rows) -> kernel path by default, multi-step grid
    #     exercising the cross-step double-buffered prefetch.
    B3, S3, M3 = 32, 16, 8
    hidden_states3 = jax.random.normal(k_h3, (B3, S3, HIDDEN), dtype=jnp.float32)
    cols = (jnp.arange(M3, dtype=jnp.int32)[None, :] * 2
            + (jnp.arange(B3, dtype=jnp.int32)[:, None] % 2)) % S3       # 8 distinct cols/row
    loss_ids3 = jnp.zeros((B3, S3), dtype=jnp.int32)
    loss_ids3 = loss_ids3.at[jnp.arange(B3)[:, None], cols].set(1)

    out3 = code_prompt_classification_forward(hidden_states3, loss_ids3, w_prompt, M3)
    out3 = jax.block_until_ready(out3)
    ref3 = _reference(hidden_states3, loss_ids3, w_prompt, M3)
    assert out3.shape == (B3, M3, HIDDEN), out3.shape
    assert jnp.allclose(out3, ref3, atol=1e-6, rtol=1e-6), "mismatch vs reference (M=8, kernel)"

    # TODO(synk): the PLM (prompt_model) and verbalizer are external submodules and are
    # represented by the synthetic hidden_states input; only this module's own forward
    # (extract_at_mask + w_prompt scaling) is implemented here.  The biggest remaining
    # win is to delete this standalone pass: since (x * w_prompt) @ W == x @ (diag(w_prompt) W),
    # pre-scale the downstream classifier/verbalizer weight columns by w_prompt and do the
    # row gather as the LHS tile fetch of that matmul kernel (same flat_pos scalar-prefetch
    # table), removing the (B, M, H) HBM round trip entirely.
    print("KERNEL_OK")
</pallas_src>

<mosaic_0001>
module attributes {stable_mosaic.version = 11 : i64} {
  func.func @_gather_scale_kernel(%arg0: i32, %arg1: memref<64xi32, #tpu.memory_space<smem>>, %arg2: memref<16x1024xf32, #tpu.memory_space<any>>, %arg3: memref<1x1024xf32, #tpu.memory_space<vmem>>, %arg4: memref<64x1024xf32, #tpu.memory_space<vmem>>, %arg5: memref<2x64x1024xf32, #tpu.memory_space<vmem>>, %arg6: memref<2x64x!tpu.dma_semaphore, #tpu.memory_space<semaphore_mem>>) attributes {dimension_semantics = [#tpu.dimension_semantics<arbitrary>], iteration_bounds = array<i64: 1>, scalar_prefetch = 1 : i64, scratch_operands = 2 : i64, tpu.core_type = #tpu.core_type<tc>, window_params = [{}, {pipeline_mode = #tpu.pipeline_mode<synchronous>, transform_indices = @transform_1, window_bounds = array<i64: 1, 1024>}, {transform_indices = @transform_2, window_bounds = array<i64: 64, 1024>}]} {
    %c1_i32 = arith.constant 1 : i32
    %0 = arith.andi %arg0, %c1_i32 : i32
    %c1_i32_0 = arith.constant 1 : i32
    %1 = arith.subi %c1_i32_0, %0 : i32
    %c0_i32 = arith.constant 0 : i32
    %2 = arith.cmpi eq, %arg0, %c0_i32 : i32
    %3 = arith.extui %2 : i1 to i32
    %c0_i32_1 = arith.constant 0 : i32
    %4 = arith.cmpi ne, %3, %c0_i32_1 : i32
    scf.if %4 {
      %c0_268 = arith.constant 0 : index
      %336 = memref.load %arg1[%c0_268] : memref<64xi32, #tpu.memory_space<smem>>
      %c1 = arith.constant 1 : index
      %337 = memref.load %arg1[%c1] : memref<64xi32, #tpu.memory_space<smem>>
      %c2 = arith.constant 2 : index
      %338 = memref.load %arg1[%c2] : memref<64xi32, #tpu.memory_space<smem>>
      %c3 = arith.constant 3 : index
      %339 = memref.load %arg1[%c3] : memref<64xi32, #tpu.memory_space<smem>>
      %c4 = arith.constant 4 : index
      %340 = memref.load %arg1[%c4] : memref<64xi32, #tpu.memory_space<smem>>
      %c5 = arith.constant 5 : index
      %341 = memref.load %arg1[%c5] : memref<64xi32, #tpu.memory_space<smem>>
      %c6 = arith.constant 6 : index
      %342 = memref.load %arg1[%c6] : memref<64xi32, #tpu.memory_space<smem>>
      %c7 = arith.constant 7 : index
      %343 = memref.load %arg1[%c7] : memref<64xi32, #tpu.memory_space<smem>>
      %c8 = arith.constant 8 : index
      %344 = memref.load %arg1[%c8] : memref<64xi32, #tpu.memory_space<smem>>
      %c9 = arith.constant 9 : index
      %345 = memref.load %arg1[%c9] : memref<64xi32, #tpu.memory_space<smem>>
      %c10 = arith.constant 10 : index
      %346 = memref.load %arg1[%c10] : memref<64xi32, #tpu.memory_space<smem>>
      %c11 = arith.constant 11 : index
      %347 = memref.load %arg1[%c11] : memref<64xi32, #tpu.memory_space<smem>>
      %c12 = arith.constant 12 : index
      %348 = memref.load %arg1[%c12] : memref<64xi32, #tpu.memory_space<smem>>
      %c13 = arith.constant 13 : index
      %349 = memref.load %arg1[%c13] : memref<64xi32, #tpu.memory_space<smem>>
      %c14 = arith.constant 14 : index
      %350 = memref.load %arg1[%c14] : memref<64xi32, #tpu.memory_space<smem>>
      %c15 = arith.constant 15 : index
      %351 = memref.load %arg1[%c15] : memref<64xi32, #tpu.memory_space<smem>>
      %c16 = arith.constant 16 : index
      %352 = memref.load %arg1[%c16] : memref<64xi32, #tpu.memory_space<smem>>
      %c17 = arith.constant 17 : index
      %353 = memref.load %arg1[%c17] : memref<64xi32, #tpu.memory_space<smem>>
      %c18 = arith.constant 18 : index
      %354 = memref.load %arg1[%c18] : memref<64xi32, #tpu.memory_space<smem>>
      %c19 = arith.constant 19 : index
      %355 = memref.load %arg1[%c19] : memref<64xi32, #tpu.memory_space<smem>>
      %c20 = arith.constant 20 : index
      %356 = memref.load %arg1[%c20] : memref<64xi32, #tpu.memory_space<smem>>
      %c21 = arith.constant 21 : index
      %357 = memref.load %arg1[%c21] : memref<64xi32, #tpu.memory_space<smem>>
      %c22 = arith.constant 22 : index
      %358 = memref.load %arg1[%c22] : memref<64xi32, #tpu.memory_space<smem>>
      %c23 = arith.constant 23 : index
      %359 = memref.load %arg1[%c23] : memref<64xi32, #tpu.memory_space<smem>>
      %c24 = arith.constant 24 : index
      %360 = memref.load %arg1[%c24] : memref<64xi32, #tpu.memory_space<smem>>
      %c25 = arith.constant 25 : index
      %361 = memref.load %arg1[%c25] : memref<64xi32, #tpu.memory_space<smem>>
      %c26 = arith.constant 26 : index
      %362 = memref.load %arg1[%c26] : memref<64xi32, #tpu.memory_space<smem>>
      %c27 = arith.constant 27 : index
      %363 = memref.load %arg1[%c27] : memref<64xi32, #tpu.memory_space<smem>>
      %c28 = arith.constant 28 : index
      %364 = memref.load %arg1[%c28] : memref<64xi32, #tpu.memory_space<smem>>
      %c29 = arith.constant 29 : index
      %365 = memref.load %arg1[%c29] : memref<64xi32, #tpu.memory_space<smem>>
      %c30 = arith.constant 30 : index
      %366 = memref.load %arg1[%c30] : memref<64xi32, #tpu.memory_space<smem>>
      %c31 = arith.constant 31 : index
      %367 = memref.load %arg1[%c31] : memref<64xi32, #tpu.memory_space<smem>>
      %c32 = arith.constant 32 : index
      %368 = memref.load %arg1[%c32] : memref<64xi32, #tpu.memory_space<smem>>
      %c33 = arith.constant 33 : index
      %369 = memref.load %arg1[%c33] : memref<64xi32, #tpu.memory_space<smem>>
      %c34 = arith.constant 34 : index
      %370 = memref.load %arg1[%c34] : memref<64xi32, #tpu.memory_space<smem>>
      %c35 = arith.constant 35 : index
      %371 = memref.load %arg1[%c35] : memref<64xi32, #tpu.memory_space<smem>>
      %c36 = arith.constant 36 : index
      %372 = memref.load %arg1[%c36] : memref<64xi32, #tpu.memory_space<smem>>
      %c37 = arith.constant 37 : index
      %373 = memref.load %arg1[%c37] : memref<64xi32, #tpu.memory_space<smem>>
      %c38 = arith.constant 38 : index
      %374 = memref.load %arg1[%c38] : memref<64xi32, #tpu.memory_space<smem>>
      %c39 = arith.constant 39 : index
      %375 = memref.load %arg1[%c39] : memref<64xi32, #tpu.memory_space<smem>>
      %c40 = arith.constant 40 : index
      %376 = memref.load %arg1[%c40] : memref<64xi32, #tpu.memory_space<smem>>
      %c41 = arith.constant 41 : index
      %377 = memref.load %arg1[%c41] : memref<64xi32, #tpu.memory_space<smem>>
      %c42 = arith.constant 42 : index
      %378 = memref.load %arg1[%c42] : memref<64xi32, #tpu.memory_space<smem>>
      %c43 = arith.constant 43 : index
      %379 = memref.load %arg1[%c43] : memref<64xi32, #tpu.memory_space<smem>>
      %c44 = arith.constant 44 : index
      %380 = memref.load %arg1[%c44] : memref<64xi32, #tpu.memory_space<smem>>
      %c45 = arith.constant 45 : index
      %381 = memref.load %arg1[%c45] : memref<64xi32, #tpu.memory_space<smem>>
      %c46 = arith.constant 46 : index
      %382 = memref.load %arg1[%c46] : memref<64xi32, #tpu.memory_space<smem>>
      %c47 = arith.constant 47 : index
      %383 = memref.load %arg1[%c47] : memref<64xi32, #tpu.memory_space<smem>>
      %c48 = arith.constant 48 : index
      %384 = memref.load %arg1[%c48] : memref<64xi32, #tpu.memory_space<smem>>
      %c49 = arith.constant 49 : index
      %385 = memref.load %arg1[%c49] : memref<64xi32, #tpu.memory_space<smem>>
      %c50 = arith.constant 50 : index
      %386 = memref.load %arg1[%c50] : memref<64xi32, #tpu.memory_space<smem>>
      %c51 = arith.constant 51 : index
      %387 = memref.load %arg1[%c51] : memref<64xi32, #tpu.memory_space<smem>>
      %c52 = arith.constant 52 : index
      %388 = memref.load %arg1[%c52] : memref<64xi32, #tpu.memory_space<smem>>
      %c53 = arith.constant 53 : index
      %389 = memref.load %arg1[%c53] : memref<64xi32, #tpu.memory_space<smem>>
      %c54 = arith.constant 54 : index
      %390 = memref.load %arg1[%c54] : memref<64xi32, #tpu.memory_space<smem>>
      %c55 = arith.constant 55 : index
      %391 = memref.load %arg1[%c55] : memref<64xi32, #tpu.memory_space<smem>>
      %c56 = arith.constant 56 : index
      %392 = memref.load %arg1[%c56] : memref<64xi32, #tpu.memory_space<smem>>
      %c57 = arith.constant 57 : index
      %393 = memref.load %arg1[%c57] : memref<64xi32, #tpu.memory_space<smem>>
      %c58 = arith.constant 58 : index
      %394 = memref.load %arg1[%c58] : memref<64xi32, #tpu.memory_space<smem>>
      %c59 = arith.constant 59 : index
      %395 = memref.load %arg1[%c59] : memref<64xi32, #tpu.memory_space<smem>>
      %c60 = arith.constant 60 : index
      %396 = memref.load %arg1[%c60] : memref<64xi32, #tpu.memory_space<smem>>
      %c61 = arith.constant 61 : index
      %397 = memref.load %arg1[%c61] : memref<64xi32, #tpu.memory_space<smem>>
      %c62 = arith.constant 62 : index
      %398 = memref.load %arg1[%c62] : memref<64xi32, #tpu.memory_space<smem>>
      %c63 = arith.constant 63 : index
      %399 = memref.load %arg1[%c63] : memref<64xi32, #tpu.memory_space<smem>>
      %c0_i32_269 = arith.constant 0 : i32
      %c0_i32_270 = arith.constant 0 : i32
      %c0_i32_271 = arith.constant 0 : i32
      %c0_i32_272 = arith.constant 0 : i32
      %400 = tpu.memref_slice %arg2[%336, %c0_i32_272] : memref<16x1024xf32, #tpu.memory_space<any>> -> memref<1x1024xf32, #tpu.memory_space<any>>
      %c0_i32_273 = arith.constant 0 : i32
      %c0_i32_274 = arith.constant 0 : i32
      %401 = tpu.memref_slice %arg5[%c0_i32_269, %c0_i32_273, %c0_i32_274] : memref<2x64x1024xf32, #tpu.memory_space<vmem>> -> memref<1x1x1024xf32, #tpu.memory_space<vmem>>
      %402 = tpu.memref_squeeze %401 : memref<1x1x1024xf32, #tpu.memory_space<vmem>> -> memref<1x1024xf32, #tpu.memory_space<vmem>>
      %403 = tpu.memref_slice %arg6[%c0_i32_270, %c0_i32_271] : memref<2x64x!tpu.dma_semaphore, #tpu.memory_space<semaphore_mem>> -> memref<1x1x!tpu.dma_semaphore, #tpu.memory_space<semaphore_mem>>
      %404 = tpu.memref_squeeze %403 : memref<1x1x!tpu.dma_semaphore, #tpu.memory_space<semaphore_mem>> -> memref<!tpu.dma_semaphore, #tpu.memory_space<semaphore_mem>>
      tpu.enqueue_dma source(%400 : memref<1x1024xf32, #tpu.memory_space<any>>) target(%402 : memref<1x1024xf32, #tpu.memory_space<vmem>>) target_semaphore(%404 : memref<!tpu.dma_semaphore, #tpu.memory_space<semaphore_mem>>)
      %c0_i32_275 = arith.constant 0 : i32
      %c0_i32_276 = arith.constant 0 : i32
      %c1_i32_277 = arith.constant 1 : i32
      %c0_i32_278 = arith.constant 0 : i32
      %405 = tpu.memref_slice %arg2[%337, %c0_i32_278] : memref<16x1024xf32, #tpu.memory_space<any>> -> memref<1x1024xf32, #tpu.memory_space<any>>
      %c1_i32_279 = arith.constant 1 : i32
      %c0_i32_280 = arith.constant 0 : i32
      %406 = tpu.memref_slice %arg5[%c0_i32_275, %c1_i32_279, %c0_i32_280] : memref<2x64x1024xf32, #tpu.memory_space<vmem>> -> memref<1x1x1024xf32, #tpu.memory_space<vmem>>
      %407 = tpu.memref_squeeze %406 : memref<1x1x1024xf32, #tpu.memory_space<vmem>> -> memref<1x1024xf32, #tpu.memory_space<vmem>>
      %408 = tpu.memref_slice %arg6[%c0_i32_276, %c1_i32_277] : memref<2x64x!tpu.dma_semaphore, #tpu.memory_space<semaphore_mem>> -> memref<1x1x!tpu.dma_semaphore, #tpu.memory_space<semaphore_mem>>
      %409 = tpu.memref_squeeze %408 : memref<1x1x!tpu.dma_semaphore, #tpu.memory_space<semaphore_mem>> -> memref<!tpu.dma_semaphore, #tpu.memory_space<semaphore_mem>>
      tpu.enqueue_dma source(%405 : memref<1x1024xf32, #tpu.memory_space<any>>) target(%407 : memref<1x1024xf32, #tpu.memory_space<vmem>>) target_semaphore(%409 : memref<!tpu.dma_semaphore, #tpu.memory_space<semaphore_mem>>)
      %c0_i32_281 = arith.constant 0 : i32
      %c0_i32_282 = arith.constant 0 : i32
      %c2_i32_283 = arith.constant 2 : i32
      %c0_i32_284 = arith.constant 0 : i32
      %410 = tpu.memref_slice %arg2[%338, %c0_i32_284] : memref<16x1024xf32, #tpu.memory_space<any>> -> memref<1x1024xf32, #tpu.memory_space<any>>
      %c2_i32_285 = arith.constant 2 : i32
      %c0_i32_286 = arith.constant 0 : i32
      %411 = tpu.memref_slice %arg5[%c0_i32_281, %c2_i32_285, %c0_i32_286] : memref<2x64x1024xf32, #tpu.memory_space<vmem>> -> memref<1x1x1024xf32, #tpu.memory_space<vmem>>
      %412 = tpu.memref_squeeze %411 : memref<1x1x1024xf32, #tpu.memory_space<vmem>> -> memref<1x1024xf32, #tpu.memory_space<vmem>>
      %413 = tpu.memref_slice %arg6[%c0_i32_282, %c2_i32_283] : memref<2x64x!tpu.dma_semaphore, #tpu.memory_space<semaphore_mem>> -> memref<1x1x!tpu.dma_semaphore, #tpu.memory_space<semaphore_mem>>
      %414 = tpu.memref_squeeze %413 : memref<1x1x!tpu.dma_semaphore, #tpu.memory_space<semaphore_mem>> -> memref<!tpu.dma_semaphore, #tpu.memory_space<semaphore_mem>>
      tpu.enqueue_dma source(%410 : memref<1x1024xf32, #tpu.memory_space<any>>) target(%412 : memref<1x1024xf32, #tpu.memory_space<vmem>>) target_semaphore(%414 : memref<!tpu.dma_semaphore, #tpu.memory_space<semaphore_mem>>)
      %c0_i32_287 = arith.constant 0 : i32
      %c0_i32_288 = arith.constant 0 : i32
      %c3_i32_289 = arith.constant 3 : i32
      %c0_i32_290 = arith.constant 0 : i32
      %415 = tpu.memref_slice %arg2[%339, %c0_i32_290] : memref<16x1024xf32, #tpu.memory_space<any>> -> memref<1x1024xf32, #tpu.memory_space<any>>
      %c3_i32_291 = arith.constant 3 : i32
      %c0_i32_292 = arith.constant 0 : i32
      %416 = tpu.memref_slice %arg5[%c0_i32_287, %c3_i32_291, %c0_i32_292] : memref<2x64x1024xf32, #tpu.memory_space<vmem>> -> memref<1x1x1024xf32, #tpu.memory_space<vmem>>
      %417 = tpu.memref_squeeze %416 : memref<1x1x1024xf32, #tpu.memory_space<vmem>> -> memref<1x1024xf32, #tpu.memory_space<vmem>>
      %418 = tpu.memref_slice %arg6[%c0_i32_288, %c3_i32_289] : memref<2x64x!tpu.dma_semaphore, #tpu.memory_space<semaphore_mem>> -> memref<1x1x!tpu.dma_semaphore, #tpu.memory_space<semaphore_mem>>
      %419 = tpu.memref_squeeze %418 : memref<1x1x!tpu.dma_semaphore, #tpu.memory_space<semaphore_mem>> -> memref<!tpu.dma_semaphore, #tpu.memory_space<semaphore_mem>>
      tpu.enqueue_dma source(%415 : memref<1x1024xf32, #tpu.memory_space<any>>) target(%417 : memref<1x1024xf32, #tpu.memory_space<vmem>>) target_semaphore(%419 : memref<!tpu.dma_semaphore, #tpu.memory_space<semaphore_mem>>)
      %c0_i32_293 = arith.constant 0 : i32
      %c0_i32_294 = arith.constant 0 : i32
      %c4_i32_295 = arith.constant 4 : i32
      %c0_i32_296 = arith.constant 0 : i32
      %420 = tpu.memref_slice %arg2[%340, %c0_i32_296] : memref<16x1024xf32, #tpu.memory_space<any>> -> memref<1x1024xf32, #tpu.memory_space<any>>
      %c4_i32_297 = arith.constant 4 : i32
      %c0_i32_298 = arith.constant 0 : i32
      %421 = tpu.memref_slice %arg5[%c0_i32_293, %c4_i32_297, %c0_i32_298] : memref<2x64x1024xf32, #tpu.memory_space<vmem>> -> memref<1x1x1024xf32, #tpu.memory_space<vmem>>
      %422 = tpu.memref_squeeze %421 : memref<1x1x1024xf32, #tpu.memory_space<vmem>> -> memref<1x1024xf32, #tpu.memory_space<vmem>>
      %423 = tpu.memref_slice %arg6[%c0_i32_294, %c4_i32_295] : memref<2x64x!tpu.dma_semaphore, #tpu.memory_space<semaphore_mem>> -> memref<1x1x!tpu.dma_semaphore, #tpu.memory_space<semaphore_mem>>
      %424 = tpu.memref_squeeze %423 : memref<1x1x!tpu.dma_semaphore, #tpu.memory_space<semaphore_mem>> -> memref<!tpu.dma_semaphore, #tpu.memory_space<semaphore_mem>>
      tpu.enqueue_dma source(%420 : memref<1x1024xf32, #tpu.memory_space<any>>) target(%422 : memref<1x1024xf32, #tpu.memory_space<vmem>>) target_semaphore(%424 : memref<!tpu.dma_semaphore, #tpu.memory_space<semaphore_mem>>)
      %c0_i32_299 = arith.constant 0 : i32
      %c0_i32_300 = arith.constant 0 : i32
      %c5_i32_301 = arith.constant 5 : i32
      %c0_i32_302 = arith.constant 0 : i32
      %425 = tpu.memref_slice %arg2[%341, %c0_i32_302] : memref<16x1024xf32, #tpu.memory_space<any>> -> memref<1x1024xf32, #tpu.memory_space<any>>
      %c5_i32_303 = arith.constant 5 : i32
      %c0_i32_304 = arith.constant 0 : i32
      %426 = tpu.memref_slice %arg5[%c0_i32_299, %c5_i32_303, %c0_i32_304] : memref<2x64x1024xf32, #tpu.memory_space<vmem>> -> memref<1x1x1024xf32, #tpu.memory_space<vmem>>
      %427 = tpu.memref_squeeze %426 : memref<1x1x1024xf32, #tpu.memory_space<vmem>> -> memref<1x1024xf32, #tpu.memory_space<vmem>>
      %428 = tpu.memref_slice %arg6[%c0_i32_300, %c5_i32_301] : memref<2x64x!tpu.dma_semaphore, #tpu.memory_space<semaphore_mem>> -> memref<1x1x!tpu.dma_semaphore, #tpu.memory_space<semaphore_mem>>
      %429 = tpu.memref_squeeze %428 : memref<1x1x!tpu.dma_semaphore, #tpu.memory_space<semaphore_mem>> -> memref<!tpu.dma_semaphore, #tpu.memory_space<semaphore_mem>>
      tpu.enqueue_dma source(%425 : memref<1x1024xf32, #tpu.memory_space<any>>) target(%427 : memref<1x1024xf32, #tpu.memory_space<vmem>>) target_semaphore(%429 : memref<!tpu.dma_semaphore, #tpu.memory_space<semaphore_mem>>)
      %c0_i32_305 = arith.constant 0 : i32
      %c0_i32_306 = arith.constant 0 : i32
      %c6_i32_307 = arith.constant 6 : i32
      %c0_i32_308 = arith.constant 0 : i32
      %430 = tpu.memref_slice %arg2[%342, %c0_i32_308] : memref<16x1024xf32, #tpu.memory_space<any>> -> memref<1x1024xf32, #tpu.memory_space<any>>
      %c6_i32_309 = arith.constant 6 : i32
      %c0_i32_310 = arith.constant 0 : i32
      %431 = tpu.memref_slice %arg5[%c0_i32_305, %c6_i32_309, %c0_i32_310] : memref<2x64x1024xf32, #tpu.memory_space<vmem>> -> memref<1x1x1024xf32, #tpu.memory_space<vmem>>
      %432 = tpu.memref_squeeze %431 : memref<1x1x1024xf32, #tpu.memory_space<vmem>> -> memref<1x1024xf32, #tpu.memory_space<vmem>>
      %433 = tpu.memref_slice %arg6[%c0_i32_306, %c6_i32_307] : memref<2x64x!tpu.dma_semaphore, #tpu.memory_space<semaphore_mem>> -> memref<1x1x!tpu.dma_semaphore, #tpu.memory_space<semaphore_mem>>
      %434 = tpu.memref_squeeze %433 : memref<1x1x!tpu.dma_semaphore, #tpu.memory_space<semaphore_mem>> -> memref<!tpu.dma_semaphore, #tpu.memory_space<semaphore_mem>>
      tpu.enqueue_dma source(%430 : memref<1x1024xf32, #tpu.memory_space<any>>) target(%432 : memref<1x1024xf32, #tpu.memory_space<vmem>>) target_semaphore(%434 : memref<!tpu.dma_semaphore, #tpu.memory_space<semaphore_mem>>)
      %c0_i32_311 = arith.constant 0 : i32
      %c0_i32_312 = arith.constant 0 : i32
      %c7_i32_313 = arith.constant 7 : i32
      %c0_i32_314 = arith.constant 0 : i32
      %435 = tpu.memref_slice %arg2[%343, %c0_i32_314] : memref<16x1024xf32, #tpu.memory_space<any>> -> memref<1x1024xf32, #tpu.memory_space<any>>
      %c7_i32_315 = arith.constant 7 : i32
      %c0_i32_316 = arith.constant 0 : i32
      %436 = tpu.memref_slice %arg5[%c0_i32_311, %c7_i32_315, %c0_i32_316] : memref<2x64x1024xf32, #tpu.memory_space<vmem>> -> memref<1x1x1024xf32, #tpu.memory_space<vmem>>
      %437 = tpu.memref_squeeze %436 : memref<1x1x1024xf32, #tpu.memory_space<vmem>> -> memref<1x1024xf32, #tpu.memory_space<vmem>>
      %438 = tpu.memref_slice %arg6[%c0_i32_312, %c7_i32_313] : memref<2x64x!tpu.dma_semaphore, #tpu.memory_space<semaphore_mem>> -> memref<1x1x!tpu.dma_semaphore, #tpu.memory_space<semaphore_mem>>
      %439 = tpu.memref_squeeze %438 : memref<1x1x!tpu.dma_semaphore, #tpu.memory_space<semaphore_mem>> -> memref<!tpu.dma_semaphore, #tpu.memory_space<semaphore_mem>>
      tpu.enqueue_dma source(%435 : memref<1x1024xf32, #tpu.memory_space<any>>) target(%437 : memref<1x1024xf32, #tpu.memory_space<vmem>>) target_semaphore(%439 : memref<!tpu.dma_semaphore, #tpu.memory_space<semaphore_mem>>)
      %c0_i32_317 = arith.constant 0 : i32
      %c0_i32_318 = arith.constant 0 : i32
      %c8_i32_319 = arith.constant 8 : i32
      %c0_i32_320 = arith.constant 0 : i32
      %440 = tpu.memref_slice %arg2[%344, %c0_i32_320] : memref<16x1024xf32, #tpu.memory_space<any>> -> memref<1x1024xf32, #tpu.memory_space<any>>
      %c8_i32_321 = arith.constant 8 : i32
      %c0_i32_322 = arith.constant 0 : i32
      %441 = tpu.memref_slice %arg5[%c0_i32_317, %c8_i32_321, %c0_i32_322] : memref<2x64x1024xf32, #tpu.memory_space<vmem>> -> memref<1x1x1024xf32, #tpu.memory_space<vmem>>
      %442 = tpu.memref_squeeze %441 : memref<1x1x1024xf32, #tpu.memory_space<vmem>> -> memref<1x1024xf32, #tpu.memory_space<vmem>>
      %443 = tpu.memref_slice %arg6[%c0_i32_318, %c8_i32_319] : memref<2x64x!tpu.dma_semaphore, #tpu.memory_space<semaphore_mem>> -> memref<1x1x!tpu.dma_semaphore, #tpu.memory_space<semaphore_mem>>
      %444 = tpu.memref_squeeze %443 : memref<1x1x!tpu.dma_semaphore, #tpu.memory_space<semaphore_mem>> -> memref<!tpu.dma_semaphore, #tpu.memory_space<semaphore_mem>>
      tpu.enqueue_dma source(%440 : memref<1x1024xf32, #tpu.memory_space<any>>) target(%442 : memref<1x1024xf32, #tpu.memory_space<vmem>>) target_semaphore(%444 : memref<!tpu.dma_semaphore, #tpu.memory_space<semaphore_mem>>)
      %c0_i32_323 = arith.constant 0 : i32
      %c0_i32_324 = arith.constant 0 : i32
      %c9_i32_325 = arith.constant 9 : i32
      %c0_i32_326 = arith.constant 0 : i32
      %445 = tpu.memref_slice %arg2[%345, %c0_i32_326] : memref<16x1024xf32, #tpu.memory_space<any>> -> memref<1x1024xf32, #tpu.memory_space<any>>
      %c9_i32_327 = arith.constant 9 : i32
      %c0_i32_328 = arith.constant 0 : i32
      %446 = tpu.memref_slice %arg5[%c0_i32_323, %c9_i32_327, %c0_i32_328] : memref<2x64x1024xf32, #tpu.memory_space<vmem>> -> memref<1x1x1024xf32, #tpu.memory_space<vmem>>
      %447 = tpu.memref_squeeze %446 : memref<1x1x1024xf32, #tpu.memory_space<vmem>> -> memref<1x1024xf32, #tpu.memory_space<vmem>>
      %448 = tpu.memref_slice %arg6[%c0_i32_324, %c9_i32_325] : memref<2x64x!tpu.dma_semaphore, #tpu.memory_space<semaphore_mem>> -> memref<1x1x!tpu.dma_semaphore, #tpu.memory_space<semaphore_mem>>
      %449 = tpu.memref_squeeze %448 : memref<1x1x!tpu.dma_semaphore, #tpu.memory_space<semaphore_mem>> -> memref<!tpu.dma_semaphore, #tpu.memory_space<semaphore_mem>>
      tpu.enqueue_dma source(%445 : memref<1x1024xf32, #tpu.memory_space<any>>) target(%447 : memref<1x1024xf32, #tpu.memory_space<vmem>>) target_semaphore(%449 : memref<!tpu.dma_semaphore, #tpu.memory_space<semaphore_mem>>)
      %c0_i32_329 = arith.constant 0 : i32
      %c0_i32_330 = arith.constant 0 : i32
      %c10_i32_331 = arith.constant 10 : i32
      %c0_i32_332 = arith.constant 0 : i32
      %450 = tpu.memref_slice %arg2[%346, %c0_i32_332] : memref<16x1024xf32, #tpu.memory_space<any>> -> memref<1x1024xf32, #tpu.memory_space<any>>
      %c10_i32_333 = arith.constant 10 : i32
      %c0_i32_334 = arith.constant 0 : i32
      %451 = tpu.memref_slice %arg5[%c0_i32_329, %c10_i32_333, %c0_i32_334] : memref<2x64x1024xf32, #tpu.memory_space<vmem>> -> memref<1x1x1024xf32, #tpu.memory_space<vmem>>
      %452 = tpu.memref_squeeze %451 : memref<1x1x1024xf32, #tpu.memory_space<vmem>> -> memref<1x1024xf32, #tpu.memory_space<vmem>>
      %453 = tpu.memref_slice %arg6[%c0_i32_330, %c10_i32_331] : memref<2x64x!tpu.dma_semaphore, #tpu.memory_space<semaphore_mem>> -> memref<1x1x!tpu.dma_semaphore, #tpu.memory_space<semaphore_mem>>
      %454 = tpu.memref_squeeze %453 : memref<1x1x!tpu.dma_semaphore, #tpu.memory_space<semaphore_mem>> -> memref<!tpu.dma_semaphore, #tpu.memory_space<semaphore_mem>>
      tpu.enqueue_dma source(%450 : memref<1x1024xf32, #tpu.memory_space<any>>) target(%452 : memref<1x1024xf32, #tpu.memory_space<vmem>>) target_semaphore(%454 : memref<!tpu.dma_semaphore, #tpu.memory_space<semaphore_mem>>)
      %c0_i32_335 = arith.constant 0 : i32
      %c0_i32_336 = arith.constant 0 : i32
      %c11_i32_337 = arith.constant 11 : i32
      %c0_i32_338 = arith.constant 0 : i32
      %455 = tpu.memref_slice %arg2[%347, %c0_i32_338] : memref<16x1024xf32, #tpu.memory_space<any>> -> memref<1x1024xf32, #tpu.memory_space<any>>
      %c11_i32_339 = arith.constant 11 : i32
      %c0_i32_340 = arith.constant 0 : i32
      %456 = tpu.memref_slice %arg5[%c0_i32_335, %c11_i32_339, %c0_i32_340] : memref<2x64x1024xf32, #tpu.memory_space<vmem>> -> memref<1x1x1024xf32, #tpu.memory_space<vmem>>
      %457 = tpu.memref_squeeze %456 : memref<1x1x1024xf32, #tpu.memory_space<vmem>> -> memref<1x1024xf32, #tpu.memory_space<vmem>>
      %458 = tpu.memref_slice %arg6[%c0_i32_336, %c11_i32_337] : memref<2x64x!tpu.dma_semaphore, #tpu.memory_space<semaphore_mem>> -> memref<1x1x!tpu.dma_semaphore, #tpu.memory_space<semaphore_mem>>
      %459 = tpu.memref_squeeze %458 : memref<1x1x!tpu.dma_semaphore, #tpu.memory_space<semaphore_mem>> -> memref<!tpu.dma_semaphore, #tpu.memory_space<semaphore_mem>>
      tpu.enqueue_dma source(%455 : memref<1x1024xf32, #tpu.memory_space<any>>) target(%457 : memref<1x1024xf32, #tpu.memory_space<vmem>>) target_semaphore(%459 : memref<!tpu.dma_semaphore, #tpu.memory_space<semaphore_mem>>)
      %c0_i32_341 = arith.constant 0 : i32
      %c0_i32_342 = arith.constant 0 : i32
      %c12_i32_343 = arith.constant 12 : i32
      %c0_i32_344 = arith.constant 0 : i32
      %460 = tpu.memref_slice %arg2[%348, %c0_i32_344] : memref<16x1024xf32, #tpu.memory_space<any>> -> memref<1x1024xf32, #tpu.memory_space<any>>
      %c12_i32_345 = arith.constant 12 : i32
      %c0_i32_346 = arith.constant 0 : i32
      %461 = tpu.memref_slice %arg5[%c0_i32_341, %c12_i32_345, %c0_i32_346] : memref<2x64x1024xf32, #tpu.memory_space<vmem>> -> memref<1x1x1024xf32, #tpu.memory_space<vmem>>
      %462 = tpu.memref_squeeze %461 : memref<1x1x1024xf32, #tpu.memory_space<vmem>> -> memref<1x1024xf32, #tpu.memory_space<vmem>>
      %463 = tpu.memref_slice %arg6[%c0_i32_342, %c12_i32_343] : memref<2x64x!tpu.dma_semaphore, #tpu.memory_space<semaphore_mem>> -> memref<1x1x!tpu.dma_semaphore, #tpu.memory_space<semaphore_mem>>
      %464 = tpu.memref_squeeze %463 : memref<1x1x!tpu.dma_semaphore, #tpu.memory_space<semaphore_mem>> -> memref<!tpu.dma_semaphore, #tpu.memory_space<semaphore_mem>>
      tpu.enqueue_dma source(%460 : memref<1x1024xf32, #tpu.memory_space<any>>) target(%462 : memref<1x1024xf32, #tpu.memory_space<vmem>>) target_semaphore(%464 : memref<!tpu.dma_semaphore, #tpu.memory_space<semaphore_mem>>)
      %c0_i32_347 = arith.constant 0 : i32
      %c0_i32_348 = arith.constant 0 : i32
      %c13_i32_349 = arith.constant 13 : i32
      %c0_i32_350 = arith.constant 0 : i32
      %465 = tpu.memref_slice %arg2[%349, %c0_i32_350] : memref<16x1024xf32, #tpu.memory_space<any>> -> memref<1x1024xf32, #tpu.memory_space<any>>
      %c13_i32_351 = arith.constant 13 : i32
      %c0_i32_352 = arith.constant 0 : i32
      %466 = tpu.memref_slice %arg5[%c0_i32_347, %c13_i32_351, %c0_i32_352] : memref<2x64x1024xf32, #tpu.memory_space<vmem>> -> memref<1x1x1024xf32, #tpu.memory_space<vmem>>
      %467 = tpu.memref_squeeze %466 : memref<1x1x1024xf32, #tpu.memory_space<vmem>> -> memref<1x1024xf32, #tpu.memory_space<vmem>>
      %468 = tpu.memref_slice %arg6[%c0_i32_348, %c13_i32_349] : memref<2x64x!tpu.dma_semaphore, #tpu.memory_space<semaphore_mem>> -> memref<1x1x!tpu.dma_semaphore, #tpu.memory_space<semaphore_mem>>
      %469 = tpu.memref_squeeze %468 : memref<1x1x!tpu.dma_semaphore, #tpu.memory_space<semaphore_mem>> -> memref<!tpu.dma_semaphore, #tpu.memory_space<semaphore_mem>>
      tpu.enqueue_dma source(%465 : memref<1x1024xf32, #tpu.memory_space<any>>) target(%467 : memref<1x1024xf32, #tpu.memory_space<vmem>>) target_semaphore(%469 : memref<!tpu.dma_semaphore, #tpu.memory_space<semaphore_mem>>)
      %c0_i32_353 = arith.constant 0 : i32
      %c0_i32_354 = arith.constant 0 : i32
      %c14_i32_355 = arith.constant 14 : i32
      %c0_i32_356 = arith.constant 0 : i32
      %470 = tpu.memref_slice %arg2[%350, %c0_i32_356] : memref<16x1024xf32, #tpu.memory_space<any>> -> memref<1x1024xf32, #tpu.memory_space<any>>
      %c14_i32_357 = arith.constant 14 : i32
      %c0_i32_358 = arith.constant 0 : i32
      %471 = tpu.memref_slice %arg5[%c0_i32_353, %c14_i32_357, %c0_i32_358] : memref<2x64x1024xf32, #tpu.memory_space<vmem>> -> memref<1x1x1024xf32, #tpu.memory_space<vmem>>
      %472 = tpu.memref_squeeze %471 : memref<1x1x1024xf32, #tpu.memory_space<vmem>> -> memref<1x1024xf32, #tpu.memory_space<vmem>>
      %473 = tpu.memref_slice %arg6[%c0_i32_354, %c14_i32_355] : memref<2x64x!tpu.dma_semaphore, #tpu.memory_space<semaphore_mem>> -> memref<1x1x!tpu.dma_semaphore, #tpu.memory_space<semaphore_mem>>
      %474 = tpu.memref_squeeze %473 : memref<1x1x!tpu.dma_semaphore, #tpu.memory_space<semaphore_mem>> -> memref<!tpu.dma_semaphore, #tpu.memory_space<semaphore_mem>>
      tpu.enqueue_dma source(%470 : memref<1x1024xf32, #tpu.memory_space<any>>) target(%472 : memref<1x1024xf32, #tpu.memory_space<vmem>>) target_semaphore(%474 : memref<!tpu.dma_semaphore, #tpu.memory_space<semaphore_mem>>)
      %c0_i32_359 = arith.constant 0 : i32
      %c0_i32_360 = arith.constant 0 : i32
      %c15_i32_361 = arith.constant 15 : i32
      %c0_i32_362 = arith.constant 0 : i32
      %475 = tpu.memref_slice %arg2[%351, %c0_i32_362] : memref<16x1024xf32, #tpu.memory_space<any>> -> memref<1x1024xf32, #tpu.memory_space<any>>
      %c15_i32_363 = arith.constant 15 : i32
      %c0_i32_364 = arith.constant 0 : i32
      %476 = tpu.memref_slice %arg5[%c0_i32_359, %c15_i32_363, %c0_i32_364] : memref<2x64x1024xf32, #tpu.memory_space<vmem>> -> memref<1x1x1024xf32, #tpu.memory_space<vmem>>
      %477 = tpu.memref_squeeze %476 : memref<1x1x1024xf32, #tpu.memory_space<vmem>> -> memref<1x1024xf32, #tpu.memory_space<vmem>>
      %478 = tpu.memref_slice %arg6[%c0_i32_360, %c15_i32_361] : memref<2x64x!tpu.dma_semaphore, #tpu.memory_space<semaphore_mem>> -> memref<1x1x!tpu.dma_semaphore, #tpu.memory_space<semaphore_mem>>
      %479 = tpu.memref_squeeze %478 : memref<1x1x!tpu.dma_semaphore, #tpu.memory_space<semaphore_mem>> -> memref<!tpu.dma_semaphore, #tpu.memory_space<semaphore_mem>>
      tpu.enqueue_dma source(%475 : memref<1x1024xf32, #tpu.memory_space<any>>) target(%477 : memref<1x1024xf32, #tpu.memory_space<vmem>>) target_semaphore(%479 : memref<!tpu.dma_semaphore, #tpu.memory_space<semaphore_mem>>)
      %c0_i32_365 = arith.constant 0 : i32
      %c0_i32_366 = arith.constant 0 : i32
      %c16_i32_367 = arith.constant 16 : i32
      %c0_i32_368 = arith.constant 0 : i32
      %480 = tpu.memref_slice %arg2[%352, %c0_i32_368] : memref<16x1024xf32, #tpu.memory_space<any>> -> memref<1x1024xf32, #tpu.memory_space<any>>
      %c16_i32_369 = arith.constant 16 : i32
      %c0_i32_370 = arith.constant 0 : i32
      %481 = tpu.memref_slice %arg5[%c0_i32_365, %c16_i32_369, %c0_i32_370] : memref<2x64x1024xf32, #tpu.memory_space<vmem>> -> memref<1x1x1024xf32, #tpu.memory_space<vmem>>
      %482 = tpu.memref_squeeze %481 : memref<1x1x1024xf32, #tpu.memory_space<vmem>> -> memref<1x1024xf32, #tpu.memory_space<vmem>>
      %483 = tpu.memref_slice %arg6[%c0_i32_366, %c16_i32_367] : memref<2x64x!tpu.dma_semaphore, #tpu.memory_space<semaphore_mem>> -> memref<1x1x!tpu.dma_semaphore, #tpu.memory_space<semaphore_mem>>
      %484 = tpu.memref_squeeze %483 : memref<1x1x!tpu.dma_semaphore, #tpu.memory_space<semaphore_mem>> -> memref<!tpu.dma_semaphore, #tpu.memory_space<semaphore_mem>>
      tpu.enqueue_dma source(%480 : memref<1x1024xf32, #tpu.memory_space<any>>) target(%482 : memref<1x1024xf32, #tpu.memory_space<vmem>>) target_semaphore(%484 : memref<!tpu.dma_semaphore, #tpu.memory_space<semaphore_mem>>)
      %c0_i32_371 = arith.constant 0 : i32
      %c0_i32_372 = arith.constant 0 : i32
      %c17_i32_373 = arith.constant 17 : i32
      %c0_i32_374 = arith.constant 0 : i32
      %485 = tpu.memref_slice %arg2[%353, %c0_i32_374] : memref<16x1024xf32, #tpu.memory_space<any>> -> memref<1x1024xf32, #tpu.memory_space<any>>
      %c17_i32_375 = arith.constant 17 : i32
      %c0_i32_376 = arith.constant 0 : i32
      %486 = tpu.memref_slice %arg5[%c0_i32_371, %c17_i32_375, %c0_i32_376] : memref<2x64x1024xf32, #tpu.memory_space<vmem>> -> memref<1x1x1024xf32, #tpu.memory_space<vmem>>
      %487 = tpu.memref_squeeze %486 : memref<1x1x1024xf32, #tpu.memory_space<vmem>> -> memref<1x1024xf32, #tpu.memory_space<vmem>>
      %488 = tpu.memref_slice %arg6[%c0_i32_372, %c17_i32_373] : memref<2x64x!tpu.dma_semaphore, #tpu.memory_space<semaphore_mem>> -> memref<1x1x!tpu.dma_semaphore, #tpu.memory_space<semaphore_mem>>
      %489 = tpu.memref_squeeze %488 : memref<1x1x!tpu.dma_semaphore, #tpu.memory_space<semaphore_mem>> -> memref<!tpu.dma_semaphore, #tpu.memory_space<semaphore_mem>>
      tpu.enqueue_dma source(%485 : memref<1x1024xf32, #tpu.memory_space<any>>) target(%487 : memref<1x1024xf32, #tpu.memory_space<vmem>>) target_semaphore(%489 : memref<!tpu.dma_semaphore, #tpu.memory_space<semaphore_mem>>)
      %c0_i32_377 = arith.constant 0 : i32
      %c0_i32_378 = arith.constant 0 : i32
      %c18_i32_379 = arith.constant 18 : i32
      %c0_i32_380 = arith.constant 0 : i32
      %490 = tpu.memref_slice %arg2[%354, %c0_i32_380] : memref<16x1024xf32, #tpu.memory_space<any>> -> memref<1x1024xf32, #tpu.memory_space<any>>
      %c18_i32_381 = arith.constant 18 : i32
      %c0_i32_382 = arith.constant 0 : i32
      %491 = tpu.memref_slice %arg5[%c0_i32_377, %c18_i32_381, %c0_i32_382] : memref<2x64x1024xf32, #tpu.memory_space<vmem>> -> memref<1x1x1024xf32, #tpu.memory_space<vmem>>
      %492 = tpu.memref_squeeze %491 : memref<1x1x1024xf32, #tpu.memory_space<vmem>> -> memref<1x1024xf32, #tpu.memory_space<vmem>>
      %493 = tpu.memref_slice %arg6[%c0_i32_378, %c18_i32_379] : memref<2x64x!tpu.dma_semaphore, #tpu.memory_space<semaphore_mem>> -> memref<1x1x!tpu.dma_semaphore, #tpu.memory_space<semaphore_mem>>
      %494 = tpu.memref_squeeze %493 : memref<1x1x!tpu.dma_semaphore, #tpu.memory_space<semaphore_mem>> -> memref<!tpu.dma_semaphore, #tpu.memory_space<semaphore_mem>>
      tpu.enqueue_dma source(%490 : memref<1x1024xf32, #tpu.memory_space<any>>) target(%492 : memref<1x1024xf32, #tpu.memory_space<vmem>>) target_semaphore(%494 : memref<!tpu.dma_semaphore, #tpu.memory_space<semaphore_mem>>)
      %c0_i32_383 = arith.constant 0 : i32
      %c0_i32_384 = arith.constant 0 : i32
      %c19_i32_385 = arith.constant 19 : i32
      %c0_i32_386 = arith.constant 0 : i32
      %495 = tpu.memref_slice %arg2[%355, %c0_i32_386] : memref<16x1024xf32, #tpu.memory_space<any>> -> memref<1x1024xf32, #tpu.memory_space<any>>
      %c19_i32_387 = arith.constant 19 : i32
      %c0_i32_388 = arith.constant 0 : i32
      %496 = tpu.memref_slice %arg5[%c0_i32_383, %c19_i32_387, %c0_i32_388] : memref<2x64x1024xf32, #tpu.memory_space<vmem>> -> memref<1x1x1024xf32, #tpu.memory_space<vmem>>
      %497 = tpu.memref_squeeze %496 : memref<1x1x1024xf32, #tpu.memory_space<vmem>> -> memref<1x1024xf32, #tpu.memory_space<vmem>>
      %498 = tpu.memref_slice %arg6[%c0_i32_384, %c19_i32_385] : memref<2x64x!tpu.dma_semaphore, #tpu.memory_space<semaphore_mem>> -> memref<1x1x!tpu.dma_semaphore, #tpu.memory_space<semaphore_mem>>
      %499 = tpu.memref_squeeze %498 : memref<1x1x!tpu.dma_semaphore, #tpu.memory_space<semaphore_mem>> -> memref<!tpu.dma_semaphore, #tpu.memory_space<semaphore_mem>>
      tpu.enqueue_dma source(%495 : memref<1x1024xf32, #tpu.memory_space<any>>) target(%497 : memref<1x1024xf32, #tpu.memory_space<vmem>>) target_semaphore(%499 : memref<!tpu.dma_semaphore, #tpu.memory_space<semaphore_mem>>)
      %c0_i32_389 = arith.constant 0 : i32
      %c0_i32_390 = arith.constant 0 : i32
      %c20_i32_391 = arith.constant 20 : i32
      %c0_i32_392 = arith.constant 0 : i32
      %500 = tpu.memref_slice %arg2[%356, %c0_i32_392] : memref<16x1024xf32, #tpu.memory_space<any>> -> memref<1x1024xf32, #tpu.memory_space<any>>
      %c20_i32_393 = arith.constant 20 : i32
      %c0_i32_394 = arith.constant 0 : i32
      %501 = tpu.memref_slice %arg5[%c0_i32_389, %c20_i32_393, %c0_i32_394] : memref<2x64x1024xf32, #tpu.memory_space<vmem>> -> memref<1x1x1024xf32, #tpu.memory_space<vmem>>
      %502 = tpu.memref_squeeze %501 : memref<1x1x1024xf32, #tpu.memory_space<vmem>> -> memref<1x1024xf32, #tpu.memory_space<vmem>>
      %503 = tpu.memref_slice %arg6[%c0_i32_390, %c20_i32_391] : memref<2x64x!tpu.dma_semaphore, #tpu.memory_space<semaphore_mem>> -> memref<1x1x!tpu.dma_semaphore, #tpu.memory_space<semaphore_mem>>
      %504 = tpu.memref_squeeze %503 : memref<1x1x!tpu.dma_semaphore, #tpu.memory_space<semaphore_mem>> -> memref<!tpu.dma_semaphore, #tpu.memory_space<semaphore_mem>>
      tpu.enqueue_dma source(%500 : memref<1x1024xf32, #tpu.memory_space<any>>) target(%502 : memref<1x1024xf32, #tpu.memory_space<vmem>>) target_semaphore(%504 : memref<!tpu.dma_semaphore, #tpu.memory_space<semaphore_mem>>)
      %c0_i32_395 = arith.constant 0 : i32
      %c0_i32_396 = arith.constant 0 : i32
      %c21_i32_397 = arith.constant 21 : i32
      %c0_i32_398 = arith.constant 0 : i32
      %505 = tpu.memref_slice %arg2[%357, %c0_i32_398] : memref<16x1024xf32, #tpu.memory_space<any>> -> memref<1x1024xf32, #tpu.memory_space<any>>
      %c21_i32_399 = arith.constant 21 : i32
      %c0_i32_400 = arith.constant 0 : i32
      %506 = tpu.memref_slice %arg5[%c0_i32_395, %c21_i32_399, %c0_i32_400] : memref<2x64x1024xf32, #tpu.memory_space<vmem>> -> memref<1x1x1024xf32, #tpu.memory_space<vmem>>
      %507 = tpu.memref_squeeze %506 : memref<1x1x1024xf32, #tpu.memory_space<vmem>> -> memref<1x1024xf32, #tpu.memory_space<vmem>>
      %508 = tpu.memref_slice %arg6[%c0_i32_396, %c21_i32_397] : memref<2x64x!tpu.dma_semaphore, #tpu.memory_space<semaphore_mem>> -> memref<1x1x!tpu.dma_semaphore, #tpu.memory_space<semaphore_mem>>
      %509 = tpu.memref_squeeze %508 : memref<1x1x!tpu.dma_semaphore, #tpu.memory_space<semaphore_mem>> -> memref<!tpu.dma_semaphore, #tpu.memory_space<semaphore_mem>>
      tpu.enqueue_dma source(%505 : memref<1x1024xf32, #tpu.memory_space<any>>) target(%507 : memref<1x1024xf32, #tpu.memory_space<vmem>>) target_semaphore(%509 : memref<!tpu.dma_semaphore, #tpu.memory_space<semaphore_mem>>)
      %c0_i32_401 = arith.constant 0 : i32
      %c0_i32_402 = arith.constant 0 : i32
      %c22_i32_403 = arith.constant 22 : i32
      %c0_i32_404 = arith.constant 0 : i32
      %510 = tpu.memref_slice %arg2[%358, %c0_i32_404] : memref<16x1024xf32, #tpu.memory_space<any>> -> memref<1x1024xf32, #tpu.memory_space<any>>
      %c22_i32_405 = arith.constant 22 : i32
      %c0_i32_406 = arith.constant 0 : i32
      %511 = tpu.memref_slice %arg5[%c0_i32_401, %c22_i32_405, %c0_i32_406] : memref<2x64x1024xf32, #tpu.memory_space<vmem>> -> memref<1x1x1024xf32, #tpu.memory_space<vmem>>
      %512 = tpu.memref_squeeze %511 : memref<1x1x1024xf32, #tpu.memory_space<vmem>> -> memref<1x1024xf32, #tpu.memory_space<vmem>>
      %513 = tpu.memref_slice %arg6[%c0_i32_402, %c22_i32_403] : memref<2x64x!tpu.dma_semaphore, #tpu.memory_space<semaphore_mem>> -> memref<1x1x!tpu.dma_semaphore, #tpu.memory_space<semaphore_mem>>
      %514 = tpu.memref_squeeze %513 : memref<1x1x!tpu.dma_semaphore, #tpu.memory_space<semaphore_mem>> -> memref<!tpu.dma_semaphore, #tpu.memory_space<semaphore_mem>>
      tpu.enqueue_dma source(%510 : memref<1x1024xf32, #tpu.memory_space<any>>) target(%512 : memref<1x1024xf32, #tpu.memory_space<vmem>>) target_semaphore(%514 : memref<!tpu.dma_semaphore, #tpu.memory_space<semaphore_mem>>)
      %c0_i32_407 = arith.constant 0 : i32
      %c0_i32_408 = arith.constant 0 : i32
      %c23_i32_409 = arith.constant 23 : i32
      %c0_i32_410 = arith.constant 0 : i32
      %515 = tpu.memref_slice %arg2[%359, %c0_i32_410] : memref<16x1024xf32, #tpu.memory_space<any>> -> memref<1x1024xf32, #tpu.memory_space<any>>
      %c23_i32_411 = arith.constant 23 : i32
      %c0_i32_412 = arith.constant 0 : i32
      %516 = tpu.memref_slice %arg5[%c0_i32_407, %c23_i32_411, %c0_i32_412] : memref<2x64x1024xf32, #tpu.memory_space<vmem>> -> memref<1x1x1024xf32, #tpu.memory_space<vmem>>
      %517 = tpu.memref_squeeze %516 : memref<1x1x1024xf32, #tpu.memory_space<vmem>> -> memref<1x1024xf32, #tpu.memory_space<vmem>>
      %518 = tpu.memref_slice %arg6[%c0_i32_408, %c23_i32_409] : memref<2x64x!tpu.dma_semaphore, #tpu.memory_space<semaphore_mem>> -> memref<1x1x!tpu.dma_semaphore, #tpu.memory_space<semaphore_mem>>
      %519 = tpu.memref_squeeze %518 : memref<1x1x!tpu.dma_semaphore, #tpu.memory_space<semaphore_mem>> -> memref<!tpu.dma_semaphore, #tpu.memory_space<semaphore_mem>>
      tpu.enqueue_dma source(%515 : memref<1x1024xf32, #tpu.memory_space<any>>) target(%517 : memref<1x1024xf32, #tpu.memory_space<vmem>>) target_semaphore(%519 : memref<!tpu.dma_semaphore, #tpu.memory_space<semaphore_mem>>)
      %c0_i32_413 = arith.constant 0 : i32
      %c0_i32_414 = arith.constant 0 : i32
      %c24_i32_415 = arith.constant 24 : i32
      %c0_i32_416 = arith.constant 0 : i32
      %520 = tpu.memref_slice %arg2[%360, %c0_i32_416] : memref<16x1024xf32, #tpu.memory_space<any>> -> memref<1x1024xf32, #tpu.memory_space<any>>
      %c24_i32_417 = arith.constant 24 : i32
      %c0_i32_418 = arith.constant 0 : i32
      %521 = tpu.memref_slice %arg5[%c0_i32_413, %c24_i32_417, %c0_i32_418] : memref<2x64x1024xf32, #tpu.memory_space<vmem>> -> memref<1x1x1024xf32, #tpu.memory_space<vmem>>
      %522 = tpu.memref_squeeze %521 : memref<1x1x1024xf32, #tpu.memory_space<vmem>> -> memref<1x1024xf32, #tpu.memory_space<vmem>>
      %523 = tpu.memref_slice %arg6[%c0_i32_414, %c24_i32_415] : memref<2x64x!tpu.dma_semaphore, #tpu.memory_space<semaphore_mem>> -> memref<1x1x!tpu.dma_semaphore, #tpu.memory_space<semaphore_mem>>
      %524 = tpu.memref_squeeze %523 : memref<1x1x!tpu.dma_semaphore, #tpu.memory_space<semaphore_mem>> -> memref<!tpu.dma_semaphore, #tpu.memory_space<semaphore_mem>>
      tpu.enqueue_dma source(%520 : memref<1x1024xf32, #tpu.memory_space<any>>) target(%522 : memref<1x1024xf32, #tpu.memory_space<vmem>>) target_semaphore(%524 : memref<!tpu.dma_semaphore, #tpu.memory_space<semaphore_mem>>)
      %c0_i32_419 = arith.constant 0 : i32
      %c0_i32_420 = arith.constant 0 : i32
      %c25_i32_421 = arith.constant 25 : i32
      %c0_i32_422 = arith.constant 0 : i32
      %525 = tpu.memref_slice %arg2[%361, %c0_i32_422] : memref<16x1024xf32, #tpu.memory_space<any>> -> memref<1x1024xf32, #tpu.memory_space<any>>
      %c25_i32_423 = arith.constant 25 : i32
      %c0_i32_424 = arith.constant 0 : i32
      %526 = tpu.memref_slice %arg5[%c0_i32_419, %c25_i32_423, %c0_i32_424] : memref<2x64x1024xf32, #tpu.memory_space<vmem>> -> memref<1x1x1024xf32, #tpu.memory_space<vmem>>
      %527 = tpu.memref_squeeze %526 : memref<1x1x1024xf32, #tpu.memory_space<vmem>> -> memref<1x1024xf32, #tpu.memory_space<vmem>>
      %528 = tpu.memref_slice %arg6[%c0_i32_420, %c25_i32_421] : memref<2x64x!tpu.dma_semaphore, #tpu.memory_space<semaphore_mem>> -> memref<1x1x!tpu.dma_semaphore, #tpu.memory_space<semaphore_mem>>
      %529 = tpu.memref_squeeze %528 : memref<1x1x!tpu.dma_semaphore, #tpu.memory_space<semaphore_mem>> -> memref<!tpu.dma_semaphore, #tpu.memory_space<semaphore_mem>>
      tpu.enqueue_dma source(%525 : memref<1x1024xf32, #tpu.memory_space<any>>) target(%527 : memref<1x1024xf32, #tpu.memory_space<vmem>>) target_semaphore(%529 : memref<!tpu.dma_semaphore, #tpu.memory_space<semaphore_mem>>)
      %c0_i32_425 = arith.constant 0 : i32
      %c0_i32_426 = arith.constant 0 : i32
      %c26_i32_427 = arith.constant 26 : i32
      %c0_i32_428 = arith.constant 0 : i32
      %530 = tpu.memref_slice %arg2[%362, %c0_i32_428] : memref<16x1024xf32, #tpu.memory_space<any>> -> memref<1x1024xf32, #tpu.memory_space<any>>
      %c26_i32_429 = arith.constant 26 : i32
      %c0_i32_430 = arith.constant 0 : i32
      %531 = tpu.memref_slice %arg5[%c0_i32_425, %c26_i32_429, %c0_i32_430] : memref<2x64x1024xf32, #tpu.memory_space<vmem>> -> memref<1x1x1024xf32, #tpu.memory_space<vmem>>
      %532 = tpu.memref_squeeze %531 : memref<1x1x1024xf32, #tpu.memory_space<vmem>> -> memref<1x1024xf32, #tpu.memory_space<vmem>>
      %533 = tpu.memref_slice %arg6[%c0_i32_426, %c26_i32_427] : memref<2x64x!tpu.dma_semaphore, #tpu.memory_space<semaphore_mem>> -> memref<1x1x!tpu.dma_semaphore, #tpu.memory_space<semaphore_mem>>
      %534 = tpu.memref_squeeze %533 : memref<1x1x!tpu.dma_semaphore, #tpu.memory_space<semaphore_mem>> -> memref<!tpu.dma_semaphore, #tpu.memory_space<semaphore_mem>>
      tpu.enqueue_dma source(%530 : memref<1x1024xf32, #tpu.memory_space<any>>) target(%532 : memref<1x1024xf32, #tpu.memory_space<vmem>>) target_semaphore(%534 : memref<!tpu.dma_semaphore, #tpu.memory_space<semaphore_mem>>)
      %c0_i32_431 = arith.constant 0 : i32
      %c0_i32_432 = arith.constant 0 : i32
      %c27_i32_433 = arith.constant 27 : i32
      %c0_i32_434 = arith.constant 0 : i32
      %535 = tpu.memref_slice %arg2[%363, %c0_i32_434] : memref<16x1024xf32, #tpu.memory_space<any>> -> memref<1x1024xf32, #tpu.memory_space<any>>
      %c27_i32_435 = arith.constant 27 : i32
      %c0_i32_436 = arith.constant 0 : i32
      %536 = tpu.memref_slice %arg5[%c0_i32_431, %c27_i32_435, %c0_i32_436] : memref<2x64x1024xf32, #tpu.memory_space<vmem>> -> memref<1x1x1024xf32, #tpu.memory_space<vmem>>
      %537 = tpu.memref_squeeze %536 : memref<1x1x1024xf32, #tpu.memory_space<vmem>> -> memref<1x1024xf32, #tpu.memory_space<vmem>>
      %538 = tpu.memref_slice %arg6[%c0_i32_432, %c27_i32_433] : memref<2x64x!tpu.dma_semaphore, #tpu.memory_space<semaphore_mem>> -> memref<1x1x!tpu.dma_semaphore, #tpu.memory_space<semaphore_mem>>
      %539 = tpu.memref_squeeze %538 : memref<1x1x!tpu.dma_semaphore, #tpu.memory_space<semaphore_mem>> -> memref<!tpu.dma_semaphore, #tpu.memory_space<semaphore_mem>>
      tpu.enqueue_dma source(%535 : memref<1x1024xf32, #tpu.memory_space<any>>) target(%537 : memref<1x1024xf32, #tpu.memory_space<vmem>>) target_semaphore(%539 : memref<!tpu.dma_semaphore, #tpu.memory_space<semaphore_mem>>)
      %c0_i32_437 = arith.constant 0 : i32
      %c0_i32_438 = arith.constant 0 : i32
      %c28_i32_439 = arith.constant 28 : i32
      %c0_i32_440 = arith.constant 0 : i32
      %540 = tpu.memref_slice %arg2[%364, %c0_i32_440] : memref<16x1024xf32, #tpu.memory_space<any>> -> memref<1x1024xf32, #tpu.memory_space<any>>
      %c28_i32_441 = arith.constant 28 : i32
      %c0_i32_442 = arith.constant 0 : i32
      %541 = tpu.memref_slice %arg5[%c0_i32_437, %c28_i32_441, %c0_i32_442] : memref<2x64x1024xf32, #tpu.memory_space<vmem>> -> memref<1x1x1024xf32, #tpu.memory_space<vmem>>
      %542 = tpu.memref_squeeze %541 : memref<1x1x1024xf32, #tpu.memory_space<vmem>> -> memref<1x1024xf32, #tpu.memory_space<vmem>>
      %543 = tpu.memref_slice %arg6[%c0_i32_438, %c28_i32_439] : memref<2x64x!tpu.dma_semaphore, #tpu.memory_space<semaphore_mem>> -> memref<1x1x!tpu.dma_semaphore, #tpu.memory_space<semaphore_mem>>
      %544 = tpu.memref_squeeze %543 : memref<1x1x!tpu.dma_semaphore, #tpu.memory_space<semaphore_mem>> -> memref<!tpu.dma_semaphore, #tpu.memory_space<semaphore_mem>>
      tpu.enqueue_dma source(%540 : memref<1x1024xf32, #tpu.memory_space<any>>) target(%542 : memref<1x1024xf32, #tpu.memory_space<vmem>>) target_semaphore(%544 : memref<!tpu.dma_semaphore, #tpu.memory_space<semaphore_mem>>)
      %c0_i32_443 = arith.constant 0 : i32
      %c0_i32_444 = arith.constant 0 : i32
      %c29_i32_445 = arith.constant 29 : i32
      %c0_i32_446 = arith.constant 0 : i32
      %545 = tpu.memref_slice %arg2[%365, %c0_i32_446] : memref<16x1024xf32, #tpu.memory_space<any>> -> memref<1x1024xf32, #tpu.memory_space<any>>
      %c29_i32_447 = arith.constant 29 : i32
      %c0_i32_448 = arith.constant 0 : i32
      %546 = tpu.memref_slice %arg5[%c0_i32_443, %c29_i32_447, %c0_i32_448] : memref<2x64x1024xf32, #tpu.memory_space<vmem>> -> memref<1x1x1024xf32, #tpu.memory_space<vmem>>
      %547 = tpu.memref_squeeze %546 : memref<1x1x1024xf32, #tpu.memory_space<vmem>> -> memref<1x1024xf32, #tpu.memory_space<vmem>>
      %548 = tpu.memref_slice %arg6[%c0_i32_444, %c29_i32_445] : memref<2x64x!tpu.dma_semaphore, #tpu.memory_space<semaphore_mem>> -> memref<1x1x!tpu.dma_semaphore, #tpu.memory_space<semaphore_mem>>
      %549 = tpu.memref_squeeze %548 : memref<1x1x!tpu.dma_semaphore, #tpu.memory_space<semaphore_mem>> -> memref<!tpu.dma_semaphore, #tpu.memory_space<semaphore_mem>>
      tpu.enqueue_dma source(%545 : memref<1x1024xf32, #tpu.memory_space<any>>) target(%547 : memref<1x1024xf32, #tpu.memory_space<vmem>>) target_semaphore(%549 : memref<!tpu.dma_semaphore, #tpu.memory_space<semaphore_mem>>)
      %c0_i32_449 = arith.constant 0 : i32
      %c0_i32_450 = arith.constant 0 : i32
      %c30_i32_451 = arith.constant 30 : i32
      %c0_i32_452 = arith.constant 0 : i32
      %550 = tpu.memref_slice %arg2[%366, %c0_i32_452] : memref<16x1024xf32, #tpu.memory_space<any>> -> memref<1x1024xf32, #tpu.memory_space<any>>
      %c30_i32_453 = arith.constant 30 : i32
      %c0_i32_454 = arith.constant 0 : i32
      %551 = tpu.memref_slice %arg5[%c0_i32_449, %c30_i32_453, %c0_i32_454] : memref<2x64x1024xf32, #tpu.memory_space<vmem>> -> memref<1x1x1024xf32, #tpu.memory_space<vmem>>
      %552 = tpu.memref_squeeze %551 : memref<1x1x1024xf32, #tpu.memory_space<vmem>> -> memref<1x1024xf32, #tpu.memory_space<vmem>>
      %553 = tpu.memref_slice %arg6[%c0_i32_450, %c30_i32_451] : memref<2x64x!tpu.dma_semaphore, #tpu.memory_space<semaphore_mem>> -> memref<1x1x!tpu.dma_semaphore, #tpu.memory_space<semaphore_mem>>
      %554 = tpu.memref_squeeze %553 : memref<1x1x!tpu.dma_semaphore, #tpu.memory_space<semaphore_mem>> -> memref<!tpu.dma_semaphore, #tpu.memory_space<semaphore_mem>>
      tpu.enqueue_dma source(%550 : memref<1x1024xf32, #tpu.memory_space<any>>) target(%552 : memref<1x1024xf32, #tpu.memory_space<vmem>>) target_semaphore(%554 : memref<!tpu.dma_semaphore, #tpu.memory_space<semaphore_mem>>)
      %c0_i32_455 = arith.constant 0 : i32
      %c0_i32_456 = arith.constant 0 : i32
      %c31_i32_457 = arith.constant 31 : i32
      %c0_i32_458 = arith.constant 0 : i32
      %555 = tpu.memref_slice %arg2[%367, %c0_i32_458] : memref<16x1024xf32, #tpu.memory_space<any>> -> memref<1x1024xf32, #tpu.memory_space<any>>
      %c31_i32_459 = arith.constant 31 : i32
      %c0_i32_460 = arith.constant 0 : i32
      %556 = tpu.memref_slice %arg5[%c0_i32_455, %c31_i32_459, %c0_i32_460] : memref<2x64x1024xf32, #tpu.memory_space<vmem>> -> memref<1x1x1024xf32, #tpu.memory_space<vmem>>
      %557 = tpu.memref_squeeze %556 : memref<1x1x1024xf32, #tpu.memory_space<vmem>> -> memref<1x1024xf32, #tpu.memory_space<vmem>>
      %558 = tpu.memref_slice %arg6[%c0_i32_456, %c31_i32_457] : memref<2x64x!tpu.dma_semaphore, #tpu.memory_space<semaphore_mem>> -> memref<1x1x!tpu.dma_semaphore, #tpu.memory_space<semaphore_mem>>
      %559 = tpu.memref_squeeze %558 : memref<1x1x!tpu.dma_semaphore, #tpu.memory_space<semaphore_mem>> -> memref<!tpu.dma_semaphore, #tpu.memory_space<semaphore_mem>>
      tpu.enqueue_dma source(%555 : memref<1x1024xf32, #tpu.memory_space<any>>) target(%557 : memref<1x1024xf32, #tpu.memory_space<vmem>>) target_semaphore(%559 : memref<!tpu.dma_semaphore, #tpu.memory_space<semaphore_mem>>)
      %c0_i32_461 = arith.constant 0 : i32
      %c0_i32_462 = arith.constant 0 : i32
      %c32_i32_463 = arith.constant 32 : i32
      %c0_i32_464 = arith.constant 0 : i32
      %560 = tpu.memref_slice %arg2[%368, %c0_i32_464] : memref<16x1024xf32, #tpu.memory_space<any>> -> memref<1x1024xf32, #tpu.memory_space<any>>
      %c32_i32_465 = arith.constant 32 : i32
      %c0_i32_466 = arith.constant 0 : i32
      %561 = tpu.memref_slice %arg5[%c0_i32_461, %c32_i32_465, %c0_i32_466] : memref<2x64x1024xf32, #tpu.memory_space<vmem>> -> memref<1x1x1024xf32, #tpu.memory_space<vmem>>
      %562 = tpu.memref_squeeze %561 : memref<1x1x1024xf32, #tpu.memory_space<vmem>> -> memref<1x1024xf32, #tpu.memory_space<vmem>>
      %563 = tpu.memref_slice %arg6[%c0_i32_462, %c32_i32_463] : memref<2x64x!tpu.dma_semaphore, #tpu.memory_space<semaphore_mem>> -> memref<1x1x!tpu.dma_semaphore, #tpu.memory_space<semaphore_mem>>
      %564 = tpu.memref_squeeze %563 : memref<1x1x!tpu.dma_semaphore, #tpu.memory_space<semaphore_mem>> -> memref<!tpu.dma_semaphore, #tpu.memory_space<semaphore_mem>>
      tpu.enqueue_dma source(%560 : memref<1x1024xf32, #tpu.memory_space<any>>) target(%562 : memref<1x1024xf32, #tpu.memory_space<vmem>>) target_semaphore(%564 : memref<!tpu.dma_semaphore, #tpu.memory_space<semaphore_mem>>)
      %c0_i32_467 = arith.constant 0 : i32
      %c0_i32_468 = arith.constant 0 : i32
      %c33_i32_469 = arith.constant 33 : i32
      %c0_i32_470 = arith.constant 0 : i32
      %565 = tpu.memref_slice %arg2[%369, %c0_i32_470] : memref<16x1024xf32, #tpu.memory_space<any>> -> memref<1x1024xf32, #tpu.memory_space<any>>
      %c33_i32_471 = arith.constant 33 : i32
      %c0_i32_472 = arith.constant 0 : i32
      %566 = tpu.memref_slice %arg5[%c0_i32_467, %c33_i32_471, %c0_i32_472] : memref<2x64x1024xf32, #tpu.memory_space<vmem>> -> memref<1x1x1024xf32, #tpu.memory_space<vmem>>
      %567 = tpu.memref_squeeze %566 : memref<1x1x1024xf32, #tpu.memory_space<vmem>> -> memref<1x1024xf32, #tpu.memory_space<vmem>>
      %568 = tpu.memref_slice %arg6[%c0_i32_468, %c33_i32_469] : memref<2x64x!tpu.dma_semaphore, #tpu.memory_space<semaphore_mem>> -> memref<1x1x!tpu.dma_semaphore, #tpu.memory_space<semaphore_mem>>
      %569 = tpu.memref_squeeze %568 : memref<1x1x!tpu.dma_semaphore, #tpu.memory_space<semaphore_mem>> -> memref<!tpu.dma_semaphore, #tpu.memory_space<semaphore_mem>>
      tpu.enqueue_dma source(%565 : memref<1x1024xf32, #tpu.memory_space<any>>) target(%567 : memref<1x1024xf32, #tpu.memory_space<vmem>>) target_semaphore(%569 : memref<!tpu.dma_semaphore, #tpu.memory_space<semaphore_mem>>)
      %c0_i32_473 = arith.constant 0 : i32
      %c0_i32_474 = arith.constant 0 : i32
      %c34_i32_475 = arith.constant 34 : i32
      %c0_i32_476 = arith.constant 0 : i32
      %570 = tpu.memref_slice %arg2[%370, %c0_i32_476] : memref<16x1024xf32, #tpu.memory_space<any>> -> memref<1x1024xf32, #tpu.memory_space<any>>
      %c34_i32_477 = arith.constant 34 : i32
      %c0_i32_478 = arith.constant 0 : i32
      %571 = tpu.memref_slice %arg5[%c0_i32_473, %c34_i32_477, %c0_i32_478] : memref<2x64x1024xf32, #tpu.memory_space<vmem>> -> memref<1x1x1024xf32, #tpu.memory_space<vmem>>
      %572 = tpu.memref_squeeze %571 : memref<1x1x1024xf32, #tpu.memory_space<vmem>> -> memref<1x1024xf32, #tpu.memory_space<vmem>>
      %573 = tpu.memref_slice %arg6[%c0_i32_474, %c34_i32_475] : memref<2x64x!tpu.dma_semaphore, #tpu.memory_space<semaphore_mem>> -> memref<1x1x!tpu.dma_semaphore, #tpu.memory_space<semaphore_mem>>
      %574 = tpu.memref_squeeze %573 : memref<1x1x!tpu.dma_semaphore, #tpu.memory_space<semaphore_mem>> -> memref<!tpu.dma_semaphore, #tpu.memory_space<semaphore_mem>>
      tpu.enqueue_dma source(%570 : memref<1x1024xf32, #tpu.memory_space<any>>) target(%572 : memref<1x1024xf32, #tpu.memory_space<vmem>>) target_semaphore(%574 : memref<!tpu.dma_semaphore, #tpu.memory_space<semaphore_mem>>)
      %c0_i32_479 = arith.constant 0 : i32
      %c0_i32_480 = arith.constant 0 : i32
      %c35_i32_481 = arith.constant 35 : i32
      %c0_i32_482 = arith.constant 0 : i32
      %575 = tpu.memref_slice %arg2[%371, %c0_i32_482] : memref<16x1024xf32, #tpu.memory_space<any>> -> memref<1x1024xf32, #tpu.memory_space<any>>
      %c35_i32_483 = arith.constant 35 : i32
      %c0_i32_484 = arith.constant 0 : i32
      %576 = tpu.memref_slice %arg5[%c0_i32_479, %c35_i32_483, %c0_i32_484] : memref<2x64x1024xf32, #tpu.memory_space<vmem>> -> memref<1x1x1024xf32, #tpu.memory_space<vmem>>
      %577 = tpu.memref_squeeze %576 : memref<1x1x1024xf32, #tpu.memory_space<vmem>> -> memref<1x1024xf32, #tpu.memory_space<vmem>>
      %578 = tpu.memref_slice %arg6[%c0_i32_480, %c35_i32_481] : memref<2x64x!tpu.dma_semaphore, #tpu.memory_space<semaphore_mem>> -> memref<1x1x!tpu.dma_semaphore, #tpu.memory_space<semaphore_mem>>
      %579 = tpu.memref_squeeze %578 : memref<1x1x!tpu.dma_semaphore, #tpu.memory_space<semaphore_mem>> -> memref<!tpu.dma_semaphore, #tpu.memory_space<semaphore_mem>>
      tpu.enqueue_dma source(%575 : memref<1x1024xf32, #tpu.memory_space<any>>) target(%577 : memref<1x1024xf32, #tpu.memory_space<vmem>>) target_semaphore(%579 : memref<!tpu.dma_semaphore, #tpu.memory_space<semaphore_mem>>)
      %c0_i32_485 = arith.constant 0 : i32
      %c0_i32_486 = arith.constant 0 : i32
      %c36_i32_487 = arith.constant 36 : i32
      %c0_i32_488 = arith.constant 0 : i32
      %580 = tpu.memref_slice %arg2[%372, %c0_i32_488] : memref<16x1024xf32, #tpu.memory_space<any>> -> memref<1x1024xf32, #tpu.memory_space<any>>
      %c36_i32_489 = arith.constant 36 : i32
      %c0_i32_490 = arith.constant 0 : i32
      %581 = tpu.memref_slice %arg5[%c0_i32_485, %c36_i32_489, %c0_i32_490] : memref<2x64x1024xf32, #tpu.memory_space<vmem>> -> memref<1x1x1024xf32, #tpu.memory_space<vmem>>
      %582 = tpu.memref_squeeze %581 : memref<1x1x1024xf32, #tpu.memory_space<vmem>> -> memref<1x1024xf32, #tpu.memory_space<vmem>>
      %583 = tpu.memref_slice %arg6[%c0_i32_486, %c36_i32_487] : memref<2x64x!tpu.dma_semaphore, #tpu.memory_space<semaphore_mem>> -> memref<1x1x!tpu.dma_semaphore, #tpu.memory_space<semaphore_mem>>
      %584 = tpu.memref_squeeze %583 : memref<1x1x!tpu.dma_semaphore, #tpu.memory_space<semaphore_mem>> -> memref<!tpu.dma_semaphore, #tpu.memory_space<semaphore_mem>>
      tpu.enqueue_dma source(%580 : memref<1x1024xf32, #tpu.memory_space<any>>) target(%582 : memref<1x1024xf32, #tpu.memory_space<vmem>>) target_semaphore(%584 : memref<!tpu.dma_semaphore, #tpu.memory_space<semaphore_mem>>)
      %c0_i32_491 = arith.constant 0 : i32
      %c0_i32_492 = arith.constant 0 : i32
      %c37_i32_493 = arith.constant 37 : i32
      %c0_i32_494 = arith.constant 0 : i32
      %585 = tpu.memref_slice %arg2[%373, %c0_i32_494] : memref<16x1024xf32, #tpu.memory_space<any>> -> memref<1x1024xf32, #tpu.memory_space<any>>
      %c37_i32_495 = arith.constant 37 : i32
      %c0_i32_496 = arith.constant 0 : i32
      %586 = tpu.memref_slice %arg5[%c0_i32_491, %c37_i32_495, %c0_i32_496] : memref<2x64x1024xf32, #tpu.memory_space<vmem>> -> memref<1x1x1024xf32, #tpu.memory_space<vmem>>
      %587 = tpu.memref_squeeze %586 : memref<1x1x1024xf32, #tpu.memory_space<vmem>> -> memref<1x1024xf32, #tpu.memory_space<vmem>>
      %588 = tpu.memref_slice %arg6[%c0_i32_492, %c37_i32_493] : memref<2x64x!tpu.dma_semaphore, #tpu.memory_space<semaphore_mem>> -> memref<1x1x!tpu.dma_semaphore, #tpu.memory_space<semaphore_mem>>
      %589 = tpu.memref_squeeze %588 : memref<1x1x!tpu.dma_semaphore, #tpu.memory_space<semaphore_mem>> -> memref<!tpu.dma_semaphore, #tpu.memory_space<semaphore_mem>>
      tpu.enqueue_dma source(%585 : memref<1x1024xf32, #tpu.memory_space<any>>) target(%587 : memref<1x1024xf32, #tpu.memory_space<vmem>>) target_semaphore(%589 : memref<!tpu.dma_semaphore, #tpu.memory_space<semaphore_mem>>)
      %c0_i32_497 = arith.constant 0 : i32
      %c0_i32_498 = arith.constant 0 : i32
      %c38_i32_499 = arith.constant 38 : i32
      %c0_i32_500 = arith.constant 0 : i32
      %590 = tpu.memref_slice %arg2[%374, %c0_i32_500] : memref<16x1024xf32, #tpu.memory_space<any>> -> memref<1x1024xf32, #tpu.memory_space<any>>
      %c38_i32_501 = arith.constant 38 : i32
      %c0_i32_502 = arith.constant 0 : i32
      %591 = tpu.memref_slice %arg5[%c0_i32_497, %c38_i32_501, %c0_i32_502] : memref<2x64x1024xf32, #tpu.memory_space<vmem>> -> memref<1x1x1024xf32, #tpu.memory_space<vmem>>
      %592 = tpu.memref_squeeze %591 : memref<1x1x1024xf32, #tpu.memory_space<vmem>> -> memref<1x1024xf32, #tpu.memory_space<vmem>>
      %593 = tpu.memref_slice %arg6[%c0_i32_498, %c38_i32_499] : memref<2x64x!tpu.dma_semaphore, #tpu.memory_space<semaphore_mem>> -> memref<1x1x!tpu.dma_semaphore, #tpu.memory_space<semaphore_mem>>
      %594 = tpu.memref_squeeze %593 : memref<1x1x!tpu.dma_semaphore, #tpu.memory_space<semaphore_mem>> -> memref<!tpu.dma_semaphore, #tpu.memory_space<semaphore_mem>>
      tpu.enqueue_dma source(%590 : memref<1x1024xf32, #tpu.memory_space<any>>) target(%592 : memref<1x1024xf32, #tpu.memory_space<vmem>>) target_semaphore(%594 : memref<!tpu.dma_semaphore, #tpu.memory_space<semaphore_mem>>)
      %c0_i32_503 = arith.constant 0 : i32
      %c0_i32_504 = arith.constant 0 : i32
      %c39_i32_505 = arith.constant 39 : i32
      %c0_i32_506 = arith.constant 0 : i32
      %595 = tpu.memref_slice %arg2[%375, %c0_i32_506] : memref<16x1024xf32, #tpu.memory_space<any>> -> memref<1x1024xf32, #tpu.memory_space<any>>
      %c39_i32_507 = arith.constant 39 : i32
      %c0_i32_508 = arith.constant 0 : i32
      %596 = tpu.memref_slice %arg5[%c0_i32_503, %c39_i32_507, %c0_i32_508] : memref<2x64x1024xf32, #tpu.memory_space<vmem>> -> memref<1x1x1024xf32, #tpu.memory_space<vmem>>
      %597 = tpu.memref_squeeze %596 : memref<1x1x1024xf32, #tpu.memory_space<vmem>> -> memref<1x1024xf32, #tpu.memory_space<vmem>>
      %598 = tpu.memref_slice %arg6[%c0_i32_504, %c39_i32_505] : memref<2x64x!tpu.dma_semaphore, #tpu.memory_space<semaphore_mem>> -> memref<1x1x!tpu.dma_semaphore, #tpu.memory_space<semaphore_mem>>
      %599 = tpu.memref_squeeze %598 : memref<1x1x!tpu.dma_semaphore, #tpu.memory_space<semaphore_mem>> -> memref<!tpu.dma_semaphore, #tpu.memory_space<semaphore_mem>>
      tpu.enqueue_dma source(%595 : memref<1x1024xf32, #tpu.memory_space<any>>) target(%597 : memref<1x1024xf32, #tpu.memory_space<vmem>>) target_semaphore(%599 : memref<!tpu.dma_semaphore, #tpu.memory_space<semaphore_mem>>)
      %c0_i32_509 = arith.constant 0 : i32
      %c0_i32_510 = arith.constant 0 : i32
      %c40_i32_511 = arith.constant 40 : i32
      %c0_i32_512 = arith.constant 0 : i32
      %600 = tpu.memref_slice %arg2[%376, %c0_i32_512] : memref<16x1024xf32, #tpu.memory_space<any>> -> memref<1x1024xf32, #tpu.memory_space<any>>
      %c40_i32_513 = arith.constant 40 : i32
      %c0_i32_514 = arith.constant 0 : i32
      %601 = tpu.memref_slice %arg5[%c0_i32_509, %c40_i32_513, %c0_i32_514] : memref<2x64x1024xf32, #tpu.memory_space<vmem>> -> memref<1x1x1024xf32, #tpu.memory_space<vmem>>
      %602 = tpu.memref_squeeze %601 : memref<1x1x1024xf32, #tpu.memory_space<vmem>> -> memref<1x1024xf32, #tpu.memory_space<vmem>>
      %603 = tpu.memref_slice %arg6[%c0_i32_510, %c40_i32_511] : memref<2x64x!tpu.dma_semaphore, #tpu.memory_space<semaphore_mem>> -> memref<1x1x!tpu.dma_semaphore, #tpu.memory_space<semaphore_mem>>
      %604 = tpu.memref_squeeze %603 : memref<1x1x!tpu.dma_semaphore, #tpu.memory_space<semaphore_mem>> -> memref<!tpu.dma_semaphore, #tpu.memory_space<semaphore_mem>>
      tpu.enqueue_dma source(%600 : memref<1x1024xf32, #tpu.memory_space<any>>) target(%602 : memref<1x1024xf32, #tpu.memory_space<vmem>>) target_semaphore(%604 : memref<!tpu.dma_semaphore, #tpu.memory_space<semaphore_mem>>)
      %c0_i32_515 = arith.constant 0 : i32
      %c0_i32_516 = arith.constant 0 : i32
      %c41_i32_517 = arith.constant 41 : i32
      %c0_i32_518 = arith.constant 0 : i32
      %605 = tpu.memref_slice %arg2[%377, %c0_i32_518] : memref<16x1024xf32, #tpu.memory_space<any>> -> memref<1x1024xf32, #tpu.memory_space<any>>
      %c41_i32_519 = arith.constant 41 : i32
      %c0_i32_520 = arith.constant 0 : i32
      %606 = tpu.memref_slice %arg5[%c0_i32_515, %c41_i32_519, %c0_i32_520] : memref<2x64x1024xf32, #tpu.memory_space<vmem>> -> memref<1x1x1024xf32, #tpu.memory_space<vmem>>
      %607 = tpu.memref_squeeze %606 : memref<1x1x1024xf32, #tpu.memory_space<vmem>> -> memref<1x1024xf32, #tpu.memory_space<vmem>>
      %608 = tpu.memref_slice %arg6[%c0_i32_516, %c41_i32_517] : memref<2x64x!tpu.dma_semaphore, #tpu.memory_space<semaphore_mem>> -> memref<1x1x!tpu.dma_semaphore, #tpu.memory_space<semaphore_mem>>
      %609 = tpu.memref_squeeze %608 : memref<1x1x!tpu.dma_semaphore, #tpu.memory_space<semaphore_mem>> -> memref<!tpu.dma_semaphore, #tpu.memory_space<semaphore_mem>>
      tpu.enqueue_dma source(%605 : memref<1x1024xf32, #tpu.memory_space<any>>) target(%607 : memref<1x1024xf32, #tpu.memory_space<vmem>>) target_semaphore(%609 : memref<!tpu.dma_semaphore, #tpu.memory_space<semaphore_mem>>)
      %c0_i32_521 = arith.constant 0 : i32
      %c0_i32_522 = arith.constant 0 : i32
      %c42_i32_523 = arith.constant 42 : i32
      %c0_i32_524 = arith.constant 0 : i32
      %610 = tpu.memref_slice %arg2[%378, %c0_i32_524] : memref<16x1024xf32, #tpu.memory_space<any>> -> memref<1x1024xf32, #tpu.memory_space<any>>
      %c42_i32_525 = arith.constant 42 : i32
      %c0_i32_526 = arith.constant 0 : i32
      %611 = tpu.memref_slice %arg5[%c0_i32_521, %c42_i32_525, %c0_i32_526] : memref<2x64x1024xf32, #tpu.memory_space<vmem>> -> memref<1x1x1024xf32, #tpu.memory_space<vmem>>
      %612 = tpu.memref_squeeze %611 : memref<1x1x1024xf32, #tpu.memory_space<vmem>> -> memref<1x1024xf32, #tpu.memory_space<vmem>>
      %613 = tpu.memref_slice %arg6[%c0_i32_522, %c42_i32_523] : memref<2x64x!tpu.dma_semaphore, #tpu.memory_space<semaphore_mem>> -> memref<1x1x!tpu.dma_semaphore, #tpu.memory_space<semaphore_mem>>
      %614 = tpu.memref_squeeze %613 : memref<1x1x!tpu.dma_semaphore, #tpu.memory_space<semaphore_mem>> -> memref<!tpu.dma_semaphore, #tpu.memory_space<semaphore_mem>>
      tpu.enqueue_dma source(%610 : memref<1x1024xf32, #tpu.memory_space<any>>) target(%612 : memref<1x1024xf32, #tpu.memory_space<vmem>>) target_semaphore(%614 : memref<!tpu.dma_semaphore, #tpu.memory_space<semaphore_mem>>)
      %c0_i32_527 = arith.constant 0 : i32
      %c0_i32_528 = arith.constant 0 : i32
      %c43_i32_529 = arith.constant 43 : i32
      %c0_i32_530 = arith.constant 0 : i32
      %615 = tpu.memref_slice %arg2[%379, %c0_i32_530] : memref<16x1024xf32, #tpu.memory_space<any>> -> memref<1x1024xf32, #tpu.memory_space<any>>
      %c43_i32_531 = arith.constant 43 : i32
      %c0_i32_532 = arith.constant 0 : i32
      %616 = tpu.memref_slice %arg5[%c0_i32_527, %c43_i32_531, %c0_i32_532] : memref<2x64x1024xf32, #tpu.memory_space<vmem>> -> memref<1x1x1024xf32, #tpu.memory_space<vmem>>
      %617 = tpu.memref_squeeze %616 : memref<1x1x1024xf32, #tpu.memory_space<vmem>> -> memref<1x1024xf32, #tpu.memory_space<vmem>>
      %618 = tpu.memref_slice %arg6[%c0_i32_528, %c43_i32_529] : memref<2x64x!tpu.dma_semaphore, #tpu.memory_space<semaphore_mem>> -> memref<1x1x!tpu.dma_semaphore, #tpu.memory_space<semaphore_mem>>
      %619 = tpu.memref_squeeze %618 : memref<1x1x!tpu.dma_semaphore, #tpu.memory_space<semaphore_mem>> -> memref<!tpu.dma_semaphore, #tpu.memory_space<semaphore_mem>>
      tpu.enqueue_dma source(%615 : memref<1x1024xf32, #tpu.memory_space<any>>) target(%617 : memref<1x1024xf32, #tpu.memory_space<vmem>>) target_semaphore(%619 : memref<!tpu.dma_semaphore, #tpu.memory_space<semaphore_mem>>)
      %c0_i32_533 = arith.constant 0 : i32
      %c0_i32_534 = arith.constant 0 : i32
      %c44_i32_535 = arith.constant 44 : i32
      %c0_i32_536 = arith.constant 0 : i32
      %620 = tpu.memref_slice %arg2[%380, %c0_i32_536] : memref<16x1024xf32, #tpu.memory_space<any>> -> memref<1x1024xf32, #tpu.memory_space<any>>
      %c44_i32_537 = arith.constant 44 : i32
      %c0_i32_538 = arith.constant 0 : i32
      %621 = tpu.memref_slice %arg5[%c0_i32_533, %c44_i32_537, %c0_i32_538] : memref<2x64x1024xf32, #tpu.memory_space<vmem>> -> memref<1x1x1024xf32, #tpu.memory_space<vmem>>
      %622 = tpu.memref_squeeze %621 : memref<1x1x1024xf32, #tpu.memory_space<vmem>> -> memref<1x1024xf32, #tpu.memory_space<vmem>>
      %623 = tpu.memref_slice %arg6[%c0_i32_534, %c44_i32_535] : memref<2x64x!tpu.dma_semaphore, #tpu.memory_space<semaphore_mem>> -> memref<1x1x!tpu.dma_semaphore, #tpu.memory_space<semaphore_mem>>
      %624 = tpu.memref_squeeze %623 : memref<1x1x!tpu.dma_semaphore, #tpu.memory_space<semaphore_mem>> -> memref<!tpu.dma_semaphore, #tpu.memory_space<semaphore_mem>>
      tpu.enqueue_dma source(%620 : memref<1x1024xf32, #tpu.memory_space<any>>) target(%622 : memref<1x1024xf32, #tpu.memory_space<vmem>>) target_semaphore(%624 : memref<!tpu.dma_semaphore, #tpu.memory_space<semaphore_mem>>)
      %c0_i32_539 = arith.constant 0 : i32
      %c0_i32_540 = arith.constant 0 : i32
      %c45_i32_541 = arith.constant 45 : i32
      %c0_i32_542 = arith.constant 0 : i32
      %625 = tpu.memref_slice %arg2[%381, %c0_i32_542] : memref<16x1024xf32, #tpu.memory_space<any>> -> memref<1x1024xf32, #tpu.memory_space<any>>
      %c45_i32_543 = arith.constant 45 : i32
      %c0_i32_544 = arith.constant 0 : i32
      %626 = tpu.memref_slice %arg5[%c0_i32_539, %c45_i32_543, %c0_i32_544] : memref<2x64x1024xf32, #tpu.memory_space<vmem>> -> memref<1x1x1024xf32, #tpu.memory_space<vmem>>
      %627 = tpu.memref_squeeze %626 : memref<1x1x1024xf32, #tpu.memory_space<vmem>> -> memref<1x1024xf32, #tpu.memory_space<vmem>>
      %628 = tpu.memref_slice %arg6[%c0_i32_540, %c45_i32_541] : memref<2x64x!tpu.dma_semaphore, #tpu.memory_space<semaphore_mem>> -> memref<1x1x!tpu.dma_semaphore, #tpu.memory_space<semaphore_mem>>
      %629 = tpu.memref_squeeze %628 : memref<1x1x!tpu.dma_semaphore, #tpu.memory_space<semaphore_mem>> -> memref<!tpu.dma_semaphore, #tpu.memory_space<semaphore_mem>>
      tpu.enqueue_dma source(%625 : memref<1x1024xf32, #tpu.memory_space<any>>) target(%627 : memref<1x1024xf32, #tpu.memory_space<vmem>>) target_semaphore(%629 : memref<!tpu.dma_semaphore, #tpu.memory_space<semaphore_mem>>)
      %c0_i32_545 = arith.constant 0 : i32
      %c0_i32_546 = arith.constant 0 : i32
      %c46_i32_547 = arith.constant 46 : i32
      %c0_i32_548 = arith.constant 0 : i32
      %630 = tpu.memref_slice %arg2[%382, %c0_i32_548] : memref<16x1024xf32, #tpu.memory_space<any>> -> memref<1x1024xf32, #tpu.memory_space<any>>
      %c46_i32_549 = arith.constant 46 : i32
      %c0_i32_550 = arith.constant 0 : i32
      %631 = tpu.memref_slice %arg5[%c0_i32_545, %c46_i32_549, %c0_i32_550] : memref<2x64x1024xf32, #tpu.memory_space<vmem>> -> memref<1x1x1024xf32, #tpu.memory_space<vmem>>
      %632 = tpu.memref_squeeze %631 : memref<1x1x1024xf32, #tpu.memory_space<vmem>> -> memref<1x1024xf32, #tpu.memory_space<vmem>>
      %633 = tpu.memref_slice %arg6[%c0_i32_546, %c46_i32_547] : memref<2x64x!tpu.dma_semaphore, #tpu.memory_space<semaphore_mem>> -> memref<1x1x!tpu.dma_semaphore, #tpu.memory_space<semaphore_mem>>
      %634 = tpu.memref_squeeze %633 : memref<1x1x!tpu.dma_semaphore, #tpu.memory_space<semaphore_mem>> -> memref<!tpu.dma_semaphore, #tpu.memory_space<semaphore_mem>>
      tpu.enqueue_dma source(%630 : memref<1x1024xf32, #tpu.memory_space<any>>) target(%632 : memref<1x1024xf32, #tpu.memory_space<vmem>>) target_semaphore(%634 : memref<!tpu.dma_semaphore, #tpu.memory_space<semaphore_mem>>)
      %c0_i32_551 = arith.constant 0 : i32
      %c0_i32_552 = arith.constant 0 : i32
      %c47_i32_553 = arith.constant 47 : i32
      %c0_i32_554 = arith.constant 0 : i32
      %635 = tpu.memref_slice %arg2[%383, %c0_i32_554] : memref<16x1024xf32, #tpu.memory_space<any>> -> memref<1x1024xf32, #tpu.memory_space<any>>
      %c47_i32_555 = arith.constant 47 : i32
      %c0_i32_556 = arith.constant 0 : i32
      %636 = tpu.memref_slice %arg5[%c0_i32_551, %c47_i32_555, %c0_i32_556] : memref<2x64x1024xf32, #tpu.memory_space<vmem>> -> memref<1x1x1024xf32, #tpu.memory_space<vmem>>
      %637 = tpu.memref_squeeze %636 : memref<1x1x1024xf32, #tpu.memory_space<vmem>> -> memref<1x1024xf32, #tpu.memory_space<vmem>>
      %638 = tpu.memref_slice %arg6[%c0_i32_552, %c47_i32_553] : memref<2x64x!tpu.dma_semaphore, #tpu.memory_space<semaphore_mem>> -> memref<1x1x!tpu.dma_semaphore, #tpu.memory_space<semaphore_mem>>
      %639 = tpu.memref_squeeze %638 : memref<1x1x!tpu.dma_semaphore, #tpu.memory_space<semaphore_mem>> -> memref<!tpu.dma_semaphore, #tpu.memory_space<semaphore_mem>>
      tpu.enqueue_dma source(%635 : memref<1x1024xf32, #tpu.memory_space<any>>) target(%637 : memref<1x1024xf32, #tpu.memory_space<vmem>>) target_semaphore(%639 : memref<!tpu.dma_semaphore, #tpu.memory_space<semaphore_mem>>)
      %c0_i32_557 = arith.constant 0 : i32
      %c0_i32_558 = arith.constant 0 : i32
      %c48_i32_559 = arith.constant 48 : i32
      %c0_i32_560 = arith.constant 0 : i32
      %640 = tpu.memref_slice %arg2[%384, %c0_i32_560] : memref<16x1024xf32, #tpu.memory_space<any>> -> memref<1x1024xf32, #tpu.memory_space<any>>
      %c48_i32_561 = arith.constant 48 : i32
      %c0_i32_562 = arith.constant 0 : i32
      %641 = tpu.memref_slice %arg5[%c0_i32_557, %c48_i32_561, %c0_i32_562] : memref<2x64x1024xf32, #tpu.memory_space<vmem>> -> memref<1x1x1024xf32, #tpu.memory_space<vmem>>
      %642 = tpu.memref_squeeze %641 : memref<1x1x1024xf32, #tpu.memory_space<vmem>> -> memref<1x1024xf32, #tpu.memory_space<vmem>>
      %643 = tpu.memref_slice %arg6[%c0_i32_558, %c48_i32_559] : memref<2x64x!tpu.dma_semaphore, #tpu.memory_space<semaphore_mem>> -> memref<1x1x!tpu.dma_semaphore, #tpu.memory_space<semaphore_mem>>
      %644 = tpu.memref_squeeze %643 : memref<1x1x!tpu.dma_semaphore, #tpu.memory_space<semaphore_mem>> -> memref<!tpu.dma_semaphore, #tpu.memory_space<semaphore_mem>>
      tpu.enqueue_dma source(%640 : memref<1x1024xf32, #tpu.memory_space<any>>) target(%642 : memref<1x1024xf32, #tpu.memory_space<vmem>>) target_semaphore(%644 : memref<!tpu.dma_semaphore, #tpu.memory_space<semaphore_mem>>)
      %c0_i32_563 = arith.constant 0 : i32
      %c0_i32_564 = arith.constant 0 : i32
      %c49_i32_565 = arith.constant 49 : i32
      %c0_i32_566 = arith.constant 0 : i32
      %645 = tpu.memref_slice %arg2[%385, %c0_i32_566] : memref<16x1024xf32, #tpu.memory_space<any>> -> memref<1x1024xf32, #tpu.memory_space<any>>
      %c49_i32_567 = arith.constant 49 : i32
      %c0_i32_568 = arith.constant 0 : i32
      %646 = tpu.memref_slice %arg5[%c0_i32_563, %c49_i32_567, %c0_i32_568] : memref<2x64x1024xf32, #tpu.memory_space<vmem>> -> memref<1x1x1024xf32, #tpu.memory_space<vmem>>
      %647 = tpu.memref_squeeze %646 : memref<1x1x1024xf32, #tpu.memory_space<vmem>> -> memref<1x1024xf32, #tpu.memory_space<vmem>>
      %648 = tpu.memref_slice %arg6[%c0_i32_564, %c49_i32_565] : memref<2x64x!tpu.dma_semaphore, #tpu.memory_space<semaphore_mem>> -> memref<1x1x!tpu.dma_semaphore, #tpu.memory_space<semaphore_mem>>
      %649 = tpu.memref_squeeze %648 : memref<1x1x!tpu.dma_semaphore, #tpu.memory_space<semaphore_mem>> -> memref<!tpu.dma_semaphore, #tpu.memory_space<semaphore_mem>>
      tpu.enqueue_dma source(%645 : memref<1x1024xf32, #tpu.memory_space<any>>) target(%647 : memref<1x1024xf32, #tpu.memory_space<vmem>>) target_semaphore(%649 : memref<!tpu.dma_semaphore, #tpu.memory_space<semaphore_mem>>)
      %c0_i32_569 = arith.constant 0 : i32
      %c0_i32_570 = arith.constant 0 : i32
      %c50_i32_571 = arith.constant 50 : i32
      %c0_i32_572 = arith.constant 0 : i32
      %650 = tpu.memref_slice %arg2[%386, %c0_i32_572] : memref<16x1024xf32, #tpu.memory_space<any>> -> memref<1x1024xf32, #tpu.memory_space<any>>
      %c50_i32_573 = arith.constant 50 : i32
      %c0_i32_574 = arith.constant 0 : i32
      %651 = tpu.memref_slice %arg5[%c0_i32_569, %c50_i32_573, %c0_i32_574] : memref<2x64x1024xf32, #tpu.memory_space<vmem>> -> memref<1x1x1024xf32, #tpu.memory_space<vmem>>
      %652 = tpu.memref_squeeze %651 : memref<1x1x1024xf32, #tpu.memory_space<vmem>> -> memref<1x1024xf32, #tpu.memory_space<vmem>>
      %653 = tpu.memref_slice %arg6[%c0_i32_570, %c50_i32_571] : memref<2x64x!tpu.dma_semaphore, #tpu.memory_space<semaphore_mem>> -> memref<1x1x!tpu.dma_semaphore, #tpu.memory_space<semaphore_mem>>
      %654 = tpu.memref_squeeze %653 : memref<1x1x!tpu.dma_semaphore, #tpu.memory_space<semaphore_mem>> -> memref<!tpu.dma_semaphore, #tpu.memory_space<semaphore_mem>>
      tpu.enqueue_dma source(%650 : memref<1x1024xf32, #tpu.memory_space<any>>) target(%652 : memref<1x1024xf32, #tpu.memory_space<vmem>>) target_semaphore(%654 : memref<!tpu.dma_semaphore, #tpu.memory_space<semaphore_mem>>)
      %c0_i32_575 = arith.constant 0 : i32
      %c0_i32_576 = arith.constant 0 : i32
      %c51_i32_577 = arith.constant 51 : i32
      %c0_i32_578 = arith.constant 0 : i32
      %655 = tpu.memref_slice %arg2[%387, %c0_i32_578] : memref<16x1024xf32, #tpu.memory_space<any>> -> memref<1x1024xf32, #tpu.memory_space<any>>
      %c51_i32_579 = arith.constant 51 : i32
      %c0_i32_580 = arith.constant 0 : i32
      %656 = tpu.memref_slice %arg5[%c0_i32_575, %c51_i32_579, %c0_i32_580] : memref<2x64x1024xf32, #tpu.memory_space<vmem>> -> memref<1x1x1024xf32, #tpu.memory_space<vmem>>
      %657 = tpu.memref_squeeze %656 : memref<1x1x1024xf32, #tpu.memory_space<vmem>> -> memref<1x1024xf32, #tpu.memory_space<vmem>>
      %658 = tpu.memref_slice %arg6[%c0_i32_576, %c51_i32_577] : memref<2x64x!tpu.dma_semaphore, #tpu.memory_space<semaphore_mem>> -> memref<1x1x!tpu.dma_semaphore, #tpu.memory_space<semaphore_mem>>
      %659 = tpu.memref_squeeze %658 : memref<1x1x!tpu.dma_semaphore, #tpu.memory_space<semaphore_mem>> -> memref<!tpu.dma_semaphore, #tpu.memory_space<semaphore_mem>>
      tpu.enqueue_dma source(%655 : memref<1x1024xf32, #tpu.memory_space<any>>) target(%657 : memref<1x1024xf32, #tpu.memory_space<vmem>>) target_semaphore(%659 : memref<!tpu.dma_semaphore, #tpu.memory_space<semaphore_mem>>)
      %c0_i32_581 = arith.constant 0 : i32
      %c0_i32_582 = arith.constant 0 : i32
      %c52_i32_583 = arith.constant 52 : i32
      %c0_i32_584 = arith.constant 0 : i32
      %660 = tpu.memref_slice %arg2[%388, %c0_i32_584] : memref<16x1024xf32, #tpu.memory_space<any>> -> memref<1x1024xf32, #tpu.memory_space<any>>
      %c52_i32_585 = arith.constant 52 : i32
      %c0_i32_586 = arith.constant 0 : i32
      %661 = tpu.memref_slice %arg5[%c0_i32_581, %c52_i32_585, %c0_i32_586] : memref<2x64x1024xf32, #tpu.memory_space<vmem>> -> memref<1x1x1024xf32, #tpu.memory_space<vmem>>
      %662 = tpu.memref_squeeze %661 : memref<1x1x1024xf32, #tpu.memory_space<vmem>> -> memref<1x1024xf32, #tpu.memory_space<vmem>>
      %663 = tpu.memref_slice %arg6[%c0_i32_582, %c52_i32_583] : memref<2x64x!tpu.dma_semaphore, #tpu.memory_space<semaphore_mem>> -> memref<1x1x!tpu.dma_semaphore, #tpu.memory_space<semaphore_mem>>
      %664 = tpu.memref_squeeze %663 : memref<1x1x!tpu.dma_semaphore, #tpu.memory_space<semaphore_mem>> -> memref<!tpu.dma_semaphore, #tpu.memory_space<semaphore_mem>>
      tpu.enqueue_dma source(%660 : memref<1x1024xf32, #tpu.memory_space<any>>) target(%662 : memref<1x1024xf32, #tpu.memory_space<vmem>>) target_semaphore(%664 : memref<!tpu.dma_semaphore, #tpu.memory_space<semaphore_mem>>)
      %c0_i32_587 = arith.constant 0 : i32
      %c0_i32_588 = arith.constant 0 : i32
      %c53_i32_589 = arith.constant 53 : i32
      %c0_i32_590 = arith.constant 0 : i32
      %665 = tpu.memref_slice %arg2[%389, %c0_i32_590] : memref<16x1024xf32, #tpu.memory_space<any>> -> memref<1x1024xf32, #tpu.memory_space<any>>
      %c53_i32_591 = arith.constant 53 : i32
      %c0_i32_592 = arith.constant 0 : i32
      %666 = tpu.memref_slice %arg5[%c0_i32_587, %c53_i32_591, %c0_i32_592] : memref<2x64x1024xf32, #tpu.memory_space<vmem>> -> memref<1x1x1024xf32, #tpu.memory_space<vmem>>
      %667 = tpu.memref_squeeze %666 : memref<1x1x1024xf32, #tpu.memory_space<vmem>> -> memref<1x1024xf32, #tpu.memory_space<vmem>>
      %668 = tpu.memref_slice %arg6[%c0_i32_588, %c53_i32_589] : memref<2x64x!tpu.dma_semaphore, #tpu.memory_space<semaphore_mem>> -> memref<1x1x!tpu.dma_semaphore, #tpu.memory_space<semaphore_mem>>
      %669 = tpu.memref_squeeze %668 : memref<1x1x!tpu.dma_semaphore, #tpu.memory_space<semaphore_mem>> -> memref<!tpu.dma_semaphore, #tpu.memory_space<semaphore_mem>>
      tpu.enqueue_dma source(%665 : memref<1x1024xf32, #tpu.memory_space<any>>) target(%667 : memref<1x1024xf32, #tpu.memory_space<vmem>>) target_semaphore(%669 : memref<!tpu.dma_semaphore, #tpu.memory_space<semaphore_mem>>)
      %c0_i32_593 = arith.constant 0 : i32
      %c0_i32_594 = arith.constant 0 : i32
      %c54_i32_595 = arith.constant 54 : i32
      %c0_i32_596 = arith.constant 0 : i32
      %670 = tpu.memref_slice %arg2[%390, %c0_i32_596] : memref<16x1024xf32, #tpu.memory_space<any>> -> memref<1x1024xf32, #tpu.memory_space<any>>
      %c54_i32_597 = arith.constant 54 : i32
      %c0_i32_598 = arith.constant 0 : i32
      %671 = tpu.memref_slice %arg5[%c0_i32_593, %c54_i32_597, %c0_i32_598] : memref<2x64x1024xf32, #tpu.memory_space<vmem>> -> memref<1x1x1024xf32, #tpu.memory_space<vmem>>
      %672 = tpu.memref_squeeze %671 : memref<1x1x1024xf32, #tpu.memory_space<vmem>> -> memref<1x1024xf32, #tpu.memory_space<vmem>>
      %673 = tpu.memref_slice %arg6[%c0_i32_594, %c54_i32_595] : memref<2x64x!tpu.dma_semaphore, #tpu.memory_space<semaphore_mem>> -> memref<1x1x!tpu.dma_semaphore, #tpu.memory_space<semaphore_mem>>
      %674 = tpu.memref_squeeze %673 : memref<1x1x!tpu.dma_semaphore, #tpu.memory_space<semaphore_mem>> -> memref<!tpu.dma_semaphore, #tpu.memory_space<semaphore_mem>>
      tpu.enqueue_dma source(%670 : memref<1x1024xf32, #tpu.memory_space<any>>) target(%672 : memref<1x1024xf32, #tpu.memory_space<vmem>>) target_semaphore(%674 : memref<!tpu.dma_semaphore, #tpu.memory_space<semaphore_mem>>)
      %c0_i32_599 = arith.constant 0 : i32
      %c0_i32_600 = arith.constant 0 : i32
      %c55_i32_601 = arith.constant 55 : i32
      %c0_i32_602 = arith.constant 0 : i32
      %675 = tpu.memref_slice %arg2[%391, %c0_i32_602] : memref<16x1024xf32, #tpu.memory_space<any>> -> memref<1x1024xf32, #tpu.memory_space<any>>
      %c55_i32_603 = arith.constant 55 : i32
      %c0_i32_604 = arith.constant 0 : i32
      %676 = tpu.memref_slice %arg5[%c0_i32_599, %c55_i32_603, %c0_i32_604] : memref<2x64x1024xf32, #tpu.memory_space<vmem>> -> memref<1x1x1024xf32, #tpu.memory_space<vmem>>
      %677 = tpu.memref_squeeze %676 : memref<1x1x1024xf32, #tpu.memory_space<vmem>> -> memref<1x1024xf32, #tpu.memory_space<vmem>>
      %678 = tpu.memref_slice %arg6[%c0_i32_600, %c55_i32_601] : memref<2x64x!tpu.dma_semaphore, #tpu.memory_space<semaphore_mem>> -> memref<1x1x!tpu.dma_semaphore, #tpu.memory_space<semaphore_mem>>
      %679 = tpu.memref_squeeze %678 : memref<1x1x!tpu.dma_semaphore, #tpu.memory_space<semaphore_mem>> -> memref<!tpu.dma_semaphore, #tpu.memory_space<semaphore_mem>>
      tpu.enqueue_dma source(%675 : memref<1x1024xf32, #tpu.memory_space<any>>) target(%677 : memref<1x1024xf32, #tpu.memory_space<vmem>>) target_semaphore(%679 : memref<!tpu.dma_semaphore, #tpu.memory_space<semaphore_mem>>)
      %c0_i32_605 = arith.constant 0 : i32
      %c0_i32_606 = arith.constant 0 : i32
      %c56_i32_607 = arith.constant 56 : i32
      %c0_i32_608 = arith.constant 0 : i32
      %680 = tpu.memref_slice %arg2[%392, %c0_i32_608] : memref<16x1024xf32, #tpu.memory_space<any>> -> memref<1x1024xf32, #tpu.memory_space<any>>
      %c56_i32_609 = arith.constant 56 : i32
      %c0_i32_610 = arith.constant 0 : i32
      %681 = tpu.memref_slice %arg5[%c0_i32_605, %c56_i32_609, %c0_i32_610] : memref<2x64x1024xf32, #tpu.memory_space<vmem>> -> memref<1x1x1024xf32, #tpu.memory_space<vmem>>
      %682 = tpu.memref_squeeze %681 : memref<1x1x1024xf32, #tpu.memory_space<vmem>> -> memref<1x1024xf32, #tpu.memory_space<vmem>>
      %683 = tpu.memref_slice %arg6[%c0_i32_606, %c56_i32_607] : memref<2x64x!tpu.dma_semaphore, #tpu.memory_space<semaphore_mem>> -> memref<1x1x!tpu.dma_semaphore, #tpu.memory_space<semaphore_mem>>
      %684 = tpu.memref_squeeze %683 : memref<1x1x!tpu.dma_semaphore, #tpu.memory_space<semaphore_mem>> -> memref<!tpu.dma_semaphore, #tpu.memory_space<semaphore_mem>>
      tpu.enqueue_dma source(%680 : memref<1x1024xf32, #tpu.memory_space<any>>) target(%682 : memref<1x1024xf32, #tpu.memory_space<vmem>>) target_semaphore(%684 : memref<!tpu.dma_semaphore, #tpu.memory_space<semaphore_mem>>)
      %c0_i32_611 = arith.constant 0 : i32
      %c0_i32_612 = arith.constant 0 : i32
      %c57_i32_613 = arith.constant 57 : i32
      %c0_i32_614 = arith.constant 0 : i32
      %685 = tpu.memref_slice %arg2[%393, %c0_i32_614] : memref<16x1024xf32, #tpu.memory_space<any>> -> memref<1x1024xf32, #tpu.memory_space<any>>
      %c57_i32_615 = arith.constant 57 : i32
      %c0_i32_616 = arith.constant 0 : i32
      %686 = tpu.memref_slice %arg5[%c0_i32_611, %c57_i32_615, %c0_i32_616] : memref<2x64x1024xf32, #tpu.memory_space<vmem>> -> memref<1x1x1024xf32, #tpu.memory_space<vmem>>
      %687 = tpu.memref_squeeze %686 : memref<1x1x1024xf32, #tpu.memory_space<vmem>> -> memref<1x1024xf32, #tpu.memory_space<vmem>>
      %688 = tpu.memref_slice %arg6[%c0_i32_612, %c57_i32_613] : memref<2x64x!tpu.dma_semaphore, #tpu.memory_space<semaphore_mem>> -> memref<1x1x!tpu.dma_semaphore, #tpu.memory_space<semaphore_mem>>
      %689 = tpu.memref_squeeze %688 : memref<1x1x!tpu.dma_semaphore, #tpu.memory_space<semaphore_mem>> -> memref<!tpu.dma_semaphore, #tpu.memory_space<semaphore_mem>>
      tpu.enqueue_dma source(%685 : memref<1x1024xf32, #tpu.memory_space<any>>) target(%687 : memref<1x1024xf32, #tpu.memory_space<vmem>>) target_semaphore(%689 : memref<!tpu.dma_semaphore, #tpu.memory_space<semaphore_mem>>)
      %c0_i32_617 = arith.constant 0 : i32
      %c0_i32_618 = arith.constant 0 : i32
      %c58_i32_619 = arith.constant 58 : i32
      %c0_i32_620 = arith.constant 0 : i32
      %690 = tpu.memref_slice %arg2[%394, %c0_i32_620] : memref<16x1024xf32, #tpu.memory_space<any>> -> memref<1x1024xf32, #tpu.memory_space<any>>
      %c58_i32_621 = arith.constant 58 : i32
      %c0_i32_622 = arith.constant 0 : i32
      %691 = tpu.memref_slice %arg5[%c0_i32_617, %c58_i32_621, %c0_i32_622] : memref<2x64x1024xf32, #tpu.memory_space<vmem>> -> memref<1x1x1024xf32, #tpu.memory_space<vmem>>
      %692 = tpu.memref_squeeze %691 : memref<1x1x1024xf32, #tpu.memory_space<vmem>> -> memref<1x1024xf32, #tpu.memory_space<vmem>>
      %693 = tpu.memref_slice %arg6[%c0_i32_618, %c58_i32_619] : memref<2x64x!tpu.dma_semaphore, #tpu.memory_space<semaphore_mem>> -> memref<1x1x!tpu.dma_semaphore, #tpu.memory_space<semaphore_mem>>
      %694 = tpu.memref_squeeze %693 : memref<1x1x!tpu.dma_semaphore, #tpu.memory_space<semaphore_mem>> -> memref<!tpu.dma_semaphore, #tpu.memory_space<semaphore_mem>>
      tpu.enqueue_dma source(%690 : memref<1x1024xf32, #tpu.memory_space<any>>) target(%692 : memref<1x1024xf32, #tpu.memory_space<vmem>>) target_semaphore(%694 : memref<!tpu.dma_semaphore, #tpu.memory_space<semaphore_mem>>)
      %c0_i32_623 = arith.constant 0 : i32
      %c0_i32_624 = arith.constant 0 : i32
      %c59_i32_625 = arith.constant 59 : i32
      %c0_i32_626 = arith.constant 0 : i32
      %695 = tpu.memref_slice %arg2[%395, %c0_i32_626] : memref<16x1024xf32, #tpu.memory_space<any>> -> memref<1x1024xf32, #tpu.memory_space<any>>
      %c59_i32_627 = arith.constant 59 : i32
      %c0_i32_628 = arith.constant 0 : i32
      %696 = tpu.memref_slice %arg5[%c0_i32_623, %c59_i32_627, %c0_i32_628] : memref<2x64x1024xf32, #tpu.memory_space<vmem>> -> memref<1x1x1024xf32, #tpu.memory_space<vmem>>
      %697 = tpu.memref_squeeze %696 : memref<1x1x1024xf32, #tpu.memory_space<vmem>> -> memref<1x1024xf32, #tpu.memory_space<vmem>>
      %698 = tpu.memref_slice %arg6[%c0_i32_624, %c59_i32_625] : memref<2x64x!tpu.dma_semaphore, #tpu.memory_space<semaphore_mem>> -> memref<1x1x!tpu.dma_semaphore, #tpu.memory_space<semaphore_mem>>
      %699 = tpu.memref_squeeze %698 : memref<1x1x!tpu.dma_semaphore, #tpu.memory_space<semaphore_mem>> -> memref<!tpu.dma_semaphore, #tpu.memory_space<semaphore_mem>>
      tpu.enqueue_dma source(%695 : memref<1x1024xf32, #tpu.memory_space<any>>) target(%697 : memref<1x1024xf32, #tpu.memory_space<vmem>>) target_semaphore(%699 : memref<!tpu.dma_semaphore, #tpu.memory_space<semaphore_mem>>)
      %c0_i32_629 = arith.constant 0 : i32
      %c0_i32_630 = arith.constant 0 : i32
      %c60_i32_631 = arith.constant 60 : i32
      %c0_i32_632 = arith.constant 0 : i32
      %700 = tpu.memref_slice %arg2[%396, %c0_i32_632] : memref<16x1024xf32, #tpu.memory_space<any>> -> memref<1x1024xf32, #tpu.memory_space<any>>
      %c60_i32_633 = arith.constant 60 : i32
      %c0_i32_634 = arith.constant 0 : i32
      %701 = tpu.memref_slice %arg5[%c0_i32_629, %c60_i32_633, %c0_i32_634] : memref<2x64x1024xf32, #tpu.memory_space<vmem>> -> memref<1x1x1024xf32, #tpu.memory_space<vmem>>
      %702 = tpu.memref_squeeze %701 : memref<1x1x1024xf32, #tpu.memory_space<vmem>> -> memref<1x1024xf32, #tpu.memory_space<vmem>>
      %703 = tpu.memref_slice %arg6[%c0_i32_630, %c60_i32_631] : memref<2x64x!tpu.dma_semaphore, #tpu.memory_space<semaphore_mem>> -> memref<1x1x!tpu.dma_semaphore, #tpu.memory_space<semaphore_mem>>
      %704 = tpu.memref_squeeze %703 : memref<1x1x!tpu.dma_semaphore, #tpu.memory_space<semaphore_mem>> -> memref<!tpu.dma_semaphore, #tpu.memory_space<semaphore_mem>>
      tpu.enqueue_dma source(%700 : memref<1x1024xf32, #tpu.memory_space<any>>) target(%702 : memref<1x1024xf32, #tpu.memory_space<vmem>>) target_semaphore(%704 : memref<!tpu.dma_semaphore, #tpu.memory_space<semaphore_mem>>)
      %c0_i32_635 = arith.constant 0 : i32
      %c0_i32_636 = arith.constant 0 : i32
      %c61_i32_637 = arith.constant 61 : i32
      %c0_i32_638 = arith.constant 0 : i32
      %705 = tpu.memref_slice %arg2[%397, %c0_i32_638] : memref<16x1024xf32, #tpu.memory_space<any>> -> memref<1x1024xf32, #tpu.memory_space<any>>
      %c61_i32_639 = arith.constant 61 : i32
      %c0_i32_640 = arith.constant 0 : i32
      %706 = tpu.memref_slice %arg5[%c0_i32_635, %c61_i32_639, %c0_i32_640] : memref<2x64x1024xf32, #tpu.memory_space<vmem>> -> memref<1x1x1024xf32, #tpu.memory_space<vmem>>
      %707 = tpu.memref_squeeze %706 : memref<1x1x1024xf32, #tpu.memory_space<vmem>> -> memref<1x1024xf32, #tpu.memory_space<vmem>>
      %708 = tpu.memref_slice %arg6[%c0_i32_636, %c61_i32_637] : memref<2x64x!tpu.dma_semaphore, #tpu.memory_space<semaphore_mem>> -> memref<1x1x!tpu.dma_semaphore, #tpu.memory_space<semaphore_mem>>
      %709 = tpu.memref_squeeze %708 : memref<1x1x!tpu.dma_semaphore, #tpu.memory_space<semaphore_mem>> -> memref<!tpu.dma_semaphore, #tpu.memory_space<semaphore_mem>>
      tpu.enqueue_dma source(%705 : memref<1x1024xf32, #tpu.memory_space<any>>) target(%707 : memref<1x1024xf32, #tpu.memory_space<vmem>>) target_semaphore(%709 : memref<!tpu.dma_semaphore, #tpu.memory_space<semaphore_mem>>)
      %c0_i32_641 = arith.constant 0 : i32
      %c0_i32_642 = arith.constant 0 : i32
      %c62_i32_643 = arith.constant 62 : i32
      %c0_i32_644 = arith.constant 0 : i32
      %710 = tpu.memref_slice %arg2[%398, %c0_i32_644] : memref<16x1024xf32, #tpu.memory_space<any>> -> memref<1x1024xf32, #tpu.memory_space<any>>
      %c62_i32_645 = arith.constant 62 : i32
      %c0_i32_646 = arith.constant 0 : i32
      %711 = tpu.memref_slice %arg5[%c0_i32_641, %c62_i32_645, %c0_i32_646] : memref<2x64x1024xf32, #tpu.memory_space<vmem>> -> memref<1x1x1024xf32, #tpu.memory_space<vmem>>
      %712 = tpu.memref_squeeze %711 : memref<1x1x1024xf32, #tpu.memory_space<vmem>> -> memref<1x1024xf32, #tpu.memory_space<vmem>>
      %713 = tpu.memref_slice %arg6[%c0_i32_642, %c62_i32_643] : memref<2x64x!tpu.dma_semaphore, #tpu.memory_space<semaphore_mem>> -> memref<1x1x!tpu.dma_semaphore, #tpu.memory_space<semaphore_mem>>
      %714 = tpu.memref_squeeze %713 : memref<1x1x!tpu.dma_semaphore, #tpu.memory_space<semaphore_mem>> -> memref<!tpu.dma_semaphore, #tpu.memory_space<semaphore_mem>>
      tpu.enqueue_dma source(%710 : memref<1x1024xf32, #tpu.memory_space<any>>) target(%712 : memref<1x1024xf32, #tpu.memory_space<vmem>>) target_semaphore(%714 : memref<!tpu.dma_semaphore, #tpu.memory_space<semaphore_mem>>)
      %c0_i32_647 = arith.constant 0 : i32
      %c0_i32_648 = arith.constant 0 : i32
      %c63_i32_649 = arith.constant 63 : i32
      %c0_i32_650 = arith.constant 0 : i32
      %715 = tpu.memref_slice %arg2[%399, %c0_i32_650] : memref<16x1024xf32, #tpu.memory_space<any>> -> memref<1x1024xf32, #tpu.memory_space<any>>
      %c63_i32_651 = arith.constant 63 : i32
      %c0_i32_652 = arith.constant 0 : i32
      %716 = tpu.memref_slice %arg5[%c0_i32_647, %c63_i32_651, %c0_i32_652] : memref<2x64x1024xf32, #tpu.memory_space<vmem>> -> memref<1x1x1024xf32, #tpu.memory_space<vmem>>
      %717 = tpu.memref_squeeze %716 : memref<1x1x1024xf32, #tpu.memory_space<vmem>> -> memref<1x1024xf32, #tpu.memory_space<vmem>>
      %718 = tpu.memref_slice %arg6[%c0_i32_648, %c63_i32_649] : memref<2x64x!tpu.dma_semaphore, #tpu.memory_space<semaphore_mem>> -> memref<1x1x!tpu.dma_semaphore, #tpu.memory_space<semaphore_mem>>
      %719 = tpu.memref_squeeze %718 : memref<1x1x!tpu.dma_semaphore, #tpu.memory_space<semaphore_mem>> -> memref<!tpu.dma_semaphore, #tpu.memory_space<semaphore_mem>>
      tpu.enqueue_dma source(%715 : memref<1x1024xf32, #tpu.memory_space<any>>) target(%717 : memref<1x1024xf32, #tpu.memory_space<vmem>>) target_semaphore(%719 : memref<!tpu.dma_semaphore, #tpu.memory_space<semaphore_mem>>)
    } else {
    }
    %c1_i32_2 = arith.constant 1 : i32
    %5 = arith.addi %arg0, %c1_i32_2 : i32
    %c1_i32_3 = arith.constant 1 : i32
    %6 = arith.cmpi slt, %5, %c1_i32_3 : i32
    %7 = arith.extui %6 : i1 to i32
    %c0_i32_4 = arith.constant 0 : i32
    %8 = arith.cmpi ne, %7, %c0_i32_4 : i32
    scf.if %8 {
      %c1_i32_268 = arith.constant 1 : i32
      %336 = arith.addi %arg0, %c1_i32_268 : i32
      %c64_i32 = arith.constant 64 : i32
      %337 = arith.muli %336, %c64_i32 : i32
      %c0_i32_269 = arith.constant 0 : i32
      %338 = arith.addi %337, %c0_i32_269 : i32
      %339 = arith.index_cast %338 : i32 to index
      %340 = memref.load %arg1[%339] : memref<64xi32, #tpu.memory_space<smem>>
      %c1_i32_270 = arith.constant 1 : i32
      %341 = arith.addi %337, %c1_i32_270 : i32
      %342 = arith.index_cast %341 : i32 to index
      %343 = memref.load %arg1[%342] : memref<64xi32, #tpu.memory_space<smem>>
      %c2_i32_271 = arith.constant 2 : i32
      %344 = arith.addi %337, %c2_i32_271 : i32
      %345 = arith.index_cast %344 : i32 to index
      %346 = memref.load %arg1[%345] : memref<64xi32, #tpu.memory_space<smem>>
      %c3_i32_272 = arith.constant 3 : i32
      %347 = arith.addi %337, %c3_i32_272 : i32
      %348 = arith.index_cast %347 : i32 to index
      %349 = memref.load %arg1[%348] : memref<64xi32, #tpu.memory_space<smem>>
      %c4_i32_273 = arith.constant 4 : i32
      %350 = arith.addi %337, %c4_i32_273 : i32
      %351 = arith.index_cast %350 : i32 to index
      %352 = memref.load %arg1[%351] : memref<64xi32, #tpu.memory_space<smem>>
      %c5_i32_274 = arith.constant 5 : i32
      %353 = arith.addi %337, %c5_i32_274 : i32
      %354 = arith.index_cast %353 : i32 to index
      %355 = memref.load %arg1[%354] : memref<64xi32, #tpu.memory_space<smem>>
      %c6_i32_275 = arith.constant 6 : i32
      %356 = arith.addi %337, %c6_i32_275 : i32
      %357 = arith.index_cast %356 : i32 to index
      %358 = memref.load %arg1[%357] : memref<64xi32, #tpu.memory_space<smem>>
      %c7_i32_276 = arith.constant 7 : i32
      %359 = arith.addi %337, %c7_i32_276 : i32
      %360 = arith.index_cast %359 : i32 to index
      %361 = memref.load %arg1[%360] : memref<64xi32, #tpu.memory_space<smem>>
      %c8_i32_277 = arith.constant 8 : i32
      %362 = arith.addi %337, %c8_i32_277 : i32
      %363 = arith.index_cast %362 : i32 to index
      %364 = memref.load %arg1[%363] : memref<64xi32, #tpu.memory_space<smem>>
      %c9_i32_278 = arith.constant 9 : i32
      %365 = arith.addi %337, %c9_i32_278 : i32
      %366 = arith.index_cast %365 : i32 to index
      %367 = memref.load %arg1[%366] : memref<64xi32, #tpu.memory_space<smem>>
      %c10_i32_279 = arith.constant 10 : i32
      %368 = arith.addi %337, %c10_i32_279 : i32
      %369 = arith.index_cast %368 : i32 to index
      %370 = memref.load %arg1[%369] : memref<64xi32, #tpu.memory_space<smem>>
      %c11_i32_280 = arith.constant 11 : i32
      %371 = arith.addi %337, %c11_i32_280 : i32
      %372 = arith.index_cast %371 : i32 to index
      %373 = memref.load %arg1[%372] : memref<64xi32, #tpu.memory_space<smem>>
      %c12_i32_281 = arith.constant 12 : i32
      %374 = arith.addi %337, %c12_i32_281 : i32
      %375 = arith.index_cast %374 : i32 to index
      %376 = memref.load %arg1[%375] : memref<64xi32, #tpu.memory_space<smem>>
      %c13_i32_282 = arith.constant 13 : i32
      %377 = arith.addi %337, %c13_i32_282 : i32
      %378 = arith.index_cast %377 : i32 to index
      %379 = memref.load %arg1[%378] : memref<64xi32, #tpu.memory_space<smem>>
      %c14_i32_283 = arith.constant 14 : i32
      %380 = arith.addi %337, %c14_i32_283 : i32
      %381 = arith.index_cast %380 : i32 to index
      %382 = memref.load %arg1[%381] : memref<64xi32, #tpu.memory_space<smem>>
      %c15_i32_284 = arith.constant 15 : i32
      %383 = arith.addi %337, %c15_i32_284 : i32
      %384 = arith.index_cast %383 : i32 to index
      %385 = memref.load %arg1[%384] : memref<64xi32, #tpu.memory_space<smem>>
      %c16_i32_285 = arith.constant 16 : i32
      %386 = arith.addi %337, %c16_i32_285 : i32
      %387 = arith.index_cast %386 : i32 to index
      %388 = memref.load %arg1[%387] : memref<64xi32, #tpu.memory_space<smem>>
      %c17_i32_286 = arith.constant 17 : i32
      %389 = arith.addi %337, %c17_i32_286 : i32
      %390 = arith.index_cast %389 : i32 to index
      %391 = memref.load %arg1[%390] : memref<64xi32, #tpu.memory_space<smem>>
      %c18_i32_287 = arith.constant 18 : i32
      %392 = arith.addi %337, %c18_i32_287 : i32
      %393 = arith.index_cast %392 : i32 to index
      %394 = memref.load %arg1[%393] : memref<64xi32, #tpu.memory_space<smem>>
      %c19_i32_288 = arith.constant 19 : i32
      %395 = arith.addi %337, %c19_i32_288 : i32
      %396 = arith.index_cast %395 : i32 to index
      %397 = memref.load %arg1[%396] : memref<64xi32, #tpu.memory_space<smem>>
      %c20_i32_289 = arith.constant 20 : i32
      %398 = arith.addi %337, %c20_i32_289 : i32
      %399 = arith.index_cast %398 : i32 to index
      %400 = memref.load %arg1[%399] : memref<64xi32, #tpu.memory_space<smem>>
      %c21_i32_290 = arith.constant 21 : i32
      %401 = arith.addi %337, %c21_i32_290 : i32
      %402 = arith.index_cast %401 : i32 to index
      %403 = memref.load %arg1[%402] : memref<64xi32, #tpu.memory_space<smem>>
      %c22_i32_291 = arith.constant 22 : i32
      %404 = arith.addi %337, %c22_i32_291 : i32
      %405 = arith.index_cast %404 : i32 to index
      %406 = memref.load %arg1[%405] : memref<64xi32, #tpu.memory_space<smem>>
      %c23_i32_292 = arith.constant 23 : i32
      %407 = arith.addi %337, %c23_i32_292 : i32
      %408 = arith.index_cast %407 : i32 to index
      %409 = memref.load %arg1[%408] : memref<64xi32, #tpu.memory_space<smem>>
      %c24_i32_293 = arith.constant 24 : i32
      %410 = arith.addi %337, %c24_i32_293 : i32
      %411 = arith.index_cast %410 : i32 to index
      %412 = memref.load %arg1[%411] : memref<64xi32, #tpu.memory_space<smem>>
      %c25_i32_294 = arith.constant 25 : i32
      %413 = arith.addi %337, %c25_i32_294 : i32
      %414 = arith.index_cast %413 : i32 to index
      %415 = memref.load %arg1[%414] : memref<64xi32, #tpu.memory_space<smem>>
      %c26_i32_295 = arith.constant 26 : i32
      %416 = arith.addi %337, %c26_i32_295 : i32
      %417 = arith.index_cast %416 : i32 to index
      %418 = memref.load %arg1[%417] : memref<64xi32, #tpu.memory_space<smem>>
      %c27_i32_296 = arith.constant 27 : i32
      %419 = arith.addi %337, %c27_i32_296 : i32
      %420 = arith.index_cast %419 : i32 to index
      %421 = memref.load %arg1[%420] : memref<64xi32, #tpu.memory_space<smem>>
      %c28_i32_297 = arith.constant 28 : i32
      %422 = arith.addi %337, %c28_i32_297 : i32
      %423 = arith.index_cast %422 : i32 to index
      %424 = memref.load %arg1[%423] : memref<64xi32, #tpu.memory_space<smem>>
      %c29_i32_298 = arith.constant 29 : i32
      %425 = arith.addi %337, %c29_i32_298 : i32
      %426 = arith.index_cast %425 : i32 to index
      %427 = memref.load %arg1[%426] : memref<64xi32, #tpu.memory_space<smem>>
      %c30_i32_299 = arith.constant 30 : i32
      %428 = arith.addi %337, %c30_i32_299 : i32
      %429 = arith.index_cast %428 : i32 to index
      %430 = memref.load %arg1[%429] : memref<64xi32, #tpu.memory_space<smem>>
      %c31_i32_300 = arith.constant 31 : i32
      %431 = arith.addi %337, %c31_i32_300 : i32
      %432 = arith.index_cast %431 : i32 to index
      %433 = memref.load %arg1[%432] : memref<64xi32, #tpu.memory_space<smem>>
      %c32_i32_301 = arith.constant 32 : i32
      %434 = arith.addi %337, %c32_i32_301 : i32
      %435 = arith.index_cast %434 : i32 to index
      %436 = memref.load %arg1[%435] : memref<64xi32, #tpu.memory_space<smem>>
      %c33_i32_302 = arith.constant 33 : i32
      %437 = arith.addi %337, %c33_i32_302 : i32
      %438 = arith.index_cast %437 : i32 to index
      %439 = memref.load %arg1[%438] : memref<64xi32, #tpu.memory_space<smem>>
      %c34_i32_303 = arith.constant 34 : i32
      %440 = arith.addi %337, %c34_i32_303 : i32
      %441 = arith.index_cast %440 : i32 to index
      %442 = memref.load %arg1[%441] : memref<64xi32, #tpu.memory_space<smem>>
      %c35_i32_304 = arith.constant 35 : i32
      %443 = arith.addi %337, %c35_i32_304 : i32
      %444 = arith.index_cast %443 : i32 to index
      %445 = memref.load %arg1[%444] : memref<64xi32, #tpu.memory_space<smem>>
      %c36_i32_305 = arith.constant 36 : i32
      %446 = arith.addi %337, %c36_i32_305 : i32
      %447 = arith.index_cast %446 : i32 to index
      %448 = memref.load %arg1[%447] : memref<64xi32, #tpu.memory_space<smem>>
      %c37_i32_306 = arith.constant 37 : i32
      %449 = arith.addi %337, %c37_i32_306 : i32
      %450 = arith.index_cast %449 : i32 to index
      %451 = memref.load %arg1[%450] : memref<64xi32, #tpu.memory_space<smem>>
      %c38_i32_307 = arith.constant 38 : i32
      %452 = arith.addi %337, %c38_i32_307 : i32
      %453 = arith.index_cast %452 : i32 to index
      %454 = memref.load %arg1[%453] : memref<64xi32, #tpu.memory_space<smem>>
      %c39_i32_308 = arith.constant 39 : i32
      %455 = arith.addi %337, %c39_i32_308 : i32
      %456 = arith.index_cast %455 : i32 to index
      %457 = memref.load %arg1[%456] : memref<64xi32, #tpu.memory_space<smem>>
      %c40_i32_309 = arith.constant 40 : i32
      %458 = arith.addi %337, %c40_i32_309 : i32
      %459 = arith.index_cast %458 : i32 to index
      %460 = memref.load %arg1[%459] : memref<64xi32, #tpu.memory_space<smem>>
      %c41_i32_310 = arith.constant 41 : i32
      %461 = arith.addi %337, %c41_i32_310 : i32
      %462 = arith.index_cast %461 : i32 to index
      %463 = memref.load %arg1[%462] : memref<64xi32, #tpu.memory_space<smem>>
      %c42_i32_311 = arith.constant 42 : i32
      %464 = arith.addi %337, %c42_i32_311 : i32
      %465 = arith.index_cast %464 : i32 to index
      %466 = memref.load %arg1[%465] : memref<64xi32, #tpu.memory_space<smem>>
      %c43_i32_312 = arith.constant 43 : i32
      %467 = arith.addi %337, %c43_i32_312 : i32
      %468 = arith.index_cast %467 : i32 to index
      %469 = memref.load %arg1[%468] : memref<64xi32, #tpu.memory_space<smem>>
      %c44_i32_313 = arith.constant 44 : i32
      %470 = arith.addi %337, %c44_i32_313 : i32
      %471 = arith.index_cast %470 : i32 to index
      %472 = memref.load %arg1[%471] : memref<64xi32, #tpu.memory_space<smem>>
      %c45_i32_314 = arith.constant 45 : i32
      %473 = arith.addi %337, %c45_i32_314 : i32
      %474 = arith.index_cast %473 : i32 to index
      %475 = memref.load %arg1[%474] : memref<64xi32, #tpu.memory_space<smem>>
      %c46_i32_315 = arith.constant 46 : i32
      %476 = arith.addi %337, %c46_i32_315 : i32
      %477 = arith.index_cast %476 : i32 to index
      %478 = memref.load %arg1[%477] : memref<64xi32, #tpu.memory_space<smem>>
      %c47_i32_316 = arith.constant 47 : i32
      %479 = arith.addi %337, %c47_i32_316 : i32
      %480 = arith.index_cast %479 : i32 to index
      %481 = memref.load %arg1[%480] : memref<64xi32, #tpu.memory_space<smem>>
      %c48_i32_317 = arith.constant 48 : i32
      %482 = arith.addi %337, %c48_i32_317 : i32
      %483 = arith.index_cast %482 : i32 to index
      %484 = memref.load %arg1[%483] : memref<64xi32, #tpu.memory_space<smem>>
      %c49_i32_318 = arith.constant 49 : i32
      %485 = arith.addi %337, %c49_i32_318 : i32
      %486 = arith.index_cast %485 : i32 to index
      %487 = memref.load %arg1[%486] : memref<64xi32, #tpu.memory_space<smem>>
      %c50_i32_319 = arith.constant 50 : i32
      %488 = arith.addi %337, %c50_i32_319 : i32
      %489 = arith.index_cast %488 : i32 to index
      %490 = memref.load %arg1[%489] : memref<64xi32, #tpu.memory_space<smem>>
      %c51_i32_320 = arith.constant 51 : i32
      %491 = arith.addi %337, %c51_i32_320 : i32
      %492 = arith.index_cast %491 : i32 to index
      %493 = memref.load %arg1[%492] : memref<64xi32, #tpu.memory_space<smem>>
      %c52_i32_321 = arith.constant 52 : i32
      %494 = arith.addi %337, %c52_i32_321 : i32
      %495 = arith.index_cast %494 : i32 to index
      %496 = memref.load %arg1[%495] : memref<64xi32, #tpu.memory_space<smem>>
      %c53_i32_322 = arith.constant 53 : i32
      %497 = arith.addi %337, %c53_i32_322 : i32
      %498 = arith.index_cast %497 : i32 to index
      %499 = memref.load %arg1[%498] : memref<64xi32, #tpu.memory_space<smem>>
      %c54_i32_323 = arith.constant 54 : i32
      %500 = arith.addi %337, %c54_i32_323 : i32
      %501 = arith.index_cast %500 : i32 to index
      %502 = memref.load %arg1[%501] : memref<64xi32, #tpu.memory_space<smem>>
      %c55_i32_324 = arith.constant 55 : i32
      %503 = arith.addi %337, %c55_i32_324 : i32
      %504 = arith.index_cast %503 : i32 to index
      %505 = memref.load %arg1[%504] : memref<64xi32, #tpu.memory_space<smem>>
      %c56_i32_325 = arith.constant 56 : i32
      %506 = arith.addi %337, %c56_i32_325 : i32
      %507 = arith.index_cast %506 : i32 to index
      %508 = memref.load %arg1[%507] : memref<64xi32, #tpu.memory_space<smem>>
      %c57_i32_326 = arith.constant 57 : i32
      %509 = arith.addi %337, %c57_i32_326 : i32
      %510 = arith.index_cast %509 : i32 to index
      %511 = memref.load %arg1[%510] : memref<64xi32, #tpu.memory_space<smem>>
      %c58_i32_327 = arith.constant 58 : i32
      %512 = arith.addi %337, %c58_i32_327 : i32
      %513 = arith.index_cast %512 : i32 to index
      %514 = memref.load %arg1[%513] : memref<64xi32, #tpu.memory_space<smem>>
      %c59_i32_328 = arith.constant 59 : i32
      %515 = arith.addi %337, %c59_i32_328 : i32
      %516 = arith.index_cast %515 : i32 to index
      %517 = memref.load %arg1[%516] : memref<64xi32, #tpu.memory_space<smem>>
      %c60_i32_329 = arith.constant 60 : i32
      %518 = arith.addi %337, %c60_i32_329 : i32
      %519 = arith.index_cast %518 : i32 to index
      %520 = memref.load %arg1[%519] : memref<64xi32, #tpu.memory_space<smem>>
      %c61_i32_330 = arith.constant 61 : i32
      %521 = arith.addi %337, %c61_i32_330 : i32
      %522 = arith.index_cast %521 : i32 to index
      %523 = memref.load %arg1[%522] : memref<64xi32, #tpu.memory_space<smem>>
      %c62_i32_331 = arith.constant 62 : i32
      %524 = arith.addi %337, %c62_i32_331 : i32
      %525 = arith.index_cast %524 : i32 to index
      %526 = memref.load %arg1[%525] : memref<64xi32, #tpu.memory_space<smem>>
      %c63_i32_332 = arith.constant 63 : i32
      %527 = arith.addi %337, %c63_i32_332 : i32
      %528 = arith.index_cast %527 : i32 to index
      %529 = memref.load %arg1[%528] : memref<64xi32, #tpu.memory_space<smem>>
      %c0_i32_333 = arith.constant 0 : i32
      %c0_i32_334 = arith.constant 0 : i32
      %530 = tpu.memref_slice %arg2[%340, %c0_i32_334] : memref<16x1024xf32, #tpu.memory_space<any>> -> memref<1x1024xf32, #tpu.memory_space<any>>
      %c0_i32_335 = arith.constant 0 : i32
      %c0_i32_336 = arith.constant 0 : i32
      %531 = tpu.memref_slice %arg5[%1, %c0_i32_335, %c0_i32_336] : memref<2x64x1024xf32, #tpu.memory_space<vmem>> -> memref<1x1x1024xf32, #tpu.memory_space<vmem>>
      %532 = tpu.memref_squeeze %531 : memref<1x1x1024xf32, #tpu.memory_space<vmem>> -> memref<1x1024xf32, #tpu.memory_space<vmem>>
      %533 = tpu.memref_slice %arg6[%1, %c0_i32_333] : memref<2x64x!tpu.dma_semaphore, #tpu.memory_space<semaphore_mem>> -> memref<1x1x!tpu.dma_semaphore, #tpu.memory_space<semaphore_mem>>
      %534 = tpu.memref_squeeze %533 : memref<1x1x!tpu.dma_semaphore, #tpu.memory_space<semaphore_mem>> -> memref<!tpu.dma_semaphore, #tpu.memory_space<semaphore_mem>>
      tpu.enqueue_dma source(%530 : memref<1x1024xf32, #tpu.memory_space<any>>) target(%532 : memref<1x1024xf32, #tpu.memory_space<vmem>>) target_semaphore(%534 : memref<!tpu.dma_semaphore, #tpu.memory_space<semaphore_mem>>)
      %c1_i32_337 = arith.constant 1 : i32
      %c0_i32_338 = arith.constant 0 : i32
      %535 = tpu.memref_slice %arg2[%343, %c0_i32_338] : memref<16x1024xf32, #tpu.memory_space<any>> -> memref<1x1024xf32, #tpu.memory_space<any>>
      %c1_i32_339 = arith.constant 1 : i32
      %c0_i32_340 = arith.constant 0 : i32
      %536 = tpu.memref_slice %arg5[%1, %c1_i32_339, %c0_i32_340] : memref<2x64x1024xf32, #tpu.memory_space<vmem>> -> memref<1x1x1024xf32, #tpu.memory_space<vmem>>
      %537 = tpu.memref_squeeze %536 : memref<1x1x1024xf32, #tpu.memory_space<vmem>> -> memref<1x1024xf32, #tpu.memory_space<vmem>>
      %538 = tpu.memref_slice %arg6[%1, %c1_i32_337] : memref<2x64x!tpu.dma_semaphore, #tpu.memory_space<semaphore_mem>> -> memref<1x1x!tpu.dma_semaphore, #tpu.memory_space<semaphore_mem>>
      %539 = tpu.memref_squeeze %538 : memref<1x1x!tpu.dma_semaphore, #tpu.memory_space<semaphore_mem>> -> memref<!tpu.dma_semaphore, #tpu.memory_space<semaphore_mem>>
      tpu.enqueue_dma source(%535 : memref<1x1024xf32, #tpu.memory_space<any>>) target(%537 : memref<1x1024xf32, #tpu.memory_space<vmem>>) target_semaphore(%539 : memref<!tpu.dma_semaphore, #tpu.memory_space<semaphore_mem>>)
      %c2_i32_341 = arith.constant 2 : i32
      %c0_i32_342 = arith.constant 0 : i32
      %540 = tpu.memref_slice %arg2[%346, %c0_i32_342] : memref<16x1024xf32, #tpu.memory_space<any>> -> memref<1x1024xf32, #tpu.memory_space<any>>
      %c2_i32_343 = arith.constant 2 : i32
      %c0_i32_344 = arith.constant 0 : i32
      %541 = tpu.memref_slice %arg5[%1, %c2_i32_343, %c0_i32_344] : memref<2x64x1024xf32, #tpu.memory_space<vmem>> -> memref<1x1x1024xf32, #tpu.memory_space<vmem>>
      %542 = tpu.memref_squeeze %541 : memref<1x1x1024xf32, #tpu.memory_space<vmem>> -> memref<1x1024xf32, #tpu.memory_space<vmem>>
      %543 = tpu.memref_slice %arg6[%1, %c2_i32_341] : memref<2x64x!tpu.dma_semaphore, #tpu.memory_space<semaphore_mem>> -> memref<1x1x!tpu.dma_semaphore, #tpu.memory_space<semaphore_mem>>
      %544 = tpu.memref_squeeze %543 : memref<1x1x!tpu.dma_semaphore, #tpu.memory_space<semaphore_mem>> -> memref<!tpu.dma_semaphore, #tpu.memory_space<semaphore_mem>>
      tpu.enqueue_dma source(%540 : memref<1x1024xf32, #tpu.memory_space<any>>) target(%542 : memref<1x1024xf32, #tpu.memory_space<vmem>>) target_semaphore(%544 : memref<!tpu.dma_semaphore, #tpu.memory_space<semaphore_mem>>)
      %c3_i32_345 = arith.constant 3 : i32
      %c0_i32_346 = arith.constant 0 : i32
      %545 = tpu.memref_slice %arg2[%349, %c0_i32_346] : memref<16x1024xf32, #tpu.memory_space<any>> -> memref<1x1024xf32, #tpu.memory_space<any>>
      %c3_i32_347 = arith.constant 3 : i32
      %c0_i32_348 = arith.constant 0 : i32
      %546 = tpu.memref_slice %arg5[%1, %c3_i32_347, %c0_i32_348] : memref<2x64x1024xf32, #tpu.memory_space<vmem>> -> memref<1x1x1024xf32, #tpu.memory_space<vmem>>
      %547 = tpu.memref_squeeze %546 : memref<1x1x1024xf32, #tpu.memory_space<vmem>> -> memref<1x1024xf32, #tpu.memory_space<vmem>>
      %548 = tpu.memref_slice %arg6[%1, %c3_i32_345] : memref<2x64x!tpu.dma_semaphore, #tpu.memory_space<semaphore_mem>> -> memref<1x1x!tpu.dma_semaphore, #tpu.memory_space<semaphore_mem>>
      %549 = tpu.memref_squeeze %548 : memref<1x1x!tpu.dma_semaphore, #tpu.memory_space<semaphore_mem>> -> memref<!tpu.dma_semaphore, #tpu.memory_space<semaphore_mem>>
      tpu.enqueue_dma source(%545 : memref<1x1024xf32, #tpu.memory_space<any>>) target(%547 : memref<1x1024xf32, #tpu.memory_space<vmem>>) target_semaphore(%549 : memref<!tpu.dma_semaphore, #tpu.memory_space<semaphore_mem>>)
      %c4_i32_349 = arith.constant 4 : i32
      %c0_i32_350 = arith.constant 0 : i32
      %550 = tpu.memref_slice %arg2[%352, %c0_i32_350] : memref<16x1024xf32, #tpu.memory_space<any>> -> memref<1x1024xf32, #tpu.memory_space<any>>
      %c4_i32_351 = arith.constant 4 : i32
      %c0_i32_352 = arith.constant 0 : i32
      %551 = tpu.memref_slice %arg5[%1, %c4_i32_351, %c0_i32_352] : memref<2x64x1024xf32, #tpu.memory_space<vmem>> -> memref<1x1x1024xf32, #tpu.memory_space<vmem>>
      %552 = tpu.memref_squeeze %551 : memref<1x1x1024xf32, #tpu.memory_space<vmem>> -> memref<1x1024xf32, #tpu.memory_space<vmem>>
      %553 = tpu.memref_slice %arg6[%1, %c4_i32_349] : memref<2x64x!tpu.dma_semaphore, #tpu.memory_space<semaphore_mem>> -> memref<1x1x!tpu.dma_semaphore, #tpu.memory_space<semaphore_mem>>
      %554 = tpu.memref_squeeze %553 : memref<1x1x!tpu.dma_semaphore, #tpu.memory_space<semaphore_mem>> -> memref<!tpu.dma_semaphore, #tpu.memory_space<semaphore_mem>>
      tpu.enqueue_dma source(%550 : memref<1x1024xf32, #tpu.memory_space<any>>) target(%552 : memref<1x1024xf32, #tpu.memory_space<vmem>>) target_semaphore(%554 : memref<!tpu.dma_semaphore, #tpu.memory_space<semaphore_mem>>)
      %c5_i32_353 = arith.constant 5 : i32
      %c0_i32_354 = arith.constant 0 : i32
      %555 = tpu.memref_slice %arg2[%355, %c0_i32_354] : memref<16x1024xf32, #tpu.memory_space<any>> -> memref<1x1024xf32, #tpu.memory_space<any>>
      %c5_i32_355 = arith.constant 5 : i32
      %c0_i32_356 = arith.constant 0 : i32
      %556 = tpu.memref_slice %arg5[%1, %c5_i32_355, %c0_i32_356] : memref<2x64x1024xf32, #tpu.memory_space<vmem>> -> memref<1x1x1024xf32, #tpu.memory_space<vmem>>
      %557 = tpu.memref_squeeze %556 : memref<1x1x1024xf32, #tpu.memory_space<vmem>> -> memref<1x1024xf32, #tpu.memory_space<vmem>>
      %558 = tpu.memref_slice %arg6[%1, %c5_i32_353] : memref<2x64x!tpu.dma_semaphore, #tpu.memory_space<semaphore_mem>> -> memref<1x1x!tpu.dma_semaphore, #tpu.memory_space<semaphore_mem>>
      %559 = tpu.memref_squeeze %558 : memref<1x1x!tpu.dma_semaphore, #tpu.memory_space<semaphore_mem>> -> memref<!tpu.dma_semaphore, #tpu.memory_space<semaphore_mem>>
      tpu.enqueue_dma source(%555 : memref<1x1024xf32, #tpu.memory_space<any>>) target(%557 : memref<1x1024xf32, #tpu.memory_space<vmem>>) target_semaphore(%559 : memref<!tpu.dma_semaphore, #tpu.memory_space<semaphore_mem>>)
      %c6_i32_357 = arith.constant 6 : i32
      %c0_i32_358 = arith.constant 0 : i32
      %560 = tpu.memref_slice %arg2[%358, %c0_i32_358] : memref<16x1024xf32, #tpu.memory_space<any>> -> memref<1x1024xf32, #tpu.memory_space<any>>
      %c6_i32_359 = arith.constant 6 : i32
      %c0_i32_360 = arith.constant 0 : i32
      %561 = tpu.memref_slice %arg5[%1, %c6_i32_359, %c0_i32_360] : memref<2x64x1024xf32, #tpu.memory_space<vmem>> -> memref<1x1x1024xf32, #tpu.memory_space<vmem>>
      %562 = tpu.memref_squeeze %561 : memref<1x1x1024xf32, #tpu.memory_space<vmem>> -> memref<1x1024xf32, #tpu.memory_space<vmem>>
      %563 = tpu.memref_slice %arg6[%1, %c6_i32_357] : memref<2x64x!tpu.dma_semaphore, #tpu.memory_space<semaphore_mem>> -> memref<1x1x!tpu.dma_semaphore, #tpu.memory_space<semaphore_mem>>
      %564 = tpu.memref_squeeze %563 : memref<1x1x!tpu.dma_semaphore, #tpu.memory_space<semaphore_mem>> -> memref<!tpu.dma_semaphore, #tpu.memory_space<semaphore_mem>>
      tpu.enqueue_dma source(%560 : memref<1x1024xf32, #tpu.memory_space<any>>) target(%562 : memref<1x1024xf32, #tpu.memory_space<vmem>>) target_semaphore(%564 : memref<!tpu.dma_semaphore, #tpu.memory_space<semaphore_mem>>)
      %c7_i32_361 = arith.constant 7 : i32
      %c0_i32_362 = arith.constant 0 : i32
      %565 = tpu.memref_slice %arg2[%361, %c0_i32_362] : memref<16x1024xf32, #tpu.memory_space<any>> -> memref<1x1024xf32, #tpu.memory_space<any>>
      %c7_i32_363 = arith.constant 7 : i32
      %c0_i32_364 = arith.constant 0 : i32
      %566 = tpu.memref_slice %arg5[%1, %c7_i32_363, %c0_i32_364] : memref<2x64x1024xf32, #tpu.memory_space<vmem>> -> memref<1x1x1024xf32, #tpu.memory_space<vmem>>
      %567 = tpu.memref_squeeze %566 : memref<1x1x1024xf32, #tpu.memory_space<vmem>> -> memref<1x1024xf32, #tpu.memory_space<vmem>>
      %568 = tpu.memref_slice %arg6[%1, %c7_i32_361] : memref<2x64x!tpu.dma_semaphore, #tpu.memory_space<semaphore_mem>> -> memref<1x1x!tpu.dma_semaphore, #tpu.memory_space<semaphore_mem>>
      %569 = tpu.memref_squeeze %568 : memref<1x1x!tpu.dma_semaphore, #tpu.memory_space<semaphore_mem>> -> memref<!tpu.dma_semaphore, #tpu.memory_space<semaphore_mem>>
      tpu.enqueue_dma source(%565 : memref<1x1024xf32, #tpu.memory_space<any>>) target(%567 : memref<1x1024xf32, #tpu.memory_space<vmem>>) target_semaphore(%569 : memref<!tpu.dma_semaphore, #tpu.memory_space<semaphore_mem>>)
      %c8_i32_365 = arith.constant 8 : i32
      %c0_i32_366 = arith.constant 0 : i32
      %570 = tpu.memref_slice %arg2[%364, %c0_i32_366] : memref<16x1024xf32, #tpu.memory_space<any>> -> memref<1x1024xf32, #tpu.memory_space<any>>
      %c8_i32_367 = arith.constant 8 : i32
      %c0_i32_368 = arith.constant 0 : i32
      %571 = tpu.memref_slice %arg5[%1, %c8_i32_367, %c0_i32_368] : memref<2x64x1024xf32, #tpu.memory_space<vmem>> -> memref<1x1x1024xf32, #tpu.memory_space<vmem>>
      %572 = tpu.memref_squeeze %571 : memref<1x1x1024xf32, #tpu.memory_space<vmem>> -> memref<1x1024xf32, #tpu.memory_space<vmem>>
      %573 = tpu.memref_slice %arg6[%1, %c8_i32_365] : memref<2x64x!tpu.dma_semaphore, #tpu.memory_space<semaphore_mem>> -> memref<1x1x!tpu.dma_semaphore, #tpu.memory_space<semaphore_mem>>
      %574 = tpu.memref_squeeze %573 : memref<1x1x!tpu.dma_semaphore, #tpu.memory_space<semaphore_mem>> -> memref<!tpu.dma_semaphore, #tpu.memory_space<semaphore_mem>>
      tpu.enqueue_dma source(%570 : memref<1x1024xf32, #tpu.memory_space<any>>) target(%572 : memref<1x1024xf32, #tpu.memory_space<vmem>>) target_semaphore(%574 : memref<!tpu.dma_semaphore, #tpu.memory_space<semaphore_mem>>)
      %c9_i32_369 = arith.constant 9 : i32
      %c0_i32_370 = arith.constant 0 : i32
      %575 = tpu.memref_slice %arg2[%367, %c0_i32_370] : memref<16x1024xf32, #tpu.memory_space<any>> -> memref<1x1024xf32, #tpu.memory_space<any>>
      %c9_i32_371 = arith.constant 9 : i32
      %c0_i32_372 = arith.constant 0 : i32
      %576 = tpu.memref_slice %arg5[%1, %c9_i32_371, %c0_i32_372] : memref<2x64x1024xf32, #tpu.memory_space<vmem>> -> memref<1x1x1024xf32, #tpu.memory_space<vmem>>
      %577 = tpu.memref_squeeze %576 : memref<1x1x1024xf32, #tpu.memory_space<vmem>> -> memref<1x1024xf32, #tpu.memory_space<vmem>>
      %578 = tpu.memref_slice %arg6[%1, %c9_i32_369] : memref<2x64x!tpu.dma_semaphore, #tpu.memory_space<semaphore_mem>> -> memref<1x1x!tpu.dma_semaphore, #tpu.memory_space<semaphore_mem>>
      %579 = tpu.memref_squeeze %578 : memref<1x1x!tpu.dma_semaphore, #tpu.memory_space<semaphore_mem>> -> memref<!tpu.dma_semaphore, #tpu.memory_space<semaphore_mem>>
      tpu.enqueue_dma source(%575 : memref<1x1024xf32, #tpu.memory_space<any>>) target(%577 : memref<1x1024xf32, #tpu.memory_space<vmem>>) target_semaphore(%579 : memref<!tpu.dma_semaphore, #tpu.memory_space<semaphore_mem>>)
      %c10_i32_373 = arith.constant 10 : i32
      %c0_i32_374 = arith.constant 0 : i32
      %580 = tpu.memref_slice %arg2[%370, %c0_i32_374] : memref<16x1024xf32, #tpu.memory_space<any>> -> memref<1x1024xf32, #tpu.memory_space<any>>
      %c10_i32_375 = arith.constant 10 : i32
      %c0_i32_376 = arith.constant 0 : i32
      %581 = tpu.memref_slice %arg5[%1, %c10_i32_375, %c0_i32_376] : memref<2x64x1024xf32, #tpu.memory_space<vmem>> -> memref<1x1x1024xf32, #tpu.memory_space<vmem>>
      %582 = tpu.memref_squeeze %581 : memref<1x1x1024xf32, #tpu.memory_space<vmem>> -> memref<1x1024xf32, #tpu.memory_space<vmem>>
      %583 = tpu.memref_slice %arg6[%1, %c10_i32_373] : memref<2x64x!tpu.dma_semaphore, #tpu.memory_space<semaphore_mem>> -> memref<1x1x!tpu.dma_semaphore, #tpu.memory_space<semaphore_mem>>
      %584 = tpu.memref_squeeze %583 : memref<1x1x!tpu.dma_semaphore, #tpu.memory_space<semaphore_mem>> -> memref<!tpu.dma_semaphore, #tpu.memory_space<semaphore_mem>>
      tpu.enqueue_dma source(%580 : memref<1x1024xf32, #tpu.memory_space<any>>) target(%582 : memref<1x1024xf32, #tpu.memory_space<vmem>>) target_semaphore(%584 : memref<!tpu.dma_semaphore, #tpu.memory_space<semaphore_mem>>)
      %c11_i32_377 = arith.constant 11 : i32
      %c0_i32_378 = arith.constant 0 : i32
      %585 = tpu.memref_slice %arg2[%373, %c0_i32_378] : memref<16x1024xf32, #tpu.memory_space<any>> -> memref<1x1024xf32, #tpu.memory_space<any>>
      %c11_i32_379 = arith.constant 11 : i32
      %c0_i32_380 = arith.constant 0 : i32
      %586 = tpu.memref_slice %arg5[%1, %c11_i32_379, %c0_i32_380] : memref<2x64x1024xf32, #tpu.memory_space<vmem>> -> memref<1x1x1024xf32, #tpu.memory_space<vmem>>
      %587 = tpu.memref_squeeze %586 : memref<1x1x1024xf32, #tpu.memory_space<vmem>> -> memref<1x1024xf32, #tpu.memory_space<vmem>>
      %588 = tpu.memref_slice %arg6[%1, %c11_i32_377] : memref<2x64x!tpu.dma_semaphore, #tpu.memory_space<semaphore_mem>> -> memref<1x1x!tpu.dma_semaphore, #tpu.memory_space<semaphore_mem>>
      %589 = tpu.memref_squeeze %588 : memref<1x1x!tpu.dma_semaphore, #tpu.memory_space<semaphore_mem>> -> memref<!tpu.dma_semaphore, #tpu.memory_space<semaphore_mem>>
      tpu.enqueue_dma source(%585 : memref<1x1024xf32, #tpu.memory_space<any>>) target(%587 : memref<1x1024xf32, #tpu.memory_space<vmem>>) target_semaphore(%589 : memref<!tpu.dma_semaphore, #tpu.memory_space<semaphore_mem>>)
      %c12_i32_381 = arith.constant 12 : i32
      %c0_i32_382 = arith.constant 0 : i32
      %590 = tpu.memref_slice %arg2[%376, %c0_i32_382] : memref<16x1024xf32, #tpu.memory_space<any>> -> memref<1x1024xf32, #tpu.memory_space<any>>
      %c12_i32_383 = arith.constant 12 : i32
      %c0_i32_384 = arith.constant 0 : i32
      %591 = tpu.memref_slice %arg5[%1, %c12_i32_383, %c0_i32_384] : memref<2x64x1024xf32, #tpu.memory_space<vmem>> -> memref<1x1x1024xf32, #tpu.memory_space<vmem>>
      %592 = tpu.memref_squeeze %591 : memref<1x1x1024xf32, #tpu.memory_space<vmem>> -> memref<1x1024xf32, #tpu.memory_space<vmem>>
      %593 = tpu.memref_slice %arg6[%1, %c12_i32_381] : memref<2x64x!tpu.dma_semaphore, #tpu.memory_space<semaphore_mem>> -> memref<1x1x!tpu.dma_semaphore, #tpu.memory_space<semaphore_mem>>
      %594 = tpu.memref_squeeze %593 : memref<1x1x!tpu.dma_semaphore, #tpu.memory_space<semaphore_mem>> -> memref<!tpu.dma_semaphore, #tpu.memory_space<semaphore_mem>>
      tpu.enqueue_dma source(%590 : memref<1x1024xf32, #tpu.memory_space<any>>) target(%592 : memref<1x1024xf32, #tpu.memory_space<vmem>>) target_semaphore(%594 : memref<!tpu.dma_semaphore, #tpu.memory_space<semaphore_mem>>)
      %c13_i32_385 = arith.constant 13 : i32
      %c0_i32_386 = arith.constant 0 : i32
      %595 = tpu.memref_slice %arg2[%379, %c0_i32_386] : memref<16x1024xf32, #tpu.memory_space<any>> -> memref<1x1024xf32, #tpu.memory_space<any>>
      %c13_i32_387 = arith.constant 13 : i32
      %c0_i32_388 = arith.constant 0 : i32
      %596 = tpu.memref_slice %arg5[%1, %c13_i32_387, %c0_i32_388] : memref<2x64x1024xf32, #tpu.memory_space<vmem>> -> memref<1x1x1024xf32, #tpu.memory_space<vmem>>
      %597 = tpu.memref_squeeze %596 : memref<1x1x1024xf32, #tpu.memory_space<vmem>> -> memref<1x1024xf32, #tpu.memory_space<vmem>>
      %598 = tpu.memref_slice %arg6[%1, %c13_i32_385] : memref<2x64x!tpu.dma_semaphore, #tpu.memory_space<semaphore_mem>> -> memref<1x1x!tpu.dma_semaphore, #tpu.memory_space<semaphore_mem>>
      %599 = tpu.memref_squeeze %598 : memref<1x1x!tpu.dma_semaphore, #tpu.memory_space<semaphore_mem>> -> memref<!tpu.dma_semaphore, #tpu.memory_space<semaphore_mem>>
      tpu.enqueue_dma source(%595 : memref<1x1024xf32, #tpu.memory_space<any>>) target(%597 : memref<1x1024xf32, #tpu.memory_space<vmem>>) target_semaphore(%599 : memref<!tpu.dma_semaphore, #tpu.memory_space<semaphore_mem>>)
      %c14_i32_389 = arith.constant 14 : i32
      %c0_i32_390 = arith.constant 0 : i32
      %600 = tpu.memref_slice %arg2[%382, %c0_i32_390] : memref<16x1024xf32, #tpu.memory_space<any>> -> memref<1x1024xf32, #tpu.memory_space<any>>
      %c14_i32_391 = arith.constant 14 : i32
      %c0_i32_392 = arith.constant 0 : i32
      %601 = tpu.memref_slice %arg5[%1, %c14_i32_391, %c0_i32_392] : memref<2x64x1024xf32, #tpu.memory_space<vmem>> -> memref<1x1x1024xf32, #tpu.memory_space<vmem>>
      %602 = tpu.memref_squeeze %601 : memref<1x1x1024xf32, #tpu.memory_space<vmem>> -> memref<1x1024xf32, #tpu.memory_space<vmem>>
      %603 = tpu.memref_slice %arg6[%1, %c14_i32_389] : memref<2x64x!tpu.dma_semaphore, #tpu.memory_space<semaphore_mem>> -> memref<1x1x!tpu.dma_semaphore, #tpu.memory_space<semaphore_mem>>
      %604 = tpu.memref_squeeze %603 : memref<1x1x!tpu.dma_semaphore, #tpu.memory_space<semaphore_mem>> -> memref<!tpu.dma_semaphore, #tpu.memory_space<semaphore_mem>>
      tpu.enqueue_dma source(%600 : memref<1x1024xf32, #tpu.memory_space<any>>) target(%602 : memref<1x1024xf32, #tpu.memory_space<vmem>>) target_semaphore(%604 : memref<!tpu.dma_semaphore, #tpu.memory_space<semaphore_mem>>)
      %c15_i32_393 = arith.constant 15 : i32
      %c0_i32_394 = arith.constant 0 : i32
      %605 = tpu.memref_slice %arg2[%385, %c0_i32_394] : memref<16x1024xf32, #tpu.memory_space<any>> -> memref<1x1024xf32, #tpu.memory_space<any>>
      %c15_i32_395 = arith.constant 15 : i32
      %c0_i32_396 = arith.constant 0 : i32
      %606 = tpu.memref_slice %arg5[%1, %c15_i32_395, %c0_i32_396] : memref<2x64x1024xf32, #tpu.memory_space<vmem>> -> memref<1x1x1024xf32, #tpu.memory_space<vmem>>
      %607 = tpu.memref_squeeze %606 : memref<1x1x1024xf32, #tpu.memory_space<vmem>> -> memref<1x1024xf32, #tpu.memory_space<vmem>>
      %608 = tpu.memref_slice %arg6[%1, %c15_i32_393] : memref<2x64x!tpu.dma_semaphore, #tpu.memory_space<semaphore_mem>> -> memref<1x1x!tpu.dma_semaphore, #tpu.memory_space<semaphore_mem>>
      %609 = tpu.memref_squeeze %608 : memref<1x1x!tpu.dma_semaphore, #tpu.memory_space<semaphore_mem>> -> memref<!tpu.dma_semaphore, #tpu.memory_space<semaphore_mem>>
      tpu.enqueue_dma source(%605 : memref<1x1024xf32, #tpu.memory_space<any>>) target(%607 : memref<1x1024xf32, #tpu.memory_space<vmem>>) target_semaphore(%609 : memref<!tpu.dma_semaphore, #tpu.memory_space<semaphore_mem>>)
      %c16_i32_397 = arith.constant 16 : i32
      %c0_i32_398 = arith.constant 0 : i32
      %610 = tpu.memref_slice %arg2[%388, %c0_i32_398] : memref<16x1024xf32, #tpu.memory_space<any>> -> memref<1x1024xf32, #tpu.memory_space<any>>
      %c16_i32_399 = arith.constant 16 : i32
      %c0_i32_400 = arith.constant 0 : i32
      %611 = tpu.memref_slice %arg5[%1, %c16_i32_399, %c0_i32_400] : memref<2x64x1024xf32, #tpu.memory_space<vmem>> -> memref<1x1x1024xf32, #tpu.memory_space<vmem>>
      %612 = tpu.memref_squeeze %611 : memref<1x1x1024xf32, #tpu.memory_space<vmem>> -> memref<1x1024xf32, #tpu.memory_space<vmem>>
      %613 = tpu.memref_slice %arg6[%1, %c16_i32_397] : memref<2x64x!tpu.dma_semaphore, #tpu.memory_space<semaphore_mem>> -> memref<1x1x!tpu.dma_semaphore, #tpu.memory_space<semaphore_mem>>
      %614 = tpu.memref_squeeze %613 : memref<1x1x!tpu.dma_semaphore, #tpu.memory_space<semaphore_mem>> -> memref<!tpu.dma_semaphore, #tpu.memory_space<semaphore_mem>>
      tpu.enqueue_dma source(%610 : memref<1x1024xf32, #tpu.memory_space<any>>) target(%612 : memref<1x1024xf32, #tpu.memory_space<vmem>>) target_semaphore(%614 : memref<!tpu.dma_semaphore, #tpu.memory_space<semaphore_mem>>)
      %c17_i32_401 = arith.constant 17 : i32
      %c0_i32_402 = arith.constant 0 : i32
      %615 = tpu.memref_slice %arg2[%391, %c0_i32_402] : memref<16x1024xf32, #tpu.memory_space<any>> -> memref<1x1024xf32, #tpu.memory_space<any>>
      %c17_i32_403 = arith.constant 17 : i32
      %c0_i32_404 = arith.constant 0 : i32
      %616 = tpu.memref_slice %arg5[%1, %c17_i32_403, %c0_i32_404] : memref<2x64x1024xf32, #tpu.memory_space<vmem>> -> memref<1x1x1024xf32, #tpu.memory_space<vmem>>
      %617 = tpu.memref_squeeze %616 : memref<1x1x1024xf32, #tpu.memory_space<vmem>> -> memref<1x1024xf32, #tpu.memory_space<vmem>>
      %618 = tpu.memref_slice %arg6[%1, %c17_i32_401] : memref<2x64x!tpu.dma_semaphore, #tpu.memory_space<semaphore_mem>> -> memref<1x1x!tpu.dma_semaphore, #tpu.memory_space<semaphore_mem>>
      %619 = tpu.memref_squeeze %618 : memref<1x1x!tpu.dma_semaphore, #tpu.memory_space<semaphore_mem>> -> memref<!tpu.dma_semaphore, #tpu.memory_space<semaphore_mem>>
      tpu.enqueue_dma source(%615 : memref<1x1024xf32, #tpu.memory_space<any>>) target(%617 : memref<1x1024xf32, #tpu.memory_space<vmem>>) target_semaphore(%619 : memref<!tpu.dma_semaphore, #tpu.memory_space<semaphore_mem>>)
      %c18_i32_405 = arith.constant 18 : i32
      %c0_i32_406 = arith.constant 0 : i32
      %620 = tpu.memref_slice %arg2[%394, %c0_i32_406] : memref<16x1024xf32, #tpu.memory_space<any>> -> memref<1x1024xf32, #tpu.memory_space<any>>
      %c18_i32_407 = arith.constant 18 : i32
      %c0_i32_408 = arith.constant 0 : i32
      %621 = tpu.memref_slice %arg5[%1, %c18_i32_407, %c0_i32_408] : memref<2x64x1024xf32, #tpu.memory_space<vmem>> -> memref<1x1x1024xf32, #tpu.memory_space<vmem>>
      %622 = tpu.memref_squeeze %621 : memref<1x1x1024xf32, #tpu.memory_space<vmem>> -> memref<1x1024xf32, #tpu.memory_space<vmem>>
      %623 = tpu.memref_slice %arg6[%1, %c18_i32_405] : memref<2x64x!tpu.dma_semaphore, #tpu.memory_space<semaphore_mem>> -> memref<1x1x!tpu.dma_semaphore, #tpu.memory_space<semaphore_mem>>
      %624 = tpu.memref_squeeze %623 : memref<1x1x!tpu.dma_semaphore, #tpu.memory_space<semaphore_mem>> -> memref<!tpu.dma_semaphore, #tpu.memory_space<semaphore_mem>>
      tpu.enqueue_dma source(%620 : memref<1x1024xf32, #tpu.memory_space<any>>) target(%622 : memref<1x1024xf32, #tpu.memory_space<vmem>>) target_semaphore(%624 : memref<!tpu.dma_semaphore, #tpu.memory_space<semaphore_mem>>)
      %c19_i32_409 = arith.constant 19 : i32
      %c0_i32_410 = arith.constant 0 : i32
      %625 = tpu.memref_slice %arg2[%397, %c0_i32_410] : memref<16x1024xf32, #tpu.memory_space<any>> -> memref<1x1024xf32, #tpu.memory_space<any>>
      %c19_i32_411 = arith.constant 19 : i32
      %c0_i32_412 = arith.constant 0 : i32
      %626 = tpu.memref_slice %arg5[%1, %c19_i32_411, %c0_i32_412] : memref<2x64x1024xf32, #tpu.memory_space<vmem>> -> memref<1x1x1024xf32, #tpu.memory_space<vmem>>
      %627 = tpu.memref_squeeze %626 : memref<1x1x1024xf32, #tpu.memory_space<vmem>> -> memref<1x1024xf32, #tpu.memory_space<vmem>>
      %628 = tpu.memref_slice %arg6[%1, %c19_i32_409] : memref<2x64x!tpu.dma_semaphore, #tpu.memory_space<semaphore_mem>> -> memref<1x1x!tpu.dma_semaphore, #tpu.memory_space<semaphore_mem>>
      %629 = tpu.memref_squeeze %628 : memref<1x1x!tpu.dma_semaphore, #tpu.memory_space<semaphore_mem>> -> memref<!tpu.dma_semaphore, #tpu.memory_space<semaphore_mem>>
      tpu.enqueue_dma source(%625 : memref<1x1024xf32, #tpu.memory_space<any>>) target(%627 : memref<1x1024xf32, #tpu.memory_space<vmem>>) target_semaphore(%629 : memref<!tpu.dma_semaphore, #tpu.memory_space<semaphore_mem>>)
      %c20_i32_413 = arith.constant 20 : i32
      %c0_i32_414 = arith.constant 0 : i32
      %630 = tpu.memref_slice %arg2[%400, %c0_i32_414] : memref<16x1024xf32, #tpu.memory_space<any>> -> memref<1x1024xf32, #tpu.memory_space<any>>
      %c20_i32_415 = arith.constant 20 : i32
      %c0_i32_416 = arith.constant 0 : i32
      %631 = tpu.memref_slice %arg5[%1, %c20_i32_415, %c0_i32_416] : memref<2x64x1024xf32, #tpu.memory_space<vmem>> -> memref<1x1x1024xf32, #tpu.memory_space<vmem>>
      %632 = tpu.memref_squeeze %631 : memref<1x1x1024xf32, #tpu.memory_space<vmem>> -> memref<1x1024xf32, #tpu.memory_space<vmem>>
      %633 = tpu.memref_slice %arg6[%1, %c20_i32_413] : memref<2x64x!tpu.dma_semaphore, #tpu.memory_space<semaphore_mem>> -> memref<1x1x!tpu.dma_semaphore, #tpu.memory_space<semaphore_mem>>
      %634 = tpu.memref_squeeze %633 : memref<1x1x!tpu.dma_semaphore, #tpu.memory_space<semaphore_mem>> -> memref<!tpu.dma_semaphore, #tpu.memory_space<semaphore_mem>>
      tpu.enqueue_dma source(%630 : memref<1x1024xf32, #tpu.memory_space<any>>) target(%632 : memref<1x1024xf32, #tpu.memory_space<vmem>>) target_semaphore(%634 : memref<!tpu.dma_semaphore, #tpu.memory_space<semaphore_mem>>)
      %c21_i32_417 = arith.constant 21 : i32
      %c0_i32_418 = arith.constant 0 : i32
      %635 = tpu.memref_slice %arg2[%403, %c0_i32_418] : memref<16x1024xf32, #tpu.memory_space<any>> -> memref<1x1024xf32, #tpu.memory_space<any>>
      %c21_i32_419 = arith.constant 21 : i32
      %c0_i32_420 = arith.constant 0 : i32
      %636 = tpu.memref_slice %arg5[%1, %c21_i32_419, %c0_i32_420] : memref<2x64x1024xf32, #tpu.memory_space<vmem>> -> memref<1x1x1024xf32, #tpu.memory_space<vmem>>
      %637 = tpu.memref_squeeze %636 : memref<1x1x1024xf32, #tpu.memory_space<vmem>> -> memref<1x1024xf32, #tpu.memory_space<vmem>>
      %638 = tpu.memref_slice %arg6[%1, %c21_i32_417] : memref<2x64x!tpu.dma_semaphore, #tpu.memory_space<semaphore_mem>> -> memref<1x1x!tpu.dma_semaphore, #tpu.memory_space<semaphore_mem>>
      %639 = tpu.memref_squeeze %638 : memref<1x1x!tpu.dma_semaphore, #tpu.memory_space<semaphore_mem>> -> memref<!tpu.dma_semaphore, #tpu.memory_space<semaphore_mem>>
      tpu.enqueue_dma source(%635 : memref<1x1024xf32, #tpu.memory_space<any>>) target(%637 : memref<1x1024xf32, #tpu.memory_space<vmem>>) target_semaphore(%639 : memref<!tpu.dma_semaphore, #tpu.memory_space<semaphore_mem>>)
      %c22_i32_421 = arith.constant 22 : i32
      %c0_i32_422 = arith.constant 0 : i32
      %640 = tpu.memref_slice %arg2[%406, %c0_i32_422] : memref<16x1024xf32, #tpu.memory_space<any>> -> memref<1x1024xf32, #tpu.memory_space<any>>
      %c22_i32_423 = arith.constant 22 : i32
      %c0_i32_424 = arith.constant 0 : i32
      %641 = tpu.memref_slice %arg5[%1, %c22_i32_423, %c0_i32_424] : memref<2x64x1024xf32, #tpu.memory_space<vmem>> -> memref<1x1x1024xf32, #tpu.memory_space<vmem>>
      %642 = tpu.memref_squeeze %641 : memref<1x1x1024xf32, #tpu.memory_space<vmem>> -> memref<1x1024xf32, #tpu.memory_space<vmem>>
      %643 = tpu.memref_slice %arg6[%1, %c22_i32_421] : memref<2x64x!tpu.dma_semaphore, #tpu.memory_space<semaphore_mem>> -> memref<1x1x!tpu.dma_semaphore, #tpu.memory_space<semaphore_mem>>
      %644 = tpu.memref_squeeze %643 : memref<1x1x!tpu.dma_semaphore, #tpu.memory_space<semaphore_mem>> -> memref<!tpu.dma_semaphore, #tpu.memory_space<semaphore_mem>>
      tpu.enqueue_dma source(%640 : memref<1x1024xf32, #tpu.memory_space<any>>) target(%642 : memref<1x1024xf32, #tpu.memory_space<vmem>>) target_semaphore(%644 : memref<!tpu.dma_semaphore, #tpu.memory_space<semaphore_mem>>)
      %c23_i32_425 = arith.constant 23 : i32
      %c0_i32_426 = arith.constant 0 : i32
      %645 = tpu.memref_slice %arg2[%409, %c0_i32_426] : memref<16x1024xf32, #tpu.memory_space<any>> -> memref<1x1024xf32, #tpu.memory_space<any>>
      %c23_i32_427 = arith.constant 23 : i32
      %c0_i32_428 = arith.constant 0 : i32
      %646 = tpu.memref_slice %arg5[%1, %c23_i32_427, %c0_i32_428] : memref<2x64x1024xf32, #tpu.memory_space<vmem>> -> memref<1x1x1024xf32, #tpu.memory_space<vmem>>
      %647 = tpu.memref_squeeze %646 : memref<1x1x1024xf32, #tpu.memory_space<vmem>> -> memref<1x1024xf32, #tpu.memory_space<vmem>>
      %648 = tpu.memref_slice %arg6[%1, %c23_i32_425] : memref<2x64x!tpu.dma_semaphore, #tpu.memory_space<semaphore_mem>> -> memref<1x1x!tpu.dma_semaphore, #tpu.memory_space<semaphore_mem>>
      %649 = tpu.memref_squeeze %648 : memref<1x1x!tpu.dma_semaphore, #tpu.memory_space<semaphore_mem>> -> memref<!tpu.dma_semaphore, #tpu.memory_space<semaphore_mem>>
      tpu.enqueue_dma source(%645 : memref<1x1024xf32, #tpu.memory_space<any>>) target(%647 : memref<1x1024xf32, #tpu.memory_space<vmem>>) target_semaphore(%649 : memref<!tpu.dma_semaphore, #tpu.memory_space<semaphore_mem>>)
      %c24_i32_429 = arith.constant 24 : i32
      %c0_i32_430 = arith.constant 0 : i32
      %650 = tpu.memref_slice %arg2[%412, %c0_i32_430] : memref<16x1024xf32, #tpu.memory_space<any>> -> memref<1x1024xf32, #tpu.memory_space<any>>
      %c24_i32_431 = arith.constant 24 : i32
      %c0_i32_432 = arith.constant 0 : i32
      %651 = tpu.memref_slice %arg5[%1, %c24_i32_431, %c0_i32_432] : memref<2x64x1024xf32, #tpu.memory_space<vmem>> -> memref<1x1x1024xf32, #tpu.memory_space<vmem>>
      %652 = tpu.memref_squeeze %651 : memref<1x1x1024xf32, #tpu.memory_space<vmem>> -> memref<1x1024xf32, #tpu.memory_space<vmem>>
      %653 = tpu.memref_slice %arg6[%1, %c24_i32_429] : memref<2x64x!tpu.dma_semaphore, #tpu.memory_space<semaphore_mem>> -> memref<1x1x!tpu.dma_semaphore, #tpu.memory_space<semaphore_mem>>
      %654 = tpu.memref_squeeze %653 : memref<1x1x!tpu.dma_semaphore, #tpu.memory_space<semaphore_mem>> -> memref<!tpu.dma_semaphore, #tpu.memory_space<semaphore_mem>>
      tpu.enqueue_dma source(%650 : memref<1x1024xf32, #tpu.memory_space<any>>) target(%652 : memref<1x1024xf32, #tpu.memory_space<vmem>>) target_semaphore(%654 : memref<!tpu.dma_semaphore, #tpu.memory_space<semaphore_mem>>)
      %c25_i32_433 = arith.constant 25 : i32
      %c0_i32_434 = arith.constant 0 : i32
      %655 = tpu.memref_slice %arg2[%415, %c0_i32_434] : memref<16x1024xf32, #tpu.memory_space<any>> -> memref<1x1024xf32, #tpu.memory_space<any>>
      %c25_i32_435 = arith.constant 25 : i32
      %c0_i32_436 = arith.constant 0 : i32
      %656 = tpu.memref_slice %arg5[%1, %c25_i32_435, %c0_i32_436] : memref<2x64x1024xf32, #tpu.memory_space<vmem>> -> memref<1x1x1024xf32, #tpu.memory_space<vmem>>
      %657 = tpu.memref_squeeze %656 : memref<1x1x1024xf32, #tpu.memory_space<vmem>> -> memref<1x1024xf32, #tpu.memory_space<vmem>>
      %658 = tpu.memref_slice %arg6[%1, %c25_i32_433] : memref<2x64x!tpu.dma_semaphore, #tpu.memory_space<semaphore_mem>> -> memref<1x1x!tpu.dma_semaphore, #tpu.memory_space<semaphore_mem>>
      %659 = tpu.memref_squeeze %658 : memref<1x1x!tpu.dma_semaphore, #tpu.memory_space<semaphore_mem>> -> memref<!tpu.dma_semaphore, #tpu.memory_space<semaphore_mem>>
      tpu.enqueue_dma source(%655 : memref<1x1024xf32, #tpu.memory_space<any>>) target(%657 : memref<1x1024xf32, #tpu.memory_space<vmem>>) target_semaphore(%659 : memref<!tpu.dma_semaphore, #tpu.memory_space<semaphore_mem>>)
      %c26_i32_437 = arith.constant 26 : i32
      %c0_i32_438 = arith.constant 0 : i32
      %660 = tpu.memref_slice %arg2[%418, %c0_i32_438] : memref<16x1024xf32, #tpu.memory_space<any>> -> memref<1x1024xf32, #tpu.memory_space<any>>
      %c26_i32_439 = arith.constant 26 : i32
      %c0_i32_440 = arith.constant 0 : i32
      %661 = tpu.memref_slice %arg5[%1, %c26_i32_439, %c0_i32_440] : memref<2x64x1024xf32, #tpu.memory_space<vmem>> -> memref<1x1x1024xf32, #tpu.memory_space<vmem>>
      %662 = tpu.memref_squeeze %661 : memref<1x1x1024xf32, #tpu.memory_space<vmem>> -> memref<1x1024xf32, #tpu.memory_space<vmem>>
      %663 = tpu.memref_slice %arg6[%1, %c26_i32_437] : memref<2x64x!tpu.dma_semaphore, #tpu.memory_space<semaphore_mem>> -> memref<1x1x!tpu.dma_semaphore, #tpu.memory_space<semaphore_mem>>
      %664 = tpu.memref_squeeze %663 : memref<1x1x!tpu.dma_semaphore, #tpu.memory_space<semaphore_mem>> -> memref<!tpu.dma_semaphore, #tpu.memory_space<semaphore_mem>>
      tpu.enqueue_dma source(%660 : memref<1x1024xf32, #tpu.memory_space<any>>) target(%662 : memref<1x1024xf32, #tpu.memory_space<vmem>>) target_semaphore(%664 : memref<!tpu.dma_semaphore, #tpu.memory_space<semaphore_mem>>)
      %c27_i32_441 = arith.constant 27 : i32
      %c0_i32_442 = arith.constant 0 : i32
      %665 = tpu.memref_slice %arg2[%421, %c0_i32_442] : memref<16x1024xf32, #tpu.memory_space<any>> -> memref<1x1024xf32, #tpu.memory_space<any>>
      %c27_i32_443 = arith.constant 27 : i32
      %c0_i32_444 = arith.constant 0 : i32
      %666 = tpu.memref_slice %arg5[%1, %c27_i32_443, %c0_i32_444] : memref<2x64x1024xf32, #tpu.memory_space<vmem>> -> memref<1x1x1024xf32, #tpu.memory_space<vmem>>
      %667 = tpu.memref_squeeze %666 : memref<1x1x1024xf32, #tpu.memory_space<vmem>> -> memref<1x1024xf32, #tpu.memory_space<vmem>>
      %668 = tpu.memref_slice %arg6[%1, %c27_i32_441] : memref<2x64x!tpu.dma_semaphore, #tpu.memory_space<semaphore_mem>> -> memref<1x1x!tpu.dma_semaphore, #tpu.memory_space<semaphore_mem>>
      %669 = tpu.memref_squeeze %668 : memref<1x1x!tpu.dma_semaphore, #tpu.memory_space<semaphore_mem>> -> memref<!tpu.dma_semaphore, #tpu.memory_space<semaphore_mem>>
      tpu.enqueue_dma source(%665 : memref<1x1024xf32, #tpu.memory_space<any>>) target(%667 : memref<1x1024xf32, #tpu.memory_space<vmem>>) target_semaphore(%669 : memref<!tpu.dma_semaphore, #tpu.memory_space<semaphore_mem>>)
      %c28_i32_445 = arith.constant 28 : i32
      %c0_i32_446 = arith.constant 0 : i32
      %670 = tpu.memref_slice %arg2[%424, %c0_i32_446] : memref<16x1024xf32, #tpu.memory_space<any>> -> memref<1x1024xf32, #tpu.memory_space<any>>
      %c28_i32_447 = arith.constant 28 : i32
      %c0_i32_448 = arith.constant 0 : i32
      %671 = tpu.memref_slice %arg5[%1, %c28_i32_447, %c0_i32_448] : memref<2x64x1024xf32, #tpu.memory_space<vmem>> -> memref<1x1x1024xf32, #tpu.memory_space<vmem>>
      %672 = tpu.memref_squeeze %671 : memref<1x1x1024xf32, #tpu.memory_space<vmem>> -> memref<1x1024xf32, #tpu.memory_space<vmem>>
      %673 = tpu.memref_slice %arg6[%1, %c28_i32_445] : memref<2x64x!tpu.dma_semaphore, #tpu.memory_space<semaphore_mem>> -> memref<1x1x!tpu.dma_semaphore, #tpu.memory_space<semaphore_mem>>
      %674 = tpu.memref_squeeze %673 : memref<1x1x!tpu.dma_semaphore, #tpu.memory_space<semaphore_mem>> -> memref<!tpu.dma_semaphore, #tpu.memory_space<semaphore_mem>>
      tpu.enqueue_dma source(%670 : memref<1x1024xf32, #tpu.memory_space<any>>) target(%672 : memref<1x1024xf32, #tpu.memory_space<vmem>>) target_semaphore(%674 : memref<!tpu.dma_semaphore, #tpu.memory_space<semaphore_mem>>)
      %c29_i32_449 = arith.constant 29 : i32
      %c0_i32_450 = arith.constant 0 : i32
      %675 = tpu.memref_slice %arg2[%427, %c0_i32_450] : memref<16x1024xf32, #tpu.memory_space<any>> -> memref<1x1024xf32, #tpu.memory_space<any>>
      %c29_i32_451 = arith.constant 29 : i32
      %c0_i32_452 = arith.constant 0 : i32
      %676 = tpu.memref_slice %arg5[%1, %c29_i32_451, %c0_i32_452] : memref<2x64x1024xf32, #tpu.memory_space<vmem>> -> memref<1x1x1024xf32, #tpu.memory_space<vmem>>
      %677 = tpu.memref_squeeze %676 : memref<1x1x1024xf32, #tpu.memory_space<vmem>> -> memref<1x1024xf32, #tpu.memory_space<vmem>>
      %678 = tpu.memref_slice %arg6[%1, %c29_i32_449] : memref<2x64x!tpu.dma_semaphore, #tpu.memory_space<semaphore_mem>> -> memref<1x1x!tpu.dma_semaphore, #tpu.memory_space<semaphore_mem>>
      %679 = tpu.memref_squeeze %678 : memref<1x1x!tpu.dma_semaphore, #tpu.memory_space<semaphore_mem>> -> memref<!tpu.dma_semaphore, #tpu.memory_space<semaphore_mem>>
      tpu.enqueue_dma source(%675 : memref<1x1024xf32, #tpu.memory_space<any>>) target(%677 : memref<1x1024xf32, #tpu.memory_space<vmem>>) target_semaphore(%679 : memref<!tpu.dma_semaphore, #tpu.memory_space<semaphore_mem>>)
      %c30_i32_453 = arith.constant 30 : i32
      %c0_i32_454 = arith.constant 0 : i32
      %680 = tpu.memref_slice %arg2[%430, %c0_i32_454] : memref<16x1024xf32, #tpu.memory_space<any>> -> memref<1x1024xf32, #tpu.memory_space<any>>
      %c30_i32_455 = arith.constant 30 : i32
      %c0_i32_456 = arith.constant 0 : i32
      %681 = tpu.memref_slice %arg5[%1, %c30_i32_455, %c0_i32_456] : memref<2x64x1024xf32, #tpu.memory_space<vmem>> -> memref<1x1x1024xf32, #tpu.memory_space<vmem>>
      %682 = tpu.memref_squeeze %681 : memref<1x1x1024xf32, #tpu.memory_space<vmem>> -> memref<1x1024xf32, #tpu.memory_space<vmem>>
      %683 = tpu.memref_slice %arg6[%1, %c30_i32_453] : memref<2x64x!tpu.dma_semaphore, #tpu.memory_space<semaphore_mem>> -> memref<1x1x!tpu.dma_semaphore, #tpu.memory_space<semaphore_mem>>
      %684 = tpu.memref_squeeze %683 : memref<1x1x!tpu.dma_semaphore, #tpu.memory_space<semaphore_mem>> -> memref<!tpu.dma_semaphore, #tpu.memory_space<semaphore_mem>>
      tpu.enqueue_dma source(%680 : memref<1x1024xf32, #tpu.memory_space<any>>) target(%682 : memref<1x1024xf32, #tpu.memory_space<vmem>>) target_semaphore(%684 : memref<!tpu.dma_semaphore, #tpu.memory_space<semaphore_mem>>)
      %c31_i32_457 = arith.constant 31 : i32
      %c0_i32_458 = arith.constant 0 : i32
      %685 = tpu.memref_slice %arg2[%433, %c0_i32_458] : memref<16x1024xf32, #tpu.memory_space<any>> -> memref<1x1024xf32, #tpu.memory_space<any>>
      %c31_i32_459 = arith.constant 31 : i32
      %c0_i32_460 = arith.constant 0 : i32
      %686 = tpu.memref_slice %arg5[%1, %c31_i32_459, %c0_i32_460] : memref<2x64x1024xf32, #tpu.memory_space<vmem>> -> memref<1x1x1024xf32, #tpu.memory_space<vmem>>
      %687 = tpu.memref_squeeze %686 : memref<1x1x1024xf32, #tpu.memory_space<vmem>> -> memref<1x1024xf32, #tpu.memory_space<vmem>>
      %688 = tpu.memref_slice %arg6[%1, %c31_i32_457] : memref<2x64x!tpu.dma_semaphore, #tpu.memory_space<semaphore_mem>> -> memref<1x1x!tpu.dma_semaphore, #tpu.memory_space<semaphore_mem>>
      %689 = tpu.memref_squeeze %688 : memref<1x1x!tpu.dma_semaphore, #tpu.memory_space<semaphore_mem>> -> memref<!tpu.dma_semaphore, #tpu.memory_space<semaphore_mem>>
      tpu.enqueue_dma source(%685 : memref<1x1024xf32, #tpu.memory_space<any>>) target(%687 : memref<1x1024xf32, #tpu.memory_space<vmem>>) target_semaphore(%689 : memref<!tpu.dma_semaphore, #tpu.memory_space<semaphore_mem>>)
      %c32_i32_461 = arith.constant 32 : i32
      %c0_i32_462 = arith.constant 0 : i32
      %690 = tpu.memref_slice %arg2[%436, %c0_i32_462] : memref<16x1024xf32, #tpu.memory_space<any>> -> memref<1x1024xf32, #tpu.memory_space<any>>
      %c32_i32_463 = arith.constant 32 : i32
      %c0_i32_464 = arith.constant 0 : i32
      %691 = tpu.memref_slice %arg5[%1, %c32_i32_463, %c0_i32_464] : memref<2x64x1024xf32, #tpu.memory_space<vmem>> -> memref<1x1x1024xf32, #tpu.memory_space<vmem>>
      %692 = tpu.memref_squeeze %691 : memref<1x1x1024xf32, #tpu.memory_space<vmem>> -> memref<1x1024xf32, #tpu.memory_space<vmem>>
      %693 = tpu.memref_slice %arg6[%1, %c32_i32_461] : memref<2x64x!tpu.dma_semaphore, #tpu.memory_space<semaphore_mem>> -> memref<1x1x!tpu.dma_semaphore, #tpu.memory_space<semaphore_mem>>
      %694 = tpu.memref_squeeze %693 : memref<1x1x!tpu.dma_semaphore, #tpu.memory_space<semaphore_mem>> -> memref<!tpu.dma_semaphore, #tpu.memory_space<semaphore_mem>>
      tpu.enqueue_dma source(%690 : memref<1x1024xf32, #tpu.memory_space<any>>) target(%692 : memref<1x1024xf32, #tpu.memory_space<vmem>>) target_semaphore(%694 : memref<!tpu.dma_semaphore, #tpu.memory_space<semaphore_mem>>)
      %c33_i32_465 = arith.constant 33 : i32
      %c0_i32_466 = arith.constant 0 : i32
      %695 = tpu.memref_slice %arg2[%439, %c0_i32_466] : memref<16x1024xf32, #tpu.memory_space<any>> -> memref<1x1024xf32, #tpu.memory_space<any>>
      %c33_i32_467 = arith.constant 33 : i32
      %c0_i32_468 = arith.constant 0 : i32
      %696 = tpu.memref_slice %arg5[%1, %c33_i32_467, %c0_i32_468] : memref<2x64x1024xf32, #tpu.memory_space<vmem>> -> memref<1x1x1024xf32, #tpu.memory_space<vmem>>
      %697 = tpu.memref_squeeze %696 : memref<1x1x1024xf32, #tpu.memory_space<vmem>> -> memref<1x1024xf32, #tpu.memory_space<vmem>>
      %698 = tpu.memref_slice %arg6[%1, %c33_i32_465] : memref<2x64x!tpu.dma_semaphore, #tpu.memory_space<semaphore_mem>> -> memref<1x1x!tpu.dma_semaphore, #tpu.memory_space<semaphore_mem>>
      %699 = tpu.memref_squeeze %698 : memref<1x1x!tpu.dma_semaphore, #tpu.memory_space<semaphore_mem>> -> memref<!tpu.dma_semaphore, #tpu.memory_space<semaphore_mem>>
      tpu.enqueue_dma source(%695 : memref<1x1024xf32, #tpu.memory_space<any>>) target(%697 : memref<1x1024xf32, #tpu.memory_space<vmem>>) target_semaphore(%699 : memref<!tpu.dma_semaphore, #tpu.memory_space<semaphore_mem>>)
      %c34_i32_469 = arith.constant 34 : i32
      %c0_i32_470 = arith.constant 0 : i32
      %700 = tpu.memref_slice %arg2[%442, %c0_i32_470] : memref<16x1024xf32, #tpu.memory_space<any>> -> memref<1x1024xf32, #tpu.memory_space<any>>
      %c34_i32_471 = arith.constant 34 : i32
      %c0_i32_472 = arith.constant 0 : i32
      %701 = tpu.memref_slice %arg5[%1, %c34_i32_471, %c0_i32_472] : memref<2x64x1024xf32, #tpu.memory_space<vmem>> -> memref<1x1x1024xf32, #tpu.memory_space<vmem>>
      %702 = tpu.memref_squeeze %701 : memref<1x1x1024xf32, #tpu.memory_space<vmem>> -> memref<1x1024xf32, #tpu.memory_space<vmem>>
      %703 = tpu.memref_slice %arg6[%1, %c34_i32_469] : memref<2x64x!tpu.dma_semaphore, #tpu.memory_space<semaphore_mem>> -> memref<1x1x!tpu.dma_semaphore, #tpu.memory_space<semaphore_mem>>
      %704 = tpu.memref_squeeze %703 : memref<1x1x!tpu.dma_semaphore, #tpu.memory_space<semaphore_mem>> -> memref<!tpu.dma_semaphore, #tpu.memory_space<semaphore_mem>>
      tpu.enqueue_dma source(%700 : memref<1x1024xf32, #tpu.memory_space<any>>) target(%702 : memref<1x1024xf32, #tpu.memory_space<vmem>>) target_semaphore(%704 : memref<!tpu.dma_semaphore, #tpu.memory_space<semaphore_mem>>)
      %c35_i32_473 = arith.constant 35 : i32
      %c0_i32_474 = arith.constant 0 : i32
      %705 = tpu.memref_slice %arg2[%445, %c0_i32_474] : memref<16x1024xf32, #tpu.memory_space<any>> -> memref<1x1024xf32, #tpu.memory_space<any>>
      %c35_i32_475 = arith.constant 35 : i32
      %c0_i32_476 = arith.constant 0 : i32
      %706 = tpu.memref_slice %arg5[%1, %c35_i32_475, %c0_i32_476] : memref<2x64x1024xf32, #tpu.memory_space<vmem>> -> memref<1x1x1024xf32, #tpu.memory_space<vmem>>
      %707 = tpu.memref_squeeze %706 : memref<1x1x1024xf32, #tpu.memory_space<vmem>> -> memref<1x1024xf32, #tpu.memory_space<vmem>>
      %708 = tpu.memref_slice %arg6[%1, %c35_i32_473] : memref<2x64x!tpu.dma_semaphore, #tpu.memory_space<semaphore_mem>> -> memref<1x1x!tpu.dma_semaphore, #tpu.memory_space<semaphore_mem>>
      %709 = tpu.memref_squeeze %708 : memref<1x1x!tpu.dma_semaphore, #tpu.memory_space<semaphore_mem>> -> memref<!tpu.dma_semaphore, #tpu.memory_space<semaphore_mem>>
      tpu.enqueue_dma source(%705 : memref<1x1024xf32, #tpu.memory_space<any>>) target(%707 : memref<1x1024xf32, #tpu.memory_space<vmem>>) target_semaphore(%709 : memref<!tpu.dma_semaphore, #tpu.memory_space<semaphore_mem>>)
      %c36_i32_477 = arith.constant 36 : i32
      %c0_i32_478 = arith.constant 0 : i32
      %710 = tpu.memref_slice %arg2[%448, %c0_i32_478] : memref<16x1024xf32, #tpu.memory_space<any>> -> memref<1x1024xf32, #tpu.memory_space<any>>
      %c36_i32_479 = arith.constant 36 : i32
      %c0_i32_480 = arith.constant 0 : i32
      %711 = tpu.memref_slice %arg5[%1, %c36_i32_479, %c0_i32_480] : memref<2x64x1024xf32, #tpu.memory_space<vmem>> -> memref<1x1x1024xf32, #tpu.memory_space<vmem>>
      %712 = tpu.memref_squeeze %711 : memref<1x1x1024xf32, #tpu.memory_space<vmem>> -> memref<1x1024xf32, #tpu.memory_space<vmem>>
      %713 = tpu.memref_slice %arg6[%1, %c36_i32_477] : memref<2x64x!tpu.dma_semaphore, #tpu.memory_space<semaphore_mem>> -> memref<1x1x!tpu.dma_semaphore, #tpu.memory_space<semaphore_mem>>
      %714 = tpu.memref_squeeze %713 : memref<1x1x!tpu.dma_semaphore, #tpu.memory_space<semaphore_mem>> -> memref<!tpu.dma_semaphore, #tpu.memory_space<semaphore_mem>>
      tpu.enqueue_dma source(%710 : memref<1x1024xf32, #tpu.memory_space<any>>) target(%712 : memref<1x1024xf32, #tpu.memory_space<vmem>>) target_semaphore(%714 : memref<!tpu.dma_semaphore, #tpu.memory_space<semaphore_mem>>)
      %c37_i32_481 = arith.constant 37 : i32
      %c0_i32_482 = arith.constant 0 : i32
      %715 = tpu.memref_slice %arg2[%451, %c0_i32_482] : memref<16x1024xf32, #tpu.memory_space<any>> -> memref<1x1024xf32, #tpu.memory_space<any>>
      %c37_i32_483 = arith.constant 37 : i32
      %c0_i32_484 = arith.constant 0 : i32
      %716 = tpu.memref_slice %arg5[%1, %c37_i32_483, %c0_i32_484] : memref<2x64x1024xf32, #tpu.memory_space<vmem>> -> memref<1x1x1024xf32, #tpu.memory_space<vmem>>
      %717 = tpu.memref_squeeze %716 : memref<1x1x1024xf32, #tpu.memory_space<vmem>> -> memref<1x1024xf32, #tpu.memory_space<vmem>>
      %718 = tpu.memref_slice %arg6[%1, %c37_i32_481] : memref<2x64x!tpu.dma_semaphore, #tpu.memory_space<semaphore_mem>> -> memref<1x1x!tpu.dma_semaphore, #tpu.memory_space<semaphore_mem>>
      %719 = tpu.memref_squeeze %718 : memref<1x1x!tpu.dma_semaphore, #tpu.memory_space<semaphore_mem>> -> memref<!tpu.dma_semaphore, #tpu.memory_space<semaphore_mem>>
      tpu.enqueue_dma source(%715 : memref<1x1024xf32, #tpu.memory_space<any>>) target(%717 : memref<1x1024xf32, #tpu.memory_space<vmem>>) target_semaphore(%719 : memref<!tpu.dma_semaphore, #tpu.memory_space<semaphore_mem>>)
      %c38_i32_485 = arith.constant 38 : i32
      %c0_i32_486 = arith.constant 0 : i32
      %720 = tpu.memref_slice %arg2[%454, %c0_i32_486] : memref<16x1024xf32, #tpu.memory_space<any>> -> memref<1x1024xf32, #tpu.memory_space<any>>
      %c38_i32_487 = arith.constant 38 : i32
      %c0_i32_488 = arith.constant 0 : i32
      %721 = tpu.memref_slice %arg5[%1, %c38_i32_487, %c0_i32_488] : memref<2x64x1024xf32, #tpu.memory_space<vmem>> -> memref<1x1x1024xf32, #tpu.memory_space<vmem>>
      %722 = tpu.memref_squeeze %721 : memref<1x1x1024xf32, #tpu.memory_space<vmem>> -> memref<1x1024xf32, #tpu.memory_space<vmem>>
      %723 = tpu.memref_slice %arg6[%1, %c38_i32_485] : memref<2x64x!tpu.dma_semaphore, #tpu.memory_space<semaphore_mem>> -> memref<1x1x!tpu.dma_semaphore, #tpu.memory_space<semaphore_mem>>
      %724 = tpu.memref_squeeze %723 : memref<1x1x!tpu.dma_semaphore, #tpu.memory_space<semaphore_mem>> -> memref<!tpu.dma_semaphore, #tpu.memory_space<semaphore_mem>>
      tpu.enqueue_dma source(%720 : memref<1x1024xf32, #tpu.memory_space<any>>) target(%722 : memref<1x1024xf32, #tpu.memory_space<vmem>>) target_semaphore(%724 : memref<!tpu.dma_semaphore, #tpu.memory_space<semaphore_mem>>)
      %c39_i32_489 = arith.constant 39 : i32
      %c0_i32_490 = arith.constant 0 : i32
      %725 = tpu.memref_slice %arg2[%457, %c0_i32_490] : memref<16x1024xf32, #tpu.memory_space<any>> -> memref<1x1024xf32, #tpu.memory_space<any>>
      %c39_i32_491 = arith.constant 39 : i32
      %c0_i32_492 = arith.constant 0 : i32
      %726 = tpu.memref_slice %arg5[%1, %c39_i32_491, %c0_i32_492] : memref<2x64x1024xf32, #tpu.memory_space<vmem>> -> memref<1x1x1024xf32, #tpu.memory_space<vmem>>
      %727 = tpu.memref_squeeze %726 : memref<1x1x1024xf32, #tpu.memory_space<vmem>> -> memref<1x1024xf32, #tpu.memory_space<vmem>>
      %728 = tpu.memref_slice %arg6[%1, %c39_i32_489] : memref<2x64x!tpu.dma_semaphore, #tpu.memory_space<semaphore_mem>> -> memref<1x1x!tpu.dma_semaphore, #tpu.memory_space<semaphore_mem>>
      %729 = tpu.memref_squeeze %728 : memref<1x1x!tpu.dma_semaphore, #tpu.memory_space<semaphore_mem>> -> memref<!tpu.dma_semaphore, #tpu.memory_space<semaphore_mem>>
      tpu.enqueue_dma source(%725 : memref<1x1024xf32, #tpu.memory_space<any>>) target(%727 : memref<1x1024xf32, #tpu.memory_space<vmem>>) target_semaphore(%729 : memref<!tpu.dma_semaphore, #tpu.memory_space<semaphore_mem>>)
      %c40_i32_493 = arith.constant 40 : i32
      %c0_i32_494 = arith.constant 0 : i32
      %730 = tpu.memref_slice %arg2[%460, %c0_i32_494] : memref<16x1024xf32, #tpu.memory_space<any>> -> memref<1x1024xf32, #tpu.memory_space<any>>
      %c40_i32_495 = arith.constant 40 : i32
      %c0_i32_496 = arith.constant 0 : i32
      %731 = tpu.memref_slice %arg5[%1, %c40_i32_495, %c0_i32_496] : memref<2x64x1024xf32, #tpu.memory_space<vmem>> -> memref<1x1x1024xf32, #tpu.memory_space<vmem>>
      %732 = tpu.memref_squeeze %731 : memref<1x1x1024xf32, #tpu.memory_space<vmem>> -> memref<1x1024xf32, #tpu.memory_space<vmem>>
      %733 = tpu.memref_slice %arg6[%1, %c40_i32_493] : memref<2x64x!tpu.dma_semaphore, #tpu.memory_space<semaphore_mem>> -> memref<1x1x!tpu.dma_semaphore, #tpu.memory_space<semaphore_mem>>
      %734 = tpu.memref_squeeze %733 : memref<1x1x!tpu.dma_semaphore, #tpu.memory_space<semaphore_mem>> -> memref<!tpu.dma_semaphore, #tpu.memory_space<semaphore_mem>>
      tpu.enqueue_dma source(%730 : memref<1x1024xf32, #tpu.memory_space<any>>) target(%732 : memref<1x1024xf32, #tpu.memory_space<vmem>>) target_semaphore(%734 : memref<!tpu.dma_semaphore, #tpu.memory_space<semaphore_mem>>)
      %c41_i32_497 = arith.constant 41 : i32
      %c0_i32_498 = arith.constant 0 : i32
      %735 = tpu.memref_slice %arg2[%463, %c0_i32_498] : memref<16x1024xf32, #tpu.memory_space<any>> -> memref<1x1024xf32, #tpu.memory_space<any>>
      %c41_i32_499 = arith.constant 41 : i32
      %c0_i32_500 = arith.constant 0 : i32
      %736 = tpu.memref_slice %arg5[%1, %c41_i32_499, %c0_i32_500] : memref<2x64x1024xf32, #tpu.memory_space<vmem>> -> memref<1x1x1024xf32, #tpu.memory_space<vmem>>
      %737 = tpu.memref_squeeze %736 : memref<1x1x1024xf32, #tpu.memory_space<vmem>> -> memref<1x1024xf32, #tpu.memory_space<vmem>>
      %738 = tpu.memref_slice %arg6[%1, %c41_i32_497] : memref<2x64x!tpu.dma_semaphore, #tpu.memory_space<semaphore_mem>> -> memref<1x1x!tpu.dma_semaphore, #tpu.memory_space<semaphore_mem>>
      %739 = tpu.memref_squeeze %738 : memref<1x1x!tpu.dma_semaphore, #tpu.memory_space<semaphore_mem>> -> memref<!tpu.dma_semaphore, #tpu.memory_space<semaphore_mem>>
      tpu.enqueue_dma source(%735 : memref<1x1024xf32, #tpu.memory_space<any>>) target(%737 : memref<1x1024xf32, #tpu.memory_space<vmem>>) target_semaphore(%739 : memref<!tpu.dma_semaphore, #tpu.memory_space<semaphore_mem>>)
      %c42_i32_501 = arith.constant 42 : i32
      %c0_i32_502 = arith.constant 0 : i32
      %740 = tpu.memref_slice %arg2[%466, %c0_i32_502] : memref<16x1024xf32, #tpu.memory_space<any>> -> memref<1x1024xf32, #tpu.memory_space<any>>
      %c42_i32_503 = arith.constant 42 : i32
      %c0_i32_504 = arith.constant 0 : i32
      %741 = tpu.memref_slice %arg5[%1, %c42_i32_503, %c0_i32_504] : memref<2x64x1024xf32, #tpu.memory_space<vmem>> -> memref<1x1x1024xf32, #tpu.memory_space<vmem>>
      %742 = tpu.memref_squeeze %741 : memref<1x1x1024xf32, #tpu.memory_space<vmem>> -> memref<1x1024xf32, #tpu.memory_space<vmem>>
      %743 = tpu.memref_slice %arg6[%1, %c42_i32_501] : memref<2x64x!tpu.dma_semaphore, #tpu.memory_space<semaphore_mem>> -> memref<1x1x!tpu.dma_semaphore, #tpu.memory_space<semaphore_mem>>
      %744 = tpu.memref_squeeze %743 : memref<1x1x!tpu.dma_semaphore, #tpu.memory_space<semaphore_mem>> -> memref<!tpu.dma_semaphore, #tpu.memory_space<semaphore_mem>>
      tpu.enqueue_dma source(%740 : memref<1x1024xf32, #tpu.memory_space<any>>) target(%742 : memref<1x1024xf32, #tpu.memory_space<vmem>>) target_semaphore(%744 : memref<!tpu.dma_semaphore, #tpu.memory_space<semaphore_mem>>)
      %c43_i32_505 = arith.constant 43 : i32
      %c0_i32_506 = arith.constant 0 : i32
      %745 = tpu.memref_slice %arg2[%469, %c0_i32_506] : memref<16x1024xf32, #tpu.memory_space<any>> -> memref<1x1024xf32, #tpu.memory_space<any>>
      %c43_i32_507 = arith.constant 43 : i32
      %c0_i32_508 = arith.constant 0 : i32
      %746 = tpu.memref_slice %arg5[%1, %c43_i32_507, %c0_i32_508] : memref<2x64x1024xf32, #tpu.memory_space<vmem>> -> memref<1x1x1024xf32, #tpu.memory_space<vmem>>
      %747 = tpu.memref_squeeze %746 : memref<1x1x1024xf32, #tpu.memory_space<vmem>> -> memref<1x1024xf32, #tpu.memory_space<vmem>>
      %748 = tpu.memref_slice %arg6[%1, %c43_i32_505] : memref<2x64x!tpu.dma_semaphore, #tpu.memory_space<semaphore_mem>> -> memref<1x1x!tpu.dma_semaphore, #tpu.memory_space<semaphore_mem>>
      %749 = tpu.memref_squeeze %748 : memref<1x1x!tpu.dma_semaphore, #tpu.memory_space<semaphore_mem>> -> memref<!tpu.dma_semaphore, #tpu.memory_space<semaphore_mem>>
      tpu.enqueue_dma source(%745 : memref<1x1024xf32, #tpu.memory_space<any>>) target(%747 : memref<1x1024xf32, #tpu.memory_space<vmem>>) target_semaphore(%749 : memref<!tpu.dma_semaphore, #tpu.memory_space<semaphore_mem>>)
      %c44_i32_509 = arith.constant 44 : i32
      %c0_i32_510 = arith.constant 0 : i32
      %750 = tpu.memref_slice %arg2[%472, %c0_i32_510] : memref<16x1024xf32, #tpu.memory_space<any>> -> memref<1x1024xf32, #tpu.memory_space<any>>
      %c44_i32_511 = arith.constant 44 : i32
      %c0_i32_512 = arith.constant 0 : i32
      %751 = tpu.memref_slice %arg5[%1, %c44_i32_511, %c0_i32_512] : memref<2x64x1024xf32, #tpu.memory_space<vmem>> -> memref<1x1x1024xf32, #tpu.memory_space<vmem>>
      %752 = tpu.memref_squeeze %751 : memref<1x1x1024xf32, #tpu.memory_space<vmem>> -> memref<1x1024xf32, #tpu.memory_space<vmem>>
      %753 = tpu.memref_slice %arg6[%1, %c44_i32_509] : memref<2x64x!tpu.dma_semaphore, #tpu.memory_space<semaphore_mem>> -> memref<1x1x!tpu.dma_semaphore, #tpu.memory_space<semaphore_mem>>
      %754 = tpu.memref_squeeze %753 : memref<1x1x!tpu.dma_semaphore, #tpu.memory_space<semaphore_mem>> -> memref<!tpu.dma_semaphore, #tpu.memory_space<semaphore_mem>>
      tpu.enqueue_dma source(%750 : memref<1x1024xf32, #tpu.memory_space<any>>) target(%752 : memref<1x1024xf32, #tpu.memory_space<vmem>>) target_semaphore(%754 : memref<!tpu.dma_semaphore, #tpu.memory_space<semaphore_mem>>)
      %c45_i32_513 = arith.constant 45 : i32
      %c0_i32_514 = arith.constant 0 : i32
      %755 = tpu.memref_slice %arg2[%475, %c0_i32_514] : memref<16x1024xf32, #tpu.memory_space<any>> -> memref<1x1024xf32, #tpu.memory_space<any>>
      %c45_i32_515 = arith.constant 45 : i32
      %c0_i32_516 = arith.constant 0 : i32
      %756 = tpu.memref_slice %arg5[%1, %c45_i32_515, %c0_i32_516] : memref<2x64x1024xf32, #tpu.memory_space<vmem>> -> memref<1x1x1024xf32, #tpu.memory_space<vmem>>
      %757 = tpu.memref_squeeze %756 : memref<1x1x1024xf32, #tpu.memory_space<vmem>> -> memref<1x1024xf32, #tpu.memory_space<vmem>>
      %758 = tpu.memref_slice %arg6[%1, %c45_i32_513] : memref<2x64x!tpu.dma_semaphore, #tpu.memory_space<semaphore_mem>> -> memref<1x1x!tpu.dma_semaphore, #tpu.memory_space<semaphore_mem>>
      %759 = tpu.memref_squeeze %758 : memref<1x1x!tpu.dma_semaphore, #tpu.memory_space<semaphore_mem>> -> memref<!tpu.dma_semaphore, #tpu.memory_space<semaphore_mem>>
      tpu.enqueue_dma source(%755 : memref<1x1024xf32, #tpu.memory_space<any>>) target(%757 : memref<1x1024xf32, #tpu.memory_space<vmem>>) target_semaphore(%759 : memref<!tpu.dma_semaphore, #tpu.memory_space<semaphore_mem>>)
      %c46_i32_517 = arith.constant 46 : i32
      %c0_i32_518 = arith.constant 0 : i32
      %760 = tpu.memref_slice %arg2[%478, %c0_i32_518] : memref<16x1024xf32, #tpu.memory_space<any>> -> memref<1x1024xf32, #tpu.memory_space<any>>
      %c46_i32_519 = arith.constant 46 : i32
      %c0_i32_520 = arith.constant 0 : i32
      %761 = tpu.memref_slice %arg5[%1, %c46_i32_519, %c0_i32_520] : memref<2x64x1024xf32, #tpu.memory_space<vmem>> -> memref<1x1x1024xf32, #tpu.memory_space<vmem>>
      %762 = tpu.memref_squeeze %761 : memref<1x1x1024xf32, #tpu.memory_space<vmem>> -> memref<1x1024xf32, #tpu.memory_space<vmem>>
      %763 = tpu.memref_slice %arg6[%1, %c46_i32_517] : memref<2x64x!tpu.dma_semaphore, #tpu.memory_space<semaphore_mem>> -> memref<1x1x!tpu.dma_semaphore, #tpu.memory_space<semaphore_mem>>
      %764 = tpu.memref_squeeze %763 : memref<1x1x!tpu.dma_semaphore, #tpu.memory_space<semaphore_mem>> -> memref<!tpu.dma_semaphore, #tpu.memory_space<semaphore_mem>>
      tpu.enqueue_dma source(%760 : memref<1x1024xf32, #tpu.memory_space<any>>) target(%762 : memref<1x1024xf32, #tpu.memory_space<vmem>>) target_semaphore(%764 : memref<!tpu.dma_semaphore, #tpu.memory_space<semaphore_mem>>)
      %c47_i32_521 = arith.constant 47 : i32
      %c0_i32_522 = arith.constant 0 : i32
      %765 = tpu.memref_slice %arg2[%481, %c0_i32_522] : memref<16x1024xf32, #tpu.memory_space<any>> -> memref<1x1024xf32, #tpu.memory_space<any>>
      %c47_i32_523 = arith.constant 47 : i32
      %c0_i32_524 = arith.constant 0 : i32
      %766 = tpu.memref_slice %arg5[%1, %c47_i32_523, %c0_i32_524] : memref<2x64x1024xf32, #tpu.memory_space<vmem>> -> memref<1x1x1024xf32, #tpu.memory_space<vmem>>
      %767 = tpu.memref_squeeze %766 : memref<1x1x1024xf32, #tpu.memory_space<vmem>> -> memref<1x1024xf32, #tpu.memory_space<vmem>>
      %768 = tpu.memref_slice %arg6[%1, %c47_i32_521] : memref<2x64x!tpu.dma_semaphore, #tpu.memory_space<semaphore_mem>> -> memref<1x1x!tpu.dma_semaphore, #tpu.memory_space<semaphore_mem>>
      %769 = tpu.memref_squeeze %768 : memref<1x1x!tpu.dma_semaphore, #tpu.memory_space<semaphore_mem>> -> memref<!tpu.dma_semaphore, #tpu.memory_space<semaphore_mem>>
      tpu.enqueue_dma source(%765 : memref<1x1024xf32, #tpu.memory_space<any>>) target(%767 : memref<1x1024xf32, #tpu.memory_space<vmem>>) target_semaphore(%769 : memref<!tpu.dma_semaphore, #tpu.memory_space<semaphore_mem>>)
      %c48_i32_525 = arith.constant 48 : i32
      %c0_i32_526 = arith.constant 0 : i32
      %770 = tpu.memref_slice %arg2[%484, %c0_i32_526] : memref<16x1024xf32, #tpu.memory_space<any>> -> memref<1x1024xf32, #tpu.memory_space<any>>
      %c48_i32_527 = arith.constant 48 : i32
      %c0_i32_528 = arith.constant 0 : i32
      %771 = tpu.memref_slice %arg5[%1, %c48_i32_527, %c0_i32_528] : memref<2x64x1024xf32, #tpu.memory_space<vmem>> -> memref<1x1x1024xf32, #tpu.memory_space<vmem>>
      %772 = tpu.memref_squeeze %771 : memref<1x1x1024xf32, #tpu.memory_space<vmem>> -> memref<1x1024xf32, #tpu.memory_space<vmem>>
      %773 = tpu.memref_slice %arg6[%1, %c48_i32_525] : memref<2x64x!tpu.dma_semaphore, #tpu.memory_space<semaphore_mem>> -> memref<1x1x!tpu.dma_semaphore, #tpu.memory_space<semaphore_mem>>
      %774 = tpu.memref_squeeze %773 : memref<1x1x!tpu.dma_semaphore, #tpu.memory_space<semaphore_mem>> -> memref<!tpu.dma_semaphore, #tpu.memory_space<semaphore_mem>>
      tpu.enqueue_dma source(%770 : memref<1x1024xf32, #tpu.memory_space<any>>) target(%772 : memref<1x1024xf32, #tpu.memory_space<vmem>>) target_semaphore(%774 : memref<!tpu.dma_semaphore, #tpu.memory_space<semaphore_mem>>)
      %c49_i32_529 = arith.constant 49 : i32
      %c0_i32_530 = arith.constant 0 : i32
      %775 = tpu.memref_slice %arg2[%487, %c0_i32_530] : memref<16x1024xf32, #tpu.memory_space<any>> -> memref<1x1024xf32, #tpu.memory_space<any>>
      %c49_i32_531 = arith.constant 49 : i32
      %c0_i32_532 = arith.constant 0 : i32
      %776 = tpu.memref_slice %arg5[%1, %c49_i32_531, %c0_i32_532] : memref<2x64x1024xf32, #tpu.memory_space<vmem>> -> memref<1x1x1024xf32, #tpu.memory_space<vmem>>
      %777 = tpu.memref_squeeze %776 : memref<1x1x1024xf32, #tpu.memory_space<vmem>> -> memref<1x1024xf32, #tpu.memory_space<vmem>>
      %778 = tpu.memref_slice %arg6[%1, %c49_i32_529] : memref<2x64x!tpu.dma_semaphore, #tpu.memory_space<semaphore_mem>> -> memref<1x1x!tpu.dma_semaphore, #tpu.memory_space<semaphore_mem>>
      %779 = tpu.memref_squeeze %778 : memref<1x1x!tpu.dma_semaphore, #tpu.memory_space<semaphore_mem>> -> memref<!tpu.dma_semaphore, #tpu.memory_space<semaphore_mem>>
      tpu.enqueue_dma source(%775 : memref<1x1024xf32, #tpu.memory_space<any>>) target(%777 : memref<1x1024xf32, #tpu.memory_space<vmem>>) target_semaphore(%779 : memref<!tpu.dma_semaphore, #tpu.memory_space<semaphore_mem>>)
      %c50_i32_533 = arith.constant 50 : i32
      %c0_i32_534 = arith.constant 0 : i32
      %780 = tpu.memref_slice %arg2[%490, %c0_i32_534] : memref<16x1024xf32, #tpu.memory_space<any>> -> memref<1x1024xf32, #tpu.memory_space<any>>
      %c50_i32_535 = arith.constant 50 : i32
      %c0_i32_536 = arith.constant 0 : i32
      %781 = tpu.memref_slice %arg5[%1, %c50_i32_535, %c0_i32_536] : memref<2x64x1024xf32, #tpu.memory_space<vmem>> -> memref<1x1x1024xf32, #tpu.memory_space<vmem>>
      %782 = tpu.memref_squeeze %781 : memref<1x1x1024xf32, #tpu.memory_space<vmem>> -> memref<1x1024xf32, #tpu.memory_space<vmem>>
      %783 = tpu.memref_slice %arg6[%1, %c50_i32_533] : memref<2x64x!tpu.dma_semaphore, #tpu.memory_space<semaphore_mem>> -> memref<1x1x!tpu.dma_semaphore, #tpu.memory_space<semaphore_mem>>
      %784 = tpu.memref_squeeze %783 : memref<1x1x!tpu.dma_semaphore, #tpu.memory_space<semaphore_mem>> -> memref<!tpu.dma_semaphore, #tpu.memory_space<semaphore_mem>>
      tpu.enqueue_dma source(%780 : memref<1x1024xf32, #tpu.memory_space<any>>) target(%782 : memref<1x1024xf32, #tpu.memory_space<vmem>>) target_semaphore(%784 : memref<!tpu.dma_semaphore, #tpu.memory_space<semaphore_mem>>)
      %c51_i32_537 = arith.constant 51 : i32
      %c0_i32_538 = arith.constant 0 : i32
      %785 = tpu.memref_slice %arg2[%493, %c0_i32_538] : memref<16x1024xf32, #tpu.memory_space<any>> -> memref<1x1024xf32, #tpu.memory_space<any>>
      %c51_i32_539 = arith.constant 51 : i32
      %c0_i32_540 = arith.constant 0 : i32
      %786 = tpu.memref_slice %arg5[%1, %c51_i32_539, %c0_i32_540] : memref<2x64x1024xf32, #tpu.memory_space<vmem>> -> memref<1x1x1024xf32, #tpu.memory_space<vmem>>
      %787 = tpu.memref_squeeze %786 : memref<1x1x1024xf32, #tpu.memory_space<vmem>> -> memref<1x1024xf32, #tpu.memory_space<vmem>>
      %788 = tpu.memref_slice %arg6[%1, %c51_i32_537] : memref<2x64x!tpu.dma_semaphore, #tpu.memory_space<semaphore_mem>> -> memref<1x1x!tpu.dma_semaphore, #tpu.memory_space<semaphore_mem>>
      %789 = tpu.memref_squeeze %788 : memref<1x1x!tpu.dma_semaphore, #tpu.memory_space<semaphore_mem>> -> memref<!tpu.dma_semaphore, #tpu.memory_space<semaphore_mem>>
      tpu.enqueue_dma source(%785 : memref<1x1024xf32, #tpu.memory_space<any>>) target(%787 : memref<1x1024xf32, #tpu.memory_space<vmem>>) target_semaphore(%789 : memref<!tpu.dma_semaphore, #tpu.memory_space<semaphore_mem>>)
      %c52_i32_541 = arith.constant 52 : i32
      %c0_i32_542 = arith.constant 0 : i32
      %790 = tpu.memref_slice %arg2[%496, %c0_i32_542] : memref<16x1024xf32, #tpu.memory_space<any>> -> memref<1x1024xf32, #tpu.memory_space<any>>
      %c52_i32_543 = arith.constant 52 : i32
      %c0_i32_544 = arith.constant 0 : i32
      %791 = tpu.memref_slice %arg5[%1, %c52_i32_543, %c0_i32_544] : memref<2x64x1024xf32, #tpu.memory_space<vmem>> -> memref<1x1x1024xf32, #tpu.memory_space<vmem>>
      %792 = tpu.memref_squeeze %791 : memref<1x1x1024xf32, #tpu.memory_space<vmem>> -> memref<1x1024xf32, #tpu.memory_space<vmem>>
      %793 = tpu.memref_slice %arg6[%1, %c52_i32_541] : memref<2x64x!tpu.dma_semaphore, #tpu.memory_space<semaphore_mem>> -> memref<1x1x!tpu.dma_semaphore, #tpu.memory_space<semaphore_mem>>
      %794 = tpu.memref_squeeze %793 : memref<1x1x!tpu.dma_semaphore, #tpu.memory_space<semaphore_mem>> -> memref<!tpu.dma_semaphore, #tpu.memory_space<semaphore_mem>>
      tpu.enqueue_dma source(%790 : memref<1x1024xf32, #tpu.memory_space<any>>) target(%792 : memref<1x1024xf32, #tpu.memory_space<vmem>>) target_semaphore(%794 : memref<!tpu.dma_semaphore, #tpu.memory_space<semaphore_mem>>)
      %c53_i32_545 = arith.constant 53 : i32
      %c0_i32_546 = arith.constant 0 : i32
      %795 = tpu.memref_slice %arg2[%499, %c0_i32_546] : memref<16x1024xf32, #tpu.memory_space<any>> -> memref<1x1024xf32, #tpu.memory_space<any>>
      %c53_i32_547 = arith.constant 53 : i32
      %c0_i32_548 = arith.constant 0 : i32
      %796 = tpu.memref_slice %arg5[%1, %c53_i32_547, %c0_i32_548] : memref<2x64x1024xf32, #tpu.memory_space<vmem>> -> memref<1x1x1024xf32, #tpu.memory_space<vmem>>
      %797 = tpu.memref_squeeze %796 : memref<1x1x1024xf32, #tpu.memory_space<vmem>> -> memref<1x1024xf32, #tpu.memory_space<vmem>>
      %798 = tpu.memref_slice %arg6[%1, %c53_i32_545] : memref<2x64x!tpu.dma_semaphore, #tpu.memory_space<semaphore_mem>> -> memref<1x1x!tpu.dma_semaphore, #tpu.memory_space<semaphore_mem>>
      %799 = tpu.memref_squeeze %798 : memref<1x1x!tpu.dma_semaphore, #tpu.memory_space<semaphore_mem>> -> memref<!tpu.dma_semaphore, #tpu.memory_space<semaphore_mem>>
      tpu.enqueue_dma source(%795 : memref<1x1024xf32, #tpu.memory_space<any>>) target(%797 : memref<1x1024xf32, #tpu.memory_space<vmem>>) target_semaphore(%799 : memref<!tpu.dma_semaphore, #tpu.memory_space<semaphore_mem>>)
      %c54_i32_549 = arith.constant 54 : i32
      %c0_i32_550 = arith.constant 0 : i32
      %800 = tpu.memref_slice %arg2[%502, %c0_i32_550] : memref<16x1024xf32, #tpu.memory_space<any>> -> memref<1x1024xf32, #tpu.memory_space<any>>
      %c54_i32_551 = arith.constant 54 : i32
      %c0_i32_552 = arith.constant 0 : i32
      %801 = tpu.memref_slice %arg5[%1, %c54_i32_551, %c0_i32_552] : memref<2x64x1024xf32, #tpu.memory_space<vmem>> -> memref<1x1x1024xf32, #tpu.memory_space<vmem>>
      %802 = tpu.memref_squeeze %801 : memref<1x1x1024xf32, #tpu.memory_space<vmem>> -> memref<1x1024xf32, #tpu.memory_space<vmem>>
      %803 = tpu.memref_slice %arg6[%1, %c54_i32_549] : memref<2x64x!tpu.dma_semaphore, #tpu.memory_space<semaphore_mem>> -> memref<1x1x!tpu.dma_semaphore, #tpu.memory_space<semaphore_mem>>
      %804 = tpu.memref_squeeze %803 : memref<1x1x!tpu.dma_semaphore, #tpu.memory_space<semaphore_mem>> -> memref<!tpu.dma_semaphore, #tpu.memory_space<semaphore_mem>>
      tpu.enqueue_dma source(%800 : memref<1x1024xf32, #tpu.memory_space<any>>) target(%802 : memref<1x1024xf32, #tpu.memory_space<vmem>>) target_semaphore(%804 : memref<!tpu.dma_semaphore, #tpu.memory_space<semaphore_mem>>)
      %c55_i32_553 = arith.constant 55 : i32
      %c0_i32_554 = arith.constant 0 : i32
      %805 = tpu.memref_slice %arg2[%505, %c0_i32_554] : memref<16x1024xf32, #tpu.memory_space<any>> -> memref<1x1024xf32, #tpu.memory_space<any>>
      %c55_i32_555 = arith.constant 55 : i32
      %c0_i32_556 = arith.constant 0 : i32
      %806 = tpu.memref_slice %arg5[%1, %c55_i32_555, %c0_i32_556] : memref<2x64x1024xf32, #tpu.memory_space<vmem>> -> memref<1x1x1024xf32, #tpu.memory_space<vmem>>
      %807 = tpu.memref_squeeze %806 : memref<1x1x1024xf32, #tpu.memory_space<vmem>> -> memref<1x1024xf32, #tpu.memory_space<vmem>>
      %808 = tpu.memref_slice %arg6[%1, %c55_i32_553] : memref<2x64x!tpu.dma_semaphore, #tpu.memory_space<semaphore_mem>> -> memref<1x1x!tpu.dma_semaphore, #tpu.memory_space<semaphore_mem>>
      %809 = tpu.memref_squeeze %808 : memref<1x1x!tpu.dma_semaphore, #tpu.memory_space<semaphore_mem>> -> memref<!tpu.dma_semaphore, #tpu.memory_space<semaphore_mem>>
      tpu.enqueue_dma source(%805 : memref<1x1024xf32, #tpu.memory_space<any>>) target(%807 : memref<1x1024xf32, #tpu.memory_space<vmem>>) target_semaphore(%809 : memref<!tpu.dma_semaphore, #tpu.memory_space<semaphore_mem>>)
      %c56_i32_557 = arith.constant 56 : i32
      %c0_i32_558 = arith.constant 0 : i32
      %810 = tpu.memref_slice %arg2[%508, %c0_i32_558] : memref<16x1024xf32, #tpu.memory_space<any>> -> memref<1x1024xf32, #tpu.memory_space<any>>
      %c56_i32_559 = arith.constant 56 : i32
      %c0_i32_560 = arith.constant 0 : i32
      %811 = tpu.memref_slice %arg5[%1, %c56_i32_559, %c0_i32_560] : memref<2x64x1024xf32, #tpu.memory_space<vmem>> -> memref<1x1x1024xf32, #tpu.memory_space<vmem>>
      %812 = tpu.memref_squeeze %811 : memref<1x1x1024xf32, #tpu.memory_space<vmem>> -> memref<1x1024xf32, #tpu.memory_space<vmem>>
      %813 = tpu.memref_slice %arg6[%1, %c56_i32_557] : memref<2x64x!tpu.dma_semaphore, #tpu.memory_space<semaphore_mem>> -> memref<1x1x!tpu.dma_semaphore, #tpu.memory_space<semaphore_mem>>
      %814 = tpu.memref_squeeze %813 : memref<1x1x!tpu.dma_semaphore, #tpu.memory_space<semaphore_mem>> -> memref<!tpu.dma_semaphore, #tpu.memory_space<semaphore_mem>>
      tpu.enqueue_dma source(%810 : memref<1x1024xf32, #tpu.memory_space<any>>) target(%812 : memref<1x1024xf32, #tpu.memory_space<vmem>>) target_semaphore(%814 : memref<!tpu.dma_semaphore, #tpu.memory_space<semaphore_mem>>)
      %c57_i32_561 = arith.constant 57 : i32
      %c0_i32_562 = arith.constant 0 : i32
      %815 = tpu.memref_slice %arg2[%511, %c0_i32_562] : memref<16x1024xf32, #tpu.memory_space<any>> -> memref<1x1024xf32, #tpu.memory_space<any>>
      %c57_i32_563 = arith.constant 57 : i32
      %c0_i32_564 = arith.constant 0 : i32
      %816 = tpu.memref_slice %arg5[%1, %c57_i32_563, %c0_i32_564] : memref<2x64x1024xf32, #tpu.memory_space<vmem>> -> memref<1x1x1024xf32, #tpu.memory_space<vmem>>
      %817 = tpu.memref_squeeze %816 : memref<1x1x1024xf32, #tpu.memory_space<vmem>> -> memref<1x1024xf32, #tpu.memory_space<vmem>>
      %818 = tpu.memref_slice %arg6[%1, %c57_i32_561] : memref<2x64x!tpu.dma_semaphore, #tpu.memory_space<semaphore_mem>> -> memref<1x1x!tpu.dma_semaphore, #tpu.memory_space<semaphore_mem>>
      %819 = tpu.memref_squeeze %818 : memref<1x1x!tpu.dma_semaphore, #tpu.memory_space<semaphore_mem>> -> memref<!tpu.dma_semaphore, #tpu.memory_space<semaphore_mem>>
      tpu.enqueue_dma source(%815 : memref<1x1024xf32, #tpu.memory_space<any>>) target(%817 : memref<1x1024xf32, #tpu.memory_space<vmem>>) target_semaphore(%819 : memref<!tpu.dma_semaphore, #tpu.memory_space<semaphore_mem>>)
      %c58_i32_565 = arith.constant 58 : i32
      %c0_i32_566 = arith.constant 0 : i32
      %820 = tpu.memref_slice %arg2[%514, %c0_i32_566] : memref<16x1024xf32, #tpu.memory_space<any>> -> memref<1x1024xf32, #tpu.memory_space<any>>
      %c58_i32_567 = arith.constant 58 : i32
      %c0_i32_568 = arith.constant 0 : i32
      %821 = tpu.memref_slice %arg5[%1, %c58_i32_567, %c0_i32_568] : memref<2x64x1024xf32, #tpu.memory_space<vmem>> -> memref<1x1x1024xf32, #tpu.memory_space<vmem>>
      %822 = tpu.memref_squeeze %821 : memref<1x1x1024xf32, #tpu.memory_space<vmem>> -> memref<1x1024xf32, #tpu.memory_space<vmem>>
      %823 = tpu.memref_slice %arg6[%1, %c58_i32_565] : memref<2x64x!tpu.dma_semaphore, #tpu.memory_space<semaphore_mem>> -> memref<1x1x!tpu.dma_semaphore, #tpu.memory_space<semaphore_mem>>
      %824 = tpu.memref_squeeze %823 : memref<1x1x!tpu.dma_semaphore, #tpu.memory_space<semaphore_mem>> -> memref<!tpu.dma_semaphore, #tpu.memory_space<semaphore_mem>>
      tpu.enqueue_dma source(%820 : memref<1x1024xf32, #tpu.memory_space<any>>) target(%822 : memref<1x1024xf32, #tpu.memory_space<vmem>>) target_semaphore(%824 : memref<!tpu.dma_semaphore, #tpu.memory_space<semaphore_mem>>)
      %c59_i32_569 = arith.constant 59 : i32
      %c0_i32_570 = arith.constant 0 : i32
      %825 = tpu.memref_slice %arg2[%517, %c0_i32_570] : memref<16x1024xf32, #tpu.memory_space<any>> -> memref<1x1024xf32, #tpu.memory_space<any>>
      %c59_i32_571 = arith.constant 59 : i32
      %c0_i32_572 = arith.constant 0 : i32
      %826 = tpu.memref_slice %arg5[%1, %c59_i32_571, %c0_i32_572] : memref<2x64x1024xf32, #tpu.memory_space<vmem>> -> memref<1x1x1024xf32, #tpu.memory_space<vmem>>
      %827 = tpu.memref_squeeze %826 : memref<1x1x1024xf32, #tpu.memory_space<vmem>> -> memref<1x1024xf32, #tpu.memory_space<vmem>>
      %828 = tpu.memref_slice %arg6[%1, %c59_i32_569] : memref<2x64x!tpu.dma_semaphore, #tpu.memory_space<semaphore_mem>> -> memref<1x1x!tpu.dma_semaphore, #tpu.memory_space<semaphore_mem>>
      %829 = tpu.memref_squeeze %828 : memref<1x1x!tpu.dma_semaphore, #tpu.memory_space<semaphore_mem>> -> memref<!tpu.dma_semaphore, #tpu.memory_space<semaphore_mem>>
      tpu.enqueue_dma source(%825 : memref<1x1024xf32, #tpu.memory_space<any>>) target(%827 : memref<1x1024xf32, #tpu.memory_space<vmem>>) target_semaphore(%829 : memref<!tpu.dma_semaphore, #tpu.memory_space<semaphore_mem>>)
      %c60_i32_573 = arith.constant 60 : i32
      %c0_i32_574 = arith.constant 0 : i32
      %830 = tpu.memref_slice %arg2[%520, %c0_i32_574] : memref<16x1024xf32, #tpu.memory_space<any>> -> memref<1x1024xf32, #tpu.memory_space<any>>
      %c60_i32_575 = arith.constant 60 : i32
      %c0_i32_576 = arith.constant 0 : i32
      %831 = tpu.memref_slice %arg5[%1, %c60_i32_575, %c0_i32_576] : memref<2x64x1024xf32, #tpu.memory_space<vmem>> -> memref<1x1x1024xf32, #tpu.memory_space<vmem>>
      %832 = tpu.memref_squeeze %831 : memref<1x1x1024xf32, #tpu.memory_space<vmem>> -> memref<1x1024xf32, #tpu.memory_space<vmem>>
      %833 = tpu.memref_slice %arg6[%1, %c60_i32_573] : memref<2x64x!tpu.dma_semaphore, #tpu.memory_space<semaphore_mem>> -> memref<1x1x!tpu.dma_semaphore, #tpu.memory_space<semaphore_mem>>
      %834 = tpu.memref_squeeze %833 : memref<1x1x!tpu.dma_semaphore, #tpu.memory_space<semaphore_mem>> -> memref<!tpu.dma_semaphore, #tpu.memory_space<semaphore_mem>>
      tpu.enqueue_dma source(%830 : memref<1x1024xf32, #tpu.memory_space<any>>) target(%832 : memref<1x1024xf32, #tpu.memory_space<vmem>>) target_semaphore(%834 : memref<!tpu.dma_semaphore, #tpu.memory_space<semaphore_mem>>)
      %c61_i32_577 = arith.constant 61 : i32
      %c0_i32_578 = arith.constant 0 : i32
      %835 = tpu.memref_slice %arg2[%523, %c0_i32_578] : memref<16x1024xf32, #tpu.memory_space<any>> -> memref<1x1024xf32, #tpu.memory_space<any>>
      %c61_i32_579 = arith.constant 61 : i32
      %c0_i32_580 = arith.constant 0 : i32
      %836 = tpu.memref_slice %arg5[%1, %c61_i32_579, %c0_i32_580] : memref<2x64x1024xf32, #tpu.memory_space<vmem>> -> memref<1x1x1024xf32, #tpu.memory_space<vmem>>
      %837 = tpu.memref_squeeze %836 : memref<1x1x1024xf32, #tpu.memory_space<vmem>> -> memref<1x1024xf32, #tpu.memory_space<vmem>>
      %838 = tpu.memref_slice %arg6[%1, %c61_i32_577] : memref<2x64x!tpu.dma_semaphore, #tpu.memory_space<semaphore_mem>> -> memref<1x1x!tpu.dma_semaphore, #tpu.memory_space<semaphore_mem>>
      %839 = tpu.memref_squeeze %838 : memref<1x1x!tpu.dma_semaphore, #tpu.memory_space<semaphore_mem>> -> memref<!tpu.dma_semaphore, #tpu.memory_space<semaphore_mem>>
      tpu.enqueue_dma source(%835 : memref<1x1024xf32, #tpu.memory_space<any>>) target(%837 : memref<1x1024xf32, #tpu.memory_space<vmem>>) target_semaphore(%839 : memref<!tpu.dma_semaphore, #tpu.memory_space<semaphore_mem>>)
      %c62_i32_581 = arith.constant 62 : i32
      %c0_i32_582 = arith.constant 0 : i32
      %840 = tpu.memref_slice %arg2[%526, %c0_i32_582] : memref<16x1024xf32, #tpu.memory_space<any>> -> memref<1x1024xf32, #tpu.memory_space<any>>
      %c62_i32_583 = arith.constant 62 : i32
      %c0_i32_584 = arith.constant 0 : i32
      %841 = tpu.memref_slice %arg5[%1, %c62_i32_583, %c0_i32_584] : memref<2x64x1024xf32, #tpu.memory_space<vmem>> -> memref<1x1x1024xf32, #tpu.memory_space<vmem>>
      %842 = tpu.memref_squeeze %841 : memref<1x1x1024xf32, #tpu.memory_space<vmem>> -> memref<1x1024xf32, #tpu.memory_space<vmem>>
      %843 = tpu.memref_slice %arg6[%1, %c62_i32_581] : memref<2x64x!tpu.dma_semaphore, #tpu.memory_space<semaphore_mem>> -> memref<1x1x!tpu.dma_semaphore, #tpu.memory_space<semaphore_mem>>
      %844 = tpu.memref_squeeze %843 : memref<1x1x!tpu.dma_semaphore, #tpu.memory_space<semaphore_mem>> -> memref<!tpu.dma_semaphore, #tpu.memory_space<semaphore_mem>>
      tpu.enqueue_dma source(%840 : memref<1x1024xf32, #tpu.memory_space<any>>) target(%842 : memref<1x1024xf32, #tpu.memory_space<vmem>>) target_semaphore(%844 : memref<!tpu.dma_semaphore, #tpu.memory_space<semaphore_mem>>)
      %c63_i32_585 = arith.constant 63 : i32
      %c0_i32_586 = arith.constant 0 : i32
      %845 = tpu.memref_slice %arg2[%529, %c0_i32_586] : memref<16x1024xf32, #tpu.memory_space<any>> -> memref<1x1024xf32, #tpu.memory_space<any>>
      %c63_i32_587 = arith.constant 63 : i32
      %c0_i32_588 = arith.constant 0 : i32
      %846 = tpu.memref_slice %arg5[%1, %c63_i32_587, %c0_i32_588] : memref<2x64x1024xf32, #tpu.memory_space<vmem>> -> memref<1x1x1024xf32, #tpu.memory_space<vmem>>
      %847 = tpu.memref_squeeze %846 : memref<1x1x1024xf32, #tpu.memory_space<vmem>> -> memref<1x1024xf32, #tpu.memory_space<vmem>>
      %848 = tpu.memref_slice %arg6[%1, %c63_i32_585] : memref<2x64x!tpu.dma_semaphore, #tpu.memory_space<semaphore_mem>> -> memref<1x1x!tpu.dma_semaphore, #tpu.memory_space<semaphore_mem>>
      %849 = tpu.memref_squeeze %848 : memref<1x1x!tpu.dma_semaphore, #tpu.memory_space<semaphore_mem>> -> memref<!tpu.dma_semaphore, #tpu.memory_space<semaphore_mem>>
      tpu.enqueue_dma source(%845 : memref<1x1024xf32, #tpu.memory_space<any>>) target(%847 : memref<1x1024xf32, #tpu.memory_space<vmem>>) target_semaphore(%849 : memref<!tpu.dma_semaphore, #tpu.memory_space<semaphore_mem>>)
    } else {
    }
    %c0_i32_5 = arith.constant 0 : i32
    %c0_i32_6 = arith.constant 0 : i32
    %c0_i32_7 = arith.constant 0 : i32
    %9 = tpu.memref_slice %arg2[%c0_i32_6, %c0_i32_7] : memref<16x1024xf32, #tpu.memory_space<any>> -> memref<1x1024xf32, #tpu.memory_space<any>>
    %c0_i32_8 = arith.constant 0 : i32
    %c0_i32_9 = arith.constant 0 : i32
    %10 = tpu.memref_slice %arg5[%0, %c0_i32_8, %c0_i32_9] : memref<2x64x1024xf32, #tpu.memory_space<vmem>> -> memref<1x1x1024xf32, #tpu.memory_space<vmem>>
    %11 = tpu.memref_squeeze %10 : memref<1x1x1024xf32, #tpu.memory_space<vmem>> -> memref<1x1024xf32, #tpu.memory_space<vmem>>
    %12 = tpu.memref_slice %arg6[%0, %c0_i32_5] : memref<2x64x!tpu.dma_semaphore, #tpu.memory_space<semaphore_mem>> -> memref<1x1x!tpu.dma_semaphore, #tpu.memory_space<semaphore_mem>>
    %13 = tpu.memref_squeeze %12 : memref<1x1x!tpu.dma_semaphore, #tpu.memory_space<semaphore_mem>> -> memref<!tpu.dma_semaphore, #tpu.memory_space<semaphore_mem>>
    tpu.wait_dma2 semaphore(%13 : memref<!tpu.dma_semaphore, #tpu.memory_space<semaphore_mem>>) src(%9 : memref<1x1024xf32, #tpu.memory_space<any>>) dst(%11 : memref<1x1024xf32, #tpu.memory_space<vmem>>)
    %c1_i32_10 = arith.constant 1 : i32
    %c0_i32_11 = arith.constant 0 : i32
    %c0_i32_12 = arith.constant 0 : i32
    %14 = tpu.memref_slice %arg2[%c0_i32_11, %c0_i32_12] : memref<16x1024xf32, #tpu.memory_space<any>> -> memref<1x1024xf32, #tpu.memory_space<any>>
    %c1_i32_13 = arith.constant 1 : i32
    %c0_i32_14 = arith.constant 0 : i32
    %15 = tpu.memref_slice %arg5[%0, %c1_i32_13, %c0_i32_14] : memref<2x64x1024xf32, #tpu.memory_space<vmem>> -> memref<1x1x1024xf32, #tpu.memory_space<vmem>>
    %16 = tpu.memref_squeeze %15 : memref<1x1x1024xf32, #tpu.memory_space<vmem>> -> memref<1x1024xf32, #tpu.memory_space<vmem>>
    %17 = tpu.memref_slice %arg6[%0, %c1_i32_10] : memref<2x64x!tpu.dma_semaphore, #tpu.memory_space<semaphore_mem>> -> memref<1x1x!tpu.dma_semaphore, #tpu.memory_space<semaphore_mem>>
    %18 = tpu.memref_squeeze %17 : memref<1x1x!tpu.dma_semaphore, #tpu.memory_space<semaphore_mem>> -> memref<!tpu.dma_semaphore, #tpu.memory_space<semaphore_mem>>
    tpu.wait_dma2 semaphore(%18 : memref<!tpu.dma_semaphore, #tpu.memory_space<semaphore_mem>>) src(%14 : memref<1x1024xf32, #tpu.memory_space<any>>) dst(%16 : memref<1x1024xf32, #tpu.memory_space<vmem>>)
    %c2_i32 = arith.constant 2 : i32
    %c0_i32_15 = arith.constant 0 : i32
    %c0_i32_16 = arith.constant 0 : i32
    %19 = tpu.memref_slice %arg2[%c0_i32_15, %c0_i32_16] : memref<16x1024xf32, #tpu.memory_space<any>> -> memref<1x1024xf32, #tpu.memory_space<any>>
    %c2_i32_17 = arith.constant 2 : i32
    %c0_i32_18 = arith.constant 0 : i32
    %20 = tpu.memref_slice %arg5[%0, %c2_i32_17, %c0_i32_18] : memref<2x64x1024xf32, #tpu.memory_space<vmem>> -> memref<1x1x1024xf32, #tpu.memory_space<vmem>>
    %21 = tpu.memref_squeeze %20 : memref<1x1x1024xf32, #tpu.memory_space<vmem>> -> memref<1x1024xf32, #tpu.memory_space<vmem>>
    %22 = tpu.memref_slice %arg6[%0, %c2_i32] : memref<2x64x!tpu.dma_semaphore, #tpu.memory_space<semaphore_mem>> -> memref<1x1x!tpu.dma_semaphore, #tpu.memory_space<semaphore_mem>>
    %23 = tpu.memref_squeeze %22 : memref<1x1x!tpu.dma_semaphore, #tpu.memory_space<semaphore_mem>> -> memref<!tpu.dma_semaphore, #tpu.memory_space<semaphore_mem>>
    tpu.wait_dma2 semaphore(%23 : memref<!tpu.dma_semaphore, #tpu.memory_space<semaphore_mem>>) src(%19 : memref<1x1024xf32, #tpu.memory_space<any>>) dst(%21 : memref<1x1024xf32, #tpu.memory_space<vmem>>)
    %c3_i32 = arith.constant 3 : i32
    %c0_i32_19 = arith.constant 0 : i32
    %c0_i32_20 = arith.constant 0 : i32
    %24 = tpu.memref_slice %arg2[%c0_i32_19, %c0_i32_20] : memref<16x1024xf32, #tpu.memory_space<any>> -> memref<1x1024xf32, #tpu.memory_space<any>>
    %c3_i32_21 = arith.constant 3 : i32
    %c0_i32_22 = arith.constant 0 : i32
    %25 = tpu.memref_slice %arg5[%0, %c3_i32_21, %c0_i32_22] : memref<2x64x1024xf32, #tpu.memory_space<vmem>> -> memref<1x1x1024xf32, #tpu.memory_space<vmem>>
    %26 = tpu.memref_squeeze %25 : memref<1x1x1024xf32, #tpu.memory_space<vmem>> -> memref<1x1024xf32, #tpu.memory_space<vmem>>
    %27 = tpu.memref_slice %arg6[%0, %c3_i32] : memref<2x64x!tpu.dma_semaphore, #tpu.memory_space<semaphore_mem>> -> memref<1x1x!tpu.dma_semaphore, #tpu.memory_space<semaphore_mem>>
    %28 = tpu.memref_squeeze %27 : memref<1x1x!tpu.dma_semaphore, #tpu.memory_space<semaphore_mem>> -> memref<!tpu.dma_semaphore, #tpu.memory_space<semaphore_mem>>
    tpu.wait_dma2 semaphore(%28 : memref<!tpu.dma_semaphore, #tpu.memory_space<semaphore_mem>>) src(%24 : memref<1x1024xf32, #tpu.memory_space<any>>) dst(%26 : memref<1x1024xf32, #tpu.memory_space<vmem>>)
    %c4_i32 = arith.constant 4 : i32
    %c0_i32_23 = arith.constant 0 : i32
    %c0_i32_24 = arith.constant 0 : i32
    %29 = tpu.memref_slice %arg2[%c0_i32_23, %c0_i32_24] : memref<16x1024xf32, #tpu.memory_space<any>> -> memref<1x1024xf32, #tpu.memory_space<any>>
    %c4_i32_25 = arith.constant 4 : i32
    %c0_i32_26 = arith.constant 0 : i32
    %30 = tpu.memref_slice %arg5[%0, %c4_i32_25, %c0_i32_26] : memref<2x64x1024xf32, #tpu.memory_space<vmem>> -> memref<1x1x1024xf32, #tpu.memory_space<vmem>>
    %31 = tpu.memref_squeeze %30 : memref<1x1x1024xf32, #tpu.memory_space<vmem>> -> memref<1x1024xf32, #tpu.memory_space<vmem>>
    %32 = tpu.memref_slice %arg6[%0, %c4_i32] : memref<2x64x!tpu.dma_semaphore, #tpu.memory_space<semaphore_mem>> -> memref<1x1x!tpu.dma_semaphore, #tpu.memory_space<semaphore_mem>>
    %33 = tpu.memref_squeeze %32 : memref<1x1x!tpu.dma_semaphore, #tpu.memory_space<semaphore_mem>> -> memref<!tpu.dma_semaphore, #tpu.memory_space<semaphore_mem>>
    tpu.wait_dma2 semaphore(%33 : memref<!tpu.dma_semaphore, #tpu.memory_space<semaphore_mem>>) src(%29 : memref<1x1024xf32, #tpu.memory_space<any>>) dst(%31 : memref<1x1024xf32, #tpu.memory_space<vmem>>)
    %c5_i32 = arith.constant 5 : i32
    %c0_i32_27 = arith.constant 0 : i32
    %c0_i32_28 = arith.constant 0 : i32
    %34 = tpu.memref_slice %arg2[%c0_i32_27, %c0_i32_28] : memref<16x1024xf32, #tpu.memory_space<any>> -> memref<1x1024xf32, #tpu.memory_space<any>>
    %c5_i32_29 = arith.constant 5 : i32
    %c0_i32_30 = arith.constant 0 : i32
    %35 = tpu.memref_slice %arg5[%0, %c5_i32_29, %c0_i32_30] : memref<2x64x1024xf32, #tpu.memory_space<vmem>> -> memref<1x1x1024xf32, #tpu.memory_space<vmem>>
    %36 = tpu.memref_squeeze %35 : memref<1x1x1024xf32, #tpu.memory_space<vmem>> -> memref<1x1024xf32, #tpu.memory_space<vmem>>
    %37 = tpu.memref_slice %arg6[%0, %c5_i32] : memref<2x64x!tpu.dma_semaphore, #tpu.memory_space<semaphore_mem>> -> memref<1x1x!tpu.dma_semaphore, #tpu.memory_space<semaphore_mem>>
    %38 = tpu.memref_squeeze %37 : memref<1x1x!tpu.dma_semaphore, #tpu.memory_space<semaphore_mem>> -> memref<!tpu.dma_semaphore, #tpu.memory_space<semaphore_mem>>
    tpu.wait_dma2 semaphore(%38 : memref<!tpu.dma_semaphore, #tpu.memory_space<semaphore_mem>>) src(%34 : memref<1x1024xf32, #tpu.memory_space<any>>) dst(%36 : memref<1x1024xf32, #tpu.memory_space<vmem>>)
    %c6_i32 = arith.constant 6 : i32
    %c0_i32_31 = arith.constant 0 : i32
    %c0_i32_32 = arith.constant 0 : i32
    %39 = tpu.memref_slice %arg2[%c0_i32_31, %c0_i32_32] : memref<16x1024xf32, #tpu.memory_space<any>> -> memref<1x1024xf32, #tpu.memory_space<any>>
    %c6_i32_33 = arith.constant 6 : i32
    %c0_i32_34 = arith.constant 0 : i32
    %40 = tpu.memref_slice %arg5[%0, %c6_i32_33, %c0_i32_34] : memref<2x64x1024xf32, #tpu.memory_space<vmem>> -> memref<1x1x1024xf32, #tpu.memory_space<vmem>>
    %41 = tpu.memref_squeeze %40 : memref<1x1x1024xf32, #tpu.memory_space<vmem>> -> memref<1x1024xf32, #tpu.memory_space<vmem>>
    %42 = tpu.memref_slice %arg6[%0, %c6_i32] : memref<2x64x!tpu.dma_semaphore, #tpu.memory_space<semaphore_mem>> -> memref<1x1x!tpu.dma_semaphore, #tpu.memory_space<semaphore_mem>>
    %43 = tpu.memref_squeeze %42 : memref<1x1x!tpu.dma_semaphore, #tpu.memory_space<semaphore_mem>> -> memref<!tpu.dma_semaphore, #tpu.memory_space<semaphore_mem>>
    tpu.wait_dma2 semaphore(%43 : memref<!tpu.dma_semaphore, #tpu.memory_space<semaphore_mem>>) src(%39 : memref<1x1024xf32, #tpu.memory_space<any>>) dst(%41 : memref<1x1024xf32, #tpu.memory_space<vmem>>)
    %c7_i32 = arith.constant 7 : i32
    %c0_i32_35 = arith.constant 0 : i32
    %c0_i32_36 = arith.constant 0 : i32
    %44 = tpu.memref_slice %arg2[%c0_i32_35, %c0_i32_36] : memref<16x1024xf32, #tpu.memory_space<any>> -> memref<1x1024xf32, #tpu.memory_space<any>>
    %c7_i32_37 = arith.constant 7 : i32
    %c0_i32_38 = arith.constant 0 : i32
    %45 = tpu.memref_slice %arg5[%0, %c7_i32_37, %c0_i32_38] : memref<2x64x1024xf32, #tpu.memory_space<vmem>> -> memref<1x1x1024xf32, #tpu.memory_space<vmem>>
    %46 = tpu.memref_squeeze %45 : memref<1x1x1024xf32, #tpu.memory_space<vmem>> -> memref<1x1024xf32, #tpu.memory_space<vmem>>
    %47 = tpu.memref_slice %arg6[%0, %c7_i32] : memref<2x64x!tpu.dma_semaphore, #tpu.memory_space<semaphore_mem>> -> memref<1x1x!tpu.dma_semaphore, #tpu.memory_space<semaphore_mem>>
    %48 = tpu.memref_squeeze %47 : memref<1x1x!tpu.dma_semaphore, #tpu.memory_space<semaphore_mem>> -> memref<!tpu.dma_semaphore, #tpu.memory_space<semaphore_mem>>
    tpu.wait_dma2 semaphore(%48 : memref<!tpu.dma_semaphore, #tpu.memory_space<semaphore_mem>>) src(%44 : memref<1x1024xf32, #tpu.memory_space<any>>) dst(%46 : memref<1x1024xf32, #tpu.memory_space<vmem>>)
    %c8_i32 = arith.constant 8 : i32
    %c0_i32_39 = arith.constant 0 : i32
    %c0_i32_40 = arith.constant 0 : i32
    %49 = tpu.memref_slice %arg2[%c0_i32_39, %c0_i32_40] : memref<16x1024xf32, #tpu.memory_space<any>> -> memref<1x1024xf32, #tpu.memory_space<any>>
    %c8_i32_41 = arith.constant 8 : i32
    %c0_i32_42 = arith.constant 0 : i32
    %50 = tpu.memref_slice %arg5[%0, %c8_i32_41, %c0_i32_42] : memref<2x64x1024xf32, #tpu.memory_space<vmem>> -> memref<1x1x1024xf32, #tpu.memory_space<vmem>>
    %51 = tpu.memref_squeeze %50 : memref<1x1x1024xf32, #tpu.memory_space<vmem>> -> memref<1x1024xf32, #tpu.memory_space<vmem>>
    %52 = tpu.memref_slice %arg6[%0, %c8_i32] : memref<2x64x!tpu.dma_semaphore, #tpu.memory_space<semaphore_mem>> -> memref<1x1x!tpu.dma_semaphore, #tpu.memory_space<semaphore_mem>>
    %53 = tpu.memref_squeeze %52 : memref<1x1x!tpu.dma_semaphore, #tpu.memory_space<semaphore_mem>> -> memref<!tpu.dma_semaphore, #tpu.memory_space<semaphore_mem>>
    tpu.wait_dma2 semaphore(%53 : memref<!tpu.dma_semaphore, #tpu.memory_space<semaphore_mem>>) src(%49 : memref<1x1024xf32, #tpu.memory_space<any>>) dst(%51 : memref<1x1024xf32, #tpu.memory_space<vmem>>)
    %c9_i32 = arith.constant 9 : i32
    %c0_i32_43 = arith.constant 0 : i32
    %c0_i32_44 = arith.constant 0 : i32
    %54 = tpu.memref_slice %arg2[%c0_i32_43, %c0_i32_44] : memref<16x1024xf32, #tpu.memory_space<any>> -> memref<1x1024xf32, #tpu.memory_space<any>>
    %c9_i32_45 = arith.constant 9 : i32
    %c0_i32_46 = arith.constant 0 : i32
    %55 = tpu.memref_slice %arg5[%0, %c9_i32_45, %c0_i32_46] : memref<2x64x1024xf32, #tpu.memory_space<vmem>> -> memref<1x1x1024xf32, #tpu.memory_space<vmem>>
    %56 = tpu.memref_squeeze %55 : memref<1x1x1024xf32, #tpu.memory_space<vmem>> -> memref<1x1024xf32, #tpu.memory_space<vmem>>
    %57 = tpu.memref_slice %arg6[%0, %c9_i32] : memref<2x64x!tpu.dma_semaphore, #tpu.memory_space<semaphore_mem>> -> memref<1x1x!tpu.dma_semaphore, #tpu.memory_space<semaphore_mem>>
    %58 = tpu.memref_squeeze %57 : memref<1x1x!tpu.dma_semaphore, #tpu.memory_space<semaphore_mem>> -> memref<!tpu.dma_semaphore, #tpu.memory_space<semaphore_mem>>
    tpu.wait_dma2 semaphore(%58 : memref<!tpu.dma_semaphore, #tpu.memory_space<semaphore_mem>>) src(%54 : memref<1x1024xf32, #tpu.memory_space<any>>) dst(%56 : memref<1x1024xf32, #tpu.memory_space<vmem>>)
    %c10_i32 = arith.constant 10 : i32
    %c0_i32_47 = arith.constant 0 : i32
    %c0_i32_48 = arith.constant 0 : i32
    %59 = tpu.memref_slice %arg2[%c0_i32_47, %c0_i32_48] : memref<16x1024xf32, #tpu.memory_space<any>> -> memref<1x1024xf32, #tpu.memory_space<any>>
    %c10_i32_49 = arith.constant 10 : i32
    %c0_i32_50 = arith.constant 0 : i32
    %60 = tpu.memref_slice %arg5[%0, %c10_i32_49, %c0_i32_50] : memref<2x64x1024xf32, #tpu.memory_space<vmem>> -> memref<1x1x1024xf32, #tpu.memory_space<vmem>>
    %61 = tpu.memref_squeeze %60 : memref<1x1x1024xf32, #tpu.memory_space<vmem>> -> memref<1x1024xf32, #tpu.memory_space<vmem>>
    %62 = tpu.memref_slice %arg6[%0, %c10_i32] : memref<2x64x!tpu.dma_semaphore, #tpu.memory_space<semaphore_mem>> -> memref<1x1x!tpu.dma_semaphore, #tpu.memory_space<semaphore_mem>>
    %63 = tpu.memref_squeeze %62 : memref<1x1x!tpu.dma_semaphore, #tpu.memory_space<semaphore_mem>> -> memref<!tpu.dma_semaphore, #tpu.memory_space<semaphore_mem>>
    tpu.wait_dma2 semaphore(%63 : memref<!tpu.dma_semaphore, #tpu.memory_space<semaphore_mem>>) src(%59 : memref<1x1024xf32, #tpu.memory_space<any>>) dst(%61 : memref<1x1024xf32, #tpu.memory_space<vmem>>)
    %c11_i32 = arith.constant 11 : i32
    %c0_i32_51 = arith.constant 0 : i32
    %c0_i32_52 = arith.constant 0 : i32
    %64 = tpu.memref_slice %arg2[%c0_i32_51, %c0_i32_52] : memref<16x1024xf32, #tpu.memory_space<any>> -> memref<1x1024xf32, #tpu.memory_space<any>>
    %c11_i32_53 = arith.constant 11 : i32
    %c0_i32_54 = arith.constant 0 : i32
    %65 = tpu.memref_slice %arg5[%0, %c11_i32_53, %c0_i32_54] : memref<2x64x1024xf32, #tpu.memory_space<vmem>> -> memref<1x1x1024xf32, #tpu.memory_space<vmem>>
    %66 = tpu.memref_squeeze %65 : memref<1x1x1024xf32, #tpu.memory_space<vmem>> -> memref<1x1024xf32, #tpu.memory_space<vmem>>
    %67 = tpu.memref_slice %arg6[%0, %c11_i32] : memref<2x64x!tpu.dma_semaphore, #tpu.memory_space<semaphore_mem>> -> memref<1x1x!tpu.dma_semaphore, #tpu.memory_space<semaphore_mem>>
    %68 = tpu.memref_squeeze %67 : memref<1x1x!tpu.dma_semaphore, #tpu.memory_space<semaphore_mem>> -> memref<!tpu.dma_semaphore, #tpu.memory_space<semaphore_mem>>
    tpu.wait_dma2 semaphore(%68 : memref<!tpu.dma_semaphore, #tpu.memory_space<semaphore_mem>>) src(%64 : memref<1x1024xf32, #tpu.memory_space<any>>) dst(%66 : memref<1x1024xf32, #tpu.memory_space<vmem>>)
    %c12_i32 = arith.constant 12 : i32
    %c0_i32_55 = arith.constant 0 : i32
    %c0_i32_56 = arith.constant 0 : i32
    %69 = tpu.memref_slice %arg2[%c0_i32_55, %c0_i32_56] : memref<16x1024xf32, #tpu.memory_space<any>> -> memref<1x1024xf32, #tpu.memory_space<any>>
    %c12_i32_57 = arith.constant 12 : i32
    %c0_i32_58 = arith.constant 0 : i32
    %70 = tpu.memref_slice %arg5[%0, %c12_i32_57, %c0_i32_58] : memref<2x64x1024xf32, #tpu.memory_space<vmem>> -> memref<1x1x1024xf32, #tpu.memory_space<vmem>>
    %71 = tpu.memref_squeeze %70 : memref<1x1x1024xf32, #tpu.memory_space<vmem>> -> memref<1x1024xf32, #tpu.memory_space<vmem>>
    %72 = tpu.memref_slice %arg6[%0, %c12_i32] : memref<2x64x!tpu.dma_semaphore, #tpu.memory_space<semaphore_mem>> -> memref<1x1x!tpu.dma_semaphore, #tpu.memory_space<semaphore_mem>>
    %73 = tpu.memref_squeeze %72 : memref<1x1x!tpu.dma_semaphore, #tpu.memory_space<semaphore_mem>> -> memref<!tpu.dma_semaphore, #tpu.memory_space<semaphore_mem>>
    tpu.wait_dma2 semaphore(%73 : memref<!tpu.dma_semaphore, #tpu.memory_space<semaphore_mem>>) src(%69 : memref<1x1024xf32, #tpu.memory_space<any>>) dst(%71 : memref<1x1024xf32, #tpu.memory_space<vmem>>)
    %c13_i32 = arith.constant 13 : i32
    %c0_i32_59 = arith.constant 0 : i32
    %c0_i32_60 = arith.constant 0 : i32
    %74 = tpu.memref_slice %arg2[%c0_i32_59, %c0_i32_60] : memref<16x1024xf32, #tpu.memory_space<any>> -> memref<1x1024xf32, #tpu.memory_space<any>>
    %c13_i32_61 = arith.constant 13 : i32
    %c0_i32_62 = arith.constant 0 : i32
    %75 = tpu.memref_slice %arg5[%0, %c13_i32_61, %c0_i32_62] : memref<2x64x1024xf32, #tpu.memory_space<vmem>> -> memref<1x1x1024xf32, #tpu.memory_space<vmem>>
    %76 = tpu.memref_squeeze %75 : memref<1x1x1024xf32, #tpu.memory_space<vmem>> -> memref<1x1024xf32, #tpu.memory_space<vmem>>
    %77 = tpu.memref_slice %arg6[%0, %c13_i32] : memref<2x64x!tpu.dma_semaphore, #tpu.memory_space<semaphore_mem>> -> memref<1x1x!tpu.dma_semaphore, #tpu.memory_space<semaphore_mem>>
    %78 = tpu.memref_squeeze %77 : memref<1x1x!tpu.dma_semaphore, #tpu.memory_space<semaphore_mem>> -> memref<!tpu.dma_semaphore, #tpu.memory_space<semaphore_mem>>
    tpu.wait_dma2 semaphore(%78 : memref<!tpu.dma_semaphore, #tpu.memory_space<semaphore_mem>>) src(%74 : memref<1x1024xf32, #tpu.memory_space<any>>) dst(%76 : memref<1x1024xf32, #tpu.memory_space<vmem>>)
    %c14_i32 = arith.constant 14 : i32
    %c0_i32_63 = arith.constant 0 : i32
    %c0_i32_64 = arith.constant 0 : i32
    %79 = tpu.memref_slice %arg2[%c0_i32_63, %c0_i32_64] : memref<16x1024xf32, #tpu.memory_space<any>> -> memref<1x1024xf32, #tpu.memory_space<any>>
    %c14_i32_65 = arith.constant 14 : i32
    %c0_i32_66 = arith.constant 0 : i32
    %80 = tpu.memref_slice %arg5[%0, %c14_i32_65, %c0_i32_66] : memref<2x64x1024xf32, #tpu.memory_space<vmem>> -> memref<1x1x1024xf32, #tpu.memory_space<vmem>>
    %81 = tpu.memref_squeeze %80 : memref<1x1x1024xf32, #tpu.memory_space<vmem>> -> memref<1x1024xf32, #tpu.memory_space<vmem>>
    %82 = tpu.memref_slice %arg6[%0, %c14_i32] : memref<2x64x!tpu.dma_semaphore, #tpu.memory_space<semaphore_mem>> -> memref<1x1x!tpu.dma_semaphore, #tpu.memory_space<semaphore_mem>>
    %83 = tpu.memref_squeeze %82 : memref<1x1x!tpu.dma_semaphore, #tpu.memory_space<semaphore_mem>> -> memref<!tpu.dma_semaphore, #tpu.memory_space<semaphore_mem>>
    tpu.wait_dma2 semaphore(%83 : memref<!tpu.dma_semaphore, #tpu.memory_space<semaphore_mem>>) src(%79 : memref<1x1024xf32, #tpu.memory_space<any>>) dst(%81 : memref<1x1024xf32, #tpu.memory_space<vmem>>)
    %c15_i32 = arith.constant 15 : i32
    %c0_i32_67 = arith.constant 0 : i32
    %c0_i32_68 = arith.constant 0 : i32
    %84 = tpu.memref_slice %arg2[%c0_i32_67, %c0_i32_68] : memref<16x1024xf32, #tpu.memory_space<any>> -> memref<1x1024xf32, #tpu.memory_space<any>>
    %c15_i32_69 = arith.constant 15 : i32
    %c0_i32_70 = arith.constant 0 : i32
    %85 = tpu.memref_slice %arg5[%0, %c15_i32_69, %c0_i32_70] : memref<2x64x1024xf32, #tpu.memory_space<vmem>> -> memref<1x1x1024xf32, #tpu.memory_space<vmem>>
    %86 = tpu.memref_squeeze %85 : memref<1x1x1024xf32, #tpu.memory_space<vmem>> -> memref<1x1024xf32, #tpu.memory_space<vmem>>
    %87 = tpu.memref_slice %arg6[%0, %c15_i32] : memref<2x64x!tpu.dma_semaphore, #tpu.memory_space<semaphore_mem>> -> memref<1x1x!tpu.dma_semaphore, #tpu.memory_space<semaphore_mem>>
    %88 = tpu.memref_squeeze %87 : memref<1x1x!tpu.dma_semaphore, #tpu.memory_space<semaphore_mem>> -> memref<!tpu.dma_semaphore, #tpu.memory_space<semaphore_mem>>
    tpu.wait_dma2 semaphore(%88 : memref<!tpu.dma_semaphore, #tpu.memory_space<semaphore_mem>>) src(%84 : memref<1x1024xf32, #tpu.memory_space<any>>) dst(%86 : memref<1x1024xf32, #tpu.memory_space<vmem>>)
    %c16_i32 = arith.constant 16 : i32
    %c0_i32_71 = arith.constant 0 : i32
    %c0_i32_72 = arith.constant 0 : i32
    %89 = tpu.memref_slice %arg2[%c0_i32_71, %c0_i32_72] : memref<16x1024xf32, #tpu.memory_space<any>> -> memref<1x1024xf32, #tpu.memory_space<any>>
    %c16_i32_73 = arith.constant 16 : i32
    %c0_i32_74 = arith.constant 0 : i32
    %90 = tpu.memref_slice %arg5[%0, %c16_i32_73, %c0_i32_74] : memref<2x64x1024xf32, #tpu.memory_space<vmem>> -> memref<1x1x1024xf32, #tpu.memory_space<vmem>>
    %91 = tpu.memref_squeeze %90 : memref<1x1x1024xf32, #tpu.memory_space<vmem>> -> memref<1x1024xf32, #tpu.memory_space<vmem>>
    %92 = tpu.memref_slice %arg6[%0, %c16_i32] : memref<2x64x!tpu.dma_semaphore, #tpu.memory_space<semaphore_mem>> -> memref<1x1x!tpu.dma_semaphore, #tpu.memory_space<semaphore_mem>>
    %93 = tpu.memref_squeeze %92 : memref<1x1x!tpu.dma_semaphore, #tpu.memory_space<semaphore_mem>> -> memref<!tpu.dma_semaphore, #tpu.memory_space<semaphore_mem>>
    tpu.wait_dma2 semaphore(%93 : memref<!tpu.dma_semaphore, #tpu.memory_space<semaphore_mem>>) src(%89 : memref<1x1024xf32, #tpu.memory_space<any>>) dst(%91 : memref<1x1024xf32, #tpu.memory_space<vmem>>)
    %c17_i32 = arith.constant 17 : i32
    %c0_i32_75 = arith.constant 0 : i32
    %c0_i32_76 = arith.constant 0 : i32
    %94 = tpu.memref_slice %arg2[%c0_i32_75, %c0_i32_76] : memref<16x1024xf32, #tpu.memory_space<any>> -> memref<1x1024xf32, #tpu.memory_space<any>>
    %c17_i32_77 = arith.constant 17 : i32
    %c0_i32_78 = arith.constant 0 : i32
    %95 = tpu.memref_slice %arg5[%0, %c17_i32_77, %c0_i32_78] : memref<2x64x1024xf32, #tpu.memory_space<vmem>> -> memref<1x1x1024xf32, #tpu.memory_space<vmem>>
    %96 = tpu.memref_squeeze %95 : memref<1x1x1024xf32, #tpu.memory_space<vmem>> -> memref<1x1024xf32, #tpu.memory_space<vmem>>
    %97 = tpu.memref_slice %arg6[%0, %c17_i32] : memref<2x64x!tpu.dma_semaphore, #tpu.memory_space<semaphore_mem>> -> memref<1x1x!tpu.dma_semaphore, #tpu.memory_space<semaphore_mem>>
    %98 = tpu.memref_squeeze %97 : memref<1x1x!tpu.dma_semaphore, #tpu.memory_space<semaphore_mem>> -> memref<!tpu.dma_semaphore, #tpu.memory_space<semaphore_mem>>
    tpu.wait_dma2 semaphore(%98 : memref<!tpu.dma_semaphore, #tpu.memory_space<semaphore_mem>>) src(%94 : memref<1x1024xf32, #tpu.memory_space<any>>) dst(%96 : memref<1x1024xf32, #tpu.memory_space<vmem>>)
    %c18_i32 = arith.constant 18 : i32
    %c0_i32_79 = arith.constant 0 : i32
    %c0_i32_80 = arith.constant 0 : i32
    %99 = tpu.memref_slice %arg2[%c0_i32_79, %c0_i32_80] : memref<16x1024xf32, #tpu.memory_space<any>> -> memref<1x1024xf32, #tpu.memory_space<any>>
    %c18_i32_81 = arith.constant 18 : i32
    %c0_i32_82 = arith.constant 0 : i32
    %100 = tpu.memref_slice %arg5[%0, %c18_i32_81, %c0_i32_82] : memref<2x64x1024xf32, #tpu.memory_space<vmem>> -> memref<1x1x1024xf32, #tpu.memory_space<vmem>>
    %101 = tpu.memref_squeeze %100 : memref<1x1x1024xf32, #tpu.memory_space<vmem>> -> memref<1x1024xf32, #tpu.memory_space<vmem>>
    %102 = tpu.memref_slice %arg6[%0, %c18_i32] : memref<2x64x!tpu.dma_semaphore, #tpu.memory_space<semaphore_mem>> -> memref<1x1x!tpu.dma_semaphore, #tpu.memory_space<semaphore_mem>>
    %103 = tpu.memref_squeeze %102 : memref<1x1x!tpu.dma_semaphore, #tpu.memory_space<semaphore_mem>> -> memref<!tpu.dma_semaphore, #tpu.memory_space<semaphore_mem>>
    tpu.wait_dma2 semaphore(%103 : memref<!tpu.dma_semaphore, #tpu.memory_space<semaphore_mem>>) src(%99 : memref<1x1024xf32, #tpu.memory_space<any>>) dst(%101 : memref<1x1024xf32, #tpu.memory_space<vmem>>)
    %c19_i32 = arith.constant 19 : i32
    %c0_i32_83 = arith.constant 0 : i32
    %c0_i32_84 = arith.constant 0 : i32
    %104 = tpu.memref_slice %arg2[%c0_i32_83, %c0_i32_84] : memref<16x1024xf32, #tpu.memory_space<any>> -> memref<1x1024xf32, #tpu.memory_space<any>>
    %c19_i32_85 = arith.constant 19 : i32
    %c0_i32_86 = arith.constant 0 : i32
    %105 = tpu.memref_slice %arg5[%0, %c19_i32_85, %c0_i32_86] : memref<2x64x1024xf32, #tpu.memory_space<vmem>> -> memref<1x1x1024xf32, #tpu.memory_space<vmem>>
    %106 = tpu.memref_squeeze %105 : memref<1x1x1024xf32, #tpu.memory_space<vmem>> -> memref<1x1024xf32, #tpu.memory_space<vmem>>
    %107 = tpu.memref_slice %arg6[%0, %c19_i32] : memref<2x64x!tpu.dma_semaphore, #tpu.memory_space<semaphore_mem>> -> memref<1x1x!tpu.dma_semaphore, #tpu.memory_space<semaphore_mem>>
    %108 = tpu.memref_squeeze %107 : memref<1x1x!tpu.dma_semaphore, #tpu.memory_space<semaphore_mem>> -> memref<!tpu.dma_semaphore, #tpu.memory_space<semaphore_mem>>
    tpu.wait_dma2 semaphore(%108 : memref<!tpu.dma_semaphore, #tpu.memory_space<semaphore_mem>>) src(%104 : memref<1x1024xf32, #tpu.memory_space<any>>) dst(%106 : memref<1x1024xf32, #tpu.memory_space<vmem>>)
    %c20_i32 = arith.constant 20 : i32
    %c0_i32_87 = arith.constant 0 : i32
    %c0_i32_88 = arith.constant 0 : i32
    %109 = tpu.memref_slice %arg2[%c0_i32_87, %c0_i32_88] : memref<16x1024xf32, #tpu.memory_space<any>> -> memref<1x1024xf32, #tpu.memory_space<any>>
    %c20_i32_89 = arith.constant 20 : i32
    %c0_i32_90 = arith.constant 0 : i32
    %110 = tpu.memref_slice %arg5[%0, %c20_i32_89, %c0_i32_90] : memref<2x64x1024xf32, #tpu.memory_space<vmem>> -> memref<1x1x1024xf32, #tpu.memory_space<vmem>>
    %111 = tpu.memref_squeeze %110 : memref<1x1x1024xf32, #tpu.memory_space<vmem>> -> memref<1x1024xf32, #tpu.memory_space<vmem>>
    %112 = tpu.memref_slice %arg6[%0, %c20_i32] : memref<2x64x!tpu.dma_semaphore, #tpu.memory_space<semaphore_mem>> -> memref<1x1x!tpu.dma_semaphore, #tpu.memory_space<semaphore_mem>>
    %113 = tpu.memref_squeeze %112 : memref<1x1x!tpu.dma_semaphore, #tpu.memory_space<semaphore_mem>> -> memref<!tpu.dma_semaphore, #tpu.memory_space<semaphore_mem>>
    tpu.wait_dma2 semaphore(%113 : memref<!tpu.dma_semaphore, #tpu.memory_space<semaphore_mem>>) src(%109 : memref<1x1024xf32, #tpu.memory_space<any>>) dst(%111 : memref<1x1024xf32, #tpu.memory_space<vmem>>)
    %c21_i32 = arith.constant 21 : i32
    %c0_i32_91 = arith.constant 0 : i32
    %c0_i32_92 = arith.constant 0 : i32
    %114 = tpu.memref_slice %arg2[%c0_i32_91, %c0_i32_92] : memref<16x1024xf32, #tpu.memory_space<any>> -> memref<1x1024xf32, #tpu.memory_space<any>>
    %c21_i32_93 = arith.constant 21 : i32
    %c0_i32_94 = arith.constant 0 : i32
    %115 = tpu.memref_slice %arg5[%0, %c21_i32_93, %c0_i32_94] : memref<2x64x1024xf32, #tpu.memory_space<vmem>> -> memref<1x1x1024xf32, #tpu.memory_space<vmem>>
    %116 = tpu.memref_squeeze %115 : memref<1x1x1024xf32, #tpu.memory_space<vmem>> -> memref<1x1024xf32, #tpu.memory_space<vmem>>
    %117 = tpu.memref_slice %arg6[%0, %c21_i32] : memref<2x64x!tpu.dma_semaphore, #tpu.memory_space<semaphore_mem>> -> memref<1x1x!tpu.dma_semaphore, #tpu.memory_space<semaphore_mem>>
    %118 = tpu.memref_squeeze %117 : memref<1x1x!tpu.dma_semaphore, #tpu.memory_space<semaphore_mem>> -> memref<!tpu.dma_semaphore, #tpu.memory_space<semaphore_mem>>
    tpu.wait_dma2 semaphore(%118 : memref<!tpu.dma_semaphore, #tpu.memory_space<semaphore_mem>>) src(%114 : memref<1x1024xf32, #tpu.memory_space<any>>) dst(%116 : memref<1x1024xf32, #tpu.memory_space<vmem>>)
    %c22_i32 = arith.constant 22 : i32
    %c0_i32_95 = arith.constant 0 : i32
    %c0_i32_96 = arith.constant 0 : i32
    %119 = tpu.memref_slice %arg2[%c0_i32_95, %c0_i32_96] : memref<16x1024xf32, #tpu.memory_space<any>> -> memref<1x1024xf32, #tpu.memory_space<any>>
    %c22_i32_97 = arith.constant 22 : i32
    %c0_i32_98 = arith.constant 0 : i32
    %120 = tpu.memref_slice %arg5[%0, %c22_i32_97, %c0_i32_98] : memref<2x64x1024xf32, #tpu.memory_space<vmem>> -> memref<1x1x1024xf32, #tpu.memory_space<vmem>>
    %121 = tpu.memref_squeeze %120 : memref<1x1x1024xf32, #tpu.memory_space<vmem>> -> memref<1x1024xf32, #tpu.memory_space<vmem>>
    %122 = tpu.memref_slice %arg6[%0, %c22_i32] : memref<2x64x!tpu.dma_semaphore, #tpu.memory_space<semaphore_mem>> -> memref<1x1x!tpu.dma_semaphore, #tpu.memory_space<semaphore_mem>>
    %123 = tpu.memref_squeeze %122 : memref<1x1x!tpu.dma_semaphore, #tpu.memory_space<semaphore_mem>> -> memref<!tpu.dma_semaphore, #tpu.memory_space<semaphore_mem>>
    tpu.wait_dma2 semaphore(%123 : memref<!tpu.dma_semaphore, #tpu.memory_space<semaphore_mem>>) src(%119 : memref<1x1024xf32, #tpu.memory_space<any>>) dst(%121 : memref<1x1024xf32, #tpu.memory_space<vmem>>)
    %c23_i32 = arith.constant 23 : i32
    %c0_i32_99 = arith.constant 0 : i32
    %c0_i32_100 = arith.constant 0 : i32
    %124 = tpu.memref_slice %arg2[%c0_i32_99, %c0_i32_100] : memref<16x1024xf32, #tpu.memory_space<any>> -> memref<1x1024xf32, #tpu.memory_space<any>>
    %c23_i32_101 = arith.constant 23 : i32
    %c0_i32_102 = arith.constant 0 : i32
    %125 = tpu.memref_slice %arg5[%0, %c23_i32_101, %c0_i32_102] : memref<2x64x1024xf32, #tpu.memory_space<vmem>> -> memref<1x1x1024xf32, #tpu.memory_space<vmem>>
    %126 = tpu.memref_squeeze %125 : memref<1x1x1024xf32, #tpu.memory_space<vmem>> -> memref<1x1024xf32, #tpu.memory_space<vmem>>
    %127 = tpu.memref_slice %arg6[%0, %c23_i32] : memref<2x64x!tpu.dma_semaphore, #tpu.memory_space<semaphore_mem>> -> memref<1x1x!tpu.dma_semaphore, #tpu.memory_space<semaphore_mem>>
    %128 = tpu.memref_squeeze %127 : memref<1x1x!tpu.dma_semaphore, #tpu.memory_space<semaphore_mem>> -> memref<!tpu.dma_semaphore, #tpu.memory_space<semaphore_mem>>
    tpu.wait_dma2 semaphore(%128 : memref<!tpu.dma_semaphore, #tpu.memory_space<semaphore_mem>>) src(%124 : memref<1x1024xf32, #tpu.memory_space<any>>) dst(%126 : memref<1x1024xf32, #tpu.memory_space<vmem>>)
    %c24_i32 = arith.constant 24 : i32
    %c0_i32_103 = arith.constant 0 : i32
    %c0_i32_104 = arith.constant 0 : i32
    %129 = tpu.memref_slice %arg2[%c0_i32_103, %c0_i32_104] : memref<16x1024xf32, #tpu.memory_space<any>> -> memref<1x1024xf32, #tpu.memory_space<any>>
    %c24_i32_105 = arith.constant 24 : i32
    %c0_i32_106 = arith.constant 0 : i32
    %130 = tpu.memref_slice %arg5[%0, %c24_i32_105, %c0_i32_106] : memref<2x64x1024xf32, #tpu.memory_space<vmem>> -> memref<1x1x1024xf32, #tpu.memory_space<vmem>>
    %131 = tpu.memref_squeeze %130 : memref<1x1x1024xf32, #tpu.memory_space<vmem>> -> memref<1x1024xf32, #tpu.memory_space<vmem>>
    %132 = tpu.memref_slice %arg6[%0, %c24_i32] : memref<2x64x!tpu.dma_semaphore, #tpu.memory_space<semaphore_mem>> -> memref<1x1x!tpu.dma_semaphore, #tpu.memory_space<semaphore_mem>>
    %133 = tpu.memref_squeeze %132 : memref<1x1x!tpu.dma_semaphore, #tpu.memory_space<semaphore_mem>> -> memref<!tpu.dma_semaphore, #tpu.memory_space<semaphore_mem>>
    tpu.wait_dma2 semaphore(%133 : memref<!tpu.dma_semaphore, #tpu.memory_space<semaphore_mem>>) src(%129 : memref<1x1024xf32, #tpu.memory_space<any>>) dst(%131 : memref<1x1024xf32, #tpu.memory_space<vmem>>)
    %c25_i32 = arith.constant 25 : i32
    %c0_i32_107 = arith.constant 0 : i32
    %c0_i32_108 = arith.constant 0 : i32
    %134 = tpu.memref_slice %arg2[%c0_i32_107, %c0_i32_108] : memref<16x1024xf32, #tpu.memory_space<any>> -> memref<1x1024xf32, #tpu.memory_space<any>>
    %c25_i32_109 = arith.constant 25 : i32
    %c0_i32_110 = arith.constant 0 : i32
    %135 = tpu.memref_slice %arg5[%0, %c25_i32_109, %c0_i32_110] : memref<2x64x1024xf32, #tpu.memory_space<vmem>> -> memref<1x1x1024xf32, #tpu.memory_space<vmem>>
    %136 = tpu.memref_squeeze %135 : memref<1x1x1024xf32, #tpu.memory_space<vmem>> -> memref<1x1024xf32, #tpu.memory_space<vmem>>
    %137 = tpu.memref_slice %arg6[%0, %c25_i32] : memref<2x64x!tpu.dma_semaphore, #tpu.memory_space<semaphore_mem>> -> memref<1x1x!tpu.dma_semaphore, #tpu.memory_space<semaphore_mem>>
    %138 = tpu.memref_squeeze %137 : memref<1x1x!tpu.dma_semaphore, #tpu.memory_space<semaphore_mem>> -> memref<!tpu.dma_semaphore, #tpu.memory_space<semaphore_mem>>
    tpu.wait_dma2 semaphore(%138 : memref<!tpu.dma_semaphore, #tpu.memory_space<semaphore_mem>>) src(%134 : memref<1x1024xf32, #tpu.memory_space<any>>) dst(%136 : memref<1x1024xf32, #tpu.memory_space<vmem>>)
    %c26_i32 = arith.constant 26 : i32
    %c0_i32_111 = arith.constant 0 : i32
    %c0_i32_112 = arith.constant 0 : i32
    %139 = tpu.memref_slice %arg2[%c0_i32_111, %c0_i32_112] : memref<16x1024xf32, #tpu.memory_space<any>> -> memref<1x1024xf32, #tpu.memory_space<any>>
    %c26_i32_113 = arith.constant 26 : i32
    %c0_i32_114 = arith.constant 0 : i32
    %140 = tpu.memref_slice %arg5[%0, %c26_i32_113, %c0_i32_114] : memref<2x64x1024xf32, #tpu.memory_space<vmem>> -> memref<1x1x1024xf32, #tpu.memory_space<vmem>>
    %141 = tpu.memref_squeeze %140 : memref<1x1x1024xf32, #tpu.memory_space<vmem>> -> memref<1x1024xf32, #tpu.memory_space<vmem>>
    %142 = tpu.memref_slice %arg6[%0, %c26_i32] : memref<2x64x!tpu.dma_semaphore, #tpu.memory_space<semaphore_mem>> -> memref<1x1x!tpu.dma_semaphore, #tpu.memory_space<semaphore_mem>>
    %143 = tpu.memref_squeeze %142 : memref<1x1x!tpu.dma_semaphore, #tpu.memory_space<semaphore_mem>> -> memref<!tpu.dma_semaphore, #tpu.memory_space<semaphore_mem>>
    tpu.wait_dma2 semaphore(%143 : memref<!tpu.dma_semaphore, #tpu.memory_space<semaphore_mem>>) src(%139 : memref<1x1024xf32, #tpu.memory_space<any>>) dst(%141 : memref<1x1024xf32, #tpu.memory_space<vmem>>)
    %c27_i32 = arith.constant 27 : i32
    %c0_i32_115 = arith.constant 0 : i32
    %c0_i32_116 = arith.constant 0 : i32
    %144 = tpu.memref_slice %arg2[%c0_i32_115, %c0_i32_116] : memref<16x1024xf32, #tpu.memory_space<any>> -> memref<1x1024xf32, #tpu.memory_space<any>>
    %c27_i32_117 = arith.constant 27 : i32
    %c0_i32_118 = arith.constant 0 : i32
    %145 = tpu.memref_slice %arg5[%0, %c27_i32_117, %c0_i32_118] : memref<2x64x1024xf32, #tpu.memory_space<vmem>> -> memref<1x1x1024xf32, #tpu.memory_space<vmem>>
    %146 = tpu.memref_squeeze %145 : memref<1x1x1024xf32, #tpu.memory_space<vmem>> -> memref<1x1024xf32, #tpu.memory_space<vmem>>
    %147 = tpu.memref_slice %arg6[%0, %c27_i32] : memref<2x64x!tpu.dma_semaphore, #tpu.memory_space<semaphore_mem>> -> memref<1x1x!tpu.dma_semaphore, #tpu.memory_space<semaphore_mem>>
    %148 = tpu.memref_squeeze %147 : memref<1x1x!tpu.dma_semaphore, #tpu.memory_space<semaphore_mem>> -> memref<!tpu.dma_semaphore, #tpu.memory_space<semaphore_mem>>
    tpu.wait_dma2 semaphore(%148 : memref<!tpu.dma_semaphore, #tpu.memory_space<semaphore_mem>>) src(%144 : memref<1x1024xf32, #tpu.memory_space<any>>) dst(%146 : memref<1x1024xf32, #tpu.memory_space<vmem>>)
    %c28_i32 = arith.constant 28 : i32
    %c0_i32_119 = arith.constant 0 : i32
    %c0_i32_120 = arith.constant 0 : i32
    %149 = tpu.memref_slice %arg2[%c0_i32_119, %c0_i32_120] : memref<16x1024xf32, #tpu.memory_space<any>> -> memref<1x1024xf32, #tpu.memory_space<any>>
    %c28_i32_121 = arith.constant 28 : i32
    %c0_i32_122 = arith.constant 0 : i32
    %150 = tpu.memref_slice %arg5[%0, %c28_i32_121, %c0_i32_122] : memref<2x64x1024xf32, #tpu.memory_space<vmem>> -> memref<1x1x1024xf32, #tpu.memory_space<vmem>>
    %151 = tpu.memref_squeeze %150 : memref<1x1x1024xf32, #tpu.memory_space<vmem>> -> memref<1x1024xf32, #tpu.memory_space<vmem>>
    %152 = tpu.memref_slice %arg6[%0, %c28_i32] : memref<2x64x!tpu.dma_semaphore, #tpu.memory_space<semaphore_mem>> -> memref<1x1x!tpu.dma_semaphore, #tpu.memory_space<semaphore_mem>>
    %153 = tpu.memref_squeeze %152 : memref<1x1x!tpu.dma_semaphore, #tpu.memory_space<semaphore_mem>> -> memref<!tpu.dma_semaphore, #tpu.memory_space<semaphore_mem>>
    tpu.wait_dma2 semaphore(%153 : memref<!tpu.dma_semaphore, #tpu.memory_space<semaphore_mem>>) src(%149 : memref<1x1024xf32, #tpu.memory_space<any>>) dst(%151 : memref<1x1024xf32, #tpu.memory_space<vmem>>)
    %c29_i32 = arith.constant 29 : i32
    %c0_i32_123 = arith.constant 0 : i32
    %c0_i32_124 = arith.constant 0 : i32
    %154 = tpu.memref_slice %arg2[%c0_i32_123, %c0_i32_124] : memref<16x1024xf32, #tpu.memory_space<any>> -> memref<1x1024xf32, #tpu.memory_space<any>>
    %c29_i32_125 = arith.constant 29 : i32
    %c0_i32_126 = arith.constant 0 : i32
    %155 = tpu.memref_slice %arg5[%0, %c29_i32_125, %c0_i32_126] : memref<2x64x1024xf32, #tpu.memory_space<vmem>> -> memref<1x1x1024xf32, #tpu.memory_space<vmem>>
    %156 = tpu.memref_squeeze %155 : memref<1x1x1024xf32, #tpu.memory_space<vmem>> -> memref<1x1024xf32, #tpu.memory_space<vmem>>
    %157 = tpu.memref_slice %arg6[%0, %c29_i32] : memref<2x64x!tpu.dma_semaphore, #tpu.memory_space<semaphore_mem>> -> memref<1x1x!tpu.dma_semaphore, #tpu.memory_space<semaphore_mem>>
    %158 = tpu.memref_squeeze %157 : memref<1x1x!tpu.dma_semaphore, #tpu.memory_space<semaphore_mem>> -> memref<!tpu.dma_semaphore, #tpu.memory_space<semaphore_mem>>
    tpu.wait_dma2 semaphore(%158 : memref<!tpu.dma_semaphore, #tpu.memory_space<semaphore_mem>>) src(%154 : memref<1x1024xf32, #tpu.memory_space<any>>) dst(%156 : memref<1x1024xf32, #tpu.memory_space<vmem>>)
    %c30_i32 = arith.constant 30 : i32
    %c0_i32_127 = arith.constant 0 : i32
    %c0_i32_128 = arith.constant 0 : i32
    %159 = tpu.memref_slice %arg2[%c0_i32_127, %c0_i32_128] : memref<16x1024xf32, #tpu.memory_space<any>> -> memref<1x1024xf32, #tpu.memory_space<any>>
    %c30_i32_129 = arith.constant 30 : i32
    %c0_i32_130 = arith.constant 0 : i32
    %160 = tpu.memref_slice %arg5[%0, %c30_i32_129, %c0_i32_130] : memref<2x64x1024xf32, #tpu.memory_space<vmem>> -> memref<1x1x1024xf32, #tpu.memory_space<vmem>>
    %161 = tpu.memref_squeeze %160 : memref<1x1x1024xf32, #tpu.memory_space<vmem>> -> memref<1x1024xf32, #tpu.memory_space<vmem>>
    %162 = tpu.memref_slice %arg6[%0, %c30_i32] : memref<2x64x!tpu.dma_semaphore, #tpu.memory_space<semaphore_mem>> -> memref<1x1x!tpu.dma_semaphore, #tpu.memory_space<semaphore_mem>>
    %163 = tpu.memref_squeeze %162 : memref<1x1x!tpu.dma_semaphore, #tpu.memory_space<semaphore_mem>> -> memref<!tpu.dma_semaphore, #tpu.memory_space<semaphore_mem>>
    tpu.wait_dma2 semaphore(%163 : memref<!tpu.dma_semaphore, #tpu.memory_space<semaphore_mem>>) src(%159 : memref<1x1024xf32, #tpu.memory_space<any>>) dst(%161 : memref<1x1024xf32, #tpu.memory_space<vmem>>)
    %c31_i32 = arith.constant 31 : i32
    %c0_i32_131 = arith.constant 0 : i32
    %c0_i32_132 = arith.constant 0 : i32
    %164 = tpu.memref_slice %arg2[%c0_i32_131, %c0_i32_132] : memref<16x1024xf32, #tpu.memory_space<any>> -> memref<1x1024xf32, #tpu.memory_space<any>>
    %c31_i32_133 = arith.constant 31 : i32
    %c0_i32_134 = arith.constant 0 : i32
    %165 = tpu.memref_slice %arg5[%0, %c31_i32_133, %c0_i32_134] : memref<2x64x1024xf32, #tpu.memory_space<vmem>> -> memref<1x1x1024xf32, #tpu.memory_space<vmem>>
    %166 = tpu.memref_squeeze %165 : memref<1x1x1024xf32, #tpu.memory_space<vmem>> -> memref<1x1024xf32, #tpu.memory_space<vmem>>
    %167 = tpu.memref_slice %arg6[%0, %c31_i32] : memref<2x64x!tpu.dma_semaphore, #tpu.memory_space<semaphore_mem>> -> memref<1x1x!tpu.dma_semaphore, #tpu.memory_space<semaphore_mem>>
    %168 = tpu.memref_squeeze %167 : memref<1x1x!tpu.dma_semaphore, #tpu.memory_space<semaphore_mem>> -> memref<!tpu.dma_semaphore, #tpu.memory_space<semaphore_mem>>
    tpu.wait_dma2 semaphore(%168 : memref<!tpu.dma_semaphore, #tpu.memory_space<semaphore_mem>>) src(%164 : memref<1x1024xf32, #tpu.memory_space<any>>) dst(%166 : memref<1x1024xf32, #tpu.memory_space<vmem>>)
    %c32_i32 = arith.constant 32 : i32
    %c0_i32_135 = arith.constant 0 : i32
    %c0_i32_136 = arith.constant 0 : i32
    %169 = tpu.memref_slice %arg2[%c0_i32_135, %c0_i32_136] : memref<16x1024xf32, #tpu.memory_space<any>> -> memref<1x1024xf32, #tpu.memory_space<any>>
    %c32_i32_137 = arith.constant 32 : i32
    %c0_i32_138 = arith.constant 0 : i32
    %170 = tpu.memref_slice %arg5[%0, %c32_i32_137, %c0_i32_138] : memref<2x64x1024xf32, #tpu.memory_space<vmem>> -> memref<1x1x1024xf32, #tpu.memory_space<vmem>>
    %171 = tpu.memref_squeeze %170 : memref<1x1x1024xf32, #tpu.memory_space<vmem>> -> memref<1x1024xf32, #tpu.memory_space<vmem>>
    %172 = tpu.memref_slice %arg6[%0, %c32_i32] : memref<2x64x!tpu.dma_semaphore, #tpu.memory_space<semaphore_mem>> -> memref<1x1x!tpu.dma_semaphore, #tpu.memory_space<semaphore_mem>>
    %173 = tpu.memref_squeeze %172 : memref<1x1x!tpu.dma_semaphore, #tpu.memory_space<semaphore_mem>> -> memref<!tpu.dma_semaphore, #tpu.memory_space<semaphore_mem>>
    tpu.wait_dma2 semaphore(%173 : memref<!tpu.dma_semaphore, #tpu.memory_space<semaphore_mem>>) src(%169 : memref<1x1024xf32, #tpu.memory_space<any>>) dst(%171 : memref<1x1024xf32, #tpu.memory_space<vmem>>)
    %c33_i32 = arith.constant 33 : i32
    %c0_i32_139 = arith.constant 0 : i32
    %c0_i32_140 = arith.constant 0 : i32
    %174 = tpu.memref_slice %arg2[%c0_i32_139, %c0_i32_140] : memref<16x1024xf32, #tpu.memory_space<any>> -> memref<1x1024xf32, #tpu.memory_space<any>>
    %c33_i32_141 = arith.constant 33 : i32
    %c0_i32_142 = arith.constant 0 : i32
    %175 = tpu.memref_slice %arg5[%0, %c33_i32_141, %c0_i32_142] : memref<2x64x1024xf32, #tpu.memory_space<vmem>> -> memref<1x1x1024xf32, #tpu.memory_space<vmem>>
    %176 = tpu.memref_squeeze %175 : memref<1x1x1024xf32, #tpu.memory_space<vmem>> -> memref<1x1024xf32, #tpu.memory_space<vmem>>
    %177 = tpu.memref_slice %arg6[%0, %c33_i32] : memref<2x64x!tpu.dma_semaphore, #tpu.memory_space<semaphore_mem>> -> memref<1x1x!tpu.dma_semaphore, #tpu.memory_space<semaphore_mem>>
    %178 = tpu.memref_squeeze %177 : memref<1x1x!tpu.dma_semaphore, #tpu.memory_space<semaphore_mem>> -> memref<!tpu.dma_semaphore, #tpu.memory_space<semaphore_mem>>
    tpu.wait_dma2 semaphore(%178 : memref<!tpu.dma_semaphore, #tpu.memory_space<semaphore_mem>>) src(%174 : memref<1x1024xf32, #tpu.memory_space<any>>) dst(%176 : memref<1x1024xf32, #tpu.memory_space<vmem>>)
    %c34_i32 = arith.constant 34 : i32
    %c0_i32_143 = arith.constant 0 : i32
    %c0_i32_144 = arith.constant 0 : i32
    %179 = tpu.memref_slice %arg2[%c0_i32_143, %c0_i32_144] : memref<16x1024xf32, #tpu.memory_space<any>> -> memref<1x1024xf32, #tpu.memory_space<any>>
    %c34_i32_145 = arith.constant 34 : i32
    %c0_i32_146 = arith.constant 0 : i32
    %180 = tpu.memref_slice %arg5[%0, %c34_i32_145, %c0_i32_146] : memref<2x64x1024xf32, #tpu.memory_space<vmem>> -> memref<1x1x1024xf32, #tpu.memory_space<vmem>>
    %181 = tpu.memref_squeeze %180 : memref<1x1x1024xf32, #tpu.memory_space<vmem>> -> memref<1x1024xf32, #tpu.memory_space<vmem>>
    %182 = tpu.memref_slice %arg6[%0, %c34_i32] : memref<2x64x!tpu.dma_semaphore, #tpu.memory_space<semaphore_mem>> -> memref<1x1x!tpu.dma_semaphore, #tpu.memory_space<semaphore_mem>>
    %183 = tpu.memref_squeeze %182 : memref<1x1x!tpu.dma_semaphore, #tpu.memory_space<semaphore_mem>> -> memref<!tpu.dma_semaphore, #tpu.memory_space<semaphore_mem>>
    tpu.wait_dma2 semaphore(%183 : memref<!tpu.dma_semaphore, #tpu.memory_space<semaphore_mem>>) src(%179 : memref<1x1024xf32, #tpu.memory_space<any>>) dst(%181 : memref<1x1024xf32, #tpu.memory_space<vmem>>)
    %c35_i32 = arith.constant 35 : i32
    %c0_i32_147 = arith.constant 0 : i32
    %c0_i32_148 = arith.constant 0 : i32
    %184 = tpu.memref_slice %arg2[%c0_i32_147, %c0_i32_148] : memref<16x1024xf32, #tpu.memory_space<any>> -> memref<1x1024xf32, #tpu.memory_space<any>>
    %c35_i32_149 = arith.constant 35 : i32
    %c0_i32_150 = arith.constant 0 : i32
    %185 = tpu.memref_slice %arg5[%0, %c35_i32_149, %c0_i32_150] : memref<2x64x1024xf32, #tpu.memory_space<vmem>> -> memref<1x1x1024xf32, #tpu.memory_space<vmem>>
    %186 = tpu.memref_squeeze %185 : memref<1x1x1024xf32, #tpu.memory_space<vmem>> -> memref<1x1024xf32, #tpu.memory_space<vmem>>
    %187 = tpu.memref_slice %arg6[%0, %c35_i32] : memref<2x64x!tpu.dma_semaphore, #tpu.memory_space<semaphore_mem>> -> memref<1x1x!tpu.dma_semaphore, #tpu.memory_space<semaphore_mem>>
    %188 = tpu.memref_squeeze %187 : memref<1x1x!tpu.dma_semaphore, #tpu.memory_space<semaphore_mem>> -> memref<!tpu.dma_semaphore, #tpu.memory_space<semaphore_mem>>
    tpu.wait_dma2 semaphore(%188 : memref<!tpu.dma_semaphore, #tpu.memory_space<semaphore_mem>>) src(%184 : memref<1x1024xf32, #tpu.memory_space<any>>) dst(%186 : memref<1x1024xf32, #tpu.memory_space<vmem>>)
    %c36_i32 = arith.constant 36 : i32
    %c0_i32_151 = arith.constant 0 : i32
    %c0_i32_152 = arith.constant 0 : i32
    %189 = tpu.memref_slice %arg2[%c0_i32_151, %c0_i32_152] : memref<16x1024xf32, #tpu.memory_space<any>> -> memref<1x1024xf32, #tpu.memory_space<any>>
    %c36_i32_153 = arith.constant 36 : i32
    %c0_i32_154 = arith.constant 0 : i32
    %190 = tpu.memref_slice %arg5[%0, %c36_i32_153, %c0_i32_154] : memref<2x64x1024xf32, #tpu.memory_space<vmem>> -> memref<1x1x1024xf32, #tpu.memory_space<vmem>>
    %191 = tpu.memref_squeeze %190 : memref<1x1x1024xf32, #tpu.memory_space<vmem>> -> memref<1x1024xf32, #tpu.memory_space<vmem>>
    %192 = tpu.memref_slice %arg6[%0, %c36_i32] : memref<2x64x!tpu.dma_semaphore, #tpu.memory_space<semaphore_mem>> -> memref<1x1x!tpu.dma_semaphore, #tpu.memory_space<semaphore_mem>>
    %193 = tpu.memref_squeeze %192 : memref<1x1x!tpu.dma_semaphore, #tpu.memory_space<semaphore_mem>> -> memref<!tpu.dma_semaphore, #tpu.memory_space<semaphore_mem>>
    tpu.wait_dma2 semaphore(%193 : memref<!tpu.dma_semaphore, #tpu.memory_space<semaphore_mem>>) src(%189 : memref<1x1024xf32, #tpu.memory_space<any>>) dst(%191 : memref<1x1024xf32, #tpu.memory_space<vmem>>)
    %c37_i32 = arith.constant 37 : i32
    %c0_i32_155 = arith.constant 0 : i32
    %c0_i32_156 = arith.constant 0 : i32
    %194 = tpu.memref_slice %arg2[%c0_i32_155, %c0_i32_156] : memref<16x1024xf32, #tpu.memory_space<any>> -> memref<1x1024xf32, #tpu.memory_space<any>>
    %c37_i32_157 = arith.constant 37 : i32
    %c0_i32_158 = arith.constant 0 : i32
    %195 = tpu.memref_slice %arg5[%0, %c37_i32_157, %c0_i32_158] : memref<2x64x1024xf32, #tpu.memory_space<vmem>> -> memref<1x1x1024xf32, #tpu.memory_space<vmem>>
    %196 = tpu.memref_squeeze %195 : memref<1x1x1024xf32, #tpu.memory_space<vmem>> -> memref<1x1024xf32, #tpu.memory_space<vmem>>
    %197 = tpu.memref_slice %arg6[%0, %c37_i32] : memref<2x64x!tpu.dma_semaphore, #tpu.memory_space<semaphore_mem>> -> memref<1x1x!tpu.dma_semaphore, #tpu.memory_space<semaphore_mem>>
    %198 = tpu.memref_squeeze %197 : memref<1x1x!tpu.dma_semaphore, #tpu.memory_space<semaphore_mem>> -> memref<!tpu.dma_semaphore, #tpu.memory_space<semaphore_mem>>
    tpu.wait_dma2 semaphore(%198 : memref<!tpu.dma_semaphore, #tpu.memory_space<semaphore_mem>>) src(%194 : memref<1x1024xf32, #tpu.memory_space<any>>) dst(%196 : memref<1x1024xf32, #tpu.memory_space<vmem>>)
    %c38_i32 = arith.constant 38 : i32
    %c0_i32_159 = arith.constant 0 : i32
    %c0_i32_160 = arith.constant 0 : i32
    %199 = tpu.memref_slice %arg2[%c0_i32_159, %c0_i32_160] : memref<16x1024xf32, #tpu.memory_space<any>> -> memref<1x1024xf32, #tpu.memory_space<any>>
    %c38_i32_161 = arith.constant 38 : i32
    %c0_i32_162 = arith.constant 0 : i32
    %200 = tpu.memref_slice %arg5[%0, %c38_i32_161, %c0_i32_162] : memref<2x64x1024xf32, #tpu.memory_space<vmem>> -> memref<1x1x1024xf32, #tpu.memory_space<vmem>>
    %201 = tpu.memref_squeeze %200 : memref<1x1x1024xf32, #tpu.memory_space<vmem>> -> memref<1x1024xf32, #tpu.memory_space<vmem>>
    %202 = tpu.memref_slice %arg6[%0, %c38_i32] : memref<2x64x!tpu.dma_semaphore, #tpu.memory_space<semaphore_mem>> -> memref<1x1x!tpu.dma_semaphore, #tpu.memory_space<semaphore_mem>>
    %203 = tpu.memref_squeeze %202 : memref<1x1x!tpu.dma_semaphore, #tpu.memory_space<semaphore_mem>> -> memref<!tpu.dma_semaphore, #tpu.memory_space<semaphore_mem>>
    tpu.wait_dma2 semaphore(%203 : memref<!tpu.dma_semaphore, #tpu.memory_space<semaphore_mem>>) src(%199 : memref<1x1024xf32, #tpu.memory_space<any>>) dst(%201 : memref<1x1024xf32, #tpu.memory_space<vmem>>)
    %c39_i32 = arith.constant 39 : i32
    %c0_i32_163 = arith.constant 0 : i32
    %c0_i32_164 = arith.constant 0 : i32
    %204 = tpu.memref_slice %arg2[%c0_i32_163, %c0_i32_164] : memref<16x1024xf32, #tpu.memory_space<any>> -> memref<1x1024xf32, #tpu.memory_space<any>>
    %c39_i32_165 = arith.constant 39 : i32
    %c0_i32_166 = arith.constant 0 : i32
    %205 = tpu.memref_slice %arg5[%0, %c39_i32_165, %c0_i32_166] : memref<2x64x1024xf32, #tpu.memory_space<vmem>> -> memref<1x1x1024xf32, #tpu.memory_space<vmem>>
    %206 = tpu.memref_squeeze %205 : memref<1x1x1024xf32, #tpu.memory_space<vmem>> -> memref<1x1024xf32, #tpu.memory_space<vmem>>
    %207 = tpu.memref_slice %arg6[%0, %c39_i32] : memref<2x64x!tpu.dma_semaphore, #tpu.memory_space<semaphore_mem>> -> memref<1x1x!tpu.dma_semaphore, #tpu.memory_space<semaphore_mem>>
    %208 = tpu.memref_squeeze %207 : memref<1x1x!tpu.dma_semaphore, #tpu.memory_space<semaphore_mem>> -> memref<!tpu.dma_semaphore, #tpu.memory_space<semaphore_mem>>
    tpu.wait_dma2 semaphore(%208 : memref<!tpu.dma_semaphore, #tpu.memory_space<semaphore_mem>>) src(%204 : memref<1x1024xf32, #tpu.memory_space<any>>) dst(%206 : memref<1x1024xf32, #tpu.memory_space<vmem>>)
    %c40_i32 = arith.constant 40 : i32
    %c0_i32_167 = arith.constant 0 : i32
    %c0_i32_168 = arith.constant 0 : i32
    %209 = tpu.memref_slice %arg2[%c0_i32_167, %c0_i32_168] : memref<16x1024xf32, #tpu.memory_space<any>> -> memref<1x1024xf32, #tpu.memory_space<any>>
    %c40_i32_169 = arith.constant 40 : i32
    %c0_i32_170 = arith.constant 0 : i32
    %210 = tpu.memref_slice %arg5[%0, %c40_i32_169, %c0_i32_170] : memref<2x64x1024xf32, #tpu.memory_space<vmem>> -> memref<1x1x1024xf32, #tpu.memory_space<vmem>>
    %211 = tpu.memref_squeeze %210 : memref<1x1x1024xf32, #tpu.memory_space<vmem>> -> memref<1x1024xf32, #tpu.memory_space<vmem>>
    %212 = tpu.memref_slice %arg6[%0, %c40_i32] : memref<2x64x!tpu.dma_semaphore, #tpu.memory_space<semaphore_mem>> -> memref<1x1x!tpu.dma_semaphore, #tpu.memory_space<semaphore_mem>>
    %213 = tpu.memref_squeeze %212 : memref<1x1x!tpu.dma_semaphore, #tpu.memory_space<semaphore_mem>> -> memref<!tpu.dma_semaphore, #tpu.memory_space<semaphore_mem>>
    tpu.wait_dma2 semaphore(%213 : memref<!tpu.dma_semaphore, #tpu.memory_space<semaphore_mem>>) src(%209 : memref<1x1024xf32, #tpu.memory_space<any>>) dst(%211 : memref<1x1024xf32, #tpu.memory_space<vmem>>)
    %c41_i32 = arith.constant 41 : i32
    %c0_i32_171 = arith.constant 0 : i32
    %c0_i32_172 = arith.constant 0 : i32
    %214 = tpu.memref_slice %arg2[%c0_i32_171, %c0_i32_172] : memref<16x1024xf32, #tpu.memory_space<any>> -> memref<1x1024xf32, #tpu.memory_space<any>>
    %c41_i32_173 = arith.constant 41 : i32
    %c0_i32_174 = arith.constant 0 : i32
    %215 = tpu.memref_slice %arg5[%0, %c41_i32_173, %c0_i32_174] : memref<2x64x1024xf32, #tpu.memory_space<vmem>> -> memref<1x1x1024xf32, #tpu.memory_space<vmem>>
    %216 = tpu.memref_squeeze %215 : memref<1x1x1024xf32, #tpu.memory_space<vmem>> -> memref<1x1024xf32, #tpu.memory_space<vmem>>
    %217 = tpu.memref_slice %arg6[%0, %c41_i32] : memref<2x64x!tpu.dma_semaphore, #tpu.memory_space<semaphore_mem>> -> memref<1x1x!tpu.dma_semaphore, #tpu.memory_space<semaphore_mem>>
    %218 = tpu.memref_squeeze %217 : memref<1x1x!tpu.dma_semaphore, #tpu.memory_space<semaphore_mem>> -> memref<!tpu.dma_semaphore, #tpu.memory_space<semaphore_mem>>
    tpu.wait_dma2 semaphore(%218 : memref<!tpu.dma_semaphore, #tpu.memory_space<semaphore_mem>>) src(%214 : memref<1x1024xf32, #tpu.memory_space<any>>) dst(%216 : memref<1x1024xf32, #tpu.memory_space<vmem>>)
    %c42_i32 = arith.constant 42 : i32
    %c0_i32_175 = arith.constant 0 : i32
    %c0_i32_176 = arith.constant 0 : i32
    %219 = tpu.memref_slice %arg2[%c0_i32_175, %c0_i32_176] : memref<16x1024xf32, #tpu.memory_space<any>> -> memref<1x1024xf32, #tpu.memory_space<any>>
    %c42_i32_177 = arith.constant 42 : i32
    %c0_i32_178 = arith.constant 0 : i32
    %220 = tpu.memref_slice %arg5[%0, %c42_i32_177, %c0_i32_178] : memref<2x64x1024xf32, #tpu.memory_space<vmem>> -> memref<1x1x1024xf32, #tpu.memory_space<vmem>>
    %221 = tpu.memref_squeeze %220 : memref<1x1x1024xf32, #tpu.memory_space<vmem>> -> memref<1x1024xf32, #tpu.memory_space<vmem>>
    %222 = tpu.memref_slice %arg6[%0, %c42_i32] : memref<2x64x!tpu.dma_semaphore, #tpu.memory_space<semaphore_mem>> -> memref<1x1x!tpu.dma_semaphore, #tpu.memory_space<semaphore_mem>>
    %223 = tpu.memref_squeeze %222 : memref<1x1x!tpu.dma_semaphore, #tpu.memory_space<semaphore_mem>> -> memref<!tpu.dma_semaphore, #tpu.memory_space<semaphore_mem>>
    tpu.wait_dma2 semaphore(%223 : memref<!tpu.dma_semaphore, #tpu.memory_space<semaphore_mem>>) src(%219 : memref<1x1024xf32, #tpu.memory_space<any>>) dst(%221 : memref<1x1024xf32, #tpu.memory_space<vmem>>)
    %c43_i32 = arith.constant 43 : i32
    %c0_i32_179 = arith.constant 0 : i32
    %c0_i32_180 = arith.constant 0 : i32
    %224 = tpu.memref_slice %arg2[%c0_i32_179, %c0_i32_180] : memref<16x1024xf32, #tpu.memory_space<any>> -> memref<1x1024xf32, #tpu.memory_space<any>>
    %c43_i32_181 = arith.constant 43 : i32
    %c0_i32_182 = arith.constant 0 : i32
    %225 = tpu.memref_slice %arg5[%0, %c43_i32_181, %c0_i32_182] : memref<2x64x1024xf32, #tpu.memory_space<vmem>> -> memref<1x1x1024xf32, #tpu.memory_space<vmem>>
    %226 = tpu.memref_squeeze %225 : memref<1x1x1024xf32, #tpu.memory_space<vmem>> -> memref<1x1024xf32, #tpu.memory_space<vmem>>
    %227 = tpu.memref_slice %arg6[%0, %c43_i32] : memref<2x64x!tpu.dma_semaphore, #tpu.memory_space<semaphore_mem>> -> memref<1x1x!tpu.dma_semaphore, #tpu.memory_space<semaphore_mem>>
    %228 = tpu.memref_squeeze %227 : memref<1x1x!tpu.dma_semaphore, #tpu.memory_space<semaphore_mem>> -> memref<!tpu.dma_semaphore, #tpu.memory_space<semaphore_mem>>
    tpu.wait_dma2 semaphore(%228 : memref<!tpu.dma_semaphore, #tpu.memory_space<semaphore_mem>>) src(%224 : memref<1x1024xf32, #tpu.memory_space<any>>) dst(%226 : memref<1x1024xf32, #tpu.memory_space<vmem>>)
    %c44_i32 = arith.constant 44 : i32
    %c0_i32_183 = arith.constant 0 : i32
    %c0_i32_184 = arith.constant 0 : i32
    %229 = tpu.memref_slice %arg2[%c0_i32_183, %c0_i32_184] : memref<16x1024xf32, #tpu.memory_space<any>> -> memref<1x1024xf32, #tpu.memory_space<any>>
    %c44_i32_185 = arith.constant 44 : i32
    %c0_i32_186 = arith.constant 0 : i32
    %230 = tpu.memref_slice %arg5[%0, %c44_i32_185, %c0_i32_186] : memref<2x64x1024xf32, #tpu.memory_space<vmem>> -> memref<1x1x1024xf32, #tpu.memory_space<vmem>>
    %231 = tpu.memref_squeeze %230 : memref<1x1x1024xf32, #tpu.memory_space<vmem>> -> memref<1x1024xf32, #tpu.memory_space<vmem>>
    %232 = tpu.memref_slice %arg6[%0, %c44_i32] : memref<2x64x!tpu.dma_semaphore, #tpu.memory_space<semaphore_mem>> -> memref<1x1x!tpu.dma_semaphore, #tpu.memory_space<semaphore_mem>>
    %233 = tpu.memref_squeeze %232 : memref<1x1x!tpu.dma_semaphore, #tpu.memory_space<semaphore_mem>> -> memref<!tpu.dma_semaphore, #tpu.memory_space<semaphore_mem>>
    tpu.wait_dma2 semaphore(%233 : memref<!tpu.dma_semaphore, #tpu.memory_space<semaphore_mem>>) src(%229 : memref<1x1024xf32, #tpu.memory_space<any>>) dst(%231 : memref<1x1024xf32, #tpu.memory_space<vmem>>)
    %c45_i32 = arith.constant 45 : i32
    %c0_i32_187 = arith.constant 0 : i32
    %c0_i32_188 = arith.constant 0 : i32
    %234 = tpu.memref_slice %arg2[%c0_i32_187, %c0_i32_188] : memref<16x1024xf32, #tpu.memory_space<any>> -> memref<1x1024xf32, #tpu.memory_space<any>>
    %c45_i32_189 = arith.constant 45 : i32
    %c0_i32_190 = arith.constant 0 : i32
    %235 = tpu.memref_slice %arg5[%0, %c45_i32_189, %c0_i32_190] : memref<2x64x1024xf32, #tpu.memory_space<vmem>> -> memref<1x1x1024xf32, #tpu.memory_space<vmem>>
    %236 = tpu.memref_squeeze %235 : memref<1x1x1024xf32, #tpu.memory_space<vmem>> -> memref<1x1024xf32, #tpu.memory_space<vmem>>
    %237 = tpu.memref_slice %arg6[%0, %c45_i32] : memref<2x64x!tpu.dma_semaphore, #tpu.memory_space<semaphore_mem>> -> memref<1x1x!tpu.dma_semaphore, #tpu.memory_space<semaphore_mem>>
    %238 = tpu.memref_squeeze %237 : memref<1x1x!tpu.dma_semaphore, #tpu.memory_space<semaphore_mem>> -> memref<!tpu.dma_semaphore, #tpu.memory_space<semaphore_mem>>
    tpu.wait_dma2 semaphore(%238 : memref<!tpu.dma_semaphore, #tpu.memory_space<semaphore_mem>>) src(%234 : memref<1x1024xf32, #tpu.memory_space<any>>) dst(%236 : memref<1x1024xf32, #tpu.memory_space<vmem>>)
    %c46_i32 = arith.constant 46 : i32
    %c0_i32_191 = arith.constant 0 : i32
    %c0_i32_192 = arith.constant 0 : i32
    %239 = tpu.memref_slice %arg2[%c0_i32_191, %c0_i32_192] : memref<16x1024xf32, #tpu.memory_space<any>> -> memref<1x1024xf32, #tpu.memory_space<any>>
    %c46_i32_193 = arith.constant 46 : i32
    %c0_i32_194 = arith.constant 0 : i32
    %240 = tpu.memref_slice %arg5[%0, %c46_i32_193, %c0_i32_194] : memref<2x64x1024xf32, #tpu.memory_space<vmem>> -> memref<1x1x1024xf32, #tpu.memory_space<vmem>>
    %241 = tpu.memref_squeeze %240 : memref<1x1x1024xf32, #tpu.memory_space<vmem>> -> memref<1x1024xf32, #tpu.memory_space<vmem>>
    %242 = tpu.memref_slice %arg6[%0, %c46_i32] : memref<2x64x!tpu.dma_semaphore, #tpu.memory_space<semaphore_mem>> -> memref<1x1x!tpu.dma_semaphore, #tpu.memory_space<semaphore_mem>>
    %243 = tpu.memref_squeeze %242 : memref<1x1x!tpu.dma_semaphore, #tpu.memory_space<semaphore_mem>> -> memref<!tpu.dma_semaphore, #tpu.memory_space<semaphore_mem>>
    tpu.wait_dma2 semaphore(%243 : memref<!tpu.dma_semaphore, #tpu.memory_space<semaphore_mem>>) src(%239 : memref<1x1024xf32, #tpu.memory_space<any>>) dst(%241 : memref<1x1024xf32, #tpu.memory_space<vmem>>)
    %c47_i32 = arith.constant 47 : i32
    %c0_i32_195 = arith.constant 0 : i32
    %c0_i32_196 = arith.constant 0 : i32
    %244 = tpu.memref_slice %arg2[%c0_i32_195, %c0_i32_196] : memref<16x1024xf32, #tpu.memory_space<any>> -> memref<1x1024xf32, #tpu.memory_space<any>>
    %c47_i32_197 = arith.constant 47 : i32
    %c0_i32_198 = arith.constant 0 : i32
    %245 = tpu.memref_slice %arg5[%0, %c47_i32_197, %c0_i32_198] : memref<2x64x1024xf32, #tpu.memory_space<vmem>> -> memref<1x1x1024xf32, #tpu.memory_space<vmem>>
    %246 = tpu.memref_squeeze %245 : memref<1x1x1024xf32, #tpu.memory_space<vmem>> -> memref<1x1024xf32, #tpu.memory_space<vmem>>
    %247 = tpu.memref_slice %arg6[%0, %c47_i32] : memref<2x64x!tpu.dma_semaphore, #tpu.memory_space<semaphore_mem>> -> memref<1x1x!tpu.dma_semaphore, #tpu.memory_space<semaphore_mem>>
    %248 = tpu.memref_squeeze %247 : memref<1x1x!tpu.dma_semaphore, #tpu.memory_space<semaphore_mem>> -> memref<!tpu.dma_semaphore, #tpu.memory_space<semaphore_mem>>
    tpu.wait_dma2 semaphore(%248 : memref<!tpu.dma_semaphore, #tpu.memory_space<semaphore_mem>>) src(%244 : memref<1x1024xf32, #tpu.memory_space<any>>) dst(%246 : memref<1x1024xf32, #tpu.memory_space<vmem>>)
    %c48_i32 = arith.constant 48 : i32
    %c0_i32_199 = arith.constant 0 : i32
    %c0_i32_200 = arith.constant 0 : i32
    %249 = tpu.memref_slice %arg2[%c0_i32_199, %c0_i32_200] : memref<16x1024xf32, #tpu.memory_space<any>> -> memref<1x1024xf32, #tpu.memory_space<any>>
    %c48_i32_201 = arith.constant 48 : i32
    %c0_i32_202 = arith.constant 0 : i32
    %250 = tpu.memref_slice %arg5[%0, %c48_i32_201, %c0_i32_202] : memref<2x64x1024xf32, #tpu.memory_space<vmem>> -> memref<1x1x1024xf32, #tpu.memory_space<vmem>>
    %251 = tpu.memref_squeeze %250 : memref<1x1x1024xf32, #tpu.memory_space<vmem>> -> memref<1x1024xf32, #tpu.memory_space<vmem>>
    %252 = tpu.memref_slice %arg6[%0, %c48_i32] : memref<2x64x!tpu.dma_semaphore, #tpu.memory_space<semaphore_mem>> -> memref<1x1x!tpu.dma_semaphore, #tpu.memory_space<semaphore_mem>>
    %253 = tpu.memref_squeeze %252 : memref<1x1x!tpu.dma_semaphore, #tpu.memory_space<semaphore_mem>> -> memref<!tpu.dma_semaphore, #tpu.memory_space<semaphore_mem>>
    tpu.wait_dma2 semaphore(%253 : memref<!tpu.dma_semaphore, #tpu.memory_space<semaphore_mem>>) src(%249 : memref<1x1024xf32, #tpu.memory_space<any>>) dst(%251 : memref<1x1024xf32, #tpu.memory_space<vmem>>)
    %c49_i32 = arith.constant 49 : i32
    %c0_i32_203 = arith.constant 0 : i32
    %c0_i32_204 = arith.constant 0 : i32
    %254 = tpu.memref_slice %arg2[%c0_i32_203, %c0_i32_204] : memref<16x1024xf32, #tpu.memory_space<any>> -> memref<1x1024xf32, #tpu.memory_space<any>>
    %c49_i32_205 = arith.constant 49 : i32
    %c0_i32_206 = arith.constant 0 : i32
    %255 = tpu.memref_slice %arg5[%0, %c49_i32_205, %c0_i32_206] : memref<2x64x1024xf32, #tpu.memory_space<vmem>> -> memref<1x1x1024xf32, #tpu.memory_space<vmem>>
    %256 = tpu.memref_squeeze %255 : memref<1x1x1024xf32, #tpu.memory_space<vmem>> -> memref<1x1024xf32, #tpu.memory_space<vmem>>
    %257 = tpu.memref_slice %arg6[%0, %c49_i32] : memref<2x64x!tpu.dma_semaphore, #tpu.memory_space<semaphore_mem>> -> memref<1x1x!tpu.dma_semaphore, #tpu.memory_space<semaphore_mem>>
    %258 = tpu.memref_squeeze %257 : memref<1x1x!tpu.dma_semaphore, #tpu.memory_space<semaphore_mem>> -> memref<!tpu.dma_semaphore, #tpu.memory_space<semaphore_mem>>
    tpu.wait_dma2 semaphore(%258 : memref<!tpu.dma_semaphore, #tpu.memory_space<semaphore_mem>>) src(%254 : memref<1x1024xf32, #tpu.memory_space<any>>) dst(%256 : memref<1x1024xf32, #tpu.memory_space<vmem>>)
    %c50_i32 = arith.constant 50 : i32
    %c0_i32_207 = arith.constant 0 : i32
    %c0_i32_208 = arith.constant 0 : i32
    %259 = tpu.memref_slice %arg2[%c0_i32_207, %c0_i32_208] : memref<16x1024xf32, #tpu.memory_space<any>> -> memref<1x1024xf32, #tpu.memory_space<any>>
    %c50_i32_209 = arith.constant 50 : i32
    %c0_i32_210 = arith.constant 0 : i32
    %260 = tpu.memref_slice %arg5[%0, %c50_i32_209, %c0_i32_210] : memref<2x64x1024xf32, #tpu.memory_space<vmem>> -> memref<1x1x1024xf32, #tpu.memory_space<vmem>>
    %261 = tpu.memref_squeeze %260 : memref<1x1x1024xf32, #tpu.memory_space<vmem>> -> memref<1x1024xf32, #tpu.memory_space<vmem>>
    %262 = tpu.memref_slice %arg6[%0, %c50_i32] : memref<2x64x!tpu.dma_semaphore, #tpu.memory_space<semaphore_mem>> -> memref<1x1x!tpu.dma_semaphore, #tpu.memory_space<semaphore_mem>>
    %263 = tpu.memref_squeeze %262 : memref<1x1x!tpu.dma_semaphore, #tpu.memory_space<semaphore_mem>> -> memref<!tpu.dma_semaphore, #tpu.memory_space<semaphore_mem>>
    tpu.wait_dma2 semaphore(%263 : memref<!tpu.dma_semaphore, #tpu.memory_space<semaphore_mem>>) src(%259 : memref<1x1024xf32, #tpu.memory_space<any>>) dst(%261 : memref<1x1024xf32, #tpu.memory_space<vmem>>)
    %c51_i32 = arith.constant 51 : i32
    %c0_i32_211 = arith.constant 0 : i32
    %c0_i32_212 = arith.constant 0 : i32
    %264 = tpu.memref_slice %arg2[%c0_i32_211, %c0_i32_212] : memref<16x1024xf32, #tpu.memory_space<any>> -> memref<1x1024xf32, #tpu.memory_space<any>>
    %c51_i32_213 = arith.constant 51 : i32
    %c0_i32_214 = arith.constant 0 : i32
    %265 = tpu.memref_slice %arg5[%0, %c51_i32_213, %c0_i32_214] : memref<2x64x1024xf32, #tpu.memory_space<vmem>> -> memref<1x1x1024xf32, #tpu.memory_space<vmem>>
    %266 = tpu.memref_squeeze %265 : memref<1x1x1024xf32, #tpu.memory_space<vmem>> -> memref<1x1024xf32, #tpu.memory_space<vmem>>
    %267 = tpu.memref_slice %arg6[%0, %c51_i32] : memref<2x64x!tpu.dma_semaphore, #tpu.memory_space<semaphore_mem>> -> memref<1x1x!tpu.dma_semaphore, #tpu.memory_space<semaphore_mem>>
    %268 = tpu.memref_squeeze %267 : memref<1x1x!tpu.dma_semaphore, #tpu.memory_space<semaphore_mem>> -> memref<!tpu.dma_semaphore, #tpu.memory_space<semaphore_mem>>
    tpu.wait_dma2 semaphore(%268 : memref<!tpu.dma_semaphore, #tpu.memory_space<semaphore_mem>>) src(%264 : memref<1x1024xf32, #tpu.memory_space<any>>) dst(%266 : memref<1x1024xf32, #tpu.memory_space<vmem>>)
    %c52_i32 = arith.constant 52 : i32
    %c0_i32_215 = arith.constant 0 : i32
    %c0_i32_216 = arith.constant 0 : i32
    %269 = tpu.memref_slice %arg2[%c0_i32_215, %c0_i32_216] : memref<16x1024xf32, #tpu.memory_space<any>> -> memref<1x1024xf32, #tpu.memory_space<any>>
    %c52_i32_217 = arith.constant 52 : i32
    %c0_i32_218 = arith.constant 0 : i32
    %270 = tpu.memref_slice %arg5[%0, %c52_i32_217, %c0_i32_218] : memref<2x64x1024xf32, #tpu.memory_space<vmem>> -> memref<1x1x1024xf32, #tpu.memory_space<vmem>>
    %271 = tpu.memref_squeeze %270 : memref<1x1x1024xf32, #tpu.memory_space<vmem>> -> memref<1x1024xf32, #tpu.memory_space<vmem>>
    %272 = tpu.memref_slice %arg6[%0, %c52_i32] : memref<2x64x!tpu.dma_semaphore, #tpu.memory_space<semaphore_mem>> -> memref<1x1x!tpu.dma_semaphore, #tpu.memory_space<semaphore_mem>>
    %273 = tpu.memref_squeeze %272 : memref<1x1x!tpu.dma_semaphore, #tpu.memory_space<semaphore_mem>> -> memref<!tpu.dma_semaphore, #tpu.memory_space<semaphore_mem>>
    tpu.wait_dma2 semaphore(%273 : memref<!tpu.dma_semaphore, #tpu.memory_space<semaphore_mem>>) src(%269 : memref<1x1024xf32, #tpu.memory_space<any>>) dst(%271 : memref<1x1024xf32, #tpu.memory_space<vmem>>)
    %c53_i32 = arith.constant 53 : i32
    %c0_i32_219 = arith.constant 0 : i32
    %c0_i32_220 = arith.constant 0 : i32
    %274 = tpu.memref_slice %arg2[%c0_i32_219, %c0_i32_220] : memref<16x1024xf32, #tpu.memory_space<any>> -> memref<1x1024xf32, #tpu.memory_space<any>>
    %c53_i32_221 = arith.constant 53 : i32
    %c0_i32_222 = arith.constant 0 : i32
    %275 = tpu.memref_slice %arg5[%0, %c53_i32_221, %c0_i32_222] : memref<2x64x1024xf32, #tpu.memory_space<vmem>> -> memref<1x1x1024xf32, #tpu.memory_space<vmem>>
    %276 = tpu.memref_squeeze %275 : memref<1x1x1024xf32, #tpu.memory_space<vmem>> -> memref<1x1024xf32, #tpu.memory_space<vmem>>
    %277 = tpu.memref_slice %arg6[%0, %c53_i32] : memref<2x64x!tpu.dma_semaphore, #tpu.memory_space<semaphore_mem>> -> memref<1x1x!tpu.dma_semaphore, #tpu.memory_space<semaphore_mem>>
    %278 = tpu.memref_squeeze %277 : memref<1x1x!tpu.dma_semaphore, #tpu.memory_space<semaphore_mem>> -> memref<!tpu.dma_semaphore, #tpu.memory_space<semaphore_mem>>
    tpu.wait_dma2 semaphore(%278 : memref<!tpu.dma_semaphore, #tpu.memory_space<semaphore_mem>>) src(%274 : memref<1x1024xf32, #tpu.memory_space<any>>) dst(%276 : memref<1x1024xf32, #tpu.memory_space<vmem>>)
    %c54_i32 = arith.constant 54 : i32
    %c0_i32_223 = arith.constant 0 : i32
    %c0_i32_224 = arith.constant 0 : i32
    %279 = tpu.memref_slice %arg2[%c0_i32_223, %c0_i32_224] : memref<16x1024xf32, #tpu.memory_space<any>> -> memref<1x1024xf32, #tpu.memory_space<any>>
    %c54_i32_225 = arith.constant 54 : i32
    %c0_i32_226 = arith.constant 0 : i32
    %280 = tpu.memref_slice %arg5[%0, %c54_i32_225, %c0_i32_226] : memref<2x64x1024xf32, #tpu.memory_space<vmem>> -> memref<1x1x1024xf32, #tpu.memory_space<vmem>>
    %281 = tpu.memref_squeeze %280 : memref<1x1x1024xf32, #tpu.memory_space<vmem>> -> memref<1x1024xf32, #tpu.memory_space<vmem>>
    %282 = tpu.memref_slice %arg6[%0, %c54_i32] : memref<2x64x!tpu.dma_semaphore, #tpu.memory_space<semaphore_mem>> -> memref<1x1x!tpu.dma_semaphore, #tpu.memory_space<semaphore_mem>>
    %283 = tpu.memref_squeeze %282 : memref<1x1x!tpu.dma_semaphore, #tpu.memory_space<semaphore_mem>> -> memref<!tpu.dma_semaphore, #tpu.memory_space<semaphore_mem>>
    tpu.wait_dma2 semaphore(%283 : memref<!tpu.dma_semaphore, #tpu.memory_space<semaphore_mem>>) src(%279 : memref<1x1024xf32, #tpu.memory_space<any>>) dst(%281 : memref<1x1024xf32, #tpu.memory_space<vmem>>)
    %c55_i32 = arith.constant 55 : i32
    %c0_i32_227 = arith.constant 0 : i32
    %c0_i32_228 = arith.constant 0 : i32
    %284 = tpu.memref_slice %arg2[%c0_i32_227, %c0_i32_228] : memref<16x1024xf32, #tpu.memory_space<any>> -> memref<1x1024xf32, #tpu.memory_space<any>>
    %c55_i32_229 = arith.constant 55 : i32
    %c0_i32_230 = arith.constant 0 : i32
    %285 = tpu.memref_slice %arg5[%0, %c55_i32_229, %c0_i32_230] : memref<2x64x1024xf32, #tpu.memory_space<vmem>> -> memref<1x1x1024xf32, #tpu.memory_space<vmem>>
    %286 = tpu.memref_squeeze %285 : memref<1x1x1024xf32, #tpu.memory_space<vmem>> -> memref<1x1024xf32, #tpu.memory_space<vmem>>
    %287 = tpu.memref_slice %arg6[%0, %c55_i32] : memref<2x64x!tpu.dma_semaphore, #tpu.memory_space<semaphore_mem>> -> memref<1x1x!tpu.dma_semaphore, #tpu.memory_space<semaphore_mem>>
    %288 = tpu.memref_squeeze %287 : memref<1x1x!tpu.dma_semaphore, #tpu.memory_space<semaphore_mem>> -> memref<!tpu.dma_semaphore, #tpu.memory_space<semaphore_mem>>
    tpu.wait_dma2 semaphore(%288 : memref<!tpu.dma_semaphore, #tpu.memory_space<semaphore_mem>>) src(%284 : memref<1x1024xf32, #tpu.memory_space<any>>) dst(%286 : memref<1x1024xf32, #tpu.memory_space<vmem>>)
    %c56_i32 = arith.constant 56 : i32
    %c0_i32_231 = arith.constant 0 : i32
    %c0_i32_232 = arith.constant 0 : i32
    %289 = tpu.memref_slice %arg2[%c0_i32_231, %c0_i32_232] : memref<16x1024xf32, #tpu.memory_space<any>> -> memref<1x1024xf32, #tpu.memory_space<any>>
    %c56_i32_233 = arith.constant 56 : i32
    %c0_i32_234 = arith.constant 0 : i32
    %290 = tpu.memref_slice %arg5[%0, %c56_i32_233, %c0_i32_234] : memref<2x64x1024xf32, #tpu.memory_space<vmem>> -> memref<1x1x1024xf32, #tpu.memory_space<vmem>>
    %291 = tpu.memref_squeeze %290 : memref<1x1x1024xf32, #tpu.memory_space<vmem>> -> memref<1x1024xf32, #tpu.memory_space<vmem>>
    %292 = tpu.memref_slice %arg6[%0, %c56_i32] : memref<2x64x!tpu.dma_semaphore, #tpu.memory_space<semaphore_mem>> -> memref<1x1x!tpu.dma_semaphore, #tpu.memory_space<semaphore_mem>>
    %293 = tpu.memref_squeeze %292 : memref<1x1x!tpu.dma_semaphore, #tpu.memory_space<semaphore_mem>> -> memref<!tpu.dma_semaphore, #tpu.memory_space<semaphore_mem>>
    tpu.wait_dma2 semaphore(%293 : memref<!tpu.dma_semaphore, #tpu.memory_space<semaphore_mem>>) src(%289 : memref<1x1024xf32, #tpu.memory_space<any>>) dst(%291 : memref<1x1024xf32, #tpu.memory_space<vmem>>)
    %c57_i32 = arith.constant 57 : i32
    %c0_i32_235 = arith.constant 0 : i32
    %c0_i32_236 = arith.constant 0 : i32
    %294 = tpu.memref_slice %arg2[%c0_i32_235, %c0_i32_236] : memref<16x1024xf32, #tpu.memory_space<any>> -> memref<1x1024xf32, #tpu.memory_space<any>>
    %c57_i32_237 = arith.constant 57 : i32
    %c0_i32_238 = arith.constant 0 : i32
    %295 = tpu.memref_slice %arg5[%0, %c57_i32_237, %c0_i32_238] : memref<2x64x1024xf32, #tpu.memory_space<vmem>> -> memref<1x1x1024xf32, #tpu.memory_space<vmem>>
    %296 = tpu.memref_squeeze %295 : memref<1x1x1024xf32, #tpu.memory_space<vmem>> -> memref<1x1024xf32, #tpu.memory_space<vmem>>
    %297 = tpu.memref_slice %arg6[%0, %c57_i32] : memref<2x64x!tpu.dma_semaphore, #tpu.memory_space<semaphore_mem>> -> memref<1x1x!tpu.dma_semaphore, #tpu.memory_space<semaphore_mem>>
    %298 = tpu.memref_squeeze %297 : memref<1x1x!tpu.dma_semaphore, #tpu.memory_space<semaphore_mem>> -> memref<!tpu.dma_semaphore, #tpu.memory_space<semaphore_mem>>
    tpu.wait_dma2 semaphore(%298 : memref<!tpu.dma_semaphore, #tpu.memory_space<semaphore_mem>>) src(%294 : memref<1x1024xf32, #tpu.memory_space<any>>) dst(%296 : memref<1x1024xf32, #tpu.memory_space<vmem>>)
    %c58_i32 = arith.constant 58 : i32
    %c0_i32_239 = arith.constant 0 : i32
    %c0_i32_240 = arith.constant 0 : i32
    %299 = tpu.memref_slice %arg2[%c0_i32_239, %c0_i32_240] : memref<16x1024xf32, #tpu.memory_space<any>> -> memref<1x1024xf32, #tpu.memory_space<any>>
    %c58_i32_241 = arith.constant 58 : i32
    %c0_i32_242 = arith.constant 0 : i32
    %300 = tpu.memref_slice %arg5[%0, %c58_i32_241, %c0_i32_242] : memref<2x64x1024xf32, #tpu.memory_space<vmem>> -> memref<1x1x1024xf32, #tpu.memory_space<vmem>>
    %301 = tpu.memref_squeeze %300 : memref<1x1x1024xf32, #tpu.memory_space<vmem>> -> memref<1x1024xf32, #tpu.memory_space<vmem>>
    %302 = tpu.memref_slice %arg6[%0, %c58_i32] : memref<2x64x!tpu.dma_semaphore, #tpu.memory_space<semaphore_mem>> -> memref<1x1x!tpu.dma_semaphore, #tpu.memory_space<semaphore_mem>>
    %303 = tpu.memref_squeeze %302 : memref<1x1x!tpu.dma_semaphore, #tpu.memory_space<semaphore_mem>> -> memref<!tpu.dma_semaphore, #tpu.memory_space<semaphore_mem>>
    tpu.wait_dma2 semaphore(%303 : memref<!tpu.dma_semaphore, #tpu.memory_space<semaphore_mem>>) src(%299 : memref<1x1024xf32, #tpu.memory_space<any>>) dst(%301 : memref<1x1024xf32, #tpu.memory_space<vmem>>)
    %c59_i32 = arith.constant 59 : i32
    %c0_i32_243 = arith.constant 0 : i32
    %c0_i32_244 = arith.constant 0 : i32
    %304 = tpu.memref_slice %arg2[%c0_i32_243, %c0_i32_244] : memref<16x1024xf32, #tpu.memory_space<any>> -> memref<1x1024xf32, #tpu.memory_space<any>>
    %c59_i32_245 = arith.constant 59 : i32
    %c0_i32_246 = arith.constant 0 : i32
    %305 = tpu.memref_slice %arg5[%0, %c59_i32_245, %c0_i32_246] : memref<2x64x1024xf32, #tpu.memory_space<vmem>> -> memref<1x1x1024xf32, #tpu.memory_space<vmem>>
    %306 = tpu.memref_squeeze %305 : memref<1x1x1024xf32, #tpu.memory_space<vmem>> -> memref<1x1024xf32, #tpu.memory_space<vmem>>
    %307 = tpu.memref_slice %arg6[%0, %c59_i32] : memref<2x64x!tpu.dma_semaphore, #tpu.memory_space<semaphore_mem>> -> memref<1x1x!tpu.dma_semaphore, #tpu.memory_space<semaphore_mem>>
    %308 = tpu.memref_squeeze %307 : memref<1x1x!tpu.dma_semaphore, #tpu.memory_space<semaphore_mem>> -> memref<!tpu.dma_semaphore, #tpu.memory_space<semaphore_mem>>
    tpu.wait_dma2 semaphore(%308 : memref<!tpu.dma_semaphore, #tpu.memory_space<semaphore_mem>>) src(%304 : memref<1x1024xf32, #tpu.memory_space<any>>) dst(%306 : memref<1x1024xf32, #tpu.memory_space<vmem>>)
    %c60_i32 = arith.constant 60 : i32
    %c0_i32_247 = arith.constant 0 : i32
    %c0_i32_248 = arith.constant 0 : i32
    %309 = tpu.memref_slice %arg2[%c0_i32_247, %c0_i32_248] : memref<16x1024xf32, #tpu.memory_space<any>> -> memref<1x1024xf32, #tpu.memory_space<any>>
    %c60_i32_249 = arith.constant 60 : i32
    %c0_i32_250 = arith.constant 0 : i32
    %310 = tpu.memref_slice %arg5[%0, %c60_i32_249, %c0_i32_250] : memref<2x64x1024xf32, #tpu.memory_space<vmem>> -> memref<1x1x1024xf32, #tpu.memory_space<vmem>>
    %311 = tpu.memref_squeeze %310 : memref<1x1x1024xf32, #tpu.memory_space<vmem>> -> memref<1x1024xf32, #tpu.memory_space<vmem>>
    %312 = tpu.memref_slice %arg6[%0, %c60_i32] : memref<2x64x!tpu.dma_semaphore, #tpu.memory_space<semaphore_mem>> -> memref<1x1x!tpu.dma_semaphore, #tpu.memory_space<semaphore_mem>>
    %313 = tpu.memref_squeeze %312 : memref<1x1x!tpu.dma_semaphore, #tpu.memory_space<semaphore_mem>> -> memref<!tpu.dma_semaphore, #tpu.memory_space<semaphore_mem>>
    tpu.wait_dma2 semaphore(%313 : memref<!tpu.dma_semaphore, #tpu.memory_space<semaphore_mem>>) src(%309 : memref<1x1024xf32, #tpu.memory_space<any>>) dst(%311 : memref<1x1024xf32, #tpu.memory_space<vmem>>)
    %c61_i32 = arith.constant 61 : i32
    %c0_i32_251 = arith.constant 0 : i32
    %c0_i32_252 = arith.constant 0 : i32
    %314 = tpu.memref_slice %arg2[%c0_i32_251, %c0_i32_252] : memref<16x1024xf32, #tpu.memory_space<any>> -> memref<1x1024xf32, #tpu.memory_space<any>>
    %c61_i32_253 = arith.constant 61 : i32
    %c0_i32_254 = arith.constant 0 : i32
    %315 = tpu.memref_slice %arg5[%0, %c61_i32_253, %c0_i32_254] : memref<2x64x1024xf32, #tpu.memory_space<vmem>> -> memref<1x1x1024xf32, #tpu.memory_space<vmem>>
    %316 = tpu.memref_squeeze %315 : memref<1x1x1024xf32, #tpu.memory_space<vmem>> -> memref<1x1024xf32, #tpu.memory_space<vmem>>
    %317 = tpu.memref_slice %arg6[%0, %c61_i32] : memref<2x64x!tpu.dma_semaphore, #tpu.memory_space<semaphore_mem>> -> memref<1x1x!tpu.dma_semaphore, #tpu.memory_space<semaphore_mem>>
    %318 = tpu.memref_squeeze %317 : memref<1x1x!tpu.dma_semaphore, #tpu.memory_space<semaphore_mem>> -> memref<!tpu.dma_semaphore, #tpu.memory_space<semaphore_mem>>
    tpu.wait_dma2 semaphore(%318 : memref<!tpu.dma_semaphore, #tpu.memory_space<semaphore_mem>>) src(%314 : memref<1x1024xf32, #tpu.memory_space<any>>) dst(%316 : memref<1x1024xf32, #tpu.memory_space<vmem>>)
    %c62_i32 = arith.constant 62 : i32
    %c0_i32_255 = arith.constant 0 : i32
    %c0_i32_256 = arith.constant 0 : i32
    %319 = tpu.memref_slice %arg2[%c0_i32_255, %c0_i32_256] : memref<16x1024xf32, #tpu.memory_space<any>> -> memref<1x1024xf32, #tpu.memory_space<any>>
    %c62_i32_257 = arith.constant 62 : i32
    %c0_i32_258 = arith.constant 0 : i32
    %320 = tpu.memref_slice %arg5[%0, %c62_i32_257, %c0_i32_258] : memref<2x64x1024xf32, #tpu.memory_space<vmem>> -> memref<1x1x1024xf32, #tpu.memory_space<vmem>>
    %321 = tpu.memref_squeeze %320 : memref<1x1x1024xf32, #tpu.memory_space<vmem>> -> memref<1x1024xf32, #tpu.memory_space<vmem>>
    %322 = tpu.memref_slice %arg6[%0, %c62_i32] : memref<2x64x!tpu.dma_semaphore, #tpu.memory_space<semaphore_mem>> -> memref<1x1x!tpu.dma_semaphore, #tpu.memory_space<semaphore_mem>>
    %323 = tpu.memref_squeeze %322 : memref<1x1x!tpu.dma_semaphore, #tpu.memory_space<semaphore_mem>> -> memref<!tpu.dma_semaphore, #tpu.memory_space<semaphore_mem>>
    tpu.wait_dma2 semaphore(%323 : memref<!tpu.dma_semaphore, #tpu.memory_space<semaphore_mem>>) src(%319 : memref<1x1024xf32, #tpu.memory_space<any>>) dst(%321 : memref<1x1024xf32, #tpu.memory_space<vmem>>)
    %c63_i32 = arith.constant 63 : i32
    %c0_i32_259 = arith.constant 0 : i32
    %c0_i32_260 = arith.constant 0 : i32
    %324 = tpu.memref_slice %arg2[%c0_i32_259, %c0_i32_260] : memref<16x1024xf32, #tpu.memory_space<any>> -> memref<1x1024xf32, #tpu.memory_space<any>>
    %c63_i32_261 = arith.constant 63 : i32
    %c0_i32_262 = arith.constant 0 : i32
    %325 = tpu.memref_slice %arg5[%0, %c63_i32_261, %c0_i32_262] : memref<2x64x1024xf32, #tpu.memory_space<vmem>> -> memref<1x1x1024xf32, #tpu.memory_space<vmem>>
    %326 = tpu.memref_squeeze %325 : memref<1x1x1024xf32, #tpu.memory_space<vmem>> -> memref<1x1024xf32, #tpu.memory_space<vmem>>
    %327 = tpu.memref_slice %arg6[%0, %c63_i32] : memref<2x64x!tpu.dma_semaphore, #tpu.memory_space<semaphore_mem>> -> memref<1x1x!tpu.dma_semaphore, #tpu.memory_space<semaphore_mem>>
    %328 = tpu.memref_squeeze %327 : memref<1x1x!tpu.dma_semaphore, #tpu.memory_space<semaphore_mem>> -> memref<!tpu.dma_semaphore, #tpu.memory_space<semaphore_mem>>
    tpu.wait_dma2 semaphore(%328 : memref<!tpu.dma_semaphore, #tpu.memory_space<semaphore_mem>>) src(%324 : memref<1x1024xf32, #tpu.memory_space<any>>) dst(%326 : memref<1x1024xf32, #tpu.memory_space<vmem>>)
    %329 = arith.index_cast %0 : i32 to index
    %c0 = arith.constant 0 : index
    %c0_263 = arith.constant 0 : index
    %330 = vector.load %arg5[%329, %c0, %c0_263] : memref<2x64x1024xf32, #tpu.memory_space<vmem>>, vector<1x64x1024xf32>
    %331 = vector.shape_cast %330 : vector<1x64x1024xf32> to vector<64x1024xf32>
    %c0_264 = arith.constant 0 : index
    %c0_265 = arith.constant 0 : index
    %332 = vector.load %arg3[%c0_264, %c0_265] : memref<1x1024xf32, #tpu.memory_space<vmem>>, vector<1x1024xf32>
    %333 = vector.broadcast %332 : vector<1x1024xf32> to vector<64x1024xf32>
    %334 = arith.mulf %331, %333 : vector<64x1024xf32>
    %c0_266 = arith.constant 0 : index
    %c0_267 = arith.constant 0 : index
    %335 = vector.load %arg4[%c0_266, %c0_267] : memref<64x1024xf32, #tpu.memory_space<vmem>>, vector<64x1024xf32>
    tpu.vector_store %arg4[%c0_266, %c0_267], %334 {strides = array<i32>} : memref<64x1024xf32, #tpu.memory_space<vmem>>, vector<64x1024xf32>,
    return
  }
  func.func @transform_1(%arg0: i32, %arg1: memref<64xi32, #tpu.memory_space<smem>>) -> (i32, i32) {
    %c0_i32 = arith.constant 0 : i32
    %c0_i32_0 = arith.constant 0 : i32
    %c0_i32_1 = arith.constant 0 : i32
    return %c0_i32, %c0_i32_0 : i32, i32
  }
  func.func @transform_2(%arg0: i32, %arg1: memref<64xi32, #tpu.memory_space<smem>>) -> (i32, i32) {
    %c0_i32 = arith.constant 0 : i32
    %c0_i32_0 = arith.constant 0 : i32
    return %arg0, %c0_i32 : i32, i32
  }
}

</mosaic_0001>

<bundles_post_ra>
// kernel: tpu_custom_call.1
= control target key start
LH: loop header
LB: loop body
LE: loop exit
PB: predicated region body
PF: predicated region fallthrough
CT: control target
= control target key end

     0   :  { %s6808_s15 = smov [#allocation5]   ;;  %s7971_s0 = inlined_call_operand.hbm [shape: s32[64], index: 0, kind: input, shape index: {}]   ;;  %s7972_s1 = inlined_call_operand.hbm [shape: f32[16,1024], index: 1, kind: input, shape index: {}]   ;;  %s7973_s2 = inlined_call_operand.hbm [shape: f32[1,1024], index: 2, kind: input, shape index: {}]   ;;  %s7974_s3 = inlined_call_operand.hbm [shape: f32[64,1024], index: 3, kind: output, shape index: {}]  }
   0x1   :  { %s9_s14 = sshll.u32 %s7971_s0, 4  ;;  %s10_s14 = int_to_ptr.hbm [resolvable:$true] %s9_s14 }
   0x2   :  { %12 = dma.hbm_to_smem %s10_s14, 16, %s6808_s15, [#allocation4] }
   0x3   :  { %6674 = dma.done.wait [#allocation4], 16 }
   0x4   :  { %6675 = vsyncadd [#allocation4], 4294967280 }
   0x5   :  { %15 = sfence }
   0x6   :  { %16 = vsyncpa [#allocation7], 0 }
   0x7   :  { %17 = vsyncpa [#allocation8], 0  ;;  %s23_s18 = sshll.u32 %s7973_s2, 4  ;;  %s6809_s19 = smov [#allocation6]   ;;  %s24_s18 = int_to_ptr.hbm [resolvable:$true] %s23_s18 }
   0x8   :  { %s25_s20 = sshll.u32 %s6809_s19, 4  ;;  %s26_s20 = int_to_ptr.vmem [resolvable:$true] %s25_s20 }
   0x9   :  { %28 = dma.hbm_to_vmem [thread:$0]  %s24_s18, 128, %s26_s20, [#allocation7]  }
   0xa   :  { %6676 = dma.done.wait [#allocation7], 128  }
   0xb   :  { %6677 = vsyncadd [#allocation7], 4294967168  ;;  %s39_s0 = sld [smem:[#allocation5]]  ;;  %s6810_s21 = smov [#allocation2]  }
   0xc   :  { %s6905_s22 = sshll.u32 %s6810_s21, 4  ;;  %s4624_s23 = sld [smem:[#allocation5 + $0x1]]  ;;  %s111_s22 = int_to_ptr.vmem [resolvable:$true] %s6905_s22 }
   0xd   :  { %s6811_s24 = smov [#allocation2 + $0x1]   ;;  %s6910_s26 = sld [smem:[#allocation5 + $0x2]] }
   0xe   :  { %s6908_s25 = sshll.u32 %s6811_s24, 4  ;;  %s6812_s2 = smov [#allocation2 + $0x2]   ;;  %s126_s25 = int_to_ptr.vmem [resolvable:$true] %s6908_s25 }
   0xf   :  { %s6913_s27 = sshll.u32 %s6812_s2, 4  ;;  %s6915_s28 = sld [smem:[#allocation5 + $0x3]]  ;;  %s141_s27 = int_to_ptr.vmem [resolvable:$true] %s6913_s27 }
  0x10   :  { %s6924_s18 = scalar_lea.hbm %s7972_s1, 128 }
  0x11   :  { %s103_s29 = sshrl.u32 %s39_s0, 3  ;;  %s104_s30 = sand.u32 7, %s39_s0  }
  0x12   :  { %s4687_s4 = sshll.u32 %s103_s29, 6  ;;  %s116_s6 = sshrl.u32 %s4624_s23, 3 }
  0x13   :  { %s106_s5 = sadd.s32 %s4687_s4, %s104_s30  ;;  %s117_s10 = sand.u32 7, %s4624_s23  }
  0x14   :  { %s107_s9 = scalar_lea.hbm %s7972_s1, %s106_s5  ;;  %s4688_s12 = sshll.u32 %s116_s6, 6 }
  0x15   :  { %s108_s11 = sshll.u32 %s107_s9, 4  ;;  %s119_s13 = sadd.s32 %s4688_s12, %s117_s10  ;;  %s109_s11 = int_to_ptr.hbm [resolvable:$true] %s108_s11 }
  0x16   :  { %s5114_s14 = sshra.s32 %s109_s11, 4  ;;  %s5115_s14 = int_to_ptr.hbm [resolvable:$true] %s5114_s14 }
  0x17   :  { %s5116_s15 = scalar_lea.hbm %s5115_s14, 8  ;;  %p5119_p1 = scmp.lt.s32.totalorder %s5115_s14, %s7972_s1 }
  0x18   :  { %p5117_p0 = scmp.ne.s32.totalorder %s5115_s14, %s5116_s15  ;;  %p5120_p2 = scmp.lt.s32.totalorder %s6924_s18, %s5116_s15 }
  0x1a   :  { %p5121_p3 = por %p5120_p2, %p5119_p1 }
  0x1c   :  { %p5122_p4 = pnand %p5121_p3, %p5117_p0 }
  0x1e   :  { %5125 = shalt.err (!%p5122_p4)  }
  0x1f   :  { %s6813_s0 = smov 128   ;;  %s6814_s21 = smov 1  }
  0x20   :  { %115 = dma.hbm_to_vmem [thread:$0]  %s109_s11, 128, %s111_s22, [#allocation3], %s6813_s0, %s6813_s0, %s6814_s21 }
  0x21   :  { %s120_s2 = scalar_lea.hbm %s7972_s1, %s119_s13  ;;  %s131_s29 = sshrl.u32 %s6910_s26, 3 }
  0x22   :  { %s123_s30 = sshll.u32 %s120_s2, 4  ;;  %s132_s4 = sand.u32 7, %s6910_s26   ;;  %s124_s30 = int_to_ptr.hbm [resolvable:$true] %s123_s30 }
  0x23   :  { %s4689_s5 = sshll.u32 %s131_s29, 6  ;;  %s5138_s6 = sshra.s32 %s124_s30, 4  ;;  %s5139_s6 = int_to_ptr.hbm [resolvable:$true] %s5138_s6 }
  0x24   :  { %s5140_s7 = scalar_lea.hbm %s5139_s6, 8  ;;  %p5143_p6 = scmp.lt.s32.totalorder %s5139_s6, %s7972_s1 }
  0x25   :  { %p5141_p5 = scmp.ne.s32.totalorder %s5139_s6, %s5140_s7  ;;  %p5144_p7 = scmp.lt.s32.totalorder %s6924_s18, %s5140_s7 }
  0x27   :  { %p5145_p8 = por %p5144_p7, %p5143_p6 }
  0x29   :  { %p5146_p9 = pnand %p5145_p8, %p5141_p5 }
  0x2b   :  { %5149 = shalt.err (!%p5146_p9)  }
  0x2c   :  { %130 = dma.hbm_to_vmem [thread:$0]  %s124_s30, 128, %s126_s25, [#allocation3 + $0x1], %s6813_s0, %s6813_s0, %s6814_s21 }
  0x2d   :  { %s134_s22 = sadd.s32 %s4689_s5, %s132_s4  ;;  %s146_s26 = sshrl.u32 %s6915_s28, 3 }
  0x2e   :  { %s135_s12 = scalar_lea.hbm %s7972_s1, %s134_s22  ;;  %s147_s13 = sand.u32 7, %s6915_s28  }
  0x2f   :  { %s138_s14 = sshll.u32 %s135_s12, 4  ;;  %s4690_s15 = sshll.u32 %s146_s26, 6  ;;  %s139_s14 = int_to_ptr.hbm [resolvable:$true] %s138_s14 }
  0x30   :  { %s149_s16 = sadd.s32 %s4690_s15, %s147_s13  ;;  %s5162_s17 = sshra.s32 %s139_s14, 4  ;;  %s5163_s17 = int_to_ptr.hbm [resolvable:$true] %s5162_s17 }
  0x31   :  { %s5164_s19 = scalar_lea.hbm %s5163_s17, 8  ;;  %p5167_p11 = scmp.lt.s32.totalorder %s5163_s17, %s7972_s1 }
  0x32   :  { %p5165_p10 = scmp.ne.s32.totalorder %s5163_s17, %s5164_s19  ;;  %p5168_p12 = scmp.lt.s32.totalorder %s6924_s18, %s5164_s19 }
  0x34   :  { %p5169_p13 = por %p5168_p12, %p5167_p11 }
  0x36   :  { %p5170_p0 = pnand %p5169_p13, %p5165_p10 }
  0x38   :  { %5173 = shalt.err (!%p5170_p0)  }
  0x39   :  { %145 = dma.hbm_to_vmem [thread:$0]  %s139_s14, 128, %s141_s27, [#allocation3 + $0x2], %s6813_s0, %s6813_s0, %s6814_s21 }
  0x3a   :  { %s150_s24 = scalar_lea.hbm %s7972_s1, %s149_s16  ;;  %s6815_s29 = smov [#allocation2 + $0x3]  }
  0x3b   :  { %s153_s2 = sshll.u32 %s150_s24, 4  ;;  %s155_s30 = sshll.u32 %s6815_s29, 4  ;;  %s154_s2 = int_to_ptr.hbm [resolvable:$true] %s153_s2  ;;  %s156_s30 = int_to_ptr.vmem [resolvable:$true] %s155_s30 }
  0x3c   :  { %s5186_s4 = sshra.s32 %s154_s2, 4  ;;  %s5187_s4 = int_to_ptr.hbm [resolvable:$true] %s5186_s4 }
  0x3d   :  { %s5188_s5 = scalar_lea.hbm %s5187_s4, 8  ;;  %p5191_p2 = scmp.lt.s32.totalorder %s5187_s4, %s7972_s1 }
  0x3e   :  { %p5189_p1 = scmp.ne.s32.totalorder %s5187_s4, %s5188_s5  ;;  %p5192_p3 = scmp.lt.s32.totalorder %s6924_s18, %s5188_s5 }
  0x40   :  { %p5193_p4 = por %p5192_p3, %p5191_p2 }
  0x42   :  { %p5194_p5 = pnand %p5193_p4, %p5189_p1 }
  0x44   :  { %5197 = shalt.err (!%p5194_p5)  }
  0x45   :  { %160 = dma.hbm_to_vmem [thread:$0]  %s154_s2, 128, %s156_s30, [#allocation3 + $0x3], %s6813_s0, %s6813_s0, %s6814_s21 }
  0x46   :  { %s4627_s27 = sld [smem:[#allocation5 + $0x4]]  ;;  %s6816_s8 = smov [#allocation2 + $0x4]  }
  0x47   :  { %s6973_s9 = sshll.u32 %s6816_s8, 4  ;;  %s4628_s22 = sld [smem:[#allocation5 + $0x5]]  ;;  %s171_s9 = int_to_ptr.vmem [resolvable:$true] %s6973_s9 }
  0x48   :  { %s6817_s26 = smov [#allocation2 + $0x5]   ;;  %s6978_s11 = sld [smem:[#allocation5 + $0x6]] }
  0x49   :  { %s6976_s10 = sshll.u32 %s6817_s26, 4  ;;  %s6818_s12 = smov [#allocation2 + $0x6]   ;;  %s186_s10 = int_to_ptr.vmem [resolvable:$true] %s6976_s10 }
  0x4a   :  { %s6981_s13 = sshll.u32 %s6818_s12, 4  ;;  %s6983_s14 = sld [smem:[#allocation5 + $0x7]]  ;;  %s201_s13 = int_to_ptr.vmem [resolvable:$true] %s6981_s13 }
  0x4c   :  { %s161_s15 = sshrl.u32 %s4627_s27, 3  ;;  %s162_s16 = sand.u32 7, %s4627_s27  }
  0x4d   :  { %s4691_s17 = sshll.u32 %s161_s15, 6  ;;  %s176_s19 = sshrl.u32 %s4628_s22, 3 }
  0x4e   :  { %s164_s20 = sadd.s32 %s4691_s17, %s162_s16  ;;  %s177_s23 = sand.u32 7, %s4628_s22  }
  0x4f   :  { %s165_s24 = scalar_lea.hbm %s7972_s1, %s164_s20  ;;  %s4692_s2 = sshll.u32 %s176_s19, 6 }
  0x50   :  { %s168_s29 = sshll.u32 %s165_s24, 4  ;;  %s179_s30 = sadd.s32 %s4692_s2, %s177_s23  ;;  %s169_s29 = int_to_ptr.hbm [resolvable:$true] %s168_s29 }
  0x51   :  { %s180_s6 = scalar_lea.hbm %s7972_s1, %s179_s30  ;;  %s5210_s7 = sshra.s32 %s169_s29, 4  ;;  %s5211_s7 = int_to_ptr.hbm [resolvable:$true] %s5210_s7 }
  0x52   :  { %s5212_s27 = scalar_lea.hbm %s5211_s7, 8  ;;  %p5215_p7 = scmp.lt.s32.totalorder %s5211_s7, %s7972_s1 }
  0x53   :  { %p5213_p6 = scmp.ne.s32.totalorder %s5211_s7, %s5212_s27  ;;  %p5216_p8 = scmp.lt.s32.totalorder %s6924_s18, %s5212_s27 }
  0x55   :  { %p5217_p9 = por %p5216_p8, %p5215_p7 }
  0x57   :  { %p5218_p10 = pnand %p5217_p9, %p5213_p6 }
  0x59   :  { %5221 = shalt.err (!%p5218_p10)  }
  0x5a   :  { %175 = dma.hbm_to_vmem [thread:$0]  %s169_s29, 128, %s171_s9, [#allocation3 + $0x4], %s6813_s0, %s6813_s0, %s6814_s21 }
  0x5b   :  { %s183_s22 = sshll.u32 %s180_s6, 4  ;;  %s191_s12 = sshrl.u32 %s6978_s11, 3  ;;  %s184_s22 = int_to_ptr.hbm [resolvable:$true] %s183_s22 }
  0x5c   :  { %s192_s15 = sand.u32 7, %s6978_s11   ;;  %s5234_s16 = sshra.s32 %s184_s22, 4  ;;  %s5235_s16 = int_to_ptr.hbm [resolvable:$true] %s5234_s16 }
  0x5d   :  { %s5236_s17 = scalar_lea.hbm %s5235_s16, 8  ;;  %p5239_p12 = scmp.lt.s32.totalorder %s5235_s16, %s7972_s1 }
  0x5e   :  { %p5237_p11 = scmp.ne.s32.totalorder %s5235_s16, %s5236_s17  ;;  %p5240_p13 = scmp.lt.s32.totalorder %s6924_s18, %s5236_s17 }
  0x60   :  { %p5241_p0 = por %p5240_p13, %p5239_p12 }
  0x62   :  { %p5242_p1 = pnand %p5241_p0, %p5237_p11 }
  0x64   :  { %5245 = shalt.err (!%p5242_p1)  }
  0x65   :  { %190 = dma.hbm_to_vmem [thread:$0]  %s184_s22, 128, %s186_s10, [#allocation3 + $0x5], %s6813_s0, %s6813_s0, %s6814_s21 }
  0x66   :  { %s4693_s9 = sshll.u32 %s191_s12, 6  ;;  %s206_s23 = sshrl.u32 %s6983_s14, 3 }
  0x67   :  { %s194_s11 = sadd.s32 %s4693_s9, %s192_s15  ;;  %s207_s2 = sand.u32 7, %s6983_s14  }
  0x68   :  { %s195_s24 = scalar_lea.hbm %s7972_s1, %s194_s11  ;;  %s4694_s30 = sshll.u32 %s206_s23, 6 }
  0x69   :  { %s198_s29 = sshll.u32 %s195_s24, 4  ;;  %s209_s4 = sadd.s32 %s4694_s30, %s207_s2  ;;  %s199_s29 = int_to_ptr.hbm [resolvable:$true] %s198_s29 }
  0x6a   :  { %s5258_s5 = sshra.s32 %s199_s29, 4  ;;  %s5259_s5 = int_to_ptr.hbm [resolvable:$true] %s5258_s5 }
  0x6b   :  { %s5260_s6 = scalar_lea.hbm %s5259_s5, 8  ;;  %p5263_p3 = scmp.lt.s32.totalorder %s5259_s5, %s7972_s1 }
  0x6c   :  { %p5261_p2 = scmp.ne.s32.totalorder %s5259_s5, %s5260_s6  ;;  %p5264_p4 = scmp.lt.s32.totalorder %s6924_s18, %s5260_s6 }
  0x6e   :  { %p5265_p5 = por %p5264_p4, %p5263_p3 }
  0x70   :  { %p5266_p6 = pnand %p5265_p5, %p5261_p2 }
  0x72   :  { %5269 = shalt.err (!%p5266_p6)  }
  0x73   :  { %205 = dma.hbm_to_vmem [thread:$0]  %s199_s29, 128, %s201_s13, [#allocation3 + $0x6], %s6813_s0, %s6813_s0, %s6814_s21 }
  0x74   :  { %s210_s8 = scalar_lea.hbm %s7972_s1, %s209_s4  ;;  %s6819_s22 = smov [#allocation2 + $0x7]  }
  0x75   :  { %s213_s26 = sshll.u32 %s210_s8, 4  ;;  %s215_s12 = sshll.u32 %s6819_s22, 4  ;;  %s214_s26 = int_to_ptr.hbm [resolvable:$true] %s213_s26  ;;  %s216_s12 = int_to_ptr.vmem [resolvable:$true] %s215_s12 }
  0x76   :  { %s5282_s15 = sshra.s32 %s214_s26, 4  ;;  %s5283_s15 = int_to_ptr.hbm [resolvable:$true] %s5282_s15 }
  0x77   :  { %s5284_s16 = scalar_lea.hbm %s5283_s15, 8  ;;  %p5287_p8 = scmp.lt.s32.totalorder %s5283_s15, %s7972_s1 }
  0x78   :  { %p5285_p7 = scmp.ne.s32.totalorder %s5283_s15, %s5284_s16  ;;  %p5288_p9 = scmp.lt.s32.totalorder %s6924_s18, %s5284_s16 }
  0x7a   :  { %p5289_p10 = por %p5288_p9, %p5287_p8 }
  0x7c   :  { %p5290_p11 = pnand %p5289_p10, %p5285_p7 }
  0x7e   :  { %5293 = shalt.err (!%p5290_p11)  }
  0x7f   :  { %220 = dma.hbm_to_vmem [thread:$0]  %s214_s26, 128, %s216_s12, [#allocation3 + $0x7], %s6813_s0, %s6813_s0, %s6814_s21 }
  0x80   :  { %s4631_s13 = sld [smem:[#allocation5 + $0x8]]  ;;  %s6820_s20 = smov [#allocation2 + $0x40]  }
  0x81   :  { %s7034_s9 = sshll.u32 %s6820_s20, 4  ;;  %s4632_s11 = sld [smem:[#allocation5 + $0x9]]  ;;  %s231_s9 = int_to_ptr.vmem [resolvable:$true] %s7034_s9 }
  0x82   :  { %s6821_s23 = smov [#allocation2 + $0x41]   ;;  %s7039_s28 = sld [smem:[#allocation5 + $0xa]] }
  0x83   :  { %s7037_s25 = sshll.u32 %s6821_s23, 4  ;;  %s6822_s24 = smov [#allocation2 + $0x42]   ;;  %s246_s25 = int_to_ptr.vmem [resolvable:$true] %s7037_s25 }
  0x84   :  { %s7042_s2 = sshll.u32 %s6822_s24, 4  ;;  %s7044_s29 = sld [smem:[#allocation5 + $0xb]]  ;;  %s261_s2 = int_to_ptr.vmem [resolvable:$true] %s7042_s2 }
  0x86   :  { %s221_s30 = sshrl.u32 %s4631_s13, 3  ;;  %s222_s4 = sand.u32 7, %s4631_s13  }
  0x87   :  { %s4695_s5 = sshll.u32 %s221_s30, 6  ;;  %s236_s6 = sshrl.u32 %s4632_s11, 3 }
  0x88   :  { %s224_s7 = sadd.s32 %s4695_s5, %s222_s4  ;;  %s237_s10 = sand.u32 7, %s4632_s11  }
  0x89   :  { %s225_s8 = scalar_lea.hbm %s7972_s1, %s224_s7  ;;  %s4696_s26 = sshll.u32 %s236_s6, 6 }
  0x8a   :  { %s228_s22 = sshll.u32 %s225_s8, 4  ;;  %s239_s12 = sadd.s32 %s4696_s26, %s237_s10  ;;  %s229_s22 = int_to_ptr.hbm [resolvable:$true] %s228_s22 }
  0x8b   :  { %s240_s17 = scalar_lea.hbm %s7972_s1, %s239_s12  ;;  %s5306_s19 = sshra.s32 %s229_s22, 4  ;;  %s5307_s19 = int_to_ptr.hbm [resolvable:$true] %s5306_s19 }
  0x8c   :  { %s5308_s13 = scalar_lea.hbm %s5307_s19, 8  ;;  %p5311_p13 = scmp.lt.s32.totalorder %s5307_s19, %s7972_s1 }
  0x8d   :  { %p5309_p12 = scmp.ne.s32.totalorder %s5307_s19, %s5308_s13  ;;  %p5312_p0 = scmp.lt.s32.totalorder %s6924_s18, %s5308_s13 }
  0x8f   :  { %p5313_p1 = por %p5312_p0, %p5311_p13 }
  0x91   :  { %p5314_p2 = pnand %p5313_p1, %p5309_p12 }
  0x93   :  { %5317 = shalt.err (!%p5314_p2)  }
  0x94   :  { %235 = dma.hbm_to_vmem [thread:$0]  %s229_s22, 128, %s231_s9, [#allocation3 + $0x8], %s6813_s0, %s6813_s0, %s6814_s21 }
  0x95   :  { %s243_s11 = sshll.u32 %s240_s17, 4  ;;  %s251_s24 = sshrl.u32 %s7039_s28, 3  ;;  %s244_s11 = int_to_ptr.hbm [resolvable:$true] %s243_s11 }
  0x96   :  { %s252_s30 = sand.u32 7, %s7039_s28   ;;  %s5330_s4 = sshra.s32 %s244_s11, 4  ;;  %s5331_s4 = int_to_ptr.hbm [resolvable:$true] %s5330_s4 }
  0x97   :  { %s5332_s5 = scalar_lea.hbm %s5331_s4, 8  ;;  %p5335_p4 = scmp.lt.s32.totalorder %s5331_s4, %s7972_s1 }
  0x98   :  { %p5333_p3 = scmp.ne.s32.totalorder %s5331_s4, %s5332_s5  ;;  %p5336_p5 = scmp.lt.s32.totalorder %s6924_s18, %s5332_s5 }
  0x9a   :  { %p5337_p6 = por %p5336_p5, %p5335_p4 }
  0x9c   :  { %p5338_p7 = pnand %p5337_p6, %p5333_p3 }
  0x9e   :  { %5341 = shalt.err (!%p5338_p7)  }
  0x9f   :  { %250 = dma.hbm_to_vmem [thread:$0]  %s244_s11, 128, %s246_s25, [#allocation3 + $0x9], %s6813_s0, %s6813_s0, %s6814_s21 }
  0xa0   :  { %s4697_s9 = sshll.u32 %s251_s24, 6  ;;  %s266_s10 = sshrl.u32 %s7044_s29, 3 }
  0xa1   :  { %s254_s28 = sadd.s32 %s4697_s9, %s252_s30  ;;  %s267_s26 = sand.u32 7, %s7044_s29  }
  0xa2   :  { %s255_s8 = scalar_lea.hbm %s7972_s1, %s254_s28  ;;  %s4698_s12 = sshll.u32 %s266_s10, 6 }
  0xa3   :  { %s258_s22 = sshll.u32 %s255_s8, 4  ;;  %s269_s15 = sadd.s32 %s4698_s12, %s267_s26  ;;  %s259_s22 = int_to_ptr.hbm [resolvable:$true] %s258_s22 }
  0xa4   :  { %s5354_s16 = sshra.s32 %s259_s22, 4  ;;  %s5355_s16 = int_to_ptr.hbm [resolvable:$true] %s5354_s16 }
  0xa5   :  { %s5356_s17 = scalar_lea.hbm %s5355_s16, 8  ;;  %p5359_p9 = scmp.lt.s32.totalorder %s5355_s16, %s7972_s1 }
  0xa6   :  { %p5357_p8 = scmp.ne.s32.totalorder %s5355_s16, %s5356_s17  ;;  %p5360_p10 = scmp.lt.s32.totalorder %s6924_s18, %s5356_s17 }
  0xa8   :  { %p5361_p11 = por %p5360_p10, %p5359_p9 }
  0xaa   :  { %p5362_p12 = pnand %p5361_p11, %p5357_p8 }
  0xac   :  { %5365 = shalt.err (!%p5362_p12)  }
  0xad   :  { %265 = dma.hbm_to_vmem [thread:$0]  %s259_s22, 128, %s261_s2, [#allocation3 + $0xa], %s6813_s0, %s6813_s0, %s6814_s21 }
  0xae   :  { %s270_s20 = scalar_lea.hbm %s7972_s1, %s269_s15  ;;  %s6823_s11 = smov [#allocation2 + $0x43]  }
  0xaf   :  { %s273_s23 = sshll.u32 %s270_s20, 4  ;;  %s275_s24 = sshll.u32 %s6823_s11, 4  ;;  %s274_s23 = int_to_ptr.hbm [resolvable:$true] %s273_s23  ;;  %s276_s24 = int_to_ptr.vmem [resolvable:$true] %s275_s24 }
  0xb0   :  { %s5378_s30 = sshra.s32 %s274_s23, 4  ;;  %s5379_s30 = int_to_ptr.hbm [resolvable:$true] %s5378_s30 }
  0xb1   :  { %s5380_s4 = scalar_lea.hbm %s5379_s30, 8  ;;  %p5383_p0 = scmp.lt.s32.totalorder %s5379_s30, %s7972_s1 }
  0xb2   :  { %p5381_p13 = scmp.ne.s32.totalorder %s5379_s30, %s5380_s4  ;;  %p5384_p1 = scmp.lt.s32.totalorder %s6924_s18, %s5380_s4 }
  0xb4   :  { %p5385_p2 = por %p5384_p1, %p5383_p0 }
  0xb6   :  { %p5386_p3 = pnand %p5385_p2, %p5381_p13 }
  0xb8   :  { %5389 = shalt.err (!%p5386_p3)  }
  0xb9   :  { %280 = dma.hbm_to_vmem [thread:$0]  %s274_s23, 128, %s276_s24, [#allocation3 + $0xb], %s6813_s0, %s6813_s0, %s6814_s21 }
  0xba   :  { %s4635_s2 = sld [smem:[#allocation5 + $0xc]]  ;;  %s6824_s7 = smov [#allocation2 + $0x44]  }
  0xbb   :  { %s7095_s9 = sshll.u32 %s6824_s7, 4  ;;  %s4636_s28 = sld [smem:[#allocation5 + $0xd]]  ;;  %s291_s9 = int_to_ptr.vmem [resolvable:$true] %s7095_s9 }
  0xbc   :  { %s6825_s10 = smov [#allocation2 + $0x45]   ;;  %s7100_s27 = sld [smem:[#allocation5 + $0xe]] }
  0xbd   :  { %s7098_s14 = sshll.u32 %s6825_s10, 4  ;;  %s6826_s8 = smov [#allocation2 + $0x46]   ;;  %s306_s14 = int_to_ptr.vmem [resolvable:$true] %s7098_s14 }
  0xbe   :  { %s7103_s26 = sshll.u32 %s6826_s8, 4  ;;  %s7105_s22 = sld [smem:[#allocation5 + $0xf]]  ;;  %s321_s26 = int_to_ptr.vmem [resolvable:$true] %s7103_s26 }
  0xc0   :  { %s281_s12 = sshrl.u32 %s4635_s2, 3  ;;  %s282_s15 = sand.u32 7, %s4635_s2  }
  0xc1   :  { %s4699_s16 = sshll.u32 %s281_s12, 6  ;;  %s296_s17 = sshrl.u32 %s4636_s28, 3 }
  0xc2   :  { %s284_s19 = sadd.s32 %s4699_s16, %s282_s15  ;;  %s297_s25 = sand.u32 7, %s4636_s28  }
  0xc3   :  { %s285_s20 = scalar_lea.hbm %s7972_s1, %s284_s19  ;;  %s4700_s23 = sshll.u32 %s296_s17, 6 }
  0xc4   :  { %s288_s11 = sshll.u32 %s285_s20, 4  ;;  %s299_s24 = sadd.s32 %s4700_s23, %s297_s25  ;;  %s289_s11 = int_to_ptr.hbm [resolvable:$true] %s288_s11 }
  0xc5   :  { %s300_s5 = scalar_lea.hbm %s7972_s1, %s299_s24  ;;  %s5402_s6 = sshra.s32 %s289_s11, 4  ;;  %s5403_s6 = int_to_ptr.hbm [resolvable:$true] %s5402_s6 }
  0xc6   :  { %s5404_s2 = scalar_lea.hbm %s5403_s6, 8  ;;  %p5407_p5 = scmp.lt.s32.totalorder %s5403_s6, %s7972_s1 }
  0xc7   :  { %p5405_p4 = scmp.ne.s32.totalorder %s5403_s6, %s5404_s2  ;;  %p5408_p6 = scmp.lt.s32.totalorder %s6924_s18, %s5404_s2 }
  0xc9   :  { %p5409_p7 = por %p5408_p6, %p5407_p5 }
  0xcb   :  { %p5410_p8 = pnand %p5409_p7, %p5405_p4 }
  0xcd   :  { %5413 = shalt.err (!%p5410_p8)  }
  0xce   :  { %295 = dma.hbm_to_vmem [thread:$0]  %s289_s11, 128, %s291_s9, [#allocation3 + $0xc], %s6813_s0, %s6813_s0, %s6814_s21 }
  0xcf   :  { %s303_s28 = sshll.u32 %s300_s5, 4  ;;  %s311_s8 = sshrl.u32 %s7100_s27, 3  ;;  %s304_s28 = int_to_ptr.hbm [resolvable:$true] %s303_s28 }
  0xd0   :  { %s312_s12 = sand.u32 7, %s7100_s27   ;;  %s5426_s15 = sshra.s32 %s304_s28, 4  ;;  %s5427_s15 = int_to_ptr.hbm [resolvable:$true] %s5426_s15 }
  0xd1   :  { %s5428_s16 = scalar_lea.hbm %s5427_s15, 8  ;;  %p5431_p10 = scmp.lt.s32.totalorder %s5427_s15, %s7972_s1 }
  0xd2   :  { %p5429_p9 = scmp.ne.s32.totalorder %s5427_s15, %s5428_s16  ;;  %p5432_p11 = scmp.lt.s32.totalorder %s6924_s18, %s5428_s16 }
  0xd4   :  { %p5433_p12 = por %p5432_p11, %p5431_p10 }
  0xd6   :  { %p5434_p13 = pnand %p5433_p12, %p5429_p9 }
  0xd8   :  { %5437 = shalt.err (!%p5434_p13)  }
  0xd9   :  { %310 = dma.hbm_to_vmem [thread:$0]  %s304_s28, 128, %s306_s14, [#allocation3 + $0xd], %s6813_s0, %s6813_s0, %s6814_s21 }
  0xda   :  { %s4701_s9 = sshll.u32 %s311_s8, 6  ;;  %s326_s25 = sshrl.u32 %s7105_s22, 3 }
  0xdb   :  { %s314_s27 = sadd.s32 %s4701_s9, %s312_s12  ;;  %s327_s23 = sand.u32 7, %s7105_s22  }
  0xdc   :  { %s315_s20 = scalar_lea.hbm %s7972_s1, %s314_s27  ;;  %s4702_s24 = sshll.u32 %s326_s25, 6 }
  0xdd   :  { %s318_s11 = sshll.u32 %s315_s20, 4  ;;  %s329_s30 = sadd.s32 %s4702_s24, %s327_s23  ;;  %s319_s11 = int_to_ptr.hbm [resolvable:$true] %s318_s11 }
  0xde   :  { %s5450_s4 = sshra.s32 %s319_s11, 4  ;;  %s5451_s4 = int_to_ptr.hbm [resolvable:$true] %s5450_s4 }
  0xdf   :  { %s5452_s5 = scalar_lea.hbm %s5451_s4, 8  ;;  %p5455_p1 = scmp.lt.s32.totalorder %s5451_s4, %s7972_s1 }
  0xe0   :  { %p5453_p0 = scmp.ne.s32.totalorder %s5451_s4, %s5452_s5  ;;  %p5456_p2 = scmp.lt.s32.totalorder %s6924_s18, %s5452_s5 }
  0xe2   :  { %p5457_p3 = por %p5456_p2, %p5455_p1 }
  0xe4   :  { %p5458_p4 = pnand %p5457_p3, %p5453_p0 }
  0xe6   :  { %5461 = shalt.err (!%p5458_p4)  }
  0xe7   :  { %325 = dma.hbm_to_vmem [thread:$0]  %s319_s11, 128, %s321_s26, [#allocation3 + $0xe], %s6813_s0, %s6813_s0, %s6814_s21 }
  0xe8   :  { %s330_s7 = scalar_lea.hbm %s7972_s1, %s329_s30  ;;  %s6827_s28 = smov [#allocation2 + $0x47]  }
  0xe9   :  { %s333_s10 = sshll.u32 %s330_s7, 4  ;;  %s335_s8 = sshll.u32 %s6827_s28, 4  ;;  %s334_s10 = int_to_ptr.hbm [resolvable:$true] %s333_s10  ;;  %s336_s8 = int_to_ptr.vmem [resolvable:$true] %s335_s8 }
  0xea   :  { %s5474_s12 = sshra.s32 %s334_s10, 4  ;;  %s5475_s12 = int_to_ptr.hbm [resolvable:$true] %s5474_s12 }
  0xeb   :  { %s5476_s15 = scalar_lea.hbm %s5475_s12, 8  ;;  %p5479_p6 = scmp.lt.s32.totalorder %s5475_s12, %s7972_s1 }
  0xec   :  { %p5477_p5 = scmp.ne.s32.totalorder %s5475_s12, %s5476_s15  ;;  %p5480_p7 = scmp.lt.s32.totalorder %s6924_s18, %s5476_s15 }
  0xee   :  { %p5481_p8 = por %p5480_p7, %p5479_p6 }
  0xf0   :  { %p5482_p9 = pnand %p5481_p8, %p5477_p5 }
  0xf2   :  { %5485 = shalt.err (!%p5482_p9)  }
  0xf3   :  { %340 = dma.hbm_to_vmem [thread:$0]  %s334_s10, 128, %s336_s8, [#allocation3 + $0xf], %s6813_s0, %s6813_s0, %s6814_s21 }
  0xf4   :  { %s4639_s26 = sld [smem:[#allocation5 + $0x10]]  ;;  %s6828_s19 = smov [#allocation2 + $0x80]  }
  0xf5   :  { %s7156_s9 = sshll.u32 %s6828_s19, 4  ;;  %s4640_s27 = sld [smem:[#allocation5 + $0x11]]  ;;  %s351_s9 = int_to_ptr.vmem [resolvable:$true] %s7156_s9 }
  0xf6   :  { %s6829_s25 = smov [#allocation2 + $0x81]   ;;  %s7161_s13 = sld [smem:[#allocation5 + $0x12]] }
  0xf7   :  { %s7159_s29 = sshll.u32 %s6829_s25, 4  ;;  %s6830_s20 = smov [#allocation2 + $0x82]   ;;  %s366_s29 = int_to_ptr.vmem [resolvable:$true] %s7159_s29 }
  0xf8   :  { %s7164_s23 = sshll.u32 %s6830_s20, 4  ;;  %s7166_s11 = sld [smem:[#allocation5 + $0x13]]  ;;  %s381_s23 = int_to_ptr.vmem [resolvable:$true] %s7164_s23 }
  0xfa   :  { %s341_s24 = sshrl.u32 %s4639_s26, 3  ;;  %s342_s30 = sand.u32 7, %s4639_s26  }
  0xfb   :  { %s4703_s4 = sshll.u32 %s341_s24, 6  ;;  %s356_s5 = sshrl.u32 %s4640_s27, 3 }
  0xfc   :  { %s344_s6 = sadd.s32 %s4703_s4, %s342_s30  ;;  %s357_s14 = sand.u32 7, %s4640_s27  }
  0xfd   :  { %s345_s7 = scalar_lea.hbm %s7972_s1, %s344_s6  ;;  %s4704_s10 = sshll.u32 %s356_s5, 6 }
  0xfe   :  { %s348_s28 = sshll.u32 %s345_s7, 4  ;;  %s359_s8 = sadd.s32 %s4704_s10, %s357_s14  ;;  %s349_s28 = int_to_ptr.hbm [resolvable:$true] %s348_s28 }
  0xff   :  { %s360_s16 = scalar_lea.hbm %s7972_s1, %s359_s8  ;;  %s5498_s17 = sshra.s32 %s349_s28, 4  ;;  %s5499_s17 = int_to_ptr.hbm [resolvable:$true] %s5498_s17 }
 0x100   :  { %s5500_s26 = scalar_lea.hbm %s5499_s17, 8  ;;  %p5503_p11 = scmp.lt.s32.totalorder %s5499_s17, %s7972_s1 }
 0x101   :  { %p5501_p10 = scmp.ne.s32.totalorder %s5499_s17, %s5500_s26  ;;  %p5504_p12 = scmp.lt.s32.totalorder %s6924_s18, %s5500_s26 }
 0x103   :  { %p5505_p13 = por %p5504_p12, %p5503_p11 }
 0x105   :  { %p5506_p0 = pnand %p5505_p13, %p5501_p10 }
 0x107   :  { %5509 = shalt.err (!%p5506_p0)  }
 0x108   :  { %355 = dma.hbm_to_vmem [thread:$0]  %s349_s28, 128, %s351_s9, [#allocation3 + $0x10], %s6813_s0, %s6813_s0, %s6814_s21 }
 0x109   :  { %s363_s27 = sshll.u32 %s360_s16, 4  ;;  %s371_s20 = sshrl.u32 %s7161_s13, 3  ;;  %s364_s27 = int_to_ptr.hbm [resolvable:$true] %s363_s27 }
 0x10a   :  { %s372_s24 = sand.u32 7, %s7161_s13   ;;  %s5522_s30 = sshra.s32 %s364_s27, 4  ;;  %s5523_s30 = int_to_ptr.hbm [resolvable:$true] %s5522_s30 }
 0x10b   :  { %s5524_s4 = scalar_lea.hbm %s5523_s30, 8  ;;  %p5527_p2 = scmp.lt.s32.totalorder %s5523_s30, %s7972_s1 }
 0x10c   :  { %p5525_p1 = scmp.ne.s32.totalorder %s5523_s30, %s5524_s4  ;;  %p5528_p3 = scmp.lt.s32.totalorder %s6924_s18, %s5524_s4 }
 0x10e   :  { %p5529_p4 = por %p5528_p3, %p5527_p2 }
 0x110   :  { %p5530_p5 = pnand %p5529_p4, %p5525_p1 }
 0x112   :  { %5533 = shalt.err (!%p5530_p5)  }
 0x113   :  { %370 = dma.hbm_to_vmem [thread:$0]  %s364_s27, 128, %s366_s29, [#allocation3 + $0x11], %s6813_s0, %s6813_s0, %s6814_s21 }
 0x114   :  { %s4705_s9 = sshll.u32 %s371_s20, 6  ;;  %s386_s14 = sshrl.u32 %s7166_s11, 3 }
 0x115   :  { %s374_s13 = sadd.s32 %s4705_s9, %s372_s24  ;;  %s387_s10 = sand.u32 7, %s7166_s11  }
 0x116   :  { %s375_s7 = scalar_lea.hbm %s7972_s1, %s374_s13  ;;  %s4706_s8 = sshll.u32 %s386_s14, 6 }
 0x117   :  { %s378_s28 = sshll.u32 %s375_s7, 4  ;;  %s389_s12 = sadd.s32 %s4706_s8, %s387_s10  ;;  %s379_s28 = int_to_ptr.hbm [resolvable:$true] %s378_s28 }
 0x118   :  { %s5546_s15 = sshra.s32 %s379_s28, 4  ;;  %s5547_s15 = int_to_ptr.hbm [resolvable:$true] %s5546_s15 }
 0x119   :  { %s5548_s16 = scalar_lea.hbm %s5547_s15, 8  ;;  %p5551_p7 = scmp.lt.s32.totalorder %s5547_s15, %s7972_s1 }
 0x11a   :  { %p5549_p6 = scmp.ne.s32.totalorder %s5547_s15, %s5548_s16  ;;  %p5552_p8 = scmp.lt.s32.totalorder %s6924_s18, %s5548_s16 }
 0x11c   :  { %p5553_p9 = por %p5552_p8, %p5551_p7 }
 0x11e   :  { %p5554_p10 = pnand %p5553_p9, %p5549_p6 }
 0x120   :  { %5557 = shalt.err (!%p5554_p10)  }
 0x121   :  { %385 = dma.hbm_to_vmem [thread:$0]  %s379_s28, 128, %s381_s23, [#allocation3 + $0x12], %s6813_s0, %s6813_s0, %s6814_s21 }
 0x122   :  { %s390_s19 = scalar_lea.hbm %s7972_s1, %s389_s12  ;;  %s6831_s27 = smov [#allocation2 + $0x83]  }
 0x123   :  { %s393_s25 = sshll.u32 %s390_s19, 4  ;;  %s395_s20 = sshll.u32 %s6831_s27, 4  ;;  %s394_s25 = int_to_ptr.hbm [resolvable:$true] %s393_s25  ;;  %s396_s20 = int_to_ptr.vmem [resolvable:$true] %s395_s20 }
 0x124   :  { %s5570_s24 = sshra.s32 %s394_s25, 4  ;;  %s5571_s24 = int_to_ptr.hbm [resolvable:$true] %s5570_s24 }
 0x125   :  { %s5572_s30 = scalar_lea.hbm %s5571_s24, 8  ;;  %p5575_p12 = scmp.lt.s32.totalorder %s5571_s24, %s7972_s1 }
 0x126   :  { %p5573_p11 = scmp.ne.s32.totalorder %s5571_s24, %s5572_s30  ;;  %p5576_p13 = scmp.lt.s32.totalorder %s6924_s18, %s5572_s30 }
 0x128   :  { %p5577_p0 = por %p5576_p13, %p5575_p12 }
 0x12a   :  { %p5578_p1 = pnand %p5577_p0, %p5573_p11 }
 0x12c   :  { %5581 = shalt.err (!%p5578_p1)  }
 0x12d   :  { %400 = dma.hbm_to_vmem [thread:$0]  %s394_s25, 128, %s396_s20, [#allocation3 + $0x13], %s6813_s0, %s6813_s0, %s6814_s21 }
 0x12e   :  { %s4643_s23 = sld [smem:[#allocation5 + $0x14]]  ;;  %s6832_s6 = smov [#allocation2 + $0x84]  }
 0x12f   :  { %s7217_s9 = sshll.u32 %s6832_s6, 4  ;;  %s4644_s13 = sld [smem:[#allocation5 + $0x15]]  ;;  %s411_s9 = int_to_ptr.vmem [resolvable:$true] %s7217_s9 }
 0x130   :  { %s6833_s14 = smov [#allocation2 + $0x85]   ;;  %s7222_s2 = sld [smem:[#allocation5 + $0x16]] }
 0x131   :  { %s7220_s22 = sshll.u32 %s6833_s14, 4  ;;  %s6834_s7 = smov [#allocation2 + $0x86]   ;;  %s426_s22 = int_to_ptr.vmem [resolvable:$true] %s7220_s22 }
 0x132   :  { %s7225_s10 = sshll.u32 %s6834_s7, 4  ;;  %s7227_s28 = sld [smem:[#allocation5 + $0x17]]  ;;  %s441_s10 = int_to_ptr.vmem [resolvable:$true] %s7225_s10 }
 0x134   :  { %s401_s8 = sshrl.u32 %s4643_s23, 3  ;;  %s402_s12 = sand.u32 7, %s4643_s23  }
 0x135   :  { %s4707_s15 = sshll.u32 %s401_s8, 6  ;;  %s416_s16 = sshrl.u32 %s4644_s13, 3 }
 0x136   :  { %s404_s17 = sadd.s32 %s4707_s15, %s402_s12  ;;  %s417_s29 = sand.u32 7, %s4644_s13  }
 0x137   :  { %s405_s19 = scalar_lea.hbm %s7972_s1, %s404_s17  ;;  %s4708_s25 = sshll.u32 %s416_s16, 6 }
 0x138   :  { %s408_s27 = sshll.u32 %s405_s19, 4  ;;  %s419_s20 = sadd.s32 %s4708_s25, %s417_s29  ;;  %s409_s27 = int_to_ptr.hbm [resolvable:$true] %s408_s27 }
 0x139   :  { %s420_s4 = scalar_lea.hbm %s7972_s1, %s419_s20  ;;  %s5594_s5 = sshra.s32 %s409_s27, 4  ;;  %s5595_s5 = int_to_ptr.hbm [resolvable:$true] %s5594_s5 }
 0x13a   :  { %s5596_s23 = scalar_lea.hbm %s5595_s5, 8  ;;  %p5599_p3 = scmp.lt.s32.totalorder %s5595_s5, %s7972_s1 }
 0x13b   :  { %p5597_p2 = scmp.ne.s32.totalorder %s5595_s5, %s5596_s23  ;;  %p5600_p4 = scmp.lt.s32.totalorder %s6924_s18, %s5596_s23 }
 0x13d   :  { %p5601_p5 = por %p5600_p4, %p5599_p3 }
 0x13f   :  { %p5602_p6 = pnand %p5601_p5, %p5597_p2 }
 0x141   :  { %5605 = shalt.err (!%p5602_p6)  }
 0x142   :  { %415 = dma.hbm_to_vmem [thread:$0]  %s409_s27, 128, %s411_s9, [#allocation3 + $0x14], %s6813_s0, %s6813_s0, %s6814_s21 }
 0x143   :  { %s423_s13 = sshll.u32 %s420_s4, 4  ;;  %s431_s7 = sshrl.u32 %s7222_s2, 3  ;;  %s424_s13 = int_to_ptr.hbm [resolvable:$true] %s423_s13 }
 0x144   :  { %s432_s8 = sand.u32 7, %s7222_s2   ;;  %s5618_s12 = sshra.s32 %s424_s13, 4  ;;  %s5619_s12 = int_to_ptr.hbm [resolvable:$true] %s5618_s12 }
 0x145   :  { %s5620_s15 = scalar_lea.hbm %s5619_s12, 8  ;;  %p5623_p8 = scmp.lt.s32.totalorder %s5619_s12, %s7972_s1 }
 0x146   :  { %p5621_p7 = scmp.ne.s32.totalorder %s5619_s12, %s5620_s15  ;;  %p5624_p9 = scmp.lt.s32.totalorder %s6924_s18, %s5620_s15 }
 0x148   :  { %p5625_p10 = por %p5624_p9, %p5623_p8 }
 0x14a   :  { %p5626_p11 = pnand %p5625_p10, %p5621_p7 }
 0x14c   :  { %5629 = shalt.err (!%p5626_p11)  }
 0x14d   :  { %430 = dma.hbm_to_vmem [thread:$0]  %s424_s13, 128, %s426_s22, [#allocation3 + $0x15], %s6813_s0, %s6813_s0, %s6814_s21 }
 0x14e   :  { %s4709_s9 = sshll.u32 %s431_s7, 6  ;;  %s446_s29 = sshrl.u32 %s7227_s28, 3 }
 0x14f   :  { %s434_s2 = sadd.s32 %s4709_s9, %s432_s8  ;;  %s447_s25 = sand.u32 7, %s7227_s28  }
 0x150   :  { %s435_s19 = scalar_lea.hbm %s7972_s1, %s434_s2  ;;  %s4710_s20 = sshll.u32 %s446_s29, 6 }
 0x151   :  { %s438_s27 = sshll.u32 %s435_s19, 4  ;;  %s449_s24 = sadd.s32 %s4710_s20, %s447_s25  ;;  %s439_s27 = int_to_ptr.hbm [resolvable:$true] %s438_s27 }
 0x152   :  { %s5642_s30 = sshra.s32 %s439_s27, 4  ;;  %s5643_s30 = int_to_ptr.hbm [resolvable:$true] %s5642_s30 }
 0x153   :  { %s5644_s4 = scalar_lea.hbm %s5643_s30, 8  ;;  %p5647_p13 = scmp.lt.s32.totalorder %s5643_s30, %s7972_s1 }
 0x154   :  { %p5645_p12 = scmp.ne.s32.totalorder %s5643_s30, %s5644_s4  ;;  %p5648_p0 = scmp.lt.s32.totalorder %s6924_s18, %s5644_s4 }
 0x156   :  { %p5649_p1 = por %p5648_p0, %p5647_p13 }
 0x158   :  { %p5650_p2 = pnand %p5649_p1, %p5645_p12 }
 0x15a   :  { %5653 = shalt.err (!%p5650_p2)  }
 0x15b   :  { %445 = dma.hbm_to_vmem [thread:$0]  %s439_s27, 128, %s441_s10, [#allocation3 + $0x16], %s6813_s0, %s6813_s0, %s6814_s21 }
 0x15c   :  { %s450_s6 = scalar_lea.hbm %s7972_s1, %s449_s24  ;;  %s6835_s13 = smov [#allocation2 + $0x87]  }
 0x15d   :  { %s453_s14 = sshll.u32 %s450_s6, 4  ;;  %s455_s7 = sshll.u32 %s6835_s13, 4  ;;  %s454_s14 = int_to_ptr.hbm [resolvable:$true] %s453_s14  ;;  %s456_s7 = int_to_ptr.vmem [resolvable:$true] %s455_s7 }
 0x15e   :  { %s5666_s8 = sshra.s32 %s454_s14, 4  ;;  %s5667_s8 = int_to_ptr.hbm [resolvable:$true] %s5666_s8 }
 0x15f   :  { %s5668_s12 = scalar_lea.hbm %s5667_s8, 8  ;;  %p5671_p4 = scmp.lt.s32.totalorder %s5667_s8, %s7972_s1 }
 0x160   :  { %p5669_p3 = scmp.ne.s32.totalorder %s5667_s8, %s5668_s12  ;;  %p5672_p5 = scmp.lt.s32.totalorder %s6924_s18, %s5668_s12 }
 0x162   :  { %p5673_p6 = por %p5672_p5, %p5671_p4 }
 0x164   :  { %p5674_p7 = pnand %p5673_p6, %p5669_p3 }
 0x166   :  { %5677 = shalt.err (!%p5674_p7)  }
 0x167   :  { %460 = dma.hbm_to_vmem [thread:$0]  %s454_s14, 128, %s456_s7, [#allocation3 + $0x17], %s6813_s0, %s6813_s0, %s6814_s21 }
 0x168   :  { %s4647_s10 = sld [smem:[#allocation5 + $0x18]]  ;;  %s6836_s17 = smov [#allocation2 + $0xc0]  }
 0x169   :  { %s7278_s9 = sshll.u32 %s6836_s17, 4  ;;  %s4648_s2 = sld [smem:[#allocation5 + $0x19]]  ;;  %s471_s9 = int_to_ptr.vmem [resolvable:$true] %s7278_s9 }
 0x16a   :  { %s6837_s29 = smov [#allocation2 + $0xc1]   ;;  %s7283_s26 = sld [smem:[#allocation5 + $0x1a]] }
 0x16b   :  { %s7281_s11 = sshll.u32 %s6837_s29, 4  ;;  %s6838_s19 = smov [#allocation2 + $0xc2]   ;;  %s486_s11 = int_to_ptr.vmem [resolvable:$true] %s7281_s11 }
 0x16c   :  { %s7286_s25 = sshll.u32 %s6838_s19, 4  ;;  %s7288_s27 = sld [smem:[#allocation5 + $0x1b]]  ;;  %s501_s25 = int_to_ptr.vmem [resolvable:$true] %s7286_s25 }
 0x16e   :  { %s461_s20 = sshrl.u32 %s4647_s10, 3  ;;  %s462_s24 = sand.u32 7, %s4647_s10  }
 0x16f   :  { %s4711_s30 = sshll.u32 %s461_s20, 6  ;;  %s476_s4 = sshrl.u32 %s4648_s2, 3 }
 0x170   :  { %s464_s5 = sadd.s32 %s4711_s30, %s462_s24  ;;  %s477_s22 = sand.u32 7, %s4648_s2  }
 0x171   :  { %s465_s6 = scalar_lea.hbm %s7972_s1, %s464_s5  ;;  %s4712_s14 = sshll.u32 %s476_s4, 6 }
 0x172   :  { %s468_s13 = sshll.u32 %s465_s6, 4  ;;  %s479_s7 = sadd.s32 %s4712_s14, %s477_s22  ;;  %s469_s13 = int_to_ptr.hbm [resolvable:$true] %s468_s13 }
 0x173   :  { %s480_s15 = scalar_lea.hbm %s7972_s1, %s479_s7  ;;  %s5690_s16 = sshra.s32 %s469_s13, 4  ;;  %s5691_s16 = int_to_ptr.hbm [resolvable:$true] %s5690_s16 }
 0x174   :  { %s5692_s10 = scalar_lea.hbm %s5691_s16, 8  ;;  %p5695_p9 = scmp.lt.s32.totalorder %s5691_s16, %s7972_s1 }
 0x175   :  { %p5693_p8 = scmp.ne.s32.totalorder %s5691_s16, %s5692_s10  ;;  %p5696_p10 = scmp.lt.s32.totalorder %s6924_s18, %s5692_s10 }
 0x177   :  { %p5697_p11 = por %p5696_p10, %p5695_p9 }
 0x179   :  { %p5698_p12 = pnand %p5697_p11, %p5693_p8 }
 0x17b   :  { %5701 = shalt.err (!%p5698_p12)  }
 0x17c   :  { %475 = dma.hbm_to_vmem [thread:$0]  %s469_s13, 128, %s471_s9, [#allocation3 + $0x18], %s6813_s0, %s6813_s0, %s6814_s21 }
 0x17d   :  { %s483_s2 = sshll.u32 %s480_s15, 4  ;;  %s491_s19 = sshrl.u32 %s7283_s26, 3  ;;  %s484_s2 = int_to_ptr.hbm [resolvable:$true] %s483_s2 }
 0x17e   :  { %s492_s20 = sand.u32 7, %s7283_s26   ;;  %s5714_s24 = sshra.s32 %s484_s2, 4  ;;  %s5715_s24 = int_to_ptr.hbm [resolvable:$true] %s5714_s24 }
 0x17f   :  { %s5716_s30 = scalar_lea.hbm %s5715_s24, 8  ;;  %p5719_p0 = scmp.lt.s32.totalorder %s5715_s24, %s7972_s1 }
 0x180   :  { %p5717_p13 = scmp.ne.s32.totalorder %s5715_s24, %s5716_s30  ;;  %p5720_p1 = scmp.lt.s32.totalorder %s6924_s18, %s5716_s30 }
 0x182   :  { %p5721_p2 = por %p5720_p1, %p5719_p0 }
 0x184   :  { %p5722_p3 = pnand %p5721_p2, %p5717_p13 }
 0x186   :  { %5725 = shalt.err (!%p5722_p3)  }
 0x187   :  { %490 = dma.hbm_to_vmem [thread:$0]  %s484_s2, 128, %s486_s11, [#allocation3 + $0x19], %s6813_s0, %s6813_s0, %s6814_s21 }
 0x188   :  { %s4713_s9 = sshll.u32 %s491_s19, 6  ;;  %s506_s22 = sshrl.u32 %s7288_s27, 3 }
 0x189   :  { %s494_s26 = sadd.s32 %s4713_s9, %s492_s20  ;;  %s507_s14 = sand.u32 7, %s7288_s27  }
 0x18a   :  { %s495_s6 = scalar_lea.hbm %s7972_s1, %s494_s26  ;;  %s4714_s7 = sshll.u32 %s506_s22, 6 }
 0x18b   :  { %s498_s13 = sshll.u32 %s495_s6, 4  ;;  %s509_s8 = sadd.s32 %s4714_s7, %s507_s14  ;;  %s499_s13 = int_to_ptr.hbm [resolvable:$true] %s498_s13 }
 0x18c   :  { %s5738_s12 = sshra.s32 %s499_s13, 4  ;;  %s5739_s12 = int_to_ptr.hbm [resolvable:$true] %s5738_s12 }
 0x18d   :  { %s5740_s15 = scalar_lea.hbm %s5739_s12, 8  ;;  %p5743_p5 = scmp.lt.s32.totalorder %s5739_s12, %s7972_s1 }
 0x18e   :  { %p5741_p4 = scmp.ne.s32.totalorder %s5739_s12, %s5740_s15  ;;  %p5744_p6 = scmp.lt.s32.totalorder %s6924_s18, %s5740_s15 }
 0x190   :  { %p5745_p7 = por %p5744_p6, %p5743_p5 }
 0x192   :  { %p5746_p8 = pnand %p5745_p7, %p5741_p4 }
 0x194   :  { %5749 = shalt.err (!%p5746_p8)  }
 0x195   :  { %505 = dma.hbm_to_vmem [thread:$0]  %s499_s13, 128, %s501_s25, [#allocation3 + $0x1a], %s6813_s0, %s6813_s0, %s6814_s21 }
 0x196   :  { %s510_s17 = scalar_lea.hbm %s7972_s1, %s509_s8  ;;  %s6839_s2 = smov [#allocation2 + $0xc3]  }
 0x197   :  { %s513_s29 = sshll.u32 %s510_s17, 4  ;;  %s515_s19 = sshll.u32 %s6839_s2, 4  ;;  %s514_s29 = int_to_ptr.hbm [resolvable:$true] %s513_s29  ;;  %s516_s19 = int_to_ptr.vmem [resolvable:$true] %s515_s19 }
 0x198   :  { %s5762_s20 = sshra.s32 %s514_s29, 4  ;;  %s5763_s20 = int_to_ptr.hbm [resolvable:$true] %s5762_s20 }
 0x199   :  { %s5764_s24 = scalar_lea.hbm %s5763_s20, 8  ;;  %p5767_p10 = scmp.lt.s32.totalorder %s5763_s20, %s7972_s1 }
 0x19a   :  { %p5765_p9 = scmp.ne.s32.totalorder %s5763_s20, %s5764_s24  ;;  %p5768_p11 = scmp.lt.s32.totalorder %s6924_s18, %s5764_s24 }
 0x19c   :  { %p5769_p12 = por %p5768_p11, %p5767_p10 }
 0x19e   :  { %p5770_p13 = pnand %p5769_p12, %p5765_p9 }
 0x1a0   :  { %5773 = shalt.err (!%p5770_p13)  }
 0x1a1   :  { %520 = dma.hbm_to_vmem [thread:$0]  %s514_s29, 128, %s516_s19, [#allocation3 + $0x1b], %s6813_s0, %s6813_s0, %s6814_s21 }
 0x1a2   :  { %s4651_s25 = sld [smem:[#allocation5 + $0x1c]]  ;;  %s6840_s5 = smov [#allocation2 + $0xc4]  }
 0x1a3   :  { %s7339_s9 = sshll.u32 %s6840_s5, 4  ;;  %s4652_s26 = sld [smem:[#allocation5 + $0x1d]]  ;;  %s531_s9 = int_to_ptr.vmem [resolvable:$true] %s7339_s9 }
 0x1a4   :  { %s6841_s22 = smov [#allocation2 + $0xc5]   ;;  %s7344_s23 = sld [smem:[#allocation5 + $0x1e]] }
 0x1a5   :  { %s7342_s28 = sshll.u32 %s6841_s22, 4  ;;  %s6842_s6 = smov [#allocation2 + $0xc6]   ;;  %s546_s28 = int_to_ptr.vmem [resolvable:$true] %s7342_s28 }
 0x1a6   :  { %s7347_s14 = sshll.u32 %s6842_s6, 4  ;;  %s7349_s13 = sld [smem:[#allocation5 + $0x1f]]  ;;  %s561_s14 = int_to_ptr.vmem [resolvable:$true] %s7347_s14 }
 0x1a8   :  { %s521_s7 = sshrl.u32 %s4651_s25, 3  ;;  %s522_s8 = sand.u32 7, %s4651_s25  }
 0x1a9   :  { %s4715_s12 = sshll.u32 %s521_s7, 6  ;;  %s536_s15 = sshrl.u32 %s4652_s26, 3 }
 0x1aa   :  { %s524_s16 = sadd.s32 %s4715_s12, %s522_s8  ;;  %s537_s11 = sand.u32 7, %s4652_s26  }
 0x1ab   :  { %s525_s17 = scalar_lea.hbm %s7972_s1, %s524_s16  ;;  %s4716_s29 = sshll.u32 %s536_s15, 6 }
 0x1ac   :  { %s528_s2 = sshll.u32 %s525_s17, 4  ;;  %s539_s19 = sadd.s32 %s4716_s29, %s537_s11  ;;  %s529_s2 = int_to_ptr.hbm [resolvable:$true] %s528_s2 }
 0x1ad   :  { %s540_s30 = scalar_lea.hbm %s7972_s1, %s539_s19  ;;  %s5786_s4 = sshra.s32 %s529_s2, 4  ;;  %s5787_s4 = int_to_ptr.hbm [resolvable:$true] %s5786_s4 }
 0x1ae   :  { %s5788_s25 = scalar_lea.hbm %s5787_s4, 8  ;;  %p5791_p1 = scmp.lt.s32.totalorder %s5787_s4, %s7972_s1 }
 0x1af   :  { %p5789_p0 = scmp.ne.s32.totalorder %s5787_s4, %s5788_s25  ;;  %p5792_p2 = scmp.lt.s32.totalorder %s6924_s18, %s5788_s25 }
 0x1b1   :  { %p5793_p3 = por %p5792_p2, %p5791_p1 }
 0x1b3   :  { %p5794_p4 = pnand %p5793_p3, %p5789_p0 }
 0x1b5   :  { %5797 = shalt.err (!%p5794_p4)  }
 0x1b6   :  { %535 = dma.hbm_to_vmem [thread:$0]  %s529_s2, 128, %s531_s9, [#allocation3 + $0x1c], %s6813_s0, %s6813_s0, %s6814_s21 }
 0x1b7   :  { %s543_s26 = sshll.u32 %s540_s30, 4  ;;  %s551_s6 = sshrl.u32 %s7344_s23, 3  ;;  %s544_s26 = int_to_ptr.hbm [resolvable:$true] %s543_s26 }
 0x1b8   :  { %s552_s7 = sand.u32 7, %s7344_s23   ;;  %s5810_s8 = sshra.s32 %s544_s26, 4  ;;  %s5811_s8 = int_to_ptr.hbm [resolvable:$true] %s5810_s8 }
 0x1b9   :  { %s5812_s12 = scalar_lea.hbm %s5811_s8, 8  ;;  %p5815_p6 = scmp.lt.s32.totalorder %s5811_s8, %s7972_s1 }
 0x1ba   :  { %p5813_p5 = scmp.ne.s32.totalorder %s5811_s8, %s5812_s12  ;;  %p5816_p7 = scmp.lt.s32.totalorder %s6924_s18, %s5812_s12 }
 0x1bc   :  { %p5817_p8 = por %p5816_p7, %p5815_p6 }
 0x1be   :  { %p5818_p9 = pnand %p5817_p8, %p5813_p5 }
 0x1c0   :  { %5821 = shalt.err (!%p5818_p9)  }
 0x1c1   :  { %550 = dma.hbm_to_vmem [thread:$0]  %s544_s26, 128, %s546_s28, [#allocation3 + $0x1d], %s6813_s0, %s6813_s0, %s6814_s21 }
 0x1c2   :  { %s4717_s9 = sshll.u32 %s551_s6, 6  ;;  %s566_s11 = sshrl.u32 %s7349_s13, 3 }
 0x1c3   :  { %s554_s23 = sadd.s32 %s4717_s9, %s552_s7  ;;  %s567_s29 = sand.u32 7, %s7349_s13  }
 0x1c4   :  { %s555_s17 = scalar_lea.hbm %s7972_s1, %s554_s23  ;;  %s4718_s19 = sshll.u32 %s566_s11, 6 }
 0x1c5   :  { %s558_s2 = sshll.u32 %s555_s17, 4  ;;  %s569_s20 = sadd.s32 %s4718_s19, %s567_s29  ;;  %s559_s2 = int_to_ptr.hbm [resolvable:$true] %s558_s2 }
 0x1c6   :  { %s5834_s24 = sshra.s32 %s559_s2, 4  ;;  %s5835_s24 = int_to_ptr.hbm [resolvable:$true] %s5834_s24 }
 0x1c7   :  { %s5836_s30 = scalar_lea.hbm %s5835_s24, 8  ;;  %p5839_p11 = scmp.lt.s32.totalorder %s5835_s24, %s7972_s1 }
 0x1c8   :  { %p5837_p10 = scmp.ne.s32.totalorder %s5835_s24, %s5836_s30  ;;  %p5840_p12 = scmp.lt.s32.totalorder %s6924_s18, %s5836_s30 }
 0x1ca   :  { %p5841_p13 = por %p5840_p12, %p5839_p11 }
 0x1cc   :  { %p5842_p0 = pnand %p5841_p13, %p5837_p10 }
 0x1ce   :  { %5845 = shalt.err (!%p5842_p0)  }
 0x1cf   :  { %565 = dma.hbm_to_vmem [thread:$0]  %s559_s2, 128, %s561_s14, [#allocation3 + $0x1e], %s6813_s0, %s6813_s0, %s6814_s21 }
 0x1d0   :  { %s570_s5 = scalar_lea.hbm %s7972_s1, %s569_s20  ;;  %s6843_s26 = smov [#allocation2 + $0xc7]  }
 0x1d1   :  { %s573_s22 = sshll.u32 %s570_s5, 4  ;;  %s575_s6 = sshll.u32 %s6843_s26, 4  ;;  %s574_s22 = int_to_ptr.hbm [resolvable:$true] %s573_s22  ;;  %s576_s6 = int_to_ptr.vmem [resolvable:$true] %s575_s6 }
 0x1d2   :  { %s5858_s7 = sshra.s32 %s574_s22, 4  ;;  %s5859_s7 = int_to_ptr.hbm [resolvable:$true] %s5858_s7 }
 0x1d3   :  { %s5860_s8 = scalar_lea.hbm %s5859_s7, 8  ;;  %p5863_p2 = scmp.lt.s32.totalorder %s5859_s7, %s7972_s1 }
 0x1d4   :  { %p5861_p1 = scmp.ne.s32.totalorder %s5859_s7, %s5860_s8  ;;  %p5864_p3 = scmp.lt.s32.totalorder %s6924_s18, %s5860_s8 }
 0x1d6   :  { %p5865_p4 = por %p5864_p3, %p5863_p2 }
 0x1d8   :  { %p5866_p5 = pnand %p5865_p4, %p5861_p1 }
 0x1da   :  { %5869 = shalt.err (!%p5866_p5)  }
 0x1db   :  { %580 = dma.hbm_to_vmem [thread:$0]  %s574_s22, 128, %s576_s6, [#allocation3 + $0x1f], %s6813_s0, %s6813_s0, %s6814_s21 }
 0x1dc   :  { %s4655_s14 = sld [smem:[#allocation5 + $0x20]]  ;;  %s6844_s16 = smov [#allocation2 + $0x100]  }
 0x1dd   :  { %s7400_s9 = sshll.u32 %s6844_s16, 4  ;;  %s4656_s23 = sld [smem:[#allocation5 + $0x21]]  ;;  %s591_s9 = int_to_ptr.vmem [resolvable:$true] %s7400_s9 }
 0x1de   :  { %s6845_s11 = smov [#allocation2 + $0x101]   ;;  %s7405_s10 = sld [smem:[#allocation5 + $0x22]] }
 0x1df   :  { %s7403_s27 = sshll.u32 %s6845_s11, 4  ;;  %s6846_s17 = smov [#allocation2 + $0x102]   ;;  %s606_s27 = int_to_ptr.vmem [resolvable:$true] %s7403_s27 }
 0x1e0   :  { %s7408_s29 = sshll.u32 %s6846_s17, 4  ;;  %s7410_s2 = sld [smem:[#allocation5 + $0x23]]  ;;  %s621_s29 = int_to_ptr.vmem [resolvable:$true] %s7408_s29 }
 0x1e2   :  { %s581_s19 = sshrl.u32 %s4655_s14, 3  ;;  %s582_s20 = sand.u32 7, %s4655_s14  }
 0x1e3   :  { %s4719_s24 = sshll.u32 %s581_s19, 6  ;;  %s596_s30 = sshrl.u32 %s4656_s23, 3 }
 0x1e4   :  { %s584_s4 = sadd.s32 %s4719_s24, %s582_s20  ;;  %s597_s28 = sand.u32 7, %s4656_s23  }
 0x1e5   :  { %s585_s5 = scalar_lea.hbm %s7972_s1, %s584_s4  ;;  %s4720_s22 = sshll.u32 %s596_s30, 6 }
 0x1e6   :  { %s588_s26 = sshll.u32 %s585_s5, 4  ;;  %s599_s6 = sadd.s32 %s4720_s22, %s597_s28  ;;  %s589_s26 = int_to_ptr.hbm [resolvable:$true] %s588_s26 }
 0x1e7   :  { %s600_s12 = scalar_lea.hbm %s7972_s1, %s599_s6  ;;  %s5882_s15 = sshra.s32 %s589_s26, 4  ;;  %s5883_s15 = int_to_ptr.hbm [resolvable:$true] %s5882_s15 }
 0x1e8   :  { %s5884_s14 = scalar_lea.hbm %s5883_s15, 8  ;;  %p5887_p7 = scmp.lt.s32.totalorder %s5883_s15, %s7972_s1 }
 0x1e9   :  { %p5885_p6 = scmp.ne.s32.totalorder %s5883_s15, %s5884_s14  ;;  %p5888_p8 = scmp.lt.s32.totalorder %s6924_s18, %s5884_s14 }
 0x1eb   :  { %p5889_p9 = por %p5888_p8, %p5887_p7 }
 0x1ed   :  { %p5890_p10 = pnand %p5889_p9, %p5885_p6 }
 0x1ef   :  { %5893 = shalt.err (!%p5890_p10)  }
 0x1f0   :  { %595 = dma.hbm_to_vmem [thread:$0]  %s589_s26, 128, %s591_s9, [#allocation3 + $0x20], %s6813_s0, %s6813_s0, %s6814_s21 }
 0x1f1   :  { %s603_s23 = sshll.u32 %s600_s12, 4  ;;  %s611_s17 = sshrl.u32 %s7405_s10, 3  ;;  %s604_s23 = int_to_ptr.hbm [resolvable:$true] %s603_s23 }
 0x1f2   :  { %s612_s19 = sand.u32 7, %s7405_s10   ;;  %s5906_s20 = sshra.s32 %s604_s23, 4  ;;  %s5907_s20 = int_to_ptr.hbm [resolvable:$true] %s5906_s20 }
 0x1f3   :  { %s5908_s24 = scalar_lea.hbm %s5907_s20, 8  ;;  %p5911_p12 = scmp.lt.s32.totalorder %s5907_s20, %s7972_s1 }
 0x1f4   :  { %p5909_p11 = scmp.ne.s32.totalorder %s5907_s20, %s5908_s24  ;;  %p5912_p13 = scmp.lt.s32.totalorder %s6924_s18, %s5908_s24 }
 0x1f6   :  { %p5913_p0 = por %p5912_p13, %p5911_p12 }
 0x1f8   :  { %p5914_p1 = pnand %p5913_p0, %p5909_p11 }
 0x1fa   :  { %5917 = shalt.err (!%p5914_p1)  }
 0x1fb   :  { %610 = dma.hbm_to_vmem [thread:$0]  %s604_s23, 128, %s606_s27, [#allocation3 + $0x21], %s6813_s0, %s6813_s0, %s6814_s21 }
 0x1fc   :  { %s4721_s9 = sshll.u32 %s611_s17, 6  ;;  %s626_s28 = sshrl.u32 %s7410_s2, 3 }
 0x1fd   :  { %s614_s10 = sadd.s32 %s4721_s9, %s612_s19  ;;  %s627_s22 = sand.u32 7, %s7410_s2  }
 0x1fe   :  { %s615_s5 = scalar_lea.hbm %s7972_s1, %s614_s10  ;;  %s4722_s6 = sshll.u32 %s626_s28, 6 }
 0x1ff   :  { %s618_s26 = sshll.u32 %s615_s5, 4  ;;  %s629_s7 = sadd.s32 %s4722_s6, %s627_s22  ;;  %s619_s26 = int_to_ptr.hbm [resolvable:$true] %s618_s26 }
 0x200   :  { %s5930_s8 = sshra.s32 %s619_s26, 4  ;;  %s5931_s8 = int_to_ptr.hbm [resolvable:$true] %s5930_s8 }
 0x201   :  { %s5932_s12 = scalar_lea.hbm %s5931_s8, 8  ;;  %p5935_p3 = scmp.lt.s32.totalorder %s5931_s8, %s7972_s1 }
 0x202   :  { %p5933_p2 = scmp.ne.s32.totalorder %s5931_s8, %s5932_s12  ;;  %p5936_p4 = scmp.lt.s32.totalorder %s6924_s18, %s5932_s12 }
 0x204   :  { %p5937_p5 = por %p5936_p4, %p5935_p3 }
 0x206   :  { %p5938_p6 = pnand %p5937_p5, %p5933_p2 }
 0x208   :  { %5941 = shalt.err (!%p5938_p6)  }
 0x209   :  { %625 = dma.hbm_to_vmem [thread:$0]  %s619_s26, 128, %s621_s29, [#allocation3 + $0x22], %s6813_s0, %s6813_s0, %s6814_s21 }
 0x20a   :  { %s630_s16 = scalar_lea.hbm %s7972_s1, %s629_s7  ;;  %s6847_s23 = smov [#allocation2 + $0x103]  }
 0x20b   :  { %s633_s11 = sshll.u32 %s630_s16, 4  ;;  %s635_s17 = sshll.u32 %s6847_s23, 4  ;;  %s634_s11 = int_to_ptr.hbm [resolvable:$true] %s633_s11  ;;  %s636_s17 = int_to_ptr.vmem [resolvable:$true] %s635_s17 }
 0x20c   :  { %s5954_s19 = sshra.s32 %s634_s11, 4  ;;  %s5955_s19 = int_to_ptr.hbm [resolvable:$true] %s5954_s19 }
 0x20d   :  { %s5956_s20 = scalar_lea.hbm %s5955_s19, 8  ;;  %p5959_p8 = scmp.lt.s32.totalorder %s5955_s19, %s7972_s1 }
 0x20e   :  { %p5957_p7 = scmp.ne.s32.totalorder %s5955_s19, %s5956_s20  ;;  %p5960_p9 = scmp.lt.s32.totalorder %s6924_s18, %s5956_s20 }
 0x210   :  { %p5961_p10 = por %p5960_p9, %p5959_p8 }
 0x212   :  { %p5962_p11 = pnand %p5961_p10, %p5957_p7 }
 0x214   :  { %5965 = shalt.err (!%p5962_p11)  }
 0x215   :  { %640 = dma.hbm_to_vmem [thread:$0]  %s634_s11, 128, %s636_s17, [#allocation3 + $0x23], %s6813_s0, %s6813_s0, %s6814_s21 }
 0x216   :  { %s4659_s29 = sld [smem:[#allocation5 + $0x24]]  ;;  %s6848_s4 = smov [#allocation2 + $0x104]  }
 0x217   :  { %s7461_s9 = sshll.u32 %s6848_s4, 4  ;;  %s4660_s10 = sld [smem:[#allocation5 + $0x25]]  ;;  %s651_s9 = int_to_ptr.vmem [resolvable:$true] %s7461_s9 }
 0x218   :  { %s6849_s28 = smov [#allocation2 + $0x105]   ;;  %s7466_s25 = sld [smem:[#allocation5 + $0x26]] }
 0x219   :  { %s7464_s13 = sshll.u32 %s6849_s28, 4  ;;  %s6850_s5 = smov [#allocation2 + $0x106]   ;;  %s666_s13 = int_to_ptr.vmem [resolvable:$true] %s7464_s13 }
 0x21a   :  { %s7469_s22 = sshll.u32 %s6850_s5, 4  ;;  %s7471_s26 = sld [smem:[#allocation5 + $0x27]]  ;;  %s681_s22 = int_to_ptr.vmem [resolvable:$true] %s7469_s22 }
 0x21c   :  { %s641_s6 = sshrl.u32 %s4659_s29, 3  ;;  %s642_s7 = sand.u32 7, %s4659_s29  }
 0x21d   :  { %s4723_s8 = sshll.u32 %s641_s6, 6  ;;  %s656_s12 = sshrl.u32 %s4660_s10, 3 }
 0x21e   :  { %s644_s15 = sadd.s32 %s4723_s8, %s642_s7  ;;  %s657_s27 = sand.u32 7, %s4660_s10  }
 0x21f   :  { %s645_s16 = scalar_lea.hbm %s7972_s1, %s644_s15  ;;  %s4724_s11 = sshll.u32 %s656_s12, 6 }
 0x220   :  { %s648_s23 = sshll.u32 %s645_s16, 4  ;;  %s659_s17 = sadd.s32 %s4724_s11, %s657_s27  ;;  %s649_s23 = int_to_ptr.hbm [resolvable:$true] %s648_s23 }
 0x221   :  { %s660_s24 = scalar_lea.hbm %s7972_s1, %s659_s17  ;;  %s5978_s30 = sshra.s32 %s649_s23, 4  ;;  %s5979_s30 = int_to_ptr.hbm [resolvable:$true] %s5978_s30 }
 0x222   :  { %s5980_s29 = scalar_lea.hbm %s5979_s30, 8  ;;  %p5983_p13 = scmp.lt.s32.totalorder %s5979_s30, %s7972_s1 }
 0x223   :  { %p5981_p12 = scmp.ne.s32.totalorder %s5979_s30, %s5980_s29  ;;  %p5984_p0 = scmp.lt.s32.totalorder %s6924_s18, %s5980_s29 }
 0x225   :  { %p5985_p1 = por %p5984_p0, %p5983_p13 }
 0x227   :  { %p5986_p2 = pnand %p5985_p1, %p5981_p12 }
 0x229   :  { %5989 = shalt.err (!%p5986_p2)  }
 0x22a   :  { %655 = dma.hbm_to_vmem [thread:$0]  %s649_s23, 128, %s651_s9, [#allocation3 + $0x24], %s6813_s0, %s6813_s0, %s6814_s21 }
 0x22b   :  { %s663_s10 = sshll.u32 %s660_s24, 4  ;;  %s671_s5 = sshrl.u32 %s7466_s25, 3  ;;  %s664_s10 = int_to_ptr.hbm [resolvable:$true] %s663_s10 }
 0x22c   :  { %s672_s6 = sand.u32 7, %s7466_s25   ;;  %s6002_s7 = sshra.s32 %s664_s10, 4  ;;  %s6003_s7 = int_to_ptr.hbm [resolvable:$true] %s6002_s7 }
 0x22d   :  { %s6004_s8 = scalar_lea.hbm %s6003_s7, 8  ;;  %p6007_p4 = scmp.lt.s32.totalorder %s6003_s7, %s7972_s1 }
 0x22e   :  { %p6005_p3 = scmp.ne.s32.totalorder %s6003_s7, %s6004_s8  ;;  %p6008_p5 = scmp.lt.s32.totalorder %s6924_s18, %s6004_s8 }
 0x230   :  { %p6009_p6 = por %p6008_p5, %p6007_p4 }
 0x232   :  { %p6010_p7 = pnand %p6009_p6, %p6005_p3 }
 0x234   :  { %6013 = shalt.err (!%p6010_p7)  }
 0x235   :  { %670 = dma.hbm_to_vmem [thread:$0]  %s664_s10, 128, %s666_s13, [#allocation3 + $0x25], %s6813_s0, %s6813_s0, %s6814_s21 }
 0x236   :  { %s4725_s9 = sshll.u32 %s671_s5, 6  ;;  %s686_s27 = sshrl.u32 %s7471_s26, 3 }
 0x237   :  { %s674_s25 = sadd.s32 %s4725_s9, %s672_s6  ;;  %s687_s11 = sand.u32 7, %s7471_s26  }
 0x238   :  { %s675_s16 = scalar_lea.hbm %s7972_s1, %s674_s25  ;;  %s4726_s17 = sshll.u32 %s686_s27, 6 }
 0x239   :  { %s678_s23 = sshll.u32 %s675_s16, 4  ;;  %s689_s19 = sadd.s32 %s4726_s17, %s687_s11  ;;  %s679_s23 = int_to_ptr.hbm [resolvable:$true] %s678_s23 }
 0x23a   :  { %s6026_s20 = sshra.s32 %s679_s23, 4  ;;  %s6027_s20 = int_to_ptr.hbm [resolvable:$true] %s6026_s20 }
 0x23b   :  { %s6028_s24 = scalar_lea.hbm %s6027_s20, 8  ;;  %p6031_p9 = scmp.lt.s32.totalorder %s6027_s20, %s7972_s1 }
 0x23c   :  { %p6029_p8 = scmp.ne.s32.totalorder %s6027_s20, %s6028_s24  ;;  %p6032_p10 = scmp.lt.s32.totalorder %s6924_s18, %s6028_s24 }
 0x23e   :  { %p6033_p11 = por %p6032_p10, %p6031_p9 }
 0x240   :  { %p6034_p12 = pnand %p6033_p11, %p6029_p8 }
 0x242   :  { %6037 = shalt.err (!%p6034_p12)  }
 0x243   :  { %685 = dma.hbm_to_vmem [thread:$0]  %s679_s23, 128, %s681_s22, [#allocation3 + $0x26], %s6813_s0, %s6813_s0, %s6814_s21 }
 0x244   :  { %s690_s4 = scalar_lea.hbm %s7972_s1, %s689_s19  ;;  %s6851_s10 = smov [#allocation2 + $0x107]  }
 0x245   :  { %s693_s28 = sshll.u32 %s690_s4, 4  ;;  %s695_s5 = sshll.u32 %s6851_s10, 4  ;;  %s694_s28 = int_to_ptr.hbm [resolvable:$true] %s693_s28  ;;  %s696_s5 = int_to_ptr.vmem [resolvable:$true] %s695_s5 }
 0x246   :  { %s6050_s6 = sshra.s32 %s694_s28, 4  ;;  %s6051_s6 = int_to_ptr.hbm [resolvable:$true] %s6050_s6 }
 0x247   :  { %s6052_s7 = scalar_lea.hbm %s6051_s6, 8  ;;  %p6055_p0 = scmp.lt.s32.totalorder %s6051_s6, %s7972_s1 }
 0x248   :  { %p6053_p13 = scmp.ne.s32.totalorder %s6051_s6, %s6052_s7  ;;  %p6056_p1 = scmp.lt.s32.totalorder %s6924_s18, %s6052_s7 }
 0x24a   :  { %p6057_p2 = por %p6056_p1, %p6055_p0 }
 0x24c   :  { %p6058_p3 = pnand %p6057_p2, %p6053_p13 }
 0x24e   :  { %6061 = shalt.err (!%p6058_p3)  }
 0x24f   :  { %700 = dma.hbm_to_vmem [thread:$0]  %s694_s28, 128, %s696_s5, [#allocation3 + $0x27], %s6813_s0, %s6813_s0, %s6814_s21 }
 0x250   :  { %s4663_s22 = sld [smem:[#allocation5 + $0x28]]  ;;  %s6852_s15 = smov [#allocation2 + $0x140]  }
 0x251   :  { %s7522_s9 = sshll.u32 %s6852_s15, 4  ;;  %s4664_s25 = sld [smem:[#allocation5 + $0x29]]  ;;  %s711_s9 = int_to_ptr.vmem [resolvable:$true] %s7522_s9 }
 0x252   :  { %s6853_s27 = smov [#allocation2 + $0x141]   ;;  %s7527_s14 = sld [smem:[#allocation5 + $0x2a]] }
 0x253   :  { %s7525_s2 = sshll.u32 %s6853_s27, 4  ;;  %s6854_s16 = smov [#allocation2 + $0x142]   ;;  %s726_s2 = int_to_ptr.vmem [resolvable:$true] %s7525_s2 }
 0x254   :  { %s7530_s11 = sshll.u32 %s6854_s16, 4  ;;  %s7532_s23 = sld [smem:[#allocation5 + $0x2b]]  ;;  %s741_s11 = int_to_ptr.vmem [resolvable:$true] %s7530_s11 }
 0x256   :  { %s701_s17 = sshrl.u32 %s4663_s22, 3  ;;  %s702_s19 = sand.u32 7, %s4663_s22  }
 0x257   :  { %s4727_s20 = sshll.u32 %s701_s17, 6  ;;  %s716_s24 = sshrl.u32 %s4664_s25, 3 }
 0x258   :  { %s704_s30 = sadd.s32 %s4727_s20, %s702_s19  ;;  %s717_s13 = sand.u32 7, %s4664_s25  }
 0x259   :  { %s705_s4 = scalar_lea.hbm %s7972_s1, %s704_s30  ;;  %s4728_s28 = sshll.u32 %s716_s24, 6 }
 0x25a   :  { %s708_s10 = sshll.u32 %s705_s4, 4  ;;  %s719_s5 = sadd.s32 %s4728_s28, %s717_s13  ;;  %s709_s10 = int_to_ptr.hbm [resolvable:$true] %s708_s10 }
 0x25b   :  { %s720_s8 = scalar_lea.hbm %s7972_s1, %s719_s5  ;;  %s6074_s12 = sshra.s32 %s709_s10, 4  ;;  %s6075_s12 = int_to_ptr.hbm [resolvable:$true] %s6074_s12 }
 0x25c   :  { %s6076_s22 = scalar_lea.hbm %s6075_s12, 8  ;;  %p6079_p5 = scmp.lt.s32.totalorder %s6075_s12, %s7972_s1 }
 0x25d   :  { %p6077_p4 = scmp.ne.s32.totalorder %s6075_s12, %s6076_s22  ;;  %p6080_p6 = scmp.lt.s32.totalorder %s6924_s18, %s6076_s22 }
 0x25f   :  { %p6081_p7 = por %p6080_p6, %p6079_p5 }
 0x261   :  { %p6082_p8 = pnand %p6081_p7, %p6077_p4 }
 0x263   :  { %6085 = shalt.err (!%p6082_p8)  }
 0x264   :  { %715 = dma.hbm_to_vmem [thread:$0]  %s709_s10, 128, %s711_s9, [#allocation3 + $0x28], %s6813_s0, %s6813_s0, %s6814_s21 }
 0x265   :  { %s723_s25 = sshll.u32 %s720_s8, 4  ;;  %s731_s16 = sshrl.u32 %s7527_s14, 3  ;;  %s724_s25 = int_to_ptr.hbm [resolvable:$true] %s723_s25 }
 0x266   :  { %s732_s17 = sand.u32 7, %s7527_s14   ;;  %s6098_s19 = sshra.s32 %s724_s25, 4  ;;  %s6099_s19 = int_to_ptr.hbm [resolvable:$true] %s6098_s19 }
 0x267   :  { %s6100_s20 = scalar_lea.hbm %s6099_s19, 8  ;;  %p6103_p10 = scmp.lt.s32.totalorder %s6099_s19, %s7972_s1 }
 0x268   :  { %p6101_p9 = scmp.ne.s32.totalorder %s6099_s19, %s6100_s20  ;;  %p6104_p11 = scmp.lt.s32.totalorder %s6924_s18, %s6100_s20 }
 0x26a   :  { %p6105_p12 = por %p6104_p11, %p6103_p10 }
 0x26c   :  { %p6106_p13 = pnand %p6105_p12, %p6101_p9 }
 0x26e   :  { %6109 = shalt.err (!%p6106_p13)  }
 0x26f   :  { %730 = dma.hbm_to_vmem [thread:$0]  %s724_s25, 128, %s726_s2, [#allocation3 + $0x29], %s6813_s0, %s6813_s0, %s6814_s21 }
 0x270   :  { %s4729_s9 = sshll.u32 %s731_s16, 6  ;;  %s746_s13 = sshrl.u32 %s7532_s23, 3 }
 0x271   :  { %s734_s14 = sadd.s32 %s4729_s9, %s732_s17  ;;  %s747_s28 = sand.u32 7, %s7532_s23  }
 0x272   :  { %s735_s4 = scalar_lea.hbm %s7972_s1, %s734_s14  ;;  %s4730_s5 = sshll.u32 %s746_s13, 6 }
 0x273   :  { %s738_s10 = sshll.u32 %s735_s4, 4  ;;  %s749_s6 = sadd.s32 %s4730_s5, %s747_s28  ;;  %s739_s10 = int_to_ptr.hbm [resolvable:$true] %s738_s10 }
 0x274   :  { %s6122_s7 = sshra.s32 %s739_s10, 4  ;;  %s6123_s7 = int_to_ptr.hbm [resolvable:$true] %s6122_s7 }
 0x275   :  { %s6124_s8 = scalar_lea.hbm %s6123_s7, 8  ;;  %p6127_p1 = scmp.lt.s32.totalorder %s6123_s7, %s7972_s1 }
 0x276   :  { %p6125_p0 = scmp.ne.s32.totalorder %s6123_s7, %s6124_s8  ;;  %p6128_p2 = scmp.lt.s32.totalorder %s6924_s18, %s6124_s8 }
 0x278   :  { %p6129_p3 = por %p6128_p2, %p6127_p1 }
 0x27a   :  { %p6130_p4 = pnand %p6129_p3, %p6125_p0 }
 0x27c   :  { %6133 = shalt.err (!%p6130_p4)  }
 0x27d   :  { %745 = dma.hbm_to_vmem [thread:$0]  %s739_s10, 128, %s741_s11, [#allocation3 + $0x2a], %s6813_s0, %s6813_s0, %s6814_s21 }
 0x27e   :  { %s750_s15 = scalar_lea.hbm %s7972_s1, %s749_s6  ;;  %s6855_s25 = smov [#allocation2 + $0x143]  }
 0x27f   :  { %s753_s27 = sshll.u32 %s750_s15, 4  ;;  %s755_s16 = sshll.u32 %s6855_s25, 4  ;;  %s754_s27 = int_to_ptr.hbm [resolvable:$true] %s753_s27  ;;  %s756_s16 = int_to_ptr.vmem [resolvable:$true] %s755_s16 }
 0x280   :  { %s6146_s17 = sshra.s32 %s754_s27, 4  ;;  %s6147_s17 = int_to_ptr.hbm [resolvable:$true] %s6146_s17 }
 0x281   :  { %s6148_s19 = scalar_lea.hbm %s6147_s17, 8  ;;  %p6151_p6 = scmp.lt.s32.totalorder %s6147_s17, %s7972_s1 }
 0x282   :  { %p6149_p5 = scmp.ne.s32.totalorder %s6147_s17, %s6148_s19  ;;  %p6152_p7 = scmp.lt.s32.totalorder %s6924_s18, %s6148_s19 }
 0x284   :  { %p6153_p8 = por %p6152_p7, %p6151_p6 }
 0x286   :  { %p6154_p9 = pnand %p6153_p8, %p6149_p5 }
 0x288   :  { %6157 = shalt.err (!%p6154_p9)  }
 0x289   :  { %760 = dma.hbm_to_vmem [thread:$0]  %s754_s27, 128, %s756_s16, [#allocation3 + $0x2b], %s6813_s0, %s6813_s0, %s6814_s21 }
 0x28a   :  { %s4667_s11 = sld [smem:[#allocation5 + $0x2c]]  ;;  %s6856_s30 = smov [#allocation2 + $0x144]  }
 0x28b   :  { %s7583_s9 = sshll.u32 %s6856_s30, 4  ;;  %s4668_s14 = sld [smem:[#allocation5 + $0x2d]]  ;;  %s771_s9 = int_to_ptr.vmem [resolvable:$true] %s7583_s9 }
 0x28c   :  { %s6857_s13 = smov [#allocation2 + $0x145]   ;;  %s7588_s29 = sld [smem:[#allocation5 + $0x2e]] }
 0x28d   :  { %s7586_s26 = sshll.u32 %s6857_s13, 4  ;;  %s6858_s4 = smov [#allocation2 + $0x146]   ;;  %s786_s26 = int_to_ptr.vmem [resolvable:$true] %s7586_s26 }
 0x28e   :  { %s7591_s28 = sshll.u32 %s6858_s4, 4  ;;  %s7593_s10 = sld [smem:[#allocation5 + $0x2f]]  ;;  %s801_s28 = int_to_ptr.vmem [resolvable:$true] %s7591_s28 }
 0x290   :  { %s761_s5 = sshrl.u32 %s4667_s11, 3  ;;  %s762_s6 = sand.u32 7, %s4667_s11  }
 0x291   :  { %s4731_s7 = sshll.u32 %s761_s5, 6  ;;  %s776_s8 = sshrl.u32 %s4668_s14, 3 }
 0x292   :  { %s764_s12 = sadd.s32 %s4731_s7, %s762_s6  ;;  %s777_s2 = sand.u32 7, %s4668_s14  }
 0x293   :  { %s765_s15 = scalar_lea.hbm %s7972_s1, %s764_s12  ;;  %s4732_s27 = sshll.u32 %s776_s8, 6 }
 0x294   :  { %s768_s25 = sshll.u32 %s765_s15, 4  ;;  %s779_s16 = sadd.s32 %s4732_s27, %s777_s2  ;;  %s769_s25 = int_to_ptr.hbm [resolvable:$true] %s768_s25 }
 0x295   :  { %s780_s20 = scalar_lea.hbm %s7972_s1, %s779_s16  ;;  %s6170_s24 = sshra.s32 %s769_s25, 4  ;;  %s6171_s24 = int_to_ptr.hbm [resolvable:$true] %s6170_s24 }
 0x296   :  { %s6172_s11 = scalar_lea.hbm %s6171_s24, 8  ;;  %p6175_p11 = scmp.lt.s32.totalorder %s6171_s24, %s7972_s1 }
 0x297   :  { %p6173_p10 = scmp.ne.s32.totalorder %s6171_s24, %s6172_s11  ;;  %p6176_p12 = scmp.lt.s32.totalorder %s6924_s18, %s6172_s11 }
 0x299   :  { %p6177_p13 = por %p6176_p12, %p6175_p11 }
 0x29b   :  { %p6178_p0 = pnand %p6177_p13, %p6173_p10 }
 0x29d   :  { %6181 = shalt.err (!%p6178_p0)  }
 0x29e   :  { %775 = dma.hbm_to_vmem [thread:$0]  %s769_s25, 128, %s771_s9, [#allocation3 + $0x2c], %s6813_s0, %s6813_s0, %s6814_s21 }
 0x29f   :  { %s783_s14 = sshll.u32 %s780_s20, 4  ;;  %s791_s4 = sshrl.u32 %s7588_s29, 3  ;;  %s784_s14 = int_to_ptr.hbm [resolvable:$true] %s783_s14 }
 0x2a0   :  { %s792_s5 = sand.u32 7, %s7588_s29   ;;  %s6194_s6 = sshra.s32 %s784_s14, 4  ;;  %s6195_s6 = int_to_ptr.hbm [resolvable:$true] %s6194_s6 }
 0x2a1   :  { %s6196_s7 = scalar_lea.hbm %s6195_s6, 8  ;;  %p6199_p2 = scmp.lt.s32.totalorder %s6195_s6, %s7972_s1 }
 0x2a2   :  { %p6197_p1 = scmp.ne.s32.totalorder %s6195_s6, %s6196_s7  ;;  %p6200_p3 = scmp.lt.s32.totalorder %s6924_s18, %s6196_s7 }
 0x2a4   :  { %p6201_p4 = por %p6200_p3, %p6199_p2 }
 0x2a6   :  { %p6202_p5 = pnand %p6201_p4, %p6197_p1 }
 0x2a8   :  { %6205 = shalt.err (!%p6202_p5)  }
 0x2a9   :  { %790 = dma.hbm_to_vmem [thread:$0]  %s784_s14, 128, %s786_s26, [#allocation3 + $0x2d], %s6813_s0, %s6813_s0, %s6814_s21 }
 0x2aa   :  { %s4733_s9 = sshll.u32 %s791_s4, 6  ;;  %s806_s2 = sshrl.u32 %s7593_s10, 3 }
 0x2ab   :  { %s794_s29 = sadd.s32 %s4733_s9, %s792_s5  ;;  %s807_s27 = sand.u32 7, %s7593_s10  }
 0x2ac   :  { %s795_s15 = scalar_lea.hbm %s7972_s1, %s794_s29  ;;  %s4734_s16 = sshll.u32 %s806_s2, 6 }
 0x2ad   :  { %s798_s25 = sshll.u32 %s795_s15, 4  ;;  %s809_s17 = sadd.s32 %s4734_s16, %s807_s27  ;;  %s799_s25 = int_to_ptr.hbm [resolvable:$true] %s798_s25 }
 0x2ae   :  { %s6218_s19 = sshra.s32 %s799_s25, 4  ;;  %s6219_s19 = int_to_ptr.hbm [resolvable:$true] %s6218_s19 }
 0x2af   :  { %s6220_s20 = scalar_lea.hbm %s6219_s19, 8  ;;  %p6223_p7 = scmp.lt.s32.totalorder %s6219_s19, %s7972_s1 }
 0x2b0   :  { %p6221_p6 = scmp.ne.s32.totalorder %s6219_s19, %s6220_s20  ;;  %p6224_p8 = scmp.lt.s32.totalorder %s6924_s18, %s6220_s20 }
 0x2b2   :  { %p6225_p9 = por %p6224_p8, %p6223_p7 }
 0x2b4   :  { %p6226_p10 = pnand %p6225_p9, %p6221_p6 }
 0x2b6   :  { %6229 = shalt.err (!%p6226_p10)  }
 0x2b7   :  { %805 = dma.hbm_to_vmem [thread:$0]  %s799_s25, 128, %s801_s28, [#allocation3 + $0x2e], %s6813_s0, %s6813_s0, %s6814_s21 }
 0x2b8   :  { %s810_s30 = scalar_lea.hbm %s7972_s1, %s809_s17  ;;  %s6859_s14 = smov [#allocation2 + $0x147]  }
 0x2b9   :  { %s813_s13 = sshll.u32 %s810_s30, 4  ;;  %s815_s4 = sshll.u32 %s6859_s14, 4  ;;  %s814_s13 = int_to_ptr.hbm [resolvable:$true] %s813_s13  ;;  %s816_s4 = int_to_ptr.vmem [resolvable:$true] %s815_s4 }
 0x2ba   :  { %s6242_s5 = sshra.s32 %s814_s13, 4  ;;  %s6243_s5 = int_to_ptr.hbm [resolvable:$true] %s6242_s5 }
 0x2bb   :  { %s6244_s6 = scalar_lea.hbm %s6243_s5, 8  ;;  %p6247_p12 = scmp.lt.s32.totalorder %s6243_s5, %s7972_s1 }
 0x2bc   :  { %p6245_p11 = scmp.ne.s32.totalorder %s6243_s5, %s6244_s6  ;;  %p6248_p13 = scmp.lt.s32.totalorder %s6924_s18, %s6244_s6 }
 0x2be   :  { %p6249_p0 = por %p6248_p13, %p6247_p12 }
 0x2c0   :  { %p6250_p1 = pnand %p6249_p0, %p6245_p11 }
 0x2c2   :  { %6253 = shalt.err (!%p6250_p1)  }
 0x2c3   :  { %820 = dma.hbm_to_vmem [thread:$0]  %s814_s13, 128, %s816_s4, [#allocation3 + $0x2f], %s6813_s0, %s6813_s0, %s6814_s21 }
 0x2c4   :  { %s4671_s28 = sld [smem:[#allocation5 + $0x30]]  ;;  %s6860_s12 = smov [#allocation2 + $0x180]  }
 0x2c5   :  { %s7644_s9 = sshll.u32 %s6860_s12, 4  ;;  %s4672_s29 = sld [smem:[#allocation5 + $0x31]]  ;;  %s831_s9 = int_to_ptr.vmem [resolvable:$true] %s7644_s9 }
 0x2c6   :  { %s6861_s2 = smov [#allocation2 + $0x181]   ;;  %s7649_s22 = sld [smem:[#allocation5 + $0x32]] }
 0x2c7   :  { %s7647_s23 = sshll.u32 %s6861_s2, 4  ;;  %s6862_s15 = smov [#allocation2 + $0x182]   ;;  %s846_s23 = int_to_ptr.vmem [resolvable:$true] %s7647_s23 }
 0x2c8   :  { %s7652_s27 = sshll.u32 %s6862_s15, 4  ;;  %s7654_s25 = sld [smem:[#allocation5 + $0x33]]  ;;  %s861_s27 = int_to_ptr.vmem [resolvable:$true] %s7652_s27 }
 0x2ca   :  { %s821_s16 = sshrl.u32 %s4671_s28, 3  ;;  %s822_s17 = sand.u32 7, %s4671_s28  }
 0x2cb   :  { %s4735_s19 = sshll.u32 %s821_s16, 6  ;;  %s836_s20 = sshrl.u32 %s4672_s29, 3 }
 0x2cc   :  { %s824_s24 = sadd.s32 %s4735_s19, %s822_s17  ;;  %s837_s26 = sand.u32 7, %s4672_s29  }
 0x2cd   :  { %s825_s30 = scalar_lea.hbm %s7972_s1, %s824_s24  ;;  %s4736_s13 = sshll.u32 %s836_s20, 6 }
 0x2ce   :  { %s828_s14 = sshll.u32 %s825_s30, 4  ;;  %s839_s4 = sadd.s32 %s4736_s13, %s837_s26  ;;  %s829_s14 = int_to_ptr.hbm [resolvable:$true] %s828_s14 }
 0x2cf   :  { %s840_s7 = scalar_lea.hbm %s7972_s1, %s839_s4  ;;  %s6266_s8 = sshra.s32 %s829_s14, 4  ;;  %s6267_s8 = int_to_ptr.hbm [resolvable:$true] %s6266_s8 }
 0x2d0   :  { %s6268_s28 = scalar_lea.hbm %s6267_s8, 8  ;;  %p6271_p3 = scmp.lt.s32.totalorder %s6267_s8, %s7972_s1 }
 0x2d1   :  { %p6269_p2 = scmp.ne.s32.totalorder %s6267_s8, %s6268_s28  ;;  %p6272_p4 = scmp.lt.s32.totalorder %s6924_s18, %s6268_s28 }
 0x2d3   :  { %p6273_p5 = por %p6272_p4, %p6271_p3 }
 0x2d5   :  { %p6274_p6 = pnand %p6273_p5, %p6269_p2 }
 0x2d7   :  { %6277 = shalt.err (!%p6274_p6)  }
 0x2d8   :  { %835 = dma.hbm_to_vmem [thread:$0]  %s829_s14, 128, %s831_s9, [#allocation3 + $0x30], %s6813_s0, %s6813_s0, %s6814_s21 }
 0x2d9   :  { %s843_s29 = sshll.u32 %s840_s7, 4  ;;  %s851_s15 = sshrl.u32 %s7649_s22, 3  ;;  %s844_s29 = int_to_ptr.hbm [resolvable:$true] %s843_s29 }
 0x2da   :  { %s852_s16 = sand.u32 7, %s7649_s22   ;;  %s6290_s17 = sshra.s32 %s844_s29, 4  ;;  %s6291_s17 = int_to_ptr.hbm [resolvable:$true] %s6290_s17 }
 0x2db   :  { %s6292_s19 = scalar_lea.hbm %s6291_s17, 8  ;;  %p6295_p8 = scmp.lt.s32.totalorder %s6291_s17, %s7972_s1 }
 0x2dc   :  { %p6293_p7 = scmp.ne.s32.totalorder %s6291_s17, %s6292_s19  ;;  %p6296_p9 = scmp.lt.s32.totalorder %s6924_s18, %s6292_s19 }
 0x2de   :  { %p6297_p10 = por %p6296_p9, %p6295_p8 }
 0x2e0   :  { %p6298_p11 = pnand %p6297_p10, %p6293_p7 }
 0x2e2   :  { %6301 = shalt.err (!%p6298_p11)  }
 0x2e3   :  { %850 = dma.hbm_to_vmem [thread:$0]  %s844_s29, 128, %s846_s23, [#allocation3 + $0x31], %s6813_s0, %s6813_s0, %s6814_s21 }
 0x2e4   :  { %s4737_s9 = sshll.u32 %s851_s15, 6  ;;  %s866_s26 = sshrl.u32 %s7654_s25, 3 }
 0x2e5   :  { %s854_s22 = sadd.s32 %s4737_s9, %s852_s16  ;;  %s867_s13 = sand.u32 7, %s7654_s25  }
 0x2e6   :  { %s855_s30 = scalar_lea.hbm %s7972_s1, %s854_s22  ;;  %s4738_s4 = sshll.u32 %s866_s26, 6 }
 0x2e7   :  { %s858_s14 = sshll.u32 %s855_s30, 4  ;;  %s869_s5 = sadd.s32 %s4738_s4, %s867_s13  ;;  %s859_s14 = int_to_ptr.hbm [resolvable:$true] %s858_s14 }
 0x2e8   :  { %s6314_s6 = sshra.s32 %s859_s14, 4  ;;  %s6315_s6 = int_to_ptr.hbm [resolvable:$true] %s6314_s6 }
 0x2e9   :  { %s6316_s7 = scalar_lea.hbm %s6315_s6, 8  ;;  %p6319_p13 = scmp.lt.s32.totalorder %s6315_s6, %s7972_s1 }
 0x2ea   :  { %p6317_p12 = scmp.ne.s32.totalorder %s6315_s6, %s6316_s7  ;;  %p6320_p0 = scmp.lt.s32.totalorder %s6924_s18, %s6316_s7 }
 0x2ec   :  { %p6321_p1 = por %p6320_p0, %p6319_p13 }
 0x2ee   :  { %p6322_p2 = pnand %p6321_p1, %p6317_p12 }
 0x2f0   :  { %6325 = shalt.err (!%p6322_p2)  }
 0x2f1   :  { %865 = dma.hbm_to_vmem [thread:$0]  %s859_s14, 128, %s861_s27, [#allocation3 + $0x32], %s6813_s0, %s6813_s0, %s6814_s21 }
 0x2f2   :  { %s870_s12 = scalar_lea.hbm %s7972_s1, %s869_s5  ;;  %s6863_s29 = smov [#allocation2 + $0x183]  }
 0x2f3   :  { %s873_s2 = sshll.u32 %s870_s12, 4  ;;  %s875_s15 = sshll.u32 %s6863_s29, 4  ;;  %s874_s2 = int_to_ptr.hbm [resolvable:$true] %s873_s2  ;;  %s876_s15 = int_to_ptr.vmem [resolvable:$true] %s875_s15 }
 0x2f4   :  { %s6338_s16 = sshra.s32 %s874_s2, 4  ;;  %s6339_s16 = int_to_ptr.hbm [resolvable:$true] %s6338_s16 }
 0x2f5   :  { %s6340_s17 = scalar_lea.hbm %s6339_s16, 8  ;;  %p6343_p4 = scmp.lt.s32.totalorder %s6339_s16, %s7972_s1 }
 0x2f6   :  { %p6341_p3 = scmp.ne.s32.totalorder %s6339_s16, %s6340_s17  ;;  %p6344_p5 = scmp.lt.s32.totalorder %s6924_s18, %s6340_s17 }
 0x2f8   :  { %p6345_p6 = por %p6344_p5, %p6343_p4 }
 0x2fa   :  { %p6346_p7 = pnand %p6345_p6, %p6341_p3 }
 0x2fc   :  { %6349 = shalt.err (!%p6346_p7)  }
 0x2fd   :  { %880 = dma.hbm_to_vmem [thread:$0]  %s874_s2, 128, %s876_s15, [#allocation3 + $0x33], %s6813_s0, %s6813_s0, %s6814_s21 }
 0x2fe   :  { %s4675_s27 = sld [smem:[#allocation5 + $0x34]]  ;;  %s6864_s24 = smov [#allocation2 + $0x184]  }
 0x2ff   :  { %s7705_s9 = sshll.u32 %s6864_s24, 4  ;;  %s4676_s22 = sld [smem:[#allocation5 + $0x35]]  ;;  %s891_s9 = int_to_ptr.vmem [resolvable:$true] %s7705_s9 }
 0x300   :  { %s6865_s26 = smov [#allocation2 + $0x185]   ;;  %s7710_s11 = sld [smem:[#allocation5 + $0x36]] }
 0x301   :  { %s7708_s10 = sshll.u32 %s6865_s26, 4  ;;  %s6866_s30 = smov [#allocation2 + $0x186]   ;;  %s906_s10 = int_to_ptr.vmem [resolvable:$true] %s7708_s10 }
 0x302   :  { %s7713_s13 = sshll.u32 %s6866_s30, 4  ;;  %s7715_s14 = sld [smem:[#allocation5 + $0x37]]  ;;  %s921_s13 = int_to_ptr.vmem [resolvable:$true] %s7713_s13 }
 0x304   :  { %s881_s4 = sshrl.u32 %s4675_s27, 3  ;;  %s882_s5 = sand.u32 7, %s4675_s27  }
 0x305   :  { %s4739_s6 = sshll.u32 %s881_s4, 6  ;;  %s896_s7 = sshrl.u32 %s4676_s22, 3 }
 0x306   :  { %s884_s8 = sadd.s32 %s4739_s6, %s882_s5  ;;  %s897_s23 = sand.u32 7, %s4676_s22  }
 0x307   :  { %s885_s12 = scalar_lea.hbm %s7972_s1, %s884_s8  ;;  %s4740_s2 = sshll.u32 %s896_s7, 6 }
 0x308   :  { %s888_s29 = sshll.u32 %s885_s12, 4  ;;  %s899_s15 = sadd.s32 %s4740_s2, %s897_s23  ;;  %s889_s29 = int_to_ptr.hbm [resolvable:$true] %s888_s29 }
 0x309   :  { %s900_s19 = scalar_lea.hbm %s7972_s1, %s899_s15  ;;  %s6362_s20 = sshra.s32 %s889_s29, 4  ;;  %s6363_s20 = int_to_ptr.hbm [resolvable:$true] %s6362_s20 }
 0x30a   :  { %s6364_s27 = scalar_lea.hbm %s6363_s20, 8  ;;  %p6367_p9 = scmp.lt.s32.totalorder %s6363_s20, %s7972_s1 }
 0x30b   :  { %p6365_p8 = scmp.ne.s32.totalorder %s6363_s20, %s6364_s27  ;;  %p6368_p10 = scmp.lt.s32.totalorder %s6924_s18, %s6364_s27 }
 0x30d   :  { %p6369_p11 = por %p6368_p10, %p6367_p9 }
 0x30f   :  { %p6370_p12 = pnand %p6369_p11, %p6365_p8 }
 0x311   :  { %6373 = shalt.err (!%p6370_p12)  }
 0x312   :  { %895 = dma.hbm_to_vmem [thread:$0]  %s889_s29, 128, %s891_s9, [#allocation3 + $0x34], %s6813_s0, %s6813_s0, %s6814_s21 }
 0x313   :  { %s903_s22 = sshll.u32 %s900_s19, 4  ;;  %s911_s30 = sshrl.u32 %s7710_s11, 3  ;;  %s904_s22 = int_to_ptr.hbm [resolvable:$true] %s903_s22 }
 0x314   :  { %s912_s4 = sand.u32 7, %s7710_s11   ;;  %s6386_s5 = sshra.s32 %s904_s22, 4  ;;  %s6387_s5 = int_to_ptr.hbm [resolvable:$true] %s6386_s5 }
 0x315   :  { %s6388_s6 = scalar_lea.hbm %s6387_s5, 8  ;;  %p6391_p0 = scmp.lt.s32.totalorder %s6387_s5, %s7972_s1 }
 0x316   :  { %p6389_p13 = scmp.ne.s32.totalorder %s6387_s5, %s6388_s6  ;;  %p6392_p1 = scmp.lt.s32.totalorder %s6924_s18, %s6388_s6 }
 0x318   :  { %p6393_p2 = por %p6392_p1, %p6391_p0 }
 0x31a   :  { %p6394_p3 = pnand %p6393_p2, %p6389_p13 }
 0x31c   :  { %6397 = shalt.err (!%p6394_p3)  }
 0x31d   :  { %910 = dma.hbm_to_vmem [thread:$0]  %s904_s22, 128, %s906_s10, [#allocation3 + $0x35], %s6813_s0, %s6813_s0, %s6814_s21 }
 0x31e   :  { %s4741_s9 = sshll.u32 %s911_s30, 6  ;;  %s926_s23 = sshrl.u32 %s7715_s14, 3 }
 0x31f   :  { %s914_s11 = sadd.s32 %s4741_s9, %s912_s4  ;;  %s927_s2 = sand.u32 7, %s7715_s14  }
 0x320   :  { %s915_s12 = scalar_lea.hbm %s7972_s1, %s914_s11  ;;  %s4742_s15 = sshll.u32 %s926_s23, 6 }
 0x321   :  { %s918_s29 = sshll.u32 %s915_s12, 4  ;;  %s929_s16 = sadd.s32 %s4742_s15, %s927_s2  ;;  %s919_s29 = int_to_ptr.hbm [resolvable:$true] %s918_s29 }
 0x322   :  { %s6410_s17 = sshra.s32 %s919_s29, 4  ;;  %s6411_s17 = int_to_ptr.hbm [resolvable:$true] %s6410_s17 }
 0x323   :  { %s6412_s19 = scalar_lea.hbm %s6411_s17, 8  ;;  %p6415_p5 = scmp.lt.s32.totalorder %s6411_s17, %s7972_s1 }
 0x324   :  { %p6413_p4 = scmp.ne.s32.totalorder %s6411_s17, %s6412_s19  ;;  %p6416_p6 = scmp.lt.s32.totalorder %s6924_s18, %s6412_s19 }
 0x326   :  { %p6417_p7 = por %p6416_p6, %p6415_p5 }
 0x328   :  { %p6418_p8 = pnand %p6417_p7, %p6413_p4 }
 0x32a   :  { %6421 = shalt.err (!%p6418_p8)  }
 0x32b   :  { %925 = dma.hbm_to_vmem [thread:$0]  %s919_s29, 128, %s921_s13, [#allocation3 + $0x36], %s6813_s0, %s6813_s0, %s6814_s21 }
 0x32c   :  { %s930_s24 = scalar_lea.hbm %s7972_s1, %s929_s16  ;;  %s6867_s22 = smov [#allocation2 + $0x187]  }
 0x32d   :  { %s933_s26 = sshll.u32 %s930_s24, 4  ;;  %s935_s30 = sshll.u32 %s6867_s22, 4  ;;  %s934_s26 = int_to_ptr.hbm [resolvable:$true] %s933_s26  ;;  %s936_s30 = int_to_ptr.vmem [resolvable:$true] %s935_s30 }
 0x32e   :  { %s6434_s4 = sshra.s32 %s934_s26, 4  ;;  %s6435_s4 = int_to_ptr.hbm [resolvable:$true] %s6434_s4 }
 0x32f   :  { %s6436_s5 = scalar_lea.hbm %s6435_s4, 8  ;;  %p6439_p10 = scmp.lt.s32.totalorder %s6435_s4, %s7972_s1 }
 0x330   :  { %p6437_p9 = scmp.ne.s32.totalorder %s6435_s4, %s6436_s5  ;;  %p6440_p11 = scmp.lt.s32.totalorder %s6924_s18, %s6436_s5 }
 0x332   :  { %p6441_p12 = por %p6440_p11, %p6439_p10 }
 0x334   :  { %p6442_p13 = pnand %p6441_p12, %p6437_p9 }
 0x336   :  { %6445 = shalt.err (!%p6442_p13)  }
 0x337   :  { %940 = dma.hbm_to_vmem [thread:$0]  %s934_s26, 128, %s936_s30, [#allocation3 + $0x37], %s6813_s0, %s6813_s0, %s6814_s21 }
 0x338   :  { %s4679_s13 = sld [smem:[#allocation5 + $0x38]]  ;;  %s6868_s8 = smov [#allocation2 + $0x1c0]  }
 0x339   :  { %s7766_s9 = sshll.u32 %s6868_s8, 4  ;;  %s4680_s11 = sld [smem:[#allocation5 + $0x39]]  ;;  %s951_s9 = int_to_ptr.vmem [resolvable:$true] %s7766_s9 }
 0x33a   :  { %s6869_s23 = smov [#allocation2 + $0x1c1]   ;;  %s7771_s28 = sld [smem:[#allocation5 + $0x3a]] }
 0x33b   :  { %s7769_s25 = sshll.u32 %s6869_s23, 4  ;;  %s6870_s12 = smov [#allocation2 + $0x1c2]   ;;  %s966_s25 = int_to_ptr.vmem [resolvable:$true] %s7769_s25 }
 0x33c   :  { %s7774_s2 = sshll.u32 %s6870_s12, 4  ;;  %s7776_s29 = sld [smem:[#allocation5 + $0x3b]]  ;;  %s981_s2 = int_to_ptr.vmem [resolvable:$true] %s7774_s2 }
 0x33e   :  { %s941_s15 = sshrl.u32 %s4679_s13, 3  ;;  %s942_s16 = sand.u32 7, %s4679_s13  }
 0x33f   :  { %s4743_s17 = sshll.u32 %s941_s15, 6  ;;  %s956_s19 = sshrl.u32 %s4680_s11, 3 }
 0x340   :  { %s944_s20 = sadd.s32 %s4743_s17, %s942_s16  ;;  %s957_s10 = sand.u32 7, %s4680_s11  }
 0x341   :  { %s945_s24 = scalar_lea.hbm %s7972_s1, %s944_s20  ;;  %s4744_s26 = sshll.u32 %s956_s19, 6 }
 0x342   :  { %s948_s22 = sshll.u32 %s945_s24, 4  ;;  %s959_s30 = sadd.s32 %s4744_s26, %s957_s10  ;;  %s949_s22 = int_to_ptr.hbm [resolvable:$true] %s948_s22 }
 0x343   :  { %s960_s6 = scalar_lea.hbm %s7972_s1, %s959_s30  ;;  %s6458_s7 = sshra.s32 %s949_s22, 4  ;;  %s6459_s7 = int_to_ptr.hbm [resolvable:$true] %s6458_s7 }
 0x344   :  { %s6460_s13 = scalar_lea.hbm %s6459_s7, 8  ;;  %p6463_p1 = scmp.lt.s32.totalorder %s6459_s7, %s7972_s1 }
 0x345   :  { %p6461_p0 = scmp.ne.s32.totalorder %s6459_s7, %s6460_s13  ;;  %p6464_p2 = scmp.lt.s32.totalorder %s6924_s18, %s6460_s13 }
 0x347   :  { %p6465_p3 = por %p6464_p2, %p6463_p1 }
 0x349   :  { %p6466_p4 = pnand %p6465_p3, %p6461_p0 }
 0x34b   :  { %6469 = shalt.err (!%p6466_p4)  }
 0x34c   :  { %955 = dma.hbm_to_vmem [thread:$0]  %s949_s22, 128, %s951_s9, [#allocation3 + $0x38], %s6813_s0, %s6813_s0, %s6814_s21 }
 0x34d   :  { %s963_s11 = sshll.u32 %s960_s6, 4  ;;  %s971_s12 = sshrl.u32 %s7771_s28, 3  ;;  %s964_s11 = int_to_ptr.hbm [resolvable:$true] %s963_s11 }
 0x34e   :  { %s972_s15 = sand.u32 7, %s7771_s28   ;;  %s6482_s16 = sshra.s32 %s964_s11, 4  ;;  %s6483_s16 = int_to_ptr.hbm [resolvable:$true] %s6482_s16 }
 0x34f   :  { %s6484_s17 = scalar_lea.hbm %s6483_s16, 8  ;;  %p6487_p6 = scmp.lt.s32.totalorder %s6483_s16, %s7972_s1 }
 0x350   :  { %p6485_p5 = scmp.ne.s32.totalorder %s6483_s16, %s6484_s17  ;;  %p6488_p7 = scmp.lt.s32.totalorder %s6924_s18, %s6484_s17 }
 0x352   :  { %p6489_p8 = por %p6488_p7, %p6487_p6 }
 0x354   :  { %p6490_p9 = pnand %p6489_p8, %p6485_p5 }
 0x356   :  { %6493 = shalt.err (!%p6490_p9)  }
 0x357   :  { %970 = dma.hbm_to_vmem [thread:$0]  %s964_s11, 128, %s966_s25, [#allocation3 + $0x39], %s6813_s0, %s6813_s0, %s6814_s21 }
 0x358   :  { %s4745_s9 = sshll.u32 %s971_s12, 6  ;;  %s986_s10 = sshrl.u32 %s7776_s29, 3 }
 0x359   :  { %s974_s28 = sadd.s32 %s4745_s9, %s972_s15  ;;  %s987_s26 = sand.u32 7, %s7776_s29  }
 0x35a   :  { %s975_s24 = scalar_lea.hbm %s7972_s1, %s974_s28  ;;  %s4746_s30 = sshll.u32 %s986_s10, 6 }
 0x35b   :  { %s978_s22 = sshll.u32 %s975_s24, 4  ;;  %s989_s4 = sadd.s32 %s4746_s30, %s987_s26  ;;  %s979_s22 = int_to_ptr.hbm [resolvable:$true] %s978_s22 }
 0x35c   :  { %s6506_s5 = sshra.s32 %s979_s22, 4  ;;  %s6507_s5 = int_to_ptr.hbm [resolvable:$true] %s6506_s5 }
 0x35d   :  { %s6508_s6 = scalar_lea.hbm %s6507_s5, 8  ;;  %p6511_p11 = scmp.lt.s32.totalorder %s6507_s5, %s7972_s1 }
 0x35e   :  { %p6509_p10 = scmp.ne.s32.totalorder %s6507_s5, %s6508_s6  ;;  %p6512_p12 = scmp.lt.s32.totalorder %s6924_s18, %s6508_s6 }
 0x360   :  { %p6513_p13 = por %p6512_p12, %p6511_p11 }
 0x362   :  { %p6514_p0 = pnand %p6513_p13, %p6509_p10 }
 0x364   :  { %6517 = shalt.err (!%p6514_p0)  }
 0x365   :  { %985 = dma.hbm_to_vmem [thread:$0]  %s979_s22, 128, %s981_s2, [#allocation3 + $0x3a], %s6813_s0, %s6813_s0, %s6814_s21 }
 0x366   :  { %s990_s8 = scalar_lea.hbm %s7972_s1, %s989_s4  ;;  %s6871_s11 = smov [#allocation2 + $0x1c3]  }
 0x367   :  { %s993_s23 = sshll.u32 %s990_s8, 4  ;;  %s995_s12 = sshll.u32 %s6871_s11, 4  ;;  %s994_s23 = int_to_ptr.hbm [resolvable:$true] %s993_s23  ;;  %s996_s12 = int_to_ptr.vmem [resolvable:$true] %s995_s12 }
 0x368   :  { %s6530_s15 = sshra.s32 %s994_s23, 4  ;;  %s6531_s15 = int_to_ptr.hbm [resolvable:$true] %s6530_s15 }
 0x369   :  { %s6532_s16 = scalar_lea.hbm %s6531_s15, 8  ;;  %p6535_p2 = scmp.lt.s32.totalorder %s6531_s15, %s7972_s1 }
 0x36a   :  { %p6533_p1 = scmp.ne.s32.totalorder %s6531_s15, %s6532_s16  ;;  %p6536_p3 = scmp.lt.s32.totalorder %s6924_s18, %s6532_s16 }
 0x36c   :  { %p6537_p4 = por %p6536_p3, %p6535_p2 }
 0x36e   :  { %p6538_p5 = pnand %p6537_p4, %p6533_p1 }
 0x370   :  { %6541 = shalt.err (!%p6538_p5)  }
 0x371   :  { %1000 = dma.hbm_to_vmem [thread:$0]  %s994_s23, 128, %s996_s12, [#allocation3 + $0x3b], %s6813_s0, %s6813_s0, %s6814_s21 }
 0x372   :  { %s4683_s2 = sld [smem:[#allocation5 + $0x3c]]  ;;  %s6872_s20 = smov [#allocation2 + $0x1c4]  }
 0x373   :  { %s7827_s9 = sshll.u32 %s6872_s20, 4  ;;  %s4684_s28 = sld [smem:[#allocation5 + $0x3d]]  ;;  %s1011_s9 = int_to_ptr.vmem [resolvable:$true] %s7827_s9 }
 0x374   :  { %s6873_s10 = smov [#allocation2 + $0x1c5]   ;;  %s7832_s27 = sld [smem:[#allocation5 + $0x3e]] }
 0x375   :  { %s7830_s14 = sshll.u32 %s6873_s10, 4  ;;  %s6874_s24 = smov [#allocation2 + $0x1c6]   ;;  %s1026_s14 = int_to_ptr.vmem [resolvable:$true] %s7830_s14 }
 0x376   :  { %s7835_s26 = sshll.u32 %s6874_s24, 4  ;;  %s7837_s22 = sld [smem:[#allocation5 + $0x3f]]  ;;  %s1041_s26 = int_to_ptr.vmem [resolvable:$true] %s7835_s26 }
 0x378   :  { %s1001_s30 = sshrl.u32 %s4683_s2, 3  ;;  %s1002_s4 = sand.u32 7, %s4683_s2  }
 0x379   :  { %s4747_s5 = sshll.u32 %s1001_s30, 6  ;;  %s1016_s6 = sshrl.u32 %s4684_s28, 3 }
 0x37a   :  { %s1004_s7 = sadd.s32 %s4747_s5, %s1002_s4  ;;  %s1017_s25 = sand.u32 7, %s4684_s28  }
 0x37b   :  { %s1005_s8 = scalar_lea.hbm %s7972_s1, %s1004_s7  ;;  %s4748_s23 = sshll.u32 %s1016_s6, 6 }
 0x37c   :  { %s1008_s11 = sshll.u32 %s1005_s8, 4  ;;  %s1019_s12 = sadd.s32 %s4748_s23, %s1017_s25  ;;  %s1009_s11 = int_to_ptr.hbm [resolvable:$true] %s1008_s11 }
 0x37d   :  { %s1020_s17 = scalar_lea.hbm %s7972_s1, %s1019_s12  ;;  %s6554_s19 = sshra.s32 %s1009_s11, 4  ;;  %s6555_s19 = int_to_ptr.hbm [resolvable:$true] %s6554_s19 }
 0x37e   :  { %s6556_s2 = scalar_lea.hbm %s6555_s19, 8  ;;  %p6559_p7 = scmp.lt.s32.totalorder %s6555_s19, %s7972_s1 }
 0x37f   :  { %p6557_p6 = scmp.ne.s32.totalorder %s6555_s19, %s6556_s2  ;;  %p6560_p8 = scmp.lt.s32.totalorder %s6924_s18, %s6556_s2 }
 0x381   :  { %p6561_p9 = por %p6560_p8, %p6559_p7 }
 0x383   :  { %p6562_p10 = pnand %p6561_p9, %p6557_p6 }
 0x385   :  { %6565 = shalt.err (!%p6562_p10)  }
 0x386   :  { %1015 = dma.hbm_to_vmem [thread:$0]  %s1009_s11, 128, %s1011_s9, [#allocation3 + $0x3c], %s6813_s0, %s6813_s0, %s6814_s21 }
 0x387   :  { %s1023_s28 = sshll.u32 %s1020_s17, 4  ;;  %s1031_s24 = sshrl.u32 %s7832_s27, 3  ;;  %s1024_s28 = int_to_ptr.hbm [resolvable:$true] %s1023_s28 }
 0x388   :  { %s1032_s30 = sand.u32 7, %s7832_s27   ;;  %s6578_s4 = sshra.s32 %s1024_s28, 4  ;;  %s6579_s4 = int_to_ptr.hbm [resolvable:$true] %s6578_s4 }
 0x389   :  { %s6580_s5 = scalar_lea.hbm %s6579_s4, 8  ;;  %p6583_p12 = scmp.lt.s32.totalorder %s6579_s4, %s7972_s1 }
 0x38a   :  { %p6581_p11 = scmp.ne.s32.totalorder %s6579_s4, %s6580_s5  ;;  %p6584_p13 = scmp.lt.s32.totalorder %s6924_s18, %s6580_s5 }
 0x38c   :  { %p6585_p0 = por %p6584_p13, %p6583_p12 }
 0x38e   :  { %p6586_p1 = pnand %p6585_p0, %p6581_p11 }
 0x390   :  { %6589 = shalt.err (!%p6586_p1)  }
 0x391   :  { %1030 = dma.hbm_to_vmem [thread:$0]  %s1024_s28, 128, %s1026_s14, [#allocation3 + $0x3d], %s6813_s0, %s6813_s0, %s6814_s21 }
 0x392   :  { %s4749_s9 = sshll.u32 %s1031_s24, 6  ;;  %s1046_s25 = sshrl.u32 %s7837_s22, 3 }
 0x393   :  { %s1034_s27 = sadd.s32 %s4749_s9, %s1032_s30  ;;  %s1047_s23 = sand.u32 7, %s7837_s22  }
 0x394   :  { %s1035_s8 = scalar_lea.hbm %s7972_s1, %s1034_s27  ;;  %s4750_s12 = sshll.u32 %s1046_s25, 6 }
 0x395   :  { %s1038_s11 = sshll.u32 %s1035_s8, 4  ;;  %s1049_s15 = sadd.s32 %s4750_s12, %s1047_s23  ;;  %s1039_s11 = int_to_ptr.hbm [resolvable:$true] %s1038_s11 }
 0x396   :  { %s6602_s16 = sshra.s32 %s1039_s11, 4  ;;  %s6603_s16 = int_to_ptr.hbm [resolvable:$true] %s6602_s16 }
 0x397   :  { %s6604_s17 = scalar_lea.hbm %s6603_s16, 8  ;;  %p6607_p3 = scmp.lt.s32.totalorder %s6603_s16, %s7972_s1 }
 0x398   :  { %p6605_p2 = scmp.ne.s32.totalorder %s6603_s16, %s6604_s17  ;;  %p6608_p4 = scmp.lt.s32.totalorder %s6924_s18, %s6604_s17 }
 0x39a   :  { %p6609_p5 = por %p6608_p4, %p6607_p3 }
 0x39c   :  { %p6610_p6 = pnand %p6609_p5, %p6605_p2 }
 0x39e   :  { %6613 = shalt.err (!%p6610_p6)  }
 0x39f   :  { %1045 = dma.hbm_to_vmem [thread:$0]  %s1039_s11, 128, %s1041_s26, [#allocation3 + $0x3e], %s6813_s0, %s6813_s0, %s6814_s21 }
 0x3a0   :  { %s1050_s20 = scalar_lea.hbm %s7972_s1, %s1049_s15  ;;  %s6875_s28 = smov [#allocation2 + $0x1c7]  }
 0x3a1   :  { %s1053_s10 = sshll.u32 %s1050_s20, 4  ;;  %s1055_s24 = sshll.u32 %s6875_s28, 4  ;;  %s1054_s10 = int_to_ptr.hbm [resolvable:$true] %s1053_s10  ;;  %s1056_s24 = int_to_ptr.vmem [resolvable:$true] %s1055_s24 }
 0x3a2   :  { %s6626_s30 = sshra.s32 %s1054_s10, 4  ;;  %s6627_s30 = int_to_ptr.hbm [resolvable:$true] %s6626_s30 }
 0x3a3   :  { %s6628_s4 = scalar_lea.hbm %s6627_s30, 8  ;;  %p6631_p8 = scmp.lt.s32.totalorder %s6627_s30, %s7972_s1 }
 0x3a4   :  { %p6629_p7 = scmp.ne.s32.totalorder %s6627_s30, %s6628_s4  ;;  %p6632_p9 = scmp.lt.s32.totalorder %s6924_s18, %s6628_s4 }
 0x3a6   :  { %p6633_p10 = por %p6632_p9, %p6631_p8 }
 0x3a8   :  { %p6634_p11 = pnand %p6633_p10, %p6629_p7 }
 0x3aa   :  { %6637 = shalt.err (!%p6634_p11)  }
 0x3ab   :  { %1060 = dma.hbm_to_vmem [thread:$0]  %s1054_s10, 128, %s1056_s24, [#allocation3 + $0x3f], %s6813_s0, %s6813_s0, %s6814_s21 }
 0x3ac   :  { %6678 = dma.done.wait [#allocation3], 128 }
 0x3ad   :  { %6679 = vsyncadd [#allocation3], 4294967168 }
 0x3ae   :  { %6680 = dma.done.wait [#allocation3 + $0x1], 128 }
 0x3af   :  { %6681 = vsyncadd [#allocation3 + $0x1], 4294967168 }
 0x3b0   :  { %6682 = dma.done.wait [#allocation3 + $0x2], 128 }
 0x3b1   :  { %6683 = vsyncadd [#allocation3 + $0x2], 4294967168 }
 0x3b2   :  { %6684 = dma.done.wait [#allocation3 + $0x3], 128 }
 0x3b3   :  { %6685 = vsyncadd [#allocation3 + $0x3], 4294967168 }
 0x3b4   :  { %6686 = dma.done.wait [#allocation3 + $0x4], 128 }
 0x3b5   :  { %6687 = vsyncadd [#allocation3 + $0x4], 4294967168 }
 0x3b6   :  { %6688 = dma.done.wait [#allocation3 + $0x5], 128 }
 0x3b7   :  { %6689 = vsyncadd [#allocation3 + $0x5], 4294967168 }
 0x3b8   :  { %6690 = dma.done.wait [#allocation3 + $0x6], 128 }
 0x3b9   :  { %6691 = vsyncadd [#allocation3 + $0x6], 4294967168 }
 0x3ba   :  { %6692 = dma.done.wait [#allocation3 + $0x7], 128 }
 0x3bb   :  { %6693 = vsyncadd [#allocation3 + $0x7], 4294967168 }
 0x3bc   :  { %6694 = dma.done.wait [#allocation3 + $0x8], 128 }
 0x3bd   :  { %6695 = vsyncadd [#allocation3 + $0x8], 4294967168 }
 0x3be   :  { %6696 = dma.done.wait [#allocation3 + $0x9], 128 }
 0x3bf   :  { %6697 = vsyncadd [#allocation3 + $0x9], 4294967168 }
 0x3c0   :  { %6698 = dma.done.wait [#allocation3 + $0xa], 128 }
 0x3c1   :  { %6699 = vsyncadd [#allocation3 + $0xa], 4294967168 }
 0x3c2   :  { %6700 = dma.done.wait [#allocation3 + $0xb], 128 }
 0x3c3   :  { %6701 = vsyncadd [#allocation3 + $0xb], 4294967168 }
 0x3c4   :  { %6702 = dma.done.wait [#allocation3 + $0xc], 128 }
 0x3c5   :  { %6703 = vsyncadd [#allocation3 + $0xc], 4294967168 }
 0x3c6   :  { %6704 = dma.done.wait [#allocation3 + $0xd], 128 }
 0x3c7   :  { %6705 = vsyncadd [#allocation3 + $0xd], 4294967168 }
 0x3c8   :  { %6706 = dma.done.wait [#allocation3 + $0xe], 128 }
 0x3c9   :  { %6707 = vsyncadd [#allocation3 + $0xe], 4294967168 }
 0x3ca   :  { %6708 = dma.done.wait [#allocation3 + $0xf], 128 }
 0x3cb   :  { %6709 = vsyncadd [#allocation3 + $0xf], 4294967168 }
 0x3cc   :  { %6710 = dma.done.wait [#allocation3 + $0x10], 128 }
 0x3cd   :  { %6711 = vsyncadd [#allocation3 + $0x10], 4294967168 }
 0x3ce   :  { %6712 = dma.done.wait [#allocation3 + $0x11], 128 }
 0x3cf   :  { %6713 = vsyncadd [#allocation3 + $0x11], 4294967168 }
 0x3d0   :  { %6714 = dma.done.wait [#allocation3 + $0x12], 128 }
 0x3d1   :  { %6715 = vsyncadd [#allocation3 + $0x12], 4294967168 }
 0x3d2   :  { %6716 = dma.done.wait [#allocation3 + $0x13], 128 }
 0x3d3   :  { %6717 = vsyncadd [#allocation3 + $0x13], 4294967168 }
 0x3d4   :  { %6718 = dma.done.wait [#allocation3 + $0x14], 128 }
 0x3d5   :  { %6719 = vsyncadd [#allocation3 + $0x14], 4294967168 }
 0x3d6   :  { %6720 = dma.done.wait [#allocation3 + $0x15], 128 }
 0x3d7   :  { %6721 = vsyncadd [#allocation3 + $0x15], 4294967168 }
 0x3d8   :  { %6722 = dma.done.wait [#allocation3 + $0x16], 128 }
 0x3d9   :  { %6723 = vsyncadd [#allocation3 + $0x16], 4294967168 }
 0x3da   :  { %6724 = dma.done.wait [#allocation3 + $0x17], 128 }
 0x3db   :  { %6725 = vsyncadd [#allocation3 + $0x17], 4294967168 }
 0x3dc   :  { %6726 = dma.done.wait [#allocation3 + $0x18], 128 }
 0x3dd   :  { %6727 = vsyncadd [#allocation3 + $0x18], 4294967168 }
 0x3de   :  { %6728 = dma.done.wait [#allocation3 + $0x19], 128 }
 0x3df   :  { %6729 = vsyncadd [#allocation3 + $0x19], 4294967168 }
 0x3e0   :  { %6730 = dma.done.wait [#allocation3 + $0x1a], 128 }
 0x3e1   :  { %6731 = vsyncadd [#allocation3 + $0x1a], 4294967168 }
 0x3e2   :  { %6732 = dma.done.wait [#allocation3 + $0x1b], 128 }
 0x3e3   :  { %6733 = vsyncadd [#allocation3 + $0x1b], 4294967168 }
 0x3e4   :  { %6734 = dma.done.wait [#allocation3 + $0x1c], 128 }
 0x3e5   :  { %6735 = vsyncadd [#allocation3 + $0x1c], 4294967168 }
 0x3e6   :  { %6736 = dma.done.wait [#allocation3 + $0x1d], 128 }
 0x3e7   :  { %6737 = vsyncadd [#allocation3 + $0x1d], 4294967168 }
 0x3e8   :  { %6738 = dma.done.wait [#allocation3 + $0x1e], 128 }
 0x3e9   :  { %6739 = vsyncadd [#allocation3 + $0x1e], 4294967168 }
 0x3ea   :  { %6740 = dma.done.wait [#allocation3 + $0x1f], 128 }
 0x3eb   :  { %6741 = vsyncadd [#allocation3 + $0x1f], 4294967168 }
 0x3ec   :  { %6742 = dma.done.wait [#allocation3 + $0x20], 128 }
 0x3ed   :  { %6743 = vsyncadd [#allocation3 + $0x20], 4294967168 }
 0x3ee   :  { %6744 = dma.done.wait [#allocation3 + $0x21], 128 }
 0x3ef   :  { %6745 = vsyncadd [#allocation3 + $0x21], 4294967168 }
 0x3f0   :  { %6746 = dma.done.wait [#allocation3 + $0x22], 128 }
 0x3f1   :  { %6747 = vsyncadd [#allocation3 + $0x22], 4294967168 }
 0x3f2   :  { %6748 = dma.done.wait [#allocation3 + $0x23], 128 }
 0x3f3   :  { %6749 = vsyncadd [#allocation3 + $0x23], 4294967168 }
 0x3f4   :  { %6750 = dma.done.wait [#allocation3 + $0x24], 128 }
 0x3f5   :  { %6751 = vsyncadd [#allocation3 + $0x24], 4294967168 }
 0x3f6   :  { %6752 = dma.done.wait [#allocation3 + $0x25], 128 }
 0x3f7   :  { %6753 = vsyncadd [#allocation3 + $0x25], 4294967168 }
 0x3f8   :  { %6754 = dma.done.wait [#allocation3 + $0x26], 128 }
 0x3f9   :  { %6755 = vsyncadd [#allocation3 + $0x26], 4294967168 }
 0x3fa   :  { %6756 = dma.done.wait [#allocation3 + $0x27], 128 }
 0x3fb   :  { %6757 = vsyncadd [#allocation3 + $0x27], 4294967168 }
 0x3fc   :  { %6758 = dma.done.wait [#allocation3 + $0x28], 128 }
 0x3fd   :  { %6759 = vsyncadd [#allocation3 + $0x28], 4294967168 }
 0x3fe   :  { %6760 = dma.done.wait [#allocation3 + $0x29], 128 }
 0x3ff   :  { %6761 = vsyncadd [#allocation3 + $0x29], 4294967168 }
 0x400   :  { %6762 = dma.done.wait [#allocation3 + $0x2a], 128 }
 0x401   :  { %6763 = vsyncadd [#allocation3 + $0x2a], 4294967168 }
 0x402   :  { %6764 = dma.done.wait [#allocation3 + $0x2b], 128 }
 0x403   :  { %6765 = vsyncadd [#allocation3 + $0x2b], 4294967168 }
 0x404   :  { %6766 = dma.done.wait [#allocation3 + $0x2c], 128 }
 0x405   :  { %6767 = vsyncadd [#allocation3 + $0x2c], 4294967168 }
 0x406   :  { %6768 = dma.done.wait [#allocation3 + $0x2d], 128 }
 0x407   :  { %6769 = vsyncadd [#allocation3 + $0x2d], 4294967168 }
 0x408   :  { %6770 = dma.done.wait [#allocation3 + $0x2e], 128 }
 0x409   :  { %6771 = vsyncadd [#allocation3 + $0x2e], 4294967168 }
 0x40a   :  { %6772 = dma.done.wait [#allocation3 + $0x2f], 128 }
 0x40b   :  { %6773 = vsyncadd [#allocation3 + $0x2f], 4294967168 }
 0x40c   :  { %6774 = dma.done.wait [#allocation3 + $0x30], 128 }
 0x40d   :  { %6775 = vsyncadd [#allocation3 + $0x30], 4294967168 }
 0x40e   :  { %6776 = dma.done.wait [#allocation3 + $0x31], 128 }
 0x40f   :  { %6777 = vsyncadd [#allocation3 + $0x31], 4294967168 }
 0x410   :  { %6778 = dma.done.wait [#allocation3 + $0x32], 128 }
 0x411   :  { %6779 = vsyncadd [#allocation3 + $0x32], 4294967168 }
 0x412   :  { %6780 = dma.done.wait [#allocation3 + $0x33], 128 }
 0x413   :  { %6781 = vsyncadd [#allocation3 + $0x33], 4294967168 }
 0x414   :  { %6782 = dma.done.wait [#allocation3 + $0x34], 128 }
 0x415   :  { %6783 = vsyncadd [#allocation3 + $0x34], 4294967168 }
 0x416   :  { %6784 = dma.done.wait [#allocation3 + $0x35], 128 }
 0x417   :  { %6785 = vsyncadd [#allocation3 + $0x35], 4294967168 }
 0x418   :  { %6786 = dma.done.wait [#allocation3 + $0x36], 128 }
 0x419   :  { %6787 = vsyncadd [#allocation3 + $0x36], 4294967168 }
 0x41a   :  { %6788 = dma.done.wait [#allocation3 + $0x37], 128 }
 0x41b   :  { %6789 = vsyncadd [#allocation3 + $0x37], 4294967168 }
 0x41c   :  { %6790 = dma.done.wait [#allocation3 + $0x38], 128 }
 0x41d   :  { %6791 = vsyncadd [#allocation3 + $0x38], 4294967168 }
 0x41e   :  { %6792 = dma.done.wait [#allocation3 + $0x39], 128 }
 0x41f   :  { %6793 = vsyncadd [#allocation3 + $0x39], 4294967168 }
 0x420   :  { %6794 = dma.done.wait [#allocation3 + $0x3a], 128 }
 0x421   :  { %6795 = vsyncadd [#allocation3 + $0x3a], 4294967168 }
 0x422   :  { %6796 = dma.done.wait [#allocation3 + $0x3b], 128 }
 0x423   :  { %6797 = vsyncadd [#allocation3 + $0x3b], 4294967168 }
 0x424   :  { %6798 = dma.done.wait [#allocation3 + $0x3c], 128 }
 0x425   :  { %6799 = vsyncadd [#allocation3 + $0x3c], 4294967168 }
 0x426   :  { %6800 = dma.done.wait [#allocation3 + $0x3d], 128 }
 0x427   :  { %6801 = vsyncadd [#allocation3 + $0x3d], 4294967168 }
 0x428   :  { %6802 = dma.done.wait [#allocation3 + $0x3e], 128 }
 0x429   :  { %6803 = vsyncadd [#allocation3 + $0x3e], 4294967168 }
 0x42a   :  { %6804 = dma.done.wait [#allocation3 + $0x3f], 128 }
 0x42b   :  { %6805 = vsyncadd [#allocation3 + $0x3f], 4294967168  ;;  %v2541_v0 = vld [vmem:[#allocation2] sm:$0xff]  ;;  %v2542_v2 = vld [vmem:[#allocation2 + $0x8] sm:$0xff]  ;;  %s6876_s1 = smov [#allocation9]   ;;  %s2757_s26 = sshll.u32 %s7974_s3, 4  ;;  %s2758_s26 = int_to_ptr.hbm [resolvable:$true] %s2757_s26 }
 0x42c   :  { %v2605_v1 = vld [vmem:[#allocation6] sm:$0xff]  ;;  %v2543_v5 = vld [vmem:[#allocation2 + $0x10] sm:$0xff]  ;;  %v2544_v7 = vld [vmem:[#allocation2 + $0x18] sm:$0xff]  ;;  %s2755_s18 = sshll.u32 %s6876_s1, 4  ;;  %s6877_s7 = smov 1024   ;;  %s2756_s18 = int_to_ptr.vmem [resolvable:$true] %s2755_s18 }
 0x42d   :  { %v7888_v3 = vperm.slane %v2605_v1, 0  ;;  %v7890_v4 = vperm.slane %v2605_v1, 1  ;;  %v7892_v6 = vperm.slane %v2605_v1, 2  ;;  %v7894_v8 = vperm.slane %v2605_v1, 3  ;;  %v2545_v9 = vld [vmem:[#allocation2 + $0x20] sm:$0xff]  ;;  %v2546_v15 = vld [vmem:[#allocation2 + $0x28] sm:$0xff] }
 0x42e   :  { %v7896_v10 = vperm.slane %v2605_v1, 4  ;;  %v7898_v11 = vperm.slane %v2605_v1, 5  ;;  %v7903_v16 = vperm.slane %v2605_v1, 6  ;;  %v2547_v18 = vld [vmem:[#allocation2 + $0x30] sm:$0xff]  ;;  %v7906_v19 = vperm.slane %v2605_v1, 7  ;;  %v2548_v21 = vld [vmem:[#allocation2 + $0x38] sm:$0xff] }
 0x42f   :  { %v2623_v12 = vmul.f32 %v7888_v3, %v2541_v0  ;;  %v2624_v13 = vmul.f32 %v7890_v4, %v2542_v2  ;;  %v2625_v14 = vmul.f32 %v7892_v6, %v2543_v5  ;;  %v2626_v17 = vmul.f32 %v7894_v8, %v2544_v7  ;;  %v2549_v23 = vld [vmem:[#allocation2 + $0x40] sm:$0xff]  ;;  %v2550_v25 = vld [vmem:[#allocation2 + $0x48] sm:$0xff]  ;;  %v2551_v27 = vld [vmem:[#allocation2 + $0x50] sm:$0xff]  ;;  %s6878_s9 = smov 64  }
 0x430   :  { %v2627_v20 = vmul.f32 %v7896_v10, %v2545_v9  ;;  %v2628_v22 = vmul.f32 %v7898_v11, %v2546_v15  ;;  %v2629_v24 = vmul.f32 %v7903_v16, %v2547_v18  ;;  %v2630_v26 = vmul.f32 %v7906_v19, %v2548_v21  ;;  %v2552_v29 = vld [vmem:[#allocation2 + $0x58] sm:$0xff]  ;;  %v2553_v31 = vld [vmem:[#allocation2 + $0x60] sm:$0xff]  ;;  %v2554_v33 = vld [vmem:[#allocation2 + $0x68] sm:$0xff] }
 0x431   :  { %2687 = vst [vmem:[#allocation9] sm:$0xff] %v2623_v12  ;;  %v2631_v28 = vmul.f32 %v7888_v3, %v2549_v23  ;;  %v2632_v30 = vmul.f32 %v7890_v4, %v2550_v25  ;;  %v2633_v32 = vmul.f32 %v7892_v6, %v2551_v27  ;;  %v2634_v34 = vmul.f32 %v7894_v8, %v2552_v29  ;;  %v2555_v35 = vld [vmem:[#allocation2 + $0x70] sm:$0xff]  ;;  %v2556_v37 = vld [vmem:[#allocation2 + $0x78] sm:$0xff]  ;;  %v2557_v39 = vld [vmem:[#allocation2 + $0x80] sm:$0xff] }
 0x432   :  { %2688 = vst [vmem:[#allocation9 + $0x8] sm:$0xff] %v2624_v13  ;;  %v2635_v36 = vmul.f32 %v7896_v10, %v2553_v31  ;;  %v2636_v38 = vmul.f32 %v7898_v11, %v2554_v33  ;;  %v2637_v40 = vmul.f32 %v7903_v16, %v2555_v35  ;;  %v2558_v41 = vld [vmem:[#allocation2 + $0x88] sm:$0xff]  ;;  %v2638_v42 = vmul.f32 %v7906_v19, %v2556_v37  ;;  %v2559_v43 = vld [vmem:[#allocation2 + $0x90] sm:$0xff]  ;;  %v2560_v45 = vld [vmem:[#allocation2 + $0x98] sm:$0xff] }
 0x433   :  { %2689 = vst [vmem:[#allocation9 + $0x10] sm:$0xff] %v2625_v14  ;;  %v2639_v44 = vmul.f32 %v7888_v3, %v2557_v39  ;;  %v2640_v46 = vmul.f32 %v7890_v4, %v2558_v41  ;;  %v2561_v47 = vld [vmem:[#allocation2 + $0xa0] sm:$0xff]  ;;  %v2641_v48 = vmul.f32 %v7892_v6, %v2559_v43  ;;  %v2562_v49 = vld [vmem:[#allocation2 + $0xa8] sm:$0xff]  ;;  %v2642_v50 = vmul.f32 %v7894_v8, %v2560_v45  ;;  %v2563_v51 = vld [vmem:[#allocation2 + $0xb0] sm:$0xff] }
 0x434   :  { %2690 = vst [vmem:[#allocation9 + $0x18] sm:$0xff] %v2626_v17  ;;  %v2643_v52 = vmul.f32 %v7896_v10, %v2561_v47  ;;  %v2564_v53 = vld [vmem:[#allocation2 + $0xb8] sm:$0xff]  ;;  %v2644_v54 = vmul.f32 %v7898_v11, %v2562_v49  ;;  %v2565_v55 = vld [vmem:[#allocation2 + $0xc0] sm:$0xff]  ;;  %v2645_v56 = vmul.f32 %v7903_v16, %v2563_v51  ;;  %v2566_v57 = vld [vmem:[#allocation2 + $0xc8] sm:$0xff] }
 0x435   :  { %2691 = vst [vmem:[#allocation9 + $0x20] sm:$0xff] %v2627_v20  ;;  %v2646_v58 = vmul.f32 %v7906_v19, %v2564_v53  ;;  %v2567_v59 = vld [vmem:[#allocation2 + $0xd0] sm:$0xff]  ;;  %v2647_v60 = vmul.f32 %v7888_v3, %v2565_v55  ;;  %v2568_v61 = vld [vmem:[#allocation2 + $0xd8] sm:$0xff]  ;;  %v2648_v62 = vmul.f32 %v7890_v4, %v2566_v57  ;;  %v2569_v63 = vld [vmem:[#allocation2 + $0xe0] sm:$0xff] }
 0x436   :  { %2692 = vst [vmem:[#allocation9 + $0x28] sm:$0xff] %v2628_v22  ;;  %v2649_v0 = vmul.f32 %v7892_v6, %v2567_v59  ;;  %v2570_v1 = vld [vmem:[#allocation2 + $0xe8] sm:$0xff]  ;;  %v2650_v2 = vmul.f32 %v7894_v8, %v2568_v61  ;;  %v2571_v5 = vld [vmem:[#allocation2 + $0xf0] sm:$0xff]  ;;  %v2651_v7 = vmul.f32 %v7896_v10, %v2569_v63  ;;  %v2572_v9 = vld [vmem:[#allocation2 + $0xf8] sm:$0xff] }
 0x437   :  { %2693 = vst [vmem:[#allocation9 + $0x30] sm:$0xff] %v2629_v24  ;;  %v2652_v12 = vmul.f32 %v7898_v11, %v2570_v1  ;;  %v2573_v13 = vld [vmem:[#allocation2 + $0x100] sm:$0xff]  ;;  %v2653_v14 = vmul.f32 %v7903_v16, %v2571_v5  ;;  %v2574_v15 = vld [vmem:[#allocation2 + $0x108] sm:$0xff]  ;;  %v2654_v17 = vmul.f32 %v7906_v19, %v2572_v9  ;;  %v2575_v18 = vld [vmem:[#allocation2 + $0x110] sm:$0xff] }
 0x438   :  { %2694 = vst [vmem:[#allocation9 + $0x38] sm:$0xff] %v2630_v26  ;;  %v2655_v20 = vmul.f32 %v7888_v3, %v2573_v13  ;;  %v2576_v21 = vld [vmem:[#allocation2 + $0x118] sm:$0xff]  ;;  %v2656_v22 = vmul.f32 %v7890_v4, %v2574_v15  ;;  %v2577_v23 = vld [vmem:[#allocation2 + $0x120] sm:$0xff]  ;;  %v2657_v24 = vmul.f32 %v7892_v6, %v2575_v18  ;;  %v2578_v25 = vld [vmem:[#allocation2 + $0x128] sm:$0xff] }
 0x439   :  { %2695 = vst [vmem:[#allocation9 + $0x40] sm:$0xff] %v2631_v28  ;;  %v2658_v26 = vmul.f32 %v7894_v8, %v2576_v21  ;;  %v2579_v27 = vld [vmem:[#allocation2 + $0x130] sm:$0xff]  ;;  %v2659_v28 = vmul.f32 %v7896_v10, %v2577_v23  ;;  %v2580_v29 = vld [vmem:[#allocation2 + $0x138] sm:$0xff]  ;;  %v2581_v31 = vld [vmem:[#allocation2 + $0x140] sm:$0xff] }
 0x43a   :  { %2696 = vst [vmem:[#allocation9 + $0x48] sm:$0xff] %v2632_v30  ;;  %v2660_v30 = vmul.f32 %v7898_v11, %v2578_v25  ;;  %v2582_v33 = vld [vmem:[#allocation2 + $0x148] sm:$0xff]  ;;  %v2583_v35 = vld [vmem:[#allocation2 + $0x150] sm:$0xff]  ;;  %v2584_v37 = vld [vmem:[#allocation2 + $0x158] sm:$0xff] }
 0x43b   :  { %2697 = vst [vmem:[#allocation9 + $0x50] sm:$0xff] %v2633_v32  ;;  %v2661_v32 = vmul.f32 %v7903_v16, %v2579_v27  ;;  %v2585_v39 = vld [vmem:[#allocation2 + $0x160] sm:$0xff]  ;;  %v2586_v41 = vld [vmem:[#allocation2 + $0x168] sm:$0xff]  ;;  %v2587_v43 = vld [vmem:[#allocation2 + $0x170] sm:$0xff] }
 0x43c   :  { %2698 = vst [vmem:[#allocation9 + $0x58] sm:$0xff] %v2634_v34  ;;  %v2662_v34 = vmul.f32 %v7906_v19, %v2580_v29  ;;  %v2588_v45 = vld [vmem:[#allocation2 + $0x178] sm:$0xff]  ;;  %v2589_v47 = vld [vmem:[#allocation2 + $0x180] sm:$0xff]  ;;  %v2590_v49 = vld [vmem:[#allocation2 + $0x188] sm:$0xff] }
 0x43d   :  { %2699 = vst [vmem:[#allocation9 + $0x60] sm:$0xff] %v2635_v36  ;;  %v2663_v36 = vmul.f32 %v7888_v3, %v2581_v31  ;;  %v2591_v51 = vld [vmem:[#allocation2 + $0x190] sm:$0xff]  ;;  %v2592_v53 = vld [vmem:[#allocation2 + $0x198] sm:$0xff]  ;;  %v2593_v55 = vld [vmem:[#allocation2 + $0x1a0] sm:$0xff] }
 0x43e   :  { %2700 = vst [vmem:[#allocation9 + $0x68] sm:$0xff] %v2636_v38  ;;  %v2664_v38 = vmul.f32 %v7890_v4, %v2582_v33  ;;  %v2594_v57 = vld [vmem:[#allocation2 + $0x1a8] sm:$0xff]  ;;  %v2595_v59 = vld [vmem:[#allocation2 + $0x1b0] sm:$0xff]  ;;  %v2596_v61 = vld [vmem:[#allocation2 + $0x1b8] sm:$0xff] }
 0x43f   :  { %2701 = vst [vmem:[#allocation9 + $0x70] sm:$0xff] %v2637_v40  ;;  %v2665_v40 = vmul.f32 %v7892_v6, %v2583_v35  ;;  %v2597_v63 = vld [vmem:[#allocation2 + $0x1c0] sm:$0xff]  ;;  %v2598_v1 = vld [vmem:[#allocation2 + $0x1c8] sm:$0xff]  ;;  %v2599_v5 = vld [vmem:[#allocation2 + $0x1d0] sm:$0xff] }
 0x440   :  { %2702 = vst [vmem:[#allocation9 + $0x78] sm:$0xff] %v2638_v42  ;;  %v2666_v42 = vmul.f32 %v7894_v8, %v2584_v37  ;;  %v2600_v9 = vld [vmem:[#allocation2 + $0x1d8] sm:$0xff]  ;;  %v2601_v13 = vld [vmem:[#allocation2 + $0x1e0] sm:$0xff]  ;;  %v2602_v15 = vld [vmem:[#allocation2 + $0x1e8] sm:$0xff] }
 0x441   :  { %2703 = vst [vmem:[#allocation9 + $0x80] sm:$0xff] %v2639_v44  ;;  %v2667_v44 = vmul.f32 %v7896_v10, %v2585_v39  ;;  %v2603_v18 = vld [vmem:[#allocation2 + $0x1f0] sm:$0xff]  ;;  %v2604_v21 = vld [vmem:[#allocation2 + $0x1f8] sm:$0xff] }
 0x442   :  { %2704 = vst [vmem:[#allocation9 + $0x88] sm:$0xff] %v2640_v46  ;;  %v2668_v46 = vmul.f32 %v7898_v11, %v2586_v41 }
 0x443   :  { %2705 = vst [vmem:[#allocation9 + $0x90] sm:$0xff] %v2641_v48  ;;  %v2669_v48 = vmul.f32 %v7903_v16, %v2587_v43 }
 0x444   :  { %2706 = vst [vmem:[#allocation9 + $0x98] sm:$0xff] %v2642_v50  ;;  %v2670_v50 = vmul.f32 %v7906_v19, %v2588_v45 }
 0x445   :  { %2707 = vst [vmem:[#allocation9 + $0xa0] sm:$0xff] %v2643_v52  ;;  %v2671_v52 = vmul.f32 %v7888_v3, %v2589_v47 }
 0x446   :  { %2708 = vst [vmem:[#allocation9 + $0xa8] sm:$0xff] %v2644_v54  ;;  %v2672_v54 = vmul.f32 %v7890_v4, %v2590_v49 }
 0x447   :  { %2709 = vst [vmem:[#allocation9 + $0xb0] sm:$0xff] %v2645_v56  ;;  %v2673_v56 = vmul.f32 %v7892_v6, %v2591_v51 }
 0x448   :  { %2710 = vst [vmem:[#allocation9 + $0xb8] sm:$0xff] %v2646_v58  ;;  %v2674_v58 = vmul.f32 %v7894_v8, %v2592_v53 }
 0x449   :  { %2711 = vst [vmem:[#allocation9 + $0xc0] sm:$0xff] %v2647_v60  ;;  %v2675_v60 = vmul.f32 %v7896_v10, %v2593_v55 }
 0x44a   :  { %2712 = vst [vmem:[#allocation9 + $0xc8] sm:$0xff] %v2648_v62  ;;  %v2676_v62 = vmul.f32 %v7898_v11, %v2594_v57 }
 0x44b   :  { %2713 = vst [vmem:[#allocation9 + $0xd0] sm:$0xff] %v2649_v0  ;;  %v2677_v0 = vmul.f32 %v7903_v16, %v2595_v59 }
 0x44c   :  { %2714 = vst [vmem:[#allocation9 + $0xd8] sm:$0xff] %v2650_v2  ;;  %v2678_v2 = vmul.f32 %v7906_v19, %v2596_v61 }
 0x44d   :  { %2715 = vst [vmem:[#allocation9 + $0xe0] sm:$0xff] %v2651_v7  ;;  %v2679_v7 = vmul.f32 %v7888_v3, %v2597_v63  ;;  %v2684_v3 = vmul.f32 %v7898_v11, %v2602_v15 }
 0x44e   :  { %2716 = vst [vmem:[#allocation9 + $0xe8] sm:$0xff] %v2652_v12  ;;  %v2680_v12 = vmul.f32 %v7890_v4, %v2598_v1  ;;  %v2685_v4 = vmul.f32 %v7903_v16, %v2603_v18 }
 0x44f   :  { %2717 = vst [vmem:[#allocation9 + $0xf0] sm:$0xff] %v2653_v14  ;;  %v2681_v14 = vmul.f32 %v7892_v6, %v2599_v5  ;;  %v2686_v6 = vmul.f32 %v7906_v19, %v2604_v21 }
 0x450   :  { %2718 = vst [vmem:[#allocation9 + $0xf8] sm:$0xff] %v2654_v17  ;;  %v2682_v17 = vmul.f32 %v7894_v8, %v2600_v9 }
 0x451   :  { %2719 = vst [vmem:[#allocation9 + $0x100] sm:$0xff] %v2655_v20  ;;  %v2683_v20 = vmul.f32 %v7896_v10, %v2601_v13 }
 0x452   :  { %2720 = vst [vmem:[#allocation9 + $0x108] sm:$0xff] %v2656_v22 }
 0x453   :  { %2721 = vst [vmem:[#allocation9 + $0x110] sm:$0xff] %v2657_v24 }
 0x454   :  { %2722 = vst [vmem:[#allocation9 + $0x118] sm:$0xff] %v2658_v26 }
 0x455   :  { %2723 = vst [vmem:[#allocation9 + $0x120] sm:$0xff] %v2659_v28 }
 0x456   :  { %2724 = vst [vmem:[#allocation9 + $0x128] sm:$0xff] %v2660_v30 }
 0x457   :  { %2725 = vst [vmem:[#allocation9 + $0x130] sm:$0xff] %v2661_v32 }
 0x458   :  { %2726 = vst [vmem:[#allocation9 + $0x138] sm:$0xff] %v2662_v34 }
 0x459   :  { %2727 = vst [vmem:[#allocation9 + $0x140] sm:$0xff] %v2663_v36 }
 0x45a   :  { %2728 = vst [vmem:[#allocation9 + $0x148] sm:$0xff] %v2664_v38 }
 0x45b   :  { %2729 = vst [vmem:[#allocation9 + $0x150] sm:$0xff] %v2665_v40 }
 0x45c   :  { %2730 = vst [vmem:[#allocation9 + $0x158] sm:$0xff] %v2666_v42 }
 0x45d   :  { %2731 = vst [vmem:[#allocation9 + $0x160] sm:$0xff] %v2667_v44 }
 0x45e   :  { %2732 = vst [vmem:[#allocation9 + $0x168] sm:$0xff] %v2668_v46 }
 0x45f   :  { %2733 = vst [vmem:[#allocation9 + $0x170] sm:$0xff] %v2669_v48 }
 0x460   :  { %2734 = vst [vmem:[#allocation9 + $0x178] sm:$0xff] %v2670_v50 }
 0x461   :  { %2735 = vst [vmem:[#allocation9 + $0x180] sm:$0xff] %v2671_v52 }
 0x462   :  { %2736 = vst [vmem:[#allocation9 + $0x188] sm:$0xff] %v2672_v54 }
 0x463   :  { %2737 = vst [vmem:[#allocation9 + $0x190] sm:$0xff] %v2673_v56 }
 0x464   :  { %2738 = vst [vmem:[#allocation9 + $0x198] sm:$0xff] %v2674_v58 }
 0x465   :  { %2739 = vst [vmem:[#allocation9 + $0x1a0] sm:$0xff] %v2675_v60 }
 0x466   :  { %2740 = vst [vmem:[#allocation9 + $0x1a8] sm:$0xff] %v2676_v62 }
 0x467   :  { %2741 = vst [vmem:[#allocation9 + $0x1b0] sm:$0xff] %v2677_v0 }
 0x468   :  { %2742 = vst [vmem:[#allocation9 + $0x1b8] sm:$0xff] %v2678_v2 }
 0x469   :  { %2743 = vst [vmem:[#allocation9 + $0x1c0] sm:$0xff] %v2679_v7 }
 0x46a   :  { %2744 = vst [vmem:[#allocation9 + $0x1c8] sm:$0xff] %v2680_v12 }
 0x46b   :  { %2745 = vst [vmem:[#allocation9 + $0x1d0] sm:$0xff] %v2681_v14 }
 0x46c   :  { %2746 = vst [vmem:[#allocation9 + $0x1d8] sm:$0xff] %v2682_v17 }
 0x46d   :  { %2747 = vst [vmem:[#allocation9 + $0x1e0] sm:$0xff] %v2683_v20 }
 0x46e   :  { %2748 = vst [vmem:[#allocation9 + $0x1e8] sm:$0xff] %v2684_v3 }
 0x46f   :  { %2749 = vst [vmem:[#allocation9 + $0x1f0] sm:$0xff] %v2685_v4 }
 0x470   :  { %2750 = vst [vmem:[#allocation9 + $0x1f8] sm:$0xff] %v2686_v6 }
 0x471   :  { %2763 = dma.vmem_to_hbm [thread:$0]  %s2756_s18, 8192, %s2758_s26, [#allocation8], %s6877_s7, %s6877_s7, %s6878_s9  }
 0x472   :  { %6806 = dma.done.wait [#allocation8], 8192  }
 0x473   :  { %6807 = vsyncadd [#allocation8], 4294959104 }
 0x474   :  { %2768 = vsyncpa [#allocation7], 1 }
 0x475   :  { %2769 = vsyncpa [#allocation8], 1 }
 0x476   :  { %2770 = vsyncmov [#allocation3] }
 0x479   :  { %s2771_s3 = vpop.sfrf %2770 }
 0x47a   :  { %p4879_p12 = scmp.ne.s32.totalorder %s2771_s3, 0 }
 0x47c   :  { %2775 = shalt.err (%p4879_p12)  }
 0x47d   :  { %2777 = vsyncmov [#allocation3 + $0x1] }
 0x480   :  { %s2778_s27 = vpop.sfrf %2777 }
 0x481   :  { %p4880_p13 = scmp.ne.s32.totalorder %s2778_s27, 0 }
 0x483   :  { %2782 = shalt.err (%p4880_p13)  }
 0x484   :  { %2784 = vsyncmov [#allocation3 + $0x2] }
 0x487   :  { %s2785_s25 = vpop.sfrf %2784 }
 0x488   :  { %p4881_p0 = scmp.ne.s32.totalorder %s2785_s25, 0 }
 0x48a   :  { %2789 = shalt.err (%p4881_p0)  }
 0x48b   :  { %2791 = vsyncmov [#allocation3 + $0x3] }
 0x48e   :  { %s2792_s29 = vpop.sfrf %2791 }
 0x48f   :  { %p4882_p1 = scmp.ne.s32.totalorder %s2792_s29, 0 }
 0x491   :  { %2796 = shalt.err (%p4882_p1)  }
 0x492   :  { %2798 = vsyncmov [#allocation3 + $0x4] }
 0x495   :  { %s2799_s13 = vpop.sfrf %2798 }
 0x496   :  { %p4883_p2 = scmp.ne.s32.totalorder %s2799_s13, 0 }
 0x498   :  { %2803 = shalt.err (%p4883_p2)  }
 0x499   :  { %2805 = vsyncmov [#allocation3 + $0x5] }
 0x49c   :  { %s2806_s8 = vpop.sfrf %2805 }
 0x49d   :  { %p4884_p3 = scmp.ne.s32.totalorder %s2806_s8, 0 }
 0x49f   :  { %2810 = shalt.err (%p4884_p3)  }
 0x4a0   :  { %2812 = vsyncmov [#allocation3 + $0x6] }
 0x4a3   :  { %s2813_s23 = vpop.sfrf %2812 }
 0x4a4   :  { %p4885_p4 = scmp.ne.s32.totalorder %s2813_s23, 0 }
 0x4a6   :  { %2817 = shalt.err (%p4885_p4)  }
 0x4a7   :  { %2819 = vsyncmov [#allocation3 + $0x7] }
 0x4aa   :  { %s2820_s11 = vpop.sfrf %2819 }
 0x4ab   :  { %p4886_p5 = scmp.ne.s32.totalorder %s2820_s11, 0 }
 0x4ad   :  { %2824 = shalt.err (%p4886_p5)  }
 0x4ae   :  { %2826 = vsyncmov [#allocation3 + $0x8] }
 0x4b1   :  { %s2827_s12 = vpop.sfrf %2826 }
 0x4b2   :  { %p4887_p6 = scmp.ne.s32.totalorder %s2827_s12, 0 }
 0x4b4   :  { %2831 = shalt.err (%p4887_p6)  }
 0x4b5   :  { %2833 = vsyncmov [#allocation3 + $0x9] }
 0x4b8   :  { %s2834_s15 = vpop.sfrf %2833 }
 0x4b9   :  { %p4888_p7 = scmp.ne.s32.totalorder %s2834_s15, 0 }
 0x4bb   :  { %2838 = shalt.err (%p4888_p7)  }
 0x4bc   :  { %2840 = vsyncmov [#allocation3 + $0xa] }
 0x4bf   :  { %s2841_s16 = vpop.sfrf %2840 }
 0x4c0   :  { %p4889_p8 = scmp.ne.s32.totalorder %s2841_s16, 0 }
 0x4c2   :  { %2845 = shalt.err (%p4889_p8)  }
 0x4c3   :  { %2847 = vsyncmov [#allocation3 + $0xb] }
 0x4c6   :  { %s2848_s17 = vpop.sfrf %2847 }
 0x4c7   :  { %p4890_p9 = scmp.ne.s32.totalorder %s2848_s17, 0 }
 0x4c9   :  { %2852 = shalt.err (%p4890_p9)  }
 0x4ca   :  { %2854 = vsyncmov [#allocation3 + $0xc] }
 0x4cd   :  { %s2855_s19 = vpop.sfrf %2854 }
 0x4ce   :  { %p4891_p10 = scmp.ne.s32.totalorder %s2855_s19, 0 }
 0x4d0   :  { %2859 = shalt.err (%p4891_p10)  }
 0x4d1   :  { %2861 = vsyncmov [#allocation3 + $0xd] }
 0x4d4   :  { %s2862_s14 = vpop.sfrf %2861 }
 0x4d5   :  { %p4892_p11 = scmp.ne.s32.totalorder %s2862_s14, 0 }
 0x4d7   :  { %2866 = shalt.err (%p4892_p11)  }
 0x4d8   :  { %2868 = vsyncmov [#allocation3 + $0xe] }
 0x4db   :  { %s2869_s22 = vpop.sfrf %2868 }
 0x4dc   :  { %p4893_p12 = scmp.ne.s32.totalorder %s2869_s22, 0 }
 0x4de   :  { %2873 = shalt.err (%p4893_p12)  }
 0x4df   :  { %2875 = vsyncmov [#allocation3 + $0xf] }
 0x4e2   :  { %s2876_s2 = vpop.sfrf %2875 }
 0x4e3   :  { %p4894_p13 = scmp.ne.s32.totalorder %s2876_s2, 0 }
 0x4e5   :  { %2880 = shalt.err (%p4894_p13)  }
 0x4e6   :  { %2882 = vsyncmov [#allocation3 + $0x10] }
 0x4e9   :  { %s2883_s20 = vpop.sfrf %2882 }
 0x4ea   :  { %p4895_p0 = scmp.ne.s32.totalorder %s2883_s20, 0 }
 0x4ec   :  { %2887 = shalt.err (%p4895_p0)  }
 0x4ed   :  { %2889 = vsyncmov [#allocation3 + $0x11] }
 0x4f0   :  { %s2890_s10 = vpop.sfrf %2889 }
 0x4f1   :  { %p4896_p1 = scmp.ne.s32.totalorder %s2890_s10, 0 }
 0x4f3   :  { %2894 = shalt.err (%p4896_p1)  }
 0x4f4   :  { %2896 = vsyncmov [#allocation3 + $0x12] }
 0x4f7   :  { %s2897_s28 = vpop.sfrf %2896 }
 0x4f8   :  { %p4897_p2 = scmp.ne.s32.totalorder %s2897_s28, 0 }
 0x4fa   :  { %2901 = shalt.err (%p4897_p2)  }
 0x4fb   :  { %2903 = vsyncmov [#allocation3 + $0x13] }
 0x4fe   :  { %s2904_s24 = vpop.sfrf %2903 }
 0x4ff   :  { %p4898_p3 = scmp.ne.s32.totalorder %s2904_s24, 0 }
 0x501   :  { %2908 = shalt.err (%p4898_p3)  }
 0x502   :  { %2910 = vsyncmov [#allocation3 + $0x14] }
 0x505   :  { %s2911_s30 = vpop.sfrf %2910 }
 0x506   :  { %p4899_p4 = scmp.ne.s32.totalorder %s2911_s30, 0 }
 0x508   :  { %2915 = shalt.err (%p4899_p4)  }
 0x509   :  { %2917 = vsyncmov [#allocation3 + $0x15] }
 0x50c   :  { %s2918_s4 = vpop.sfrf %2917 }
 0x50d   :  { %p4900_p5 = scmp.ne.s32.totalorder %s2918_s4, 0 }
 0x50f   :  { %2922 = shalt.err (%p4900_p5)  }
 0x510   :  { %2924 = vsyncmov [#allocation3 + $0x16] }
 0x513   :  { %s2925_s5 = vpop.sfrf %2924 }
 0x514   :  { %p4901_p6 = scmp.ne.s32.totalorder %s2925_s5, 0 }
 0x516   :  { %2929 = shalt.err (%p4901_p6)  }
 0x517   :  { %2931 = vsyncmov [#allocation3 + $0x17] }
 0x51a   :  { %s2932_s6 = vpop.sfrf %2931 }
 0x51b   :  { %p4902_p7 = scmp.ne.s32.totalorder %s2932_s6, 0 }
 0x51d   :  { %2936 = shalt.err (%p4902_p7)  }
 0x51e   :  { %2938 = vsyncmov [#allocation3 + $0x18] }
 0x521   :  { %s2939_s1 = vpop.sfrf %2938 }
 0x522   :  { %p4903_p8 = scmp.ne.s32.totalorder %s2939_s1, 0 }
 0x524   :  { %2943 = shalt.err (%p4903_p8)  }
 0x525   :  { %2945 = vsyncmov [#allocation3 + $0x19] }
 0x528   :  { %s2946_s18 = vpop.sfrf %2945 }
 0x529   :  { %p4904_p9 = scmp.ne.s32.totalorder %s2946_s18, 0 }
 0x52b   :  { %2950 = shalt.err (%p4904_p9)  }
 0x52c   :  { %2952 = vsyncmov [#allocation3 + $0x1a] }
 0x52f   :  { %s2953_s0 = vpop.sfrf %2952 }
 0x530   :  { %p4905_p10 = scmp.ne.s32.totalorder %s2953_s0, 0 }
 0x532   :  { %2957 = shalt.err (%p4905_p10)  }
 0x533   :  { %2959 = vsyncmov [#allocation3 + $0x1b] }
 0x536   :  { %s2960_s21 = vpop.sfrf %2959 }
 0x537   :  { %p4906_p11 = scmp.ne.s32.totalorder %s2960_s21, 0 }
 0x539   :  { %2964 = shalt.err (%p4906_p11)  }
 0x53a   :  { %2966 = vsyncmov [#allocation3 + $0x1c] }
 0x53d   :  { %s2967_s26 = vpop.sfrf %2966 }
 0x53e   :  { %p4907_p12 = scmp.ne.s32.totalorder %s2967_s26, 0 }
 0x540   :  { %2971 = shalt.err (%p4907_p12)  }
 0x541   :  { %2973 = vsyncmov [#allocation3 + $0x1d] }
 0x544   :  { %s2974_s7 = vpop.sfrf %2973 }
 0x545   :  { %p4908_p13 = scmp.ne.s32.totalorder %s2974_s7, 0 }
 0x547   :  { %2978 = shalt.err (%p4908_p13)  }
 0x548   :  { %2980 = vsyncmov [#allocation3 + $0x1e] }
 0x54b   :  { %s2981_s9 = vpop.sfrf %2980 }
 0x54c   :  { %p4909_p0 = scmp.ne.s32.totalorder %s2981_s9, 0 }
 0x54e   :  { %2985 = shalt.err (%p4909_p0)  }
 0x54f   :  { %2987 = vsyncmov [#allocation3 + $0x1f] }
 0x552   :  { %s2988_s3 = vpop.sfrf %2987 }
 0x553   :  { %p4910_p1 = scmp.ne.s32.totalorder %s2988_s3, 0 }
 0x555   :  { %2992 = shalt.err (%p4910_p1)  }
 0x556   :  { %2994 = vsyncmov [#allocation3 + $0x20] }
 0x559   :  { %s2995_s27 = vpop.sfrf %2994 }
 0x55a   :  { %p4911_p2 = scmp.ne.s32.totalorder %s2995_s27, 0 }
 0x55c   :  { %2999 = shalt.err (%p4911_p2)  }
 0x55d   :  { %3001 = vsyncmov [#allocation3 + $0x21] }
 0x560   :  { %s3002_s25 = vpop.sfrf %3001 }
 0x561   :  { %p4912_p3 = scmp.ne.s32.totalorder %s3002_s25, 0 }
 0x563   :  { %3006 = shalt.err (%p4912_p3)  }
 0x564   :  { %3008 = vsyncmov [#allocation3 + $0x22] }
 0x567   :  { %s3009_s29 = vpop.sfrf %3008 }
 0x568   :  { %p4913_p4 = scmp.ne.s32.totalorder %s3009_s29, 0 }
 0x56a   :  { %3013 = shalt.err (%p4913_p4)  }
 0x56b   :  { %3015 = vsyncmov [#allocation3 + $0x23] }
 0x56e   :  { %s3016_s13 = vpop.sfrf %3015 }
 0x56f   :  { %p4914_p5 = scmp.ne.s32.totalorder %s3016_s13, 0 }
 0x571   :  { %3020 = shalt.err (%p4914_p5)  }
 0x572   :  { %3022 = vsyncmov [#allocation3 + $0x24] }
 0x575   :  { %s3023_s8 = vpop.sfrf %3022 }
 0x576   :  { %p4915_p6 = scmp.ne.s32.totalorder %s3023_s8, 0 }
 0x578   :  { %3027 = shalt.err (%p4915_p6)  }
 0x579   :  { %3029 = vsyncmov [#allocation3 + $0x25] }
 0x57c   :  { %s3030_s23 = vpop.sfrf %3029 }
 0x57d   :  { %p4916_p7 = scmp.ne.s32.totalorder %s3030_s23, 0 }
 0x57f   :  { %3034 = shalt.err (%p4916_p7)  }
 0x580   :  { %3036 = vsyncmov [#allocation3 + $0x26] }
 0x583   :  { %s3037_s11 = vpop.sfrf %3036 }
 0x584   :  { %p4917_p8 = scmp.ne.s32.totalorder %s3037_s11, 0 }
 0x586   :  { %3041 = shalt.err (%p4917_p8)  }
 0x587   :  { %3043 = vsyncmov [#allocation3 + $0x27] }
 0x58a   :  { %s3044_s12 = vpop.sfrf %3043 }
 0x58b   :  { %p4918_p9 = scmp.ne.s32.totalorder %s3044_s12, 0 }
 0x58d   :  { %3048 = shalt.err (%p4918_p9)  }
 0x58e   :  { %3050 = vsyncmov [#allocation3 + $0x28] }
 0x591   :  { %s3051_s15 = vpop.sfrf %3050 }
 0x592   :  { %p4919_p10 = scmp.ne.s32.totalorder %s3051_s15, 0 }
 0x594   :  { %3055 = shalt.err (%p4919_p10)  }
 0x595   :  { %3057 = vsyncmov [#allocation3 + $0x29] }
 0x598   :  { %s3058_s16 = vpop.sfrf %3057 }
 0x599   :  { %p4920_p11 = scmp.ne.s32.totalorder %s3058_s16, 0 }
 0x59b   :  { %3062 = shalt.err (%p4920_p11)  }
 0x59c   :  { %3064 = vsyncmov [#allocation3 + $0x2a] }
 0x59f   :  { %s3065_s17 = vpop.sfrf %3064 }
 0x5a0   :  { %p4921_p12 = scmp.ne.s32.totalorder %s3065_s17, 0 }
 0x5a2   :  { %3069 = shalt.err (%p4921_p12)  }
 0x5a3   :  { %3071 = vsyncmov [#allocation3 + $0x2b] }
 0x5a6   :  { %s3072_s19 = vpop.sfrf %3071 }
 0x5a7   :  { %p4922_p13 = scmp.ne.s32.totalorder %s3072_s19, 0 }
 0x5a9   :  { %3076 = shalt.err (%p4922_p13)  }
 0x5aa   :  { %3078 = vsyncmov [#allocation3 + $0x2c] }
 0x5ad   :  { %s3079_s14 = vpop.sfrf %3078 }
 0x5ae   :  { %p4923_p0 = scmp.ne.s32.totalorder %s3079_s14, 0 }
 0x5b0   :  { %3083 = shalt.err (%p4923_p0)  }
 0x5b1   :  { %3085 = vsyncmov [#allocation3 + $0x2d] }
 0x5b4   :  { %s3086_s22 = vpop.sfrf %3085 }
 0x5b5   :  { %p4924_p1 = scmp.ne.s32.totalorder %s3086_s22, 0 }
 0x5b7   :  { %3090 = shalt.err (%p4924_p1)  }
 0x5b8   :  { %3092 = vsyncmov [#allocation3 + $0x2e] }
 0x5bb   :  { %s3093_s2 = vpop.sfrf %3092 }
 0x5bc   :  { %p4925_p2 = scmp.ne.s32.totalorder %s3093_s2, 0 }
 0x5be   :  { %3097 = shalt.err (%p4925_p2)  }
 0x5bf   :  { %3099 = vsyncmov [#allocation3 + $0x2f] }
 0x5c2   :  { %s3100_s20 = vpop.sfrf %3099 }
 0x5c3   :  { %p4926_p3 = scmp.ne.s32.totalorder %s3100_s20, 0 }
 0x5c5   :  { %3104 = shalt.err (%p4926_p3)  }
 0x5c6   :  { %3106 = vsyncmov [#allocation3 + $0x30] }
 0x5c9   :  { %s3107_s10 = vpop.sfrf %3106 }
 0x5ca   :  { %p4927_p4 = scmp.ne.s32.totalorder %s3107_s10, 0 }
 0x5cc   :  { %3111 = shalt.err (%p4927_p4)  }
 0x5cd   :  { %3113 = vsyncmov [#allocation3 + $0x31] }
 0x5d0   :  { %s3114_s28 = vpop.sfrf %3113 }
 0x5d1   :  { %p4928_p5 = scmp.ne.s32.totalorder %s3114_s28, 0 }
 0x5d3   :  { %3118 = shalt.err (%p4928_p5)  }
 0x5d4   :  { %3120 = vsyncmov [#allocation3 + $0x32] }
 0x5d7   :  { %s3121_s24 = vpop.sfrf %3120 }
 0x5d8   :  { %p4929_p6 = scmp.ne.s32.totalorder %s3121_s24, 0 }
 0x5da   :  { %3125 = shalt.err (%p4929_p6)  }
 0x5db   :  { %3127 = vsyncmov [#allocation3 + $0x33] }
 0x5de   :  { %s3128_s30 = vpop.sfrf %3127 }
 0x5df   :  { %p4930_p7 = scmp.ne.s32.totalorder %s3128_s30, 0 }
 0x5e1   :  { %3132 = shalt.err (%p4930_p7)  }
 0x5e2   :  { %3134 = vsyncmov [#allocation3 + $0x34] }
 0x5e5   :  { %s3135_s4 = vpop.sfrf %3134 }
 0x5e6   :  { %p4931_p8 = scmp.ne.s32.totalorder %s3135_s4, 0 }
 0x5e8   :  { %3139 = shalt.err (%p4931_p8)  }
 0x5e9   :  { %3141 = vsyncmov [#allocation3 + $0x35] }
 0x5ec   :  { %s3142_s5 = vpop.sfrf %3141 }
 0x5ed   :  { %p4932_p9 = scmp.ne.s32.totalorder %s3142_s5, 0 }
 0x5ef   :  { %3146 = shalt.err (%p4932_p9)  }
 0x5f0   :  { %3148 = vsyncmov [#allocation3 + $0x36] }
 0x5f3   :  { %s3149_s6 = vpop.sfrf %3148 }
 0x5f4   :  { %p4933_p10 = scmp.ne.s32.totalorder %s3149_s6, 0 }
 0x5f6   :  { %3153 = shalt.err (%p4933_p10)  }
 0x5f7   :  { %3155 = vsyncmov [#allocation3 + $0x37] }
 0x5fa   :  { %s3156_s1 = vpop.sfrf %3155 }
 0x5fb   :  { %p4934_p11 = scmp.ne.s32.totalorder %s3156_s1, 0 }
 0x5fd   :  { %3160 = shalt.err (%p4934_p11)  }
 0x5fe   :  { %3162 = vsyncmov [#allocation3 + $0x38] }
 0x601   :  { %s3163_s18 = vpop.sfrf %3162 }
 0x602   :  { %p4935_p12 = scmp.ne.s32.totalorder %s3163_s18, 0 }
 0x604   :  { %3167 = shalt.err (%p4935_p12)  }
 0x605   :  { %3169 = vsyncmov [#allocation3 + $0x39] }
 0x608   :  { %s3170_s0 = vpop.sfrf %3169 }
 0x609   :  { %p4936_p13 = scmp.ne.s32.totalorder %s3170_s0, 0 }
 0x60b   :  { %3174 = shalt.err (%p4936_p13)  }
 0x60c   :  { %3176 = vsyncmov [#allocation3 + $0x3a] }
 0x60f   :  { %s3177_s21 = vpop.sfrf %3176 }
 0x610   :  { %p4937_p0 = scmp.ne.s32.totalorder %s3177_s21, 0 }
 0x612   :  { %3181 = shalt.err (%p4937_p0)  }
 0x613   :  { %3183 = vsyncmov [#allocation3 + $0x3b] }
 0x616   :  { %s3184_s26 = vpop.sfrf %3183 }
 0x617   :  { %p4938_p1 = scmp.ne.s32.totalorder %s3184_s26, 0 }
 0x619   :  { %3188 = shalt.err (%p4938_p1)  }
 0x61a   :  { %3190 = vsyncmov [#allocation3 + $0x3c] }
 0x61d   :  { %s3191_s7 = vpop.sfrf %3190 }
 0x61e   :  { %p4939_p2 = scmp.ne.s32.totalorder %s3191_s7, 0 }
 0x620   :  { %3195 = shalt.err (%p4939_p2)  }
 0x621   :  { %3197 = vsyncmov [#allocation3 + $0x3d] }
 0x624   :  { %s3198_s9 = vpop.sfrf %3197 }
 0x625   :  { %p4940_p3 = scmp.ne.s32.totalorder %s3198_s9, 0 }
 0x627   :  { %3202 = shalt.err (%p4940_p3)  }
 0x628   :  { %3204 = vsyncmov [#allocation3 + $0x3e] }
 0x62b   :  { %s3205_s3 = vpop.sfrf %3204 }
 0x62c   :  { %p4941_p4 = scmp.ne.s32.totalorder %s3205_s3, 0 }
 0x62e   :  { %3209 = shalt.err (%p4941_p4)  }
 0x62f   :  { %3211 = vsyncmov [#allocation3 + $0x3f] }
 0x632   :  { %s3212_s27 = vpop.sfrf %3211 }
 0x633   :  { %p4942_p5 = scmp.ne.s32.totalorder %s3212_s27, 0 }
 0x635   :  { %3216 = shalt.err (%p4942_p5)  }
 0x636   :  { %3218 = vsyncmov [#allocation3 + $0x40] }
 0x639   :  { %s3219_s25 = vpop.sfrf %3218 }
 0x63a   :  { %p4943_p6 = scmp.ne.s32.totalorder %s3219_s25, 0 }
 0x63c   :  { %3223 = shalt.err (%p4943_p6)  }
 0x63d   :  { %3225 = vsyncmov [#allocation3 + $0x41] }
 0x640   :  { %s3226_s29 = vpop.sfrf %3225 }
 0x641   :  { %p4944_p7 = scmp.ne.s32.totalorder %s3226_s29, 0 }
 0x643   :  { %3230 = shalt.err (%p4944_p7)  }
 0x644   :  { %3232 = vsyncmov [#allocation3 + $0x42] }
 0x647   :  { %s3233_s13 = vpop.sfrf %3232 }
 0x648   :  { %p4945_p8 = scmp.ne.s32.totalorder %s3233_s13, 0 }
 0x64a   :  { %3237 = shalt.err (%p4945_p8)  }
 0x64b   :  { %3239 = vsyncmov [#allocation3 + $0x43] }
 0x64e   :  { %s3240_s8 = vpop.sfrf %3239 }
 0x64f   :  { %p4946_p9 = scmp.ne.s32.totalorder %s3240_s8, 0 }
 0x651   :  { %3244 = shalt.err (%p4946_p9)  }
 0x652   :  { %3246 = vsyncmov [#allocation3 + $0x44] }
 0x655   :  { %s3247_s23 = vpop.sfrf %3246 }
 0x656   :  { %p4947_p10 = scmp.ne.s32.totalorder %s3247_s23, 0 }
 0x658   :  { %3251 = shalt.err (%p4947_p10)  }
 0x659   :  { %3253 = vsyncmov [#allocation3 + $0x45] }
 0x65c   :  { %s3254_s11 = vpop.sfrf %3253 }
 0x65d   :  { %p4948_p11 = scmp.ne.s32.totalorder %s3254_s11, 0 }
 0x65f   :  { %3258 = shalt.err (%p4948_p11)  }
 0x660   :  { %3260 = vsyncmov [#allocation3 + $0x46] }
 0x663   :  { %s3261_s12 = vpop.sfrf %3260 }
 0x664   :  { %p4949_p12 = scmp.ne.s32.totalorder %s3261_s12, 0 }
 0x666   :  { %3265 = shalt.err (%p4949_p12)  }
 0x667   :  { %3267 = vsyncmov [#allocation3 + $0x47] }
 0x66a   :  { %s3268_s15 = vpop.sfrf %3267 }
 0x66b   :  { %p4950_p13 = scmp.ne.s32.totalorder %s3268_s15, 0 }
 0x66d   :  { %3272 = shalt.err (%p4950_p13)  }
 0x66e   :  { %3274 = vsyncmov [#allocation3 + $0x48] }
 0x671   :  { %s3275_s16 = vpop.sfrf %3274 }
 0x672   :  { %p4951_p0 = scmp.ne.s32.totalorder %s3275_s16, 0 }
 0x674   :  { %3279 = shalt.err (%p4951_p0)  }
 0x675   :  { %3281 = vsyncmov [#allocation3 + $0x49] }
 0x678   :  { %s3282_s17 = vpop.sfrf %3281 }
 0x679   :  { %p4952_p1 = scmp.ne.s32.totalorder %s3282_s17, 0 }
 0x67b   :  { %3286 = shalt.err (%p4952_p1)  }
 0x67c   :  { %3288 = vsyncmov [#allocation3 + $0x4a] }
 0x67f   :  { %s3289_s19 = vpop.sfrf %3288 }
 0x680   :  { %p4953_p2 = scmp.ne.s32.totalorder %s3289_s19, 0 }
 0x682   :  { %3293 = shalt.err (%p4953_p2)  }
 0x683   :  { %3295 = vsyncmov [#allocation3 + $0x4b] }
 0x686   :  { %s3296_s14 = vpop.sfrf %3295 }
 0x687   :  { %p4954_p3 = scmp.ne.s32.totalorder %s3296_s14, 0 }
 0x689   :  { %3300 = shalt.err (%p4954_p3)  }
 0x68a   :  { %3302 = vsyncmov [#allocation3 + $0x4c] }
 0x68d   :  { %s3303_s22 = vpop.sfrf %3302 }
 0x68e   :  { %p4955_p4 = scmp.ne.s32.totalorder %s3303_s22, 0 }
 0x690   :  { %3307 = shalt.err (%p4955_p4)  }
 0x691   :  { %3309 = vsyncmov [#allocation3 + $0x4d] }
 0x694   :  { %s3310_s2 = vpop.sfrf %3309 }
 0x695   :  { %p4956_p5 = scmp.ne.s32.totalorder %s3310_s2, 0 }
 0x697   :  { %3314 = shalt.err (%p4956_p5)  }
 0x698   :  { %3316 = vsyncmov [#allocation3 + $0x4e] }
 0x69b   :  { %s3317_s20 = vpop.sfrf %3316 }
 0x69c   :  { %p4957_p6 = scmp.ne.s32.totalorder %s3317_s20, 0 }
 0x69e   :  { %3321 = shalt.err (%p4957_p6)  }
 0x69f   :  { %3323 = vsyncmov [#allocation3 + $0x4f] }
 0x6a2   :  { %s3324_s10 = vpop.sfrf %3323 }
 0x6a3   :  { %p4958_p7 = scmp.ne.s32.totalorder %s3324_s10, 0 }
 0x6a5   :  { %3328 = shalt.err (%p4958_p7)  }
 0x6a6   :  { %3330 = vsyncmov [#allocation3 + $0x50] }
 0x6a9   :  { %s3331_s28 = vpop.sfrf %3330 }
 0x6aa   :  { %p4959_p8 = scmp.ne.s32.totalorder %s3331_s28, 0 }
 0x6ac   :  { %3335 = shalt.err (%p4959_p8)  }
 0x6ad   :  { %3337 = vsyncmov [#allocation3 + $0x51] }
 0x6b0   :  { %s3338_s24 = vpop.sfrf %3337 }
 0x6b1   :  { %p4960_p9 = scmp.ne.s32.totalorder %s3338_s24, 0 }
 0x6b3   :  { %3342 = shalt.err (%p4960_p9)  }
 0x6b4   :  { %3344 = vsyncmov [#allocation3 + $0x52] }
 0x6b7   :  { %s3345_s30 = vpop.sfrf %3344 }
 0x6b8   :  { %p4961_p10 = scmp.ne.s32.totalorder %s3345_s30, 0 }
 0x6ba   :  { %3349 = shalt.err (%p4961_p10)  }
 0x6bb   :  { %3351 = vsyncmov [#allocation3 + $0x53] }
 0x6be   :  { %s3352_s4 = vpop.sfrf %3351 }
 0x6bf   :  { %p4962_p11 = scmp.ne.s32.totalorder %s3352_s4, 0 }
 0x6c1   :  { %3356 = shalt.err (%p4962_p11)  }
 0x6c2   :  { %3358 = vsyncmov [#allocation3 + $0x54] }
 0x6c5   :  { %s3359_s5 = vpop.sfrf %3358 }
 0x6c6   :  { %p4963_p12 = scmp.ne.s32.totalorder %s3359_s5, 0 }
 0x6c8   :  { %3363 = shalt.err (%p4963_p12)  }
 0x6c9   :  { %3365 = vsyncmov [#allocation3 + $0x55] }
 0x6cc   :  { %s3366_s6 = vpop.sfrf %3365 }
 0x6cd   :  { %p4964_p13 = scmp.ne.s32.totalorder %s3366_s6, 0 }
 0x6cf   :  { %3370 = shalt.err (%p4964_p13)  }
 0x6d0   :  { %3372 = vsyncmov [#allocation3 + $0x56] }
 0x6d3   :  { %s3373_s1 = vpop.sfrf %3372 }
 0x6d4   :  { %p4965_p0 = scmp.ne.s32.totalorder %s3373_s1, 0 }
 0x6d6   :  { %3377 = shalt.err (%p4965_p0)  }
 0x6d7   :  { %3379 = vsyncmov [#allocation3 + $0x57] }
 0x6da   :  { %s3380_s18 = vpop.sfrf %3379 }
 0x6db   :  { %p4966_p1 = scmp.ne.s32.totalorder %s3380_s18, 0 }
 0x6dd   :  { %3384 = shalt.err (%p4966_p1)  }
 0x6de   :  { %3386 = vsyncmov [#allocation3 + $0x58] }
 0x6e1   :  { %s3387_s0 = vpop.sfrf %3386 }
 0x6e2   :  { %p4967_p2 = scmp.ne.s32.totalorder %s3387_s0, 0 }
 0x6e4   :  { %3391 = shalt.err (%p4967_p2)  }
 0x6e5   :  { %3393 = vsyncmov [#allocation3 + $0x59] }
 0x6e8   :  { %s3394_s21 = vpop.sfrf %3393 }
 0x6e9   :  { %p4968_p3 = scmp.ne.s32.totalorder %s3394_s21, 0 }
 0x6eb   :  { %3398 = shalt.err (%p4968_p3)  }
 0x6ec   :  { %3400 = vsyncmov [#allocation3 + $0x5a] }
 0x6ef   :  { %s3401_s26 = vpop.sfrf %3400 }
 0x6f0   :  { %p4969_p4 = scmp.ne.s32.totalorder %s3401_s26, 0 }
 0x6f2   :  { %3405 = shalt.err (%p4969_p4)  }
 0x6f3   :  { %3407 = vsyncmov [#allocation3 + $0x5b] }
 0x6f6   :  { %s3408_s7 = vpop.sfrf %3407 }
 0x6f7   :  { %p4970_p5 = scmp.ne.s32.totalorder %s3408_s7, 0 }
 0x6f9   :  { %3412 = shalt.err (%p4970_p5)  }
 0x6fa   :  { %3414 = vsyncmov [#allocation3 + $0x5c] }
 0x6fd   :  { %s3415_s9 = vpop.sfrf %3414 }
 0x6fe   :  { %p4971_p6 = scmp.ne.s32.totalorder %s3415_s9, 0 }
 0x700   :  { %3419 = shalt.err (%p4971_p6)  }
 0x701   :  { %3421 = vsyncmov [#allocation3 + $0x5d] }
 0x704   :  { %s3422_s3 = vpop.sfrf %3421 }
 0x705   :  { %p4972_p7 = scmp.ne.s32.totalorder %s3422_s3, 0 }
 0x707   :  { %3426 = shalt.err (%p4972_p7)  }
 0x708   :  { %3428 = vsyncmov [#allocation3 + $0x5e] }
 0x70b   :  { %s3429_s27 = vpop.sfrf %3428 }
 0x70c   :  { %p4973_p8 = scmp.ne.s32.totalorder %s3429_s27, 0 }
 0x70e   :  { %3433 = shalt.err (%p4973_p8)  }
 0x70f   :  { %3435 = vsyncmov [#allocation3 + $0x5f] }
 0x712   :  { %s3436_s25 = vpop.sfrf %3435 }
 0x713   :  { %p4974_p9 = scmp.ne.s32.totalorder %s3436_s25, 0 }
 0x715   :  { %3440 = shalt.err (%p4974_p9)  }
 0x716   :  { %3442 = vsyncmov [#allocation3 + $0x60] }
 0x719   :  { %s3443_s29 = vpop.sfrf %3442 }
 0x71a   :  { %p4975_p10 = scmp.ne.s32.totalorder %s3443_s29, 0 }
 0x71c   :  { %3447 = shalt.err (%p4975_p10)  }
 0x71d   :  { %3449 = vsyncmov [#allocation3 + $0x61] }
 0x720   :  { %s3450_s13 = vpop.sfrf %3449 }
 0x721   :  { %p4976_p11 = scmp.ne.s32.totalorder %s3450_s13, 0 }
 0x723   :  { %3454 = shalt.err (%p4976_p11)  }
 0x724   :  { %3456 = vsyncmov [#allocation3 + $0x62] }
 0x727   :  { %s3457_s8 = vpop.sfrf %3456 }
 0x728   :  { %p4977_p12 = scmp.ne.s32.totalorder %s3457_s8, 0 }
 0x72a   :  { %3461 = shalt.err (%p4977_p12)  }
 0x72b   :  { %3463 = vsyncmov [#allocation3 + $0x63] }
 0x72e   :  { %s3464_s23 = vpop.sfrf %3463 }
 0x72f   :  { %p4978_p13 = scmp.ne.s32.totalorder %s3464_s23, 0 }
 0x731   :  { %3468 = shalt.err (%p4978_p13)  }
 0x732   :  { %3470 = vsyncmov [#allocation3 + $0x64] }
 0x735   :  { %s3471_s11 = vpop.sfrf %3470 }
 0x736   :  { %p4979_p0 = scmp.ne.s32.totalorder %s3471_s11, 0 }
 0x738   :  { %3475 = shalt.err (%p4979_p0)  }
 0x739   :  { %3477 = vsyncmov [#allocation3 + $0x65] }
 0x73c   :  { %s3478_s12 = vpop.sfrf %3477 }
 0x73d   :  { %p4980_p1 = scmp.ne.s32.totalorder %s3478_s12, 0 }
 0x73f   :  { %3482 = shalt.err (%p4980_p1)  }
 0x740   :  { %3484 = vsyncmov [#allocation3 + $0x66] }
 0x743   :  { %s3485_s15 = vpop.sfrf %3484 }
 0x744   :  { %p4981_p2 = scmp.ne.s32.totalorder %s3485_s15, 0 }
 0x746   :  { %3489 = shalt.err (%p4981_p2)  }
 0x747   :  { %3491 = vsyncmov [#allocation3 + $0x67] }
 0x74a   :  { %s3492_s16 = vpop.sfrf %3491 }
 0x74b   :  { %p4982_p3 = scmp.ne.s32.totalorder %s3492_s16, 0 }
 0x74d   :  { %3496 = shalt.err (%p4982_p3)  }
 0x74e   :  { %3498 = vsyncmov [#allocation3 + $0x68] }
 0x751   :  { %s3499_s17 = vpop.sfrf %3498 }
 0x752   :  { %p4983_p4 = scmp.ne.s32.totalorder %s3499_s17, 0 }
 0x754   :  { %3503 = shalt.err (%p4983_p4)  }
 0x755   :  { %3505 = vsyncmov [#allocation3 + $0x69] }
 0x758   :  { %s3506_s19 = vpop.sfrf %3505 }
 0x759   :  { %p4984_p5 = scmp.ne.s32.totalorder %s3506_s19, 0 }
 0x75b   :  { %3510 = shalt.err (%p4984_p5)  }
 0x75c   :  { %3512 = vsyncmov [#allocation3 + $0x6a] }
 0x75f   :  { %s3513_s14 = vpop.sfrf %3512 }
 0x760   :  { %p4985_p6 = scmp.ne.s32.totalorder %s3513_s14, 0 }
 0x762   :  { %3517 = shalt.err (%p4985_p6)  }
 0x763   :  { %3519 = vsyncmov [#allocation3 + $0x6b] }
 0x766   :  { %s3520_s22 = vpop.sfrf %3519 }
 0x767   :  { %p4986_p7 = scmp.ne.s32.totalorder %s3520_s22, 0 }
 0x769   :  { %3524 = shalt.err (%p4986_p7)  }
 0x76a   :  { %3526 = vsyncmov [#allocation3 + $0x6c] }
 0x76d   :  { %s3527_s2 = vpop.sfrf %3526 }
 0x76e   :  { %p4987_p8 = scmp.ne.s32.totalorder %s3527_s2, 0 }
 0x770   :  { %3531 = shalt.err (%p4987_p8)  }
 0x771   :  { %3533 = vsyncmov [#allocation3 + $0x6d] }
 0x774   :  { %s3534_s20 = vpop.sfrf %3533 }
 0x775   :  { %p4988_p9 = scmp.ne.s32.totalorder %s3534_s20, 0 }
 0x777   :  { %3538 = shalt.err (%p4988_p9)  }
 0x778   :  { %3540 = vsyncmov [#allocation3 + $0x6e] }
 0x77b   :  { %s3541_s10 = vpop.sfrf %3540 }
 0x77c   :  { %p4989_p10 = scmp.ne.s32.totalorder %s3541_s10, 0 }
 0x77e   :  { %3545 = shalt.err (%p4989_p10)  }
 0x77f   :  { %3547 = vsyncmov [#allocation3 + $0x6f] }
 0x782   :  { %s3548_s28 = vpop.sfrf %3547 }
 0x783   :  { %p4990_p11 = scmp.ne.s32.totalorder %s3548_s28, 0 }
 0x785   :  { %3552 = shalt.err (%p4990_p11)  }
 0x786   :  { %3554 = vsyncmov [#allocation3 + $0x70] }
 0x789   :  { %s3555_s24 = vpop.sfrf %3554 }
 0x78a   :  { %p4991_p12 = scmp.ne.s32.totalorder %s3555_s24, 0 }
 0x78c   :  { %3559 = shalt.err (%p4991_p12)  }
 0x78d   :  { %3561 = vsyncmov [#allocation3 + $0x71] }
 0x790   :  { %s3562_s30 = vpop.sfrf %3561 }
 0x791   :  { %p4992_p13 = scmp.ne.s32.totalorder %s3562_s30, 0 }
 0x793   :  { %3566 = shalt.err (%p4992_p13)  }
 0x794   :  { %3568 = vsyncmov [#allocation3 + $0x72] }
 0x797   :  { %s3569_s4 = vpop.sfrf %3568 }
 0x798   :  { %p4993_p0 = scmp.ne.s32.totalorder %s3569_s4, 0 }
 0x79a   :  { %3573 = shalt.err (%p4993_p0)  }
 0x79b   :  { %3575 = vsyncmov [#allocation3 + $0x73] }
 0x79e   :  { %s3576_s5 = vpop.sfrf %3575 }
 0x79f   :  { %p4994_p1 = scmp.ne.s32.totalorder %s3576_s5, 0 }
 0x7a1   :  { %3580 = shalt.err (%p4994_p1)  }
 0x7a2   :  { %3582 = vsyncmov [#allocation3 + $0x74] }
 0x7a5   :  { %s3583_s6 = vpop.sfrf %3582 }
 0x7a6   :  { %p4995_p2 = scmp.ne.s32.totalorder %s3583_s6, 0 }
 0x7a8   :  { %3587 = shalt.err (%p4995_p2)  }
 0x7a9   :  { %3589 = vsyncmov [#allocation3 + $0x75] }
 0x7ac   :  { %s3590_s1 = vpop.sfrf %3589 }
 0x7ad   :  { %p4996_p3 = scmp.ne.s32.totalorder %s3590_s1, 0 }
 0x7af   :  { %3594 = shalt.err (%p4996_p3)  }
 0x7b0   :  { %3596 = vsyncmov [#allocation3 + $0x76] }
 0x7b3   :  { %s3597_s18 = vpop.sfrf %3596 }
 0x7b4   :  { %p4997_p4 = scmp.ne.s32.totalorder %s3597_s18, 0 }
 0x7b6   :  { %3601 = shalt.err (%p4997_p4)  }
 0x7b7   :  { %3603 = vsyncmov [#allocation3 + $0x77] }
 0x7ba   :  { %s3604_s0 = vpop.sfrf %3603 }
 0x7bb   :  { %p4998_p5 = scmp.ne.s32.totalorder %s3604_s0, 0 }
 0x7bd   :  { %3608 = shalt.err (%p4998_p5)  }
 0x7be   :  { %3610 = vsyncmov [#allocation3 + $0x78] }
 0x7c1   :  { %s3611_s21 = vpop.sfrf %3610 }
 0x7c2   :  { %p4999_p6 = scmp.ne.s32.totalorder %s3611_s21, 0 }
 0x7c4   :  { %3615 = shalt.err (%p4999_p6)  }
 0x7c5   :  { %3617 = vsyncmov [#allocation3 + $0x79] }
 0x7c8   :  { %s3618_s26 = vpop.sfrf %3617 }
 0x7c9   :  { %p5000_p7 = scmp.ne.s32.totalorder %s3618_s26, 0 }
 0x7cb   :  { %3622 = shalt.err (%p5000_p7)  }
 0x7cc   :  { %3624 = vsyncmov [#allocation3 + $0x7a] }
 0x7cf   :  { %s3625_s7 = vpop.sfrf %3624 }
 0x7d0   :  { %p5001_p8 = scmp.ne.s32.totalorder %s3625_s7, 0 }
 0x7d2   :  { %3629 = shalt.err (%p5001_p8)  }
 0x7d3   :  { %3631 = vsyncmov [#allocation3 + $0x7b] }
 0x7d6   :  { %s3632_s9 = vpop.sfrf %3631 }
 0x7d7   :  { %p5002_p9 = scmp.ne.s32.totalorder %s3632_s9, 0 }
 0x7d9   :  { %3636 = shalt.err (%p5002_p9)  }
 0x7da   :  { %3638 = vsyncmov [#allocation3 + $0x7c] }
 0x7dd   :  { %s3639_s3 = vpop.sfrf %3638 }
 0x7de   :  { %p5003_p10 = scmp.ne.s32.totalorder %s3639_s3, 0 }
 0x7e0   :  { %3643 = shalt.err (%p5003_p10)  }
 0x7e1   :  { %3645 = vsyncmov [#allocation3 + $0x7d] }
 0x7e4   :  { %s3646_s27 = vpop.sfrf %3645 }
 0x7e5   :  { %p5004_p11 = scmp.ne.s32.totalorder %s3646_s27, 0 }
 0x7e7   :  { %3650 = shalt.err (%p5004_p11)  }
 0x7e8   :  { %3652 = vsyncmov [#allocation3 + $0x7e] }
 0x7eb   :  { %s3653_s25 = vpop.sfrf %3652 }
 0x7ec   :  { %p5005_p12 = scmp.ne.s32.totalorder %s3653_s25, 0 }
 0x7ee   :  { %3657 = shalt.err (%p5005_p12)  }
 0x7ef   :  { %3659 = vsyncmov [#allocation3 + $0x7f] }
 0x7f2   :  { %s3660_s29 = vpop.sfrf %3659 }
 0x7f3   :  { %p5006_p13 = scmp.ne.s32.totalorder %s3660_s29, 0 }
 0x7f5   :  { %3664 = shalt.err (%p5006_p13)  }

</bundles_post_ra>
